<compile_context>
chip_gen: v6e
topology: v6e:2x2x1
jax: 0.10.0
libtpu: 0.0.40
codegen_flags: <defaults>
</compile_context>

<pallas_src>
import functools

import jax
import jax.numpy as jnp
from jax import lax
from jax.experimental import pallas as pl
from jax.experimental.pallas import tpu as pltpu
import numpy as np


def _round_up(x, m):
    return ((x + m - 1) // m) * m


# ----------------------------- Pallas kernel -------------------------------
def rcnn_kernel(embed_ref,        # [T*BT, E]   this batch tile, time-major rows
                wih_fb_ref,       # [E, 8HP]    input proj weights [fwd|bwd], gates (i,f,o,g)
                whh_fb_ref,       # [2HP, 8HP]  block-diag recurrent weights [fwd|bwd]
                b_fb_ref,         # [1, 8HP]    (bih+bhh), [fwd|bwd]
                fc_we_ref,        # [E, CP]     FC slice for pooled embeddings
                fc_wf_ref,        # [HP, CP]    FC slice for pooled fwd hidden
                fc_wb_ref,        # [HP, CP]    FC slice for pooled bwd hidden
                fc_b_ref,         # [1, CP]
                out_ref,          # [BT, CP]
                gx_scr,           # [T*BT, 8HP] scratch: hoisted input projection
                *, seq_len, batch_tile, hidden_pad):
    T, BT, HP = seq_len, batch_tile, hidden_pad
    H4 = 4 * HP
    H8 = 8 * HP
    f32 = jnp.float32

    # ---- hoisted input projection: ONE MXU matmul covering both directions,
    #      biases folded in; off the recurrence critical path.
    gx_scr[...] = (jnp.dot(embed_ref[...], wih_fb_ref[...],
                           preferred_element_type=f32) + b_fb_ref[...])

    # Recurrent weights loaded once.
    whh = whh_fb_ref[...]

    # ---- hoisted embedding max-pool (independent of h/c): running max over
    #      the T row-blocks, relu folded in at the end.
    mx_e = embed_ref[pl.ds(0, BT), :].astype(f32)
    if T <= 32:
        for t in range(1, T):
            mx_e = jnp.maximum(mx_e, embed_ref[pl.ds(t * BT, BT), :].astype(f32))
    else:
        def emb_body(t, m):
            r = pl.multiple_of(t * BT, BT)
            return jnp.maximum(m, embed_ref[pl.ds(r, BT), :].astype(f32))
        mx_e = lax.fori_loop(1, T, emb_body, mx_e, unroll=4)
    mx_e = jnp.maximum(mx_e, 0.0)

    # ---- serial biLSTM recurrence: fwd and bwd chains advance together, one
    #      merged block-diagonal matmul per step.
    def step(t, carry):
        h_f, c_f, h_b, c_b, mx_f, mx_b = carry
        rf = t * BT                  # fwd consumes time t
        rb = (T - 1 - t) * BT        # bwd consumes time T-1-t
        if not isinstance(t, int):   # dynamic index -> alignment hint
            rf = pl.multiple_of(rf, BT)
            rb = pl.multiple_of(rb, BT)

        # Single recurrent matmul for both directions (block-diagonal whh).
        h_all = jnp.concatenate([h_f, h_b], axis=1)            # [BT, 2HP]
        g_all = jnp.dot(h_all, whh, preferred_element_type=f32)  # [BT, 8HP]
        g_f = g_all[:, 0:H4] + gx_scr[pl.ds(rf, BT), 0:H4]
        g_b = g_all[:, H4:H8] + gx_scr[pl.ds(rb, BT), H4:H8]

        # Gate layout (i | f | o | g), each gate padded to a 128-lane block:
        # one sigmoid over 3HP lanes + one tanh over HP lanes per direction,
        # all slices vreg-aligned.
        s_f = jax.nn.sigmoid(g_f[:, 0:3 * HP])
        s_b = jax.nn.sigmoid(g_b[:, 0:3 * HP])
        u_f = jnp.tanh(g_f[:, 3 * HP:H4])
        u_b = jnp.tanh(g_b[:, 3 * HP:H4])

        c_f = s_f[:, HP:2 * HP] * c_f + s_f[:, 0:HP] * u_f
        c_b = s_b[:, HP:2 * HP] * c_b + s_b[:, 0:HP] * u_b
        h_f = s_f[:, 2 * HP:3 * HP] * jnp.tanh(c_f)
        h_b = s_b[:, 2 * HP:3 * HP] * jnp.tanh(c_b)

        # Running max == MaxPool1d over time; relu folded in by the zero init.
        mx_f = jnp.maximum(mx_f, h_f)
        mx_b = jnp.maximum(mx_b, h_b)
        return h_f, c_f, h_b, c_b, mx_f, mx_b

    zh = jnp.zeros((BT, HP), f32)
    carry = (zh, zh, zh, zh, zh, zh)
    if T <= 32:
        for t in range(T):
            carry = step(t, carry)
    else:
        # Small unroll: cross-step scheduler visibility without blowing the
        # instruction footprint / live ranges.
        carry = lax.fori_loop(0, T, step, carry, unroll=2)
    _, _, _, _, mx_f, mx_b = carry

    # Epilogue FC: three partial matmuls summed (no lane-axis concatenate),
    # lane-dense (CP = multiple of 128) single store.
    out_ref[...] = (jnp.dot(mx_e, fc_we_ref[...], preferred_element_type=f32)
                    + jnp.dot(mx_f, fc_wf_ref[...], preferred_element_type=f32)
                    + jnp.dot(mx_b, fc_wb_ref[...], preferred_element_type=f32)
                    + fc_b_ref[...])


# ------------------------------- wrapper ------------------------------------
@functools.partial(jax.jit, static_argnames=("num_classes", "use_bf16"))
def textrcnn_forward(token_ids, params, *, num_classes, use_bf16=False):
    emb_table = params["embedding"]                  # [V, E]
    embed = emb_table[token_ids]                     # [B, T, E]  (gather = glue)
    B, T, E = embed.shape
    H = params["whh_f"].shape[1]                     # whh: [4H, H]
    C = num_classes
    HP = _round_up(H, 128)                           # 128-lane-aligned gate blocks
    CP = _round_up(C, 128)                           # lane-dense FC output
    f32 = jnp.float32
    cdt = jnp.bfloat16 if use_bf16 else f32          # dtype of embed / wih slabs

    # ---- choose a batch tile: multiple of 8, grown while the per-tile
    #      embed + gx slabs stay under a modest VMEM budget.
    B8 = _round_up(B, 8)
    budget = 6 * 2**20
    BT = 8
    while BT * 2 <= B8 and T * (BT * 2) * (E + 8 * HP) * 4 <= budget:
        BT *= 2
    BP = _round_up(B, BT)
    NB = BP // BT

    # ---- weight prep (plain-JAX glue) -------------------------------------
    def reorder(w):                                  # rows (i,f,g,o) -> (i,f,o,g)
        return jnp.concatenate(
            [w[0:H], w[H:2 * H], w[3 * H:4 * H], w[2 * H:3 * H]], axis=0)

    def pad_gate_cols(wc):                           # [rows, 4H] -> [rows, 4HP]
        if HP == H:
            return wc
        blocks = [jnp.pad(wc[:, k * H:(k + 1) * H], ((0, 0), (0, HP - H)))
                  for k in range(4)]
        return jnp.concatenate(blocks, axis=1)

    def pad_gate_vec(v):                             # [4H] -> [4HP]
        if HP == H:
            return v
        blocks = [jnp.pad(v[k * H:(k + 1) * H], (0, HP - H)) for k in range(4)]
        return jnp.concatenate(blocks, axis=0)

    wih_f = pad_gate_cols(reorder(params["wih_f"]).T)          # [E, 4HP]
    wih_b = pad_gate_cols(reorder(params["wih_b"]).T)
    wih_fb = jnp.concatenate([wih_f, wih_b], axis=1).astype(cdt)  # [E, 8HP]

    whh_f = jnp.pad(pad_gate_cols(reorder(params["whh_f"]).T),
                    ((0, HP - H), (0, 0)))                      # [HP, 4HP]
    whh_b = jnp.pad(pad_gate_cols(reorder(params["whh_b"]).T),
                    ((0, HP - H), (0, 0)))
    whh_fb = (jnp.zeros((2 * HP, 8 * HP), f32)
              .at[:HP, :4 * HP].set(whh_f)
              .at[HP:, 4 * HP:].set(whh_b))                     # block-diagonal

    b_f = pad_gate_vec(reorder(params["bih_f"] + params["bhh_f"]))
    b_b = pad_gate_vec(reorder(params["bih_b"] + params["bhh_b"]))
    b_fb = jnp.concatenate([b_f, b_b]).reshape(1, 8 * HP).astype(f32)

    fc_w = params["fc_w"]                            # [C, E+2H], cols = [emb|h_f|h_b]
    fc_we = jnp.pad(fc_w[:, 0:E].T, ((0, 0), (0, CP - C)))              # [E, CP]
    fc_wf = jnp.pad(fc_w[:, E:E + H].T, ((0, HP - H), (0, CP - C)))     # [HP, CP]
    fc_wb = jnp.pad(fc_w[:, E + H:E + 2 * H].T, ((0, HP - H), (0, CP - C)))
    fc_b = jnp.pad(params["fc_b"], (0, CP - C)).reshape(1, CP)

    # ---- embedding layout: [NB, T*BT, E], rows = t*BT + b_local (time-major
    #      within each batch tile), built with plain-JAX glue.
    embed_p = jnp.pad(embed, ((0, BP - B), (0, 0), (0, 0)))     # [BP, T, E]
    embed_tiles = (embed_p.reshape(NB, BT, T, E)
                   .transpose(0, 2, 1, 3)
                   .reshape(NB, T * BT, E)
                   .astype(cdt))

    # ---- VMEM budget for the compiler (per-tile resident footprint + slack)
    isz = 2 if use_bf16 else 4
    footprint = (2 * T * BT * E * isz                # embed tile (double-buffered)
                 + T * BT * 8 * HP * 4               # gx scratch
                 + 2 * E * 8 * HP * isz              # wih_fb
                 + 2 * 2 * HP * 8 * HP * 4           # whh_fb
                 + 2 * 8 * HP * 4                    # b_fb
                 + 2 * (E + 2 * HP) * CP * 4         # fc weights
                 + 2 * CP * 4                        # fc bias
                 + 2 * BT * CP * 4)                  # out tile
    vmem_limit = int(min(100 * 2**20, max(32 * 2**20, footprint + 8 * 2**20)))

    out = pl.pallas_call(
        functools.partial(rcnn_kernel, seq_len=T, batch_tile=BT, hidden_pad=HP),
        out_shape=jax.ShapeDtypeStruct((BP, CP), f32),
        grid_spec=pltpu.PrefetchScalarGridSpec(
            num_scalar_prefetch=0,
            grid=(NB,),
            in_specs=[
                # per-tile batch slice of the embeddings
                pl.BlockSpec((None, T * BT, E), lambda i: (i, 0, 0)),
                # weights: constant index_map -> resident across tiles
                pl.BlockSpec((E, 8 * HP), lambda i: (0, 0)),
                pl.BlockSpec((2 * HP, 8 * HP), lambda i: (0, 0)),
                pl.BlockSpec((1, 8 * HP), lambda i: (0, 0)),
                pl.BlockSpec((E, CP), lambda i: (0, 0)),
                pl.BlockSpec((HP, CP), lambda i: (0, 0)),
                pl.BlockSpec((HP, CP), lambda i: (0, 0)),
                pl.BlockSpec((1, CP), lambda i: (0, 0)),
            ],
            out_specs=pl.BlockSpec((BT, CP), lambda i: (i, 0)),
            scratch_shapes=[pltpu.VMEM((T * BT, 8 * HP), f32)],
        ),
        compiler_params=pltpu.CompilerParams(
            dimension_semantics=("parallel",),
            vmem_limit_bytes=vmem_limit,
        ),
    )(embed_tiles, wih_fb, whh_fb, b_fb, fc_we, fc_wf, fc_wb, fc_b)
    return out[:B, :num_classes]


# --------------------------- pure-JAX reference ------------------------------
def textrcnn_reference(token_ids, params, *, num_classes):
    emb_table = params["embedding"]
    embed = emb_table[token_ids]                     # [B, T, E]
    B, T, E = embed.shape
    H = params["whh_f"].shape[1]

    def lstm_dir(wih, whh, bih, bhh, reverse):
        xs = embed[:, ::-1, :] if reverse else embed

        def step(carry, x_t):
            h, c = carry
            gates = x_t @ wih.T + h @ whh.T + bih + bhh
            i = jax.nn.sigmoid(gates[:, 0:H])
            f = jax.nn.sigmoid(gates[:, H:2 * H])
            g = jnp.tanh(gates[:, 2 * H:3 * H])
            o = jax.nn.sigmoid(gates[:, 3 * H:4 * H])
            c_new = f * c + i * g
            h_new = o * jnp.tanh(c_new)
            return (h_new, c_new), h_new

        h0 = jnp.zeros((B, H), jnp.float32)
        _, hs = lax.scan(step, (h0, h0), jnp.transpose(xs, (1, 0, 2)))
        hs = jnp.transpose(hs, (1, 0, 2))            # [B, T, H]
        return hs[:, ::-1, :] if reverse else hs

    h_f = lstm_dir(params["wih_f"], params["whh_f"], params["bih_f"], params["bhh_f"], False)
    h_b = lstm_dir(params["wih_b"], params["whh_b"], params["bih_b"], params["bhh_b"], True)
    out = jnp.concatenate([embed, h_f, h_b], axis=2)       # [B, T, E+2H]
    out = jnp.maximum(out, 0.0)
    out = jnp.max(out, axis=1)                             # MaxPool1d(pad_size) + squeeze
    return out @ params["fc_w"].T + params["fc_b"]


# --------------------------------- main --------------------------------------
if __name__ == "__main__":
    # Small config consistent with TextRCNN's __init__ (num_layers = 1).
    n_vocab, E, H, T, B, C = 50, 32, 32, 8, 2, 4

    key = jax.random.PRNGKey(0)
    ks = jax.random.split(key, 12)
    u = 1.0 / np.sqrt(H)

    emb = jax.random.normal(ks[0], (n_vocab, E), jnp.float32)
    emb = emb.at[n_vocab - 1].set(0.0)               # padding_idx row zeroed

    params = {
        "embedding": emb,
        "wih_f": jax.random.uniform(ks[1], (4 * H, E), jnp.float32, -u, u),
        "whh_f": jax.random.uniform(ks[2], (4 * H, H), jnp.float32, -u, u),
        "bih_f": jax.random.uniform(ks[3], (4 * H,), jnp.float32, -u, u),
        "bhh_f": jax.random.uniform(ks[4], (4 * H,), jnp.float32, -u, u),
        "wih_b": jax.random.uniform(ks[5], (4 * H, E), jnp.float32, -u, u),
        "whh_b": jax.random.uniform(ks[6], (4 * H, H), jnp.float32, -u, u),
        "bih_b": jax.random.uniform(ks[7], (4 * H,), jnp.float32, -u, u),
        "bhh_b": jax.random.uniform(ks[8], (4 * H,), jnp.float32, -u, u),
        "fc_w": jax.random.uniform(ks[9], (C, 2 * H + E), jnp.float32, -u, u),
        "fc_b": jax.random.uniform(ks[10], (C,), jnp.float32, -u, u),
    }

    token_ids = jax.random.randint(ks[11], (B, T), 0, n_vocab, jnp.int32)

    out = textrcnn_forward(token_ids, params, num_classes=C)
    out = jax.block_until_ready(out)

    ref = textrcnn_reference(token_ids, params, num_classes=C)
    np.testing.assert_allclose(np.asarray(out), np.asarray(ref), rtol=1e-4, atol=1e-4)

    print("KERNEL_OK")
</pallas_src>

<mosaic_0001>
module attributes {stable_mosaic.version = 11 : i64} {
  func.func @rcnn_kernel(%arg0: i32, %arg1: memref<1x64x32xf32, #tpu.memory_space<vmem>>, %arg2: memref<32x1024xf32, #tpu.memory_space<vmem>>, %arg3: memref<256x1024xf32, #tpu.memory_space<vmem>>, %arg4: memref<1x1024xf32, #tpu.memory_space<vmem>>, %arg5: memref<32x128xf32, #tpu.memory_space<vmem>>, %arg6: memref<128x128xf32, #tpu.memory_space<vmem>>, %arg7: memref<128x128xf32, #tpu.memory_space<vmem>>, %arg8: memref<1x128xf32, #tpu.memory_space<vmem>>, %arg9: memref<8x128xf32, #tpu.memory_space<vmem>>, %arg10: memref<64x1024xf32, #tpu.memory_space<vmem>>) attributes {dimension_semantics = [#tpu.dimension_semantics<parallel>], iteration_bounds = array<i64: 1>, scalar_prefetch = 0 : i64, scratch_operands = 1 : i64, tpu.core_type = #tpu.core_type<tc>, window_params = [{transform_indices = @transform_0, window_bounds = array<i64: 1, 64, 32>}, {pipeline_mode = #tpu.pipeline_mode<synchronous>, transform_indices = @transform_1, window_bounds = array<i64: 32, 1024>}, {pipeline_mode = #tpu.pipeline_mode<synchronous>, transform_indices = @transform_2, window_bounds = array<i64: 256, 1024>}, {pipeline_mode = #tpu.pipeline_mode<synchronous>, transform_indices = @transform_3, window_bounds = array<i64: 1, 1024>}, {pipeline_mode = #tpu.pipeline_mode<synchronous>, transform_indices = @transform_4, window_bounds = array<i64: 32, 128>}, {pipeline_mode = #tpu.pipeline_mode<synchronous>, transform_indices = @transform_5, window_bounds = array<i64: 128, 128>}, {pipeline_mode = #tpu.pipeline_mode<synchronous>, transform_indices = @transform_6, window_bounds = array<i64: 128, 128>}, {pipeline_mode = #tpu.pipeline_mode<synchronous>, transform_indices = @transform_7, window_bounds = array<i64: 1, 128>}, {transform_indices = @transform_8, window_bounds = array<i64: 8, 128>}]} {
    %c0 = arith.constant 0 : index
    %c0_0 = arith.constant 0 : index
    %c0_1 = arith.constant 0 : index
    %0 = vector.load %arg1[%c0, %c0_0, %c0_1] : memref<1x64x32xf32, #tpu.memory_space<vmem>>, vector<1x64x32xf32>
    %1 = vector.shape_cast %0 : vector<1x64x32xf32> to vector<64x32xf32>
    %c0_2 = arith.constant 0 : index
    %c0_3 = arith.constant 0 : index
    %2 = vector.load %arg2[%c0_2, %c0_3] : memref<32x1024xf32, #tpu.memory_space<vmem>>, vector<32x1024xf32>
    %cst = arith.constant dense<0.000000e+00> : vector<64x1024xf32>
    %3 = tpu.matmul %1, %2, %cst {dimension_numbers = #tpu.dot_dimension_numbers<[1], [0], [0], [1], [0, 0, 1, 1], [], []>} : vector<64x32xf32>, vector<32x1024xf32>, vector<64x1024xf32> -> vector<64x1024xf32>
    %c0_4 = arith.constant 0 : index
    %c0_5 = arith.constant 0 : index
    %4 = vector.load %arg4[%c0_4, %c0_5] : memref<1x1024xf32, #tpu.memory_space<vmem>>, vector<1x1024xf32>
    %5 = vector.broadcast %4 : vector<1x1024xf32> to vector<64x1024xf32>
    %6 = arith.addf %3, %5 : vector<64x1024xf32>
    %c0_6 = arith.constant 0 : index
    %c0_7 = arith.constant 0 : index
    %7 = vector.load %arg10[%c0_6, %c0_7] : memref<64x1024xf32, #tpu.memory_space<vmem>>, vector<64x1024xf32>
    tpu.vector_store %arg10[%c0_6, %c0_7], %6 {strides = array<i32>} : memref<64x1024xf32, #tpu.memory_space<vmem>>, vector<64x1024xf32>,
    %c0_8 = arith.constant 0 : index
    %c0_9 = arith.constant 0 : index
    %8 = vector.load %arg3[%c0_8, %c0_9] : memref<256x1024xf32, #tpu.memory_space<vmem>>, vector<256x1024xf32>
    %c0_10 = arith.constant 0 : index
    %c0_11 = arith.constant 0 : index
    %c0_12 = arith.constant 0 : index
    %9 = vector.load %arg1[%c0_10, %c0_11, %c0_12] : memref<1x64x32xf32, #tpu.memory_space<vmem>>, vector<1x8x32xf32>
    %10 = vector.shape_cast %9 : vector<1x8x32xf32> to vector<8x32xf32>
    %c0_13 = arith.constant 0 : index
    %c8 = arith.constant 8 : index
    %c0_14 = arith.constant 0 : index
    %11 = vector.load %arg1[%c0_13, %c8, %c0_14] : memref<1x64x32xf32, #tpu.memory_space<vmem>>, vector<1x8x32xf32>
    %12 = vector.shape_cast %11 : vector<1x8x32xf32> to vector<8x32xf32>
    %13 = arith.maximumf %10, %12 : vector<8x32xf32>
    %c0_15 = arith.constant 0 : index
    %c16 = arith.constant 16 : index
    %c0_16 = arith.constant 0 : index
    %14 = vector.load %arg1[%c0_15, %c16, %c0_16] : memref<1x64x32xf32, #tpu.memory_space<vmem>>, vector<1x8x32xf32>
    %15 = vector.shape_cast %14 : vector<1x8x32xf32> to vector<8x32xf32>
    %16 = arith.maximumf %13, %15 : vector<8x32xf32>
    %c0_17 = arith.constant 0 : index
    %c24 = arith.constant 24 : index
    %c0_18 = arith.constant 0 : index
    %17 = vector.load %arg1[%c0_17, %c24, %c0_18] : memref<1x64x32xf32, #tpu.memory_space<vmem>>, vector<1x8x32xf32>
    %18 = vector.shape_cast %17 : vector<1x8x32xf32> to vector<8x32xf32>
    %19 = arith.maximumf %16, %18 : vector<8x32xf32>
    %c0_19 = arith.constant 0 : index
    %c32 = arith.constant 32 : index
    %c0_20 = arith.constant 0 : index
    %20 = vector.load %arg1[%c0_19, %c32, %c0_20] : memref<1x64x32xf32, #tpu.memory_space<vmem>>, vector<1x8x32xf32>
    %21 = vector.shape_cast %20 : vector<1x8x32xf32> to vector<8x32xf32>
    %22 = arith.maximumf %19, %21 : vector<8x32xf32>
    %c0_21 = arith.constant 0 : index
    %c40 = arith.constant 40 : index
    %c0_22 = arith.constant 0 : index
    %23 = vector.load %arg1[%c0_21, %c40, %c0_22] : memref<1x64x32xf32, #tpu.memory_space<vmem>>, vector<1x8x32xf32>
    %24 = vector.shape_cast %23 : vector<1x8x32xf32> to vector<8x32xf32>
    %25 = arith.maximumf %22, %24 : vector<8x32xf32>
    %c0_23 = arith.constant 0 : index
    %c48 = arith.constant 48 : index
    %c0_24 = arith.constant 0 : index
    %26 = vector.load %arg1[%c0_23, %c48, %c0_24] : memref<1x64x32xf32, #tpu.memory_space<vmem>>, vector<1x8x32xf32>
    %27 = vector.shape_cast %26 : vector<1x8x32xf32> to vector<8x32xf32>
    %28 = arith.maximumf %25, %27 : vector<8x32xf32>
    %c0_25 = arith.constant 0 : index
    %c56 = arith.constant 56 : index
    %c0_26 = arith.constant 0 : index
    %29 = vector.load %arg1[%c0_25, %c56, %c0_26] : memref<1x64x32xf32, #tpu.memory_space<vmem>>, vector<1x8x32xf32>
    %30 = vector.shape_cast %29 : vector<1x8x32xf32> to vector<8x32xf32>
    %31 = arith.maximumf %28, %30 : vector<8x32xf32>
    %cst_27 = arith.constant 0.000000e+00 : f32
    %32 = vector.broadcast %cst_27 : f32 to vector<8x32xf32>
    %33 = arith.maximumf %31, %32 : vector<8x32xf32>
    %cst_28 = arith.constant 0.000000e+00 : f32
    %34 = vector.broadcast %cst_28 : f32 to vector<8x128xf32>
    %35 = tpu.concatenate %34, %34 in 1 : vector<8x128xf32>, vector<8x128xf32> -> vector<8x256xf32>
    %cst_29 = arith.constant dense<0.000000e+00> : vector<8x1024xf32>
    %36 = tpu.matmul %35, %8, %cst_29 {dimension_numbers = #tpu.dot_dimension_numbers<[1], [0], [0], [1], [0, 0, 1, 1], [], []>} : vector<8x256xf32>, vector<256x1024xf32>, vector<8x1024xf32> -> vector<8x1024xf32>
    %37 = vector.extract_strided_slice %36 {offsets = [0, 0], sizes = [8, 512], strides = [1, 1]} : vector<8x1024xf32> to vector<8x512xf32>
    %c0_30 = arith.constant 0 : index
    %c0_31 = arith.constant 0 : index
    %38 = vector.load %arg10[%c0_30, %c0_31] : memref<64x1024xf32, #tpu.memory_space<vmem>>, vector<8x512xf32>
    %39 = arith.addf %37, %38 : vector<8x512xf32>
    %40 = vector.extract_strided_slice %36 {offsets = [0, 512], sizes = [8, 512], strides = [1, 1]} : vector<8x1024xf32> to vector<8x512xf32>
    %c56_32 = arith.constant 56 : index
    %c512 = arith.constant 512 : index
    %41 = vector.load %arg10[%c56_32, %c512] : memref<64x1024xf32, #tpu.memory_space<vmem>>, vector<8x512xf32>
    %42 = arith.addf %40, %41 : vector<8x512xf32>
    %43 = vector.extract_strided_slice %39 {offsets = [0, 0], sizes = [8, 384], strides = [1, 1]} : vector<8x512xf32> to vector<8x384xf32>
    %44 = arith.negf %43 : vector<8x384xf32>
    %45 = math.exp %44 : vector<8x384xf32>
    %cst_33 = arith.constant 1.000000e+00 : f32
    %46 = vector.broadcast %cst_33 : f32 to vector<8x384xf32>
    %47 = arith.addf %46, %45 : vector<8x384xf32>
    %48 = arith.divf %46, %47 : vector<8x384xf32>
    %49 = vector.extract_strided_slice %42 {offsets = [0, 0], sizes = [8, 384], strides = [1, 1]} : vector<8x512xf32> to vector<8x384xf32>
    %50 = arith.negf %49 : vector<8x384xf32>
    %51 = math.exp %50 : vector<8x384xf32>
    %cst_34 = arith.constant 1.000000e+00 : f32
    %52 = vector.broadcast %cst_34 : f32 to vector<8x384xf32>
    %53 = arith.addf %52, %51 : vector<8x384xf32>
    %54 = arith.divf %52, %53 : vector<8x384xf32>
    %55 = vector.extract_strided_slice %39 {offsets = [0, 384], sizes = [8, 128], strides = [1, 1]} : vector<8x512xf32> to vector<8x128xf32>
    %56 = math.tanh %55 : vector<8x128xf32>
    %57 = vector.extract_strided_slice %42 {offsets = [0, 384], sizes = [8, 128], strides = [1, 1]} : vector<8x512xf32> to vector<8x128xf32>
    %58 = math.tanh %57 : vector<8x128xf32>
    %59 = vector.extract_strided_slice %48 {offsets = [0, 128], sizes = [8, 128], strides = [1, 1]} : vector<8x384xf32> to vector<8x128xf32>
    %60 = arith.mulf %59, %34 : vector<8x128xf32>
    %61 = vector.extract_strided_slice %48 {offsets = [0, 0], sizes = [8, 128], strides = [1, 1]} : vector<8x384xf32> to vector<8x128xf32>
    %62 = arith.mulf %61, %56 : vector<8x128xf32>
    %63 = arith.addf %60, %62 : vector<8x128xf32>
    %64 = vector.extract_strided_slice %54 {offsets = [0, 128], sizes = [8, 128], strides = [1, 1]} : vector<8x384xf32> to vector<8x128xf32>
    %65 = arith.mulf %64, %34 : vector<8x128xf32>
    %66 = vector.extract_strided_slice %54 {offsets = [0, 0], sizes = [8, 128], strides = [1, 1]} : vector<8x384xf32> to vector<8x128xf32>
    %67 = arith.mulf %66, %58 : vector<8x128xf32>
    %68 = arith.addf %65, %67 : vector<8x128xf32>
    %69 = vector.extract_strided_slice %48 {offsets = [0, 256], sizes = [8, 128], strides = [1, 1]} : vector<8x384xf32> to vector<8x128xf32>
    %70 = math.tanh %63 : vector<8x128xf32>
    %71 = arith.mulf %69, %70 : vector<8x128xf32>
    %72 = vector.extract_strided_slice %54 {offsets = [0, 256], sizes = [8, 128], strides = [1, 1]} : vector<8x384xf32> to vector<8x128xf32>
    %73 = math.tanh %68 : vector<8x128xf32>
    %74 = arith.mulf %72, %73 : vector<8x128xf32>
    %75 = arith.maximumf %34, %71 : vector<8x128xf32>
    %76 = arith.maximumf %34, %74 : vector<8x128xf32>
    %77 = tpu.concatenate %71, %74 in 1 : vector<8x128xf32>, vector<8x128xf32> -> vector<8x256xf32>
    %cst_35 = arith.constant dense<0.000000e+00> : vector<8x1024xf32>
    %78 = tpu.matmul %77, %8, %cst_35 {dimension_numbers = #tpu.dot_dimension_numbers<[1], [0], [0], [1], [0, 0, 1, 1], [], []>} : vector<8x256xf32>, vector<256x1024xf32>, vector<8x1024xf32> -> vector<8x1024xf32>
    %79 = vector.extract_strided_slice %78 {offsets = [0, 0], sizes = [8, 512], strides = [1, 1]} : vector<8x1024xf32> to vector<8x512xf32>
    %c8_36 = arith.constant 8 : index
    %c0_37 = arith.constant 0 : index
    %80 = vector.load %arg10[%c8_36, %c0_37] : memref<64x1024xf32, #tpu.memory_space<vmem>>, vector<8x512xf32>
    %81 = arith.addf %79, %80 : vector<8x512xf32>
    %82 = vector.extract_strided_slice %78 {offsets = [0, 512], sizes = [8, 512], strides = [1, 1]} : vector<8x1024xf32> to vector<8x512xf32>
    %c48_38 = arith.constant 48 : index
    %c512_39 = arith.constant 512 : index
    %83 = vector.load %arg10[%c48_38, %c512_39] : memref<64x1024xf32, #tpu.memory_space<vmem>>, vector<8x512xf32>
    %84 = arith.addf %82, %83 : vector<8x512xf32>
    %85 = vector.extract_strided_slice %81 {offsets = [0, 0], sizes = [8, 384], strides = [1, 1]} : vector<8x512xf32> to vector<8x384xf32>
    %86 = arith.negf %85 : vector<8x384xf32>
    %87 = math.exp %86 : vector<8x384xf32>
    %cst_40 = arith.constant 1.000000e+00 : f32
    %88 = vector.broadcast %cst_40 : f32 to vector<8x384xf32>
    %89 = arith.addf %88, %87 : vector<8x384xf32>
    %90 = arith.divf %88, %89 : vector<8x384xf32>
    %91 = vector.extract_strided_slice %84 {offsets = [0, 0], sizes = [8, 384], strides = [1, 1]} : vector<8x512xf32> to vector<8x384xf32>
    %92 = arith.negf %91 : vector<8x384xf32>
    %93 = math.exp %92 : vector<8x384xf32>
    %cst_41 = arith.constant 1.000000e+00 : f32
    %94 = vector.broadcast %cst_41 : f32 to vector<8x384xf32>
    %95 = arith.addf %94, %93 : vector<8x384xf32>
    %96 = arith.divf %94, %95 : vector<8x384xf32>
    %97 = vector.extract_strided_slice %81 {offsets = [0, 384], sizes = [8, 128], strides = [1, 1]} : vector<8x512xf32> to vector<8x128xf32>
    %98 = math.tanh %97 : vector<8x128xf32>
    %99 = vector.extract_strided_slice %84 {offsets = [0, 384], sizes = [8, 128], strides = [1, 1]} : vector<8x512xf32> to vector<8x128xf32>
    %100 = math.tanh %99 : vector<8x128xf32>
    %101 = vector.extract_strided_slice %90 {offsets = [0, 128], sizes = [8, 128], strides = [1, 1]} : vector<8x384xf32> to vector<8x128xf32>
    %102 = arith.mulf %101, %63 : vector<8x128xf32>
    %103 = vector.extract_strided_slice %90 {offsets = [0, 0], sizes = [8, 128], strides = [1, 1]} : vector<8x384xf32> to vector<8x128xf32>
    %104 = arith.mulf %103, %98 : vector<8x128xf32>
    %105 = arith.addf %102, %104 : vector<8x128xf32>
    %106 = vector.extract_strided_slice %96 {offsets = [0, 128], sizes = [8, 128], strides = [1, 1]} : vector<8x384xf32> to vector<8x128xf32>
    %107 = arith.mulf %106, %68 : vector<8x128xf32>
    %108 = vector.extract_strided_slice %96 {offsets = [0, 0], sizes = [8, 128], strides = [1, 1]} : vector<8x384xf32> to vector<8x128xf32>
    %109 = arith.mulf %108, %100 : vector<8x128xf32>
    %110 = arith.addf %107, %109 : vector<8x128xf32>
    %111 = vector.extract_strided_slice %90 {offsets = [0, 256], sizes = [8, 128], strides = [1, 1]} : vector<8x384xf32> to vector<8x128xf32>
    %112 = math.tanh %105 : vector<8x128xf32>
    %113 = arith.mulf %111, %112 : vector<8x128xf32>
    %114 = vector.extract_strided_slice %96 {offsets = [0, 256], sizes = [8, 128], strides = [1, 1]} : vector<8x384xf32> to vector<8x128xf32>
    %115 = math.tanh %110 : vector<8x128xf32>
    %116 = arith.mulf %114, %115 : vector<8x128xf32>
    %117 = arith.maximumf %75, %113 : vector<8x128xf32>
    %118 = arith.maximumf %76, %116 : vector<8x128xf32>
    %119 = tpu.concatenate %113, %116 in 1 : vector<8x128xf32>, vector<8x128xf32> -> vector<8x256xf32>
    %cst_42 = arith.constant dense<0.000000e+00> : vector<8x1024xf32>
    %120 = tpu.matmul %119, %8, %cst_42 {dimension_numbers = #tpu.dot_dimension_numbers<[1], [0], [0], [1], [0, 0, 1, 1], [], []>} : vector<8x256xf32>, vector<256x1024xf32>, vector<8x1024xf32> -> vector<8x1024xf32>
    %121 = vector.extract_strided_slice %120 {offsets = [0, 0], sizes = [8, 512], strides = [1, 1]} : vector<8x1024xf32> to vector<8x512xf32>
    %c16_43 = arith.constant 16 : index
    %c0_44 = arith.constant 0 : index
    %122 = vector.load %arg10[%c16_43, %c0_44] : memref<64x1024xf32, #tpu.memory_space<vmem>>, vector<8x512xf32>
    %123 = arith.addf %121, %122 : vector<8x512xf32>
    %124 = vector.extract_strided_slice %120 {offsets = [0, 512], sizes = [8, 512], strides = [1, 1]} : vector<8x1024xf32> to vector<8x512xf32>
    %c40_45 = arith.constant 40 : index
    %c512_46 = arith.constant 512 : index
    %125 = vector.load %arg10[%c40_45, %c512_46] : memref<64x1024xf32, #tpu.memory_space<vmem>>, vector<8x512xf32>
    %126 = arith.addf %124, %125 : vector<8x512xf32>
    %127 = vector.extract_strided_slice %123 {offsets = [0, 0], sizes = [8, 384], strides = [1, 1]} : vector<8x512xf32> to vector<8x384xf32>
    %128 = arith.negf %127 : vector<8x384xf32>
    %129 = math.exp %128 : vector<8x384xf32>
    %cst_47 = arith.constant 1.000000e+00 : f32
    %130 = vector.broadcast %cst_47 : f32 to vector<8x384xf32>
    %131 = arith.addf %130, %129 : vector<8x384xf32>
    %132 = arith.divf %130, %131 : vector<8x384xf32>
    %133 = vector.extract_strided_slice %126 {offsets = [0, 0], sizes = [8, 384], strides = [1, 1]} : vector<8x512xf32> to vector<8x384xf32>
    %134 = arith.negf %133 : vector<8x384xf32>
    %135 = math.exp %134 : vector<8x384xf32>
    %cst_48 = arith.constant 1.000000e+00 : f32
    %136 = vector.broadcast %cst_48 : f32 to vector<8x384xf32>
    %137 = arith.addf %136, %135 : vector<8x384xf32>
    %138 = arith.divf %136, %137 : vector<8x384xf32>
    %139 = vector.extract_strided_slice %123 {offsets = [0, 384], sizes = [8, 128], strides = [1, 1]} : vector<8x512xf32> to vector<8x128xf32>
    %140 = math.tanh %139 : vector<8x128xf32>
    %141 = vector.extract_strided_slice %126 {offsets = [0, 384], sizes = [8, 128], strides = [1, 1]} : vector<8x512xf32> to vector<8x128xf32>
    %142 = math.tanh %141 : vector<8x128xf32>
    %143 = vector.extract_strided_slice %132 {offsets = [0, 128], sizes = [8, 128], strides = [1, 1]} : vector<8x384xf32> to vector<8x128xf32>
    %144 = arith.mulf %143, %105 : vector<8x128xf32>
    %145 = vector.extract_strided_slice %132 {offsets = [0, 0], sizes = [8, 128], strides = [1, 1]} : vector<8x384xf32> to vector<8x128xf32>
    %146 = arith.mulf %145, %140 : vector<8x128xf32>
    %147 = arith.addf %144, %146 : vector<8x128xf32>
    %148 = vector.extract_strided_slice %138 {offsets = [0, 128], sizes = [8, 128], strides = [1, 1]} : vector<8x384xf32> to vector<8x128xf32>
    %149 = arith.mulf %148, %110 : vector<8x128xf32>
    %150 = vector.extract_strided_slice %138 {offsets = [0, 0], sizes = [8, 128], strides = [1, 1]} : vector<8x384xf32> to vector<8x128xf32>
    %151 = arith.mulf %150, %142 : vector<8x128xf32>
    %152 = arith.addf %149, %151 : vector<8x128xf32>
    %153 = vector.extract_strided_slice %132 {offsets = [0, 256], sizes = [8, 128], strides = [1, 1]} : vector<8x384xf32> to vector<8x128xf32>
    %154 = math.tanh %147 : vector<8x128xf32>
    %155 = arith.mulf %153, %154 : vector<8x128xf32>
    %156 = vector.extract_strided_slice %138 {offsets = [0, 256], sizes = [8, 128], strides = [1, 1]} : vector<8x384xf32> to vector<8x128xf32>
    %157 = math.tanh %152 : vector<8x128xf32>
    %158 = arith.mulf %156, %157 : vector<8x128xf32>
    %159 = arith.maximumf %117, %155 : vector<8x128xf32>
    %160 = arith.maximumf %118, %158 : vector<8x128xf32>
    %161 = tpu.concatenate %155, %158 in 1 : vector<8x128xf32>, vector<8x128xf32> -> vector<8x256xf32>
    %cst_49 = arith.constant dense<0.000000e+00> : vector<8x1024xf32>
    %162 = tpu.matmul %161, %8, %cst_49 {dimension_numbers = #tpu.dot_dimension_numbers<[1], [0], [0], [1], [0, 0, 1, 1], [], []>} : vector<8x256xf32>, vector<256x1024xf32>, vector<8x1024xf32> -> vector<8x1024xf32>
    %163 = vector.extract_strided_slice %162 {offsets = [0, 0], sizes = [8, 512], strides = [1, 1]} : vector<8x1024xf32> to vector<8x512xf32>
    %c24_50 = arith.constant 24 : index
    %c0_51 = arith.constant 0 : index
    %164 = vector.load %arg10[%c24_50, %c0_51] : memref<64x1024xf32, #tpu.memory_space<vmem>>, vector<8x512xf32>
    %165 = arith.addf %163, %164 : vector<8x512xf32>
    %166 = vector.extract_strided_slice %162 {offsets = [0, 512], sizes = [8, 512], strides = [1, 1]} : vector<8x1024xf32> to vector<8x512xf32>
    %c32_52 = arith.constant 32 : index
    %c512_53 = arith.constant 512 : index
    %167 = vector.load %arg10[%c32_52, %c512_53] : memref<64x1024xf32, #tpu.memory_space<vmem>>, vector<8x512xf32>
    %168 = arith.addf %166, %167 : vector<8x512xf32>
    %169 = vector.extract_strided_slice %165 {offsets = [0, 0], sizes = [8, 384], strides = [1, 1]} : vector<8x512xf32> to vector<8x384xf32>
    %170 = arith.negf %169 : vector<8x384xf32>
    %171 = math.exp %170 : vector<8x384xf32>
    %cst_54 = arith.constant 1.000000e+00 : f32
    %172 = vector.broadcast %cst_54 : f32 to vector<8x384xf32>
    %173 = arith.addf %172, %171 : vector<8x384xf32>
    %174 = arith.divf %172, %173 : vector<8x384xf32>
    %175 = vector.extract_strided_slice %168 {offsets = [0, 0], sizes = [8, 384], strides = [1, 1]} : vector<8x512xf32> to vector<8x384xf32>
    %176 = arith.negf %175 : vector<8x384xf32>
    %177 = math.exp %176 : vector<8x384xf32>
    %cst_55 = arith.constant 1.000000e+00 : f32
    %178 = vector.broadcast %cst_55 : f32 to vector<8x384xf32>
    %179 = arith.addf %178, %177 : vector<8x384xf32>
    %180 = arith.divf %178, %179 : vector<8x384xf32>
    %181 = vector.extract_strided_slice %165 {offsets = [0, 384], sizes = [8, 128], strides = [1, 1]} : vector<8x512xf32> to vector<8x128xf32>
    %182 = math.tanh %181 : vector<8x128xf32>
    %183 = vector.extract_strided_slice %168 {offsets = [0, 384], sizes = [8, 128], strides = [1, 1]} : vector<8x512xf32> to vector<8x128xf32>
    %184 = math.tanh %183 : vector<8x128xf32>
    %185 = vector.extract_strided_slice %174 {offsets = [0, 128], sizes = [8, 128], strides = [1, 1]} : vector<8x384xf32> to vector<8x128xf32>
    %186 = arith.mulf %185, %147 : vector<8x128xf32>
    %187 = vector.extract_strided_slice %174 {offsets = [0, 0], sizes = [8, 128], strides = [1, 1]} : vector<8x384xf32> to vector<8x128xf32>
    %188 = arith.mulf %187, %182 : vector<8x128xf32>
    %189 = arith.addf %186, %188 : vector<8x128xf32>
    %190 = vector.extract_strided_slice %180 {offsets = [0, 128], sizes = [8, 128], strides = [1, 1]} : vector<8x384xf32> to vector<8x128xf32>
    %191 = arith.mulf %190, %152 : vector<8x128xf32>
    %192 = vector.extract_strided_slice %180 {offsets = [0, 0], sizes = [8, 128], strides = [1, 1]} : vector<8x384xf32> to vector<8x128xf32>
    %193 = arith.mulf %192, %184 : vector<8x128xf32>
    %194 = arith.addf %191, %193 : vector<8x128xf32>
    %195 = vector.extract_strided_slice %174 {offsets = [0, 256], sizes = [8, 128], strides = [1, 1]} : vector<8x384xf32> to vector<8x128xf32>
    %196 = math.tanh %189 : vector<8x128xf32>
    %197 = arith.mulf %195, %196 : vector<8x128xf32>
    %198 = vector.extract_strided_slice %180 {offsets = [0, 256], sizes = [8, 128], strides = [1, 1]} : vector<8x384xf32> to vector<8x128xf32>
    %199 = math.tanh %194 : vector<8x128xf32>
    %200 = arith.mulf %198, %199 : vector<8x128xf32>
    %201 = arith.maximumf %159, %197 : vector<8x128xf32>
    %202 = arith.maximumf %160, %200 : vector<8x128xf32>
    %203 = tpu.concatenate %197, %200 in 1 : vector<8x128xf32>, vector<8x128xf32> -> vector<8x256xf32>
    %cst_56 = arith.constant dense<0.000000e+00> : vector<8x1024xf32>
    %204 = tpu.matmul %203, %8, %cst_56 {dimension_numbers = #tpu.dot_dimension_numbers<[1], [0], [0], [1], [0, 0, 1, 1], [], []>} : vector<8x256xf32>, vector<256x1024xf32>, vector<8x1024xf32> -> vector<8x1024xf32>
    %205 = vector.extract_strided_slice %204 {offsets = [0, 0], sizes = [8, 512], strides = [1, 1]} : vector<8x1024xf32> to vector<8x512xf32>
    %c32_57 = arith.constant 32 : index
    %c0_58 = arith.constant 0 : index
    %206 = vector.load %arg10[%c32_57, %c0_58] : memref<64x1024xf32, #tpu.memory_space<vmem>>, vector<8x512xf32>
    %207 = arith.addf %205, %206 : vector<8x512xf32>
    %208 = vector.extract_strided_slice %204 {offsets = [0, 512], sizes = [8, 512], strides = [1, 1]} : vector<8x1024xf32> to vector<8x512xf32>
    %c24_59 = arith.constant 24 : index
    %c512_60 = arith.constant 512 : index
    %209 = vector.load %arg10[%c24_59, %c512_60] : memref<64x1024xf32, #tpu.memory_space<vmem>>, vector<8x512xf32>
    %210 = arith.addf %208, %209 : vector<8x512xf32>
    %211 = vector.extract_strided_slice %207 {offsets = [0, 0], sizes = [8, 384], strides = [1, 1]} : vector<8x512xf32> to vector<8x384xf32>
    %212 = arith.negf %211 : vector<8x384xf32>
    %213 = math.exp %212 : vector<8x384xf32>
    %cst_61 = arith.constant 1.000000e+00 : f32
    %214 = vector.broadcast %cst_61 : f32 to vector<8x384xf32>
    %215 = arith.addf %214, %213 : vector<8x384xf32>
    %216 = arith.divf %214, %215 : vector<8x384xf32>
    %217 = vector.extract_strided_slice %210 {offsets = [0, 0], sizes = [8, 384], strides = [1, 1]} : vector<8x512xf32> to vector<8x384xf32>
    %218 = arith.negf %217 : vector<8x384xf32>
    %219 = math.exp %218 : vector<8x384xf32>
    %cst_62 = arith.constant 1.000000e+00 : f32
    %220 = vector.broadcast %cst_62 : f32 to vector<8x384xf32>
    %221 = arith.addf %220, %219 : vector<8x384xf32>
    %222 = arith.divf %220, %221 : vector<8x384xf32>
    %223 = vector.extract_strided_slice %207 {offsets = [0, 384], sizes = [8, 128], strides = [1, 1]} : vector<8x512xf32> to vector<8x128xf32>
    %224 = math.tanh %223 : vector<8x128xf32>
    %225 = vector.extract_strided_slice %210 {offsets = [0, 384], sizes = [8, 128], strides = [1, 1]} : vector<8x512xf32> to vector<8x128xf32>
    %226 = math.tanh %225 : vector<8x128xf32>
    %227 = vector.extract_strided_slice %216 {offsets = [0, 128], sizes = [8, 128], strides = [1, 1]} : vector<8x384xf32> to vector<8x128xf32>
    %228 = arith.mulf %227, %189 : vector<8x128xf32>
    %229 = vector.extract_strided_slice %216 {offsets = [0, 0], sizes = [8, 128], strides = [1, 1]} : vector<8x384xf32> to vector<8x128xf32>
    %230 = arith.mulf %229, %224 : vector<8x128xf32>
    %231 = arith.addf %228, %230 : vector<8x128xf32>
    %232 = vector.extract_strided_slice %222 {offsets = [0, 128], sizes = [8, 128], strides = [1, 1]} : vector<8x384xf32> to vector<8x128xf32>
    %233 = arith.mulf %232, %194 : vector<8x128xf32>
    %234 = vector.extract_strided_slice %222 {offsets = [0, 0], sizes = [8, 128], strides = [1, 1]} : vector<8x384xf32> to vector<8x128xf32>
    %235 = arith.mulf %234, %226 : vector<8x128xf32>
    %236 = arith.addf %233, %235 : vector<8x128xf32>
    %237 = vector.extract_strided_slice %216 {offsets = [0, 256], sizes = [8, 128], strides = [1, 1]} : vector<8x384xf32> to vector<8x128xf32>
    %238 = math.tanh %231 : vector<8x128xf32>
    %239 = arith.mulf %237, %238 : vector<8x128xf32>
    %240 = vector.extract_strided_slice %222 {offsets = [0, 256], sizes = [8, 128], strides = [1, 1]} : vector<8x384xf32> to vector<8x128xf32>
    %241 = math.tanh %236 : vector<8x128xf32>
    %242 = arith.mulf %240, %241 : vector<8x128xf32>
    %243 = arith.maximumf %201, %239 : vector<8x128xf32>
    %244 = arith.maximumf %202, %242 : vector<8x128xf32>
    %245 = tpu.concatenate %239, %242 in 1 : vector<8x128xf32>, vector<8x128xf32> -> vector<8x256xf32>
    %cst_63 = arith.constant dense<0.000000e+00> : vector<8x1024xf32>
    %246 = tpu.matmul %245, %8, %cst_63 {dimension_numbers = #tpu.dot_dimension_numbers<[1], [0], [0], [1], [0, 0, 1, 1], [], []>} : vector<8x256xf32>, vector<256x1024xf32>, vector<8x1024xf32> -> vector<8x1024xf32>
    %247 = vector.extract_strided_slice %246 {offsets = [0, 0], sizes = [8, 512], strides = [1, 1]} : vector<8x1024xf32> to vector<8x512xf32>
    %c40_64 = arith.constant 40 : index
    %c0_65 = arith.constant 0 : index
    %248 = vector.load %arg10[%c40_64, %c0_65] : memref<64x1024xf32, #tpu.memory_space<vmem>>, vector<8x512xf32>
    %249 = arith.addf %247, %248 : vector<8x512xf32>
    %250 = vector.extract_strided_slice %246 {offsets = [0, 512], sizes = [8, 512], strides = [1, 1]} : vector<8x1024xf32> to vector<8x512xf32>
    %c16_66 = arith.constant 16 : index
    %c512_67 = arith.constant 512 : index
    %251 = vector.load %arg10[%c16_66, %c512_67] : memref<64x1024xf32, #tpu.memory_space<vmem>>, vector<8x512xf32>
    %252 = arith.addf %250, %251 : vector<8x512xf32>
    %253 = vector.extract_strided_slice %249 {offsets = [0, 0], sizes = [8, 384], strides = [1, 1]} : vector<8x512xf32> to vector<8x384xf32>
    %254 = arith.negf %253 : vector<8x384xf32>
    %255 = math.exp %254 : vector<8x384xf32>
    %cst_68 = arith.constant 1.000000e+00 : f32
    %256 = vector.broadcast %cst_68 : f32 to vector<8x384xf32>
    %257 = arith.addf %256, %255 : vector<8x384xf32>
    %258 = arith.divf %256, %257 : vector<8x384xf32>
    %259 = vector.extract_strided_slice %252 {offsets = [0, 0], sizes = [8, 384], strides = [1, 1]} : vector<8x512xf32> to vector<8x384xf32>
    %260 = arith.negf %259 : vector<8x384xf32>
    %261 = math.exp %260 : vector<8x384xf32>
    %cst_69 = arith.constant 1.000000e+00 : f32
    %262 = vector.broadcast %cst_69 : f32 to vector<8x384xf32>
    %263 = arith.addf %262, %261 : vector<8x384xf32>
    %264 = arith.divf %262, %263 : vector<8x384xf32>
    %265 = vector.extract_strided_slice %249 {offsets = [0, 384], sizes = [8, 128], strides = [1, 1]} : vector<8x512xf32> to vector<8x128xf32>
    %266 = math.tanh %265 : vector<8x128xf32>
    %267 = vector.extract_strided_slice %252 {offsets = [0, 384], sizes = [8, 128], strides = [1, 1]} : vector<8x512xf32> to vector<8x128xf32>
    %268 = math.tanh %267 : vector<8x128xf32>
    %269 = vector.extract_strided_slice %258 {offsets = [0, 128], sizes = [8, 128], strides = [1, 1]} : vector<8x384xf32> to vector<8x128xf32>
    %270 = arith.mulf %269, %231 : vector<8x128xf32>
    %271 = vector.extract_strided_slice %258 {offsets = [0, 0], sizes = [8, 128], strides = [1, 1]} : vector<8x384xf32> to vector<8x128xf32>
    %272 = arith.mulf %271, %266 : vector<8x128xf32>
    %273 = arith.addf %270, %272 : vector<8x128xf32>
    %274 = vector.extract_strided_slice %264 {offsets = [0, 128], sizes = [8, 128], strides = [1, 1]} : vector<8x384xf32> to vector<8x128xf32>
    %275 = arith.mulf %274, %236 : vector<8x128xf32>
    %276 = vector.extract_strided_slice %264 {offsets = [0, 0], sizes = [8, 128], strides = [1, 1]} : vector<8x384xf32> to vector<8x128xf32>
    %277 = arith.mulf %276, %268 : vector<8x128xf32>
    %278 = arith.addf %275, %277 : vector<8x128xf32>
    %279 = vector.extract_strided_slice %258 {offsets = [0, 256], sizes = [8, 128], strides = [1, 1]} : vector<8x384xf32> to vector<8x128xf32>
    %280 = math.tanh %273 : vector<8x128xf32>
    %281 = arith.mulf %279, %280 : vector<8x128xf32>
    %282 = vector.extract_strided_slice %264 {offsets = [0, 256], sizes = [8, 128], strides = [1, 1]} : vector<8x384xf32> to vector<8x128xf32>
    %283 = math.tanh %278 : vector<8x128xf32>
    %284 = arith.mulf %282, %283 : vector<8x128xf32>
    %285 = arith.maximumf %243, %281 : vector<8x128xf32>
    %286 = arith.maximumf %244, %284 : vector<8x128xf32>
    %287 = tpu.concatenate %281, %284 in 1 : vector<8x128xf32>, vector<8x128xf32> -> vector<8x256xf32>
    %cst_70 = arith.constant dense<0.000000e+00> : vector<8x1024xf32>
    %288 = tpu.matmul %287, %8, %cst_70 {dimension_numbers = #tpu.dot_dimension_numbers<[1], [0], [0], [1], [0, 0, 1, 1], [], []>} : vector<8x256xf32>, vector<256x1024xf32>, vector<8x1024xf32> -> vector<8x1024xf32>
    %289 = vector.extract_strided_slice %288 {offsets = [0, 0], sizes = [8, 512], strides = [1, 1]} : vector<8x1024xf32> to vector<8x512xf32>
    %c48_71 = arith.constant 48 : index
    %c0_72 = arith.constant 0 : index
    %290 = vector.load %arg10[%c48_71, %c0_72] : memref<64x1024xf32, #tpu.memory_space<vmem>>, vector<8x512xf32>
    %291 = arith.addf %289, %290 : vector<8x512xf32>
    %292 = vector.extract_strided_slice %288 {offsets = [0, 512], sizes = [8, 512], strides = [1, 1]} : vector<8x1024xf32> to vector<8x512xf32>
    %c8_73 = arith.constant 8 : index
    %c512_74 = arith.constant 512 : index
    %293 = vector.load %arg10[%c8_73, %c512_74] : memref<64x1024xf32, #tpu.memory_space<vmem>>, vector<8x512xf32>
    %294 = arith.addf %292, %293 : vector<8x512xf32>
    %295 = vector.extract_strided_slice %291 {offsets = [0, 0], sizes = [8, 384], strides = [1, 1]} : vector<8x512xf32> to vector<8x384xf32>
    %296 = arith.negf %295 : vector<8x384xf32>
    %297 = math.exp %296 : vector<8x384xf32>
    %cst_75 = arith.constant 1.000000e+00 : f32
    %298 = vector.broadcast %cst_75 : f32 to vector<8x384xf32>
    %299 = arith.addf %298, %297 : vector<8x384xf32>
    %300 = arith.divf %298, %299 : vector<8x384xf32>
    %301 = vector.extract_strided_slice %294 {offsets = [0, 0], sizes = [8, 384], strides = [1, 1]} : vector<8x512xf32> to vector<8x384xf32>
    %302 = arith.negf %301 : vector<8x384xf32>
    %303 = math.exp %302 : vector<8x384xf32>
    %cst_76 = arith.constant 1.000000e+00 : f32
    %304 = vector.broadcast %cst_76 : f32 to vector<8x384xf32>
    %305 = arith.addf %304, %303 : vector<8x384xf32>
    %306 = arith.divf %304, %305 : vector<8x384xf32>
    %307 = vector.extract_strided_slice %291 {offsets = [0, 384], sizes = [8, 128], strides = [1, 1]} : vector<8x512xf32> to vector<8x128xf32>
    %308 = math.tanh %307 : vector<8x128xf32>
    %309 = vector.extract_strided_slice %294 {offsets = [0, 384], sizes = [8, 128], strides = [1, 1]} : vector<8x512xf32> to vector<8x128xf32>
    %310 = math.tanh %309 : vector<8x128xf32>
    %311 = vector.extract_strided_slice %300 {offsets = [0, 128], sizes = [8, 128], strides = [1, 1]} : vector<8x384xf32> to vector<8x128xf32>
    %312 = arith.mulf %311, %273 : vector<8x128xf32>
    %313 = vector.extract_strided_slice %300 {offsets = [0, 0], sizes = [8, 128], strides = [1, 1]} : vector<8x384xf32> to vector<8x128xf32>
    %314 = arith.mulf %313, %308 : vector<8x128xf32>
    %315 = arith.addf %312, %314 : vector<8x128xf32>
    %316 = vector.extract_strided_slice %306 {offsets = [0, 128], sizes = [8, 128], strides = [1, 1]} : vector<8x384xf32> to vector<8x128xf32>
    %317 = arith.mulf %316, %278 : vector<8x128xf32>
    %318 = vector.extract_strided_slice %306 {offsets = [0, 0], sizes = [8, 128], strides = [1, 1]} : vector<8x384xf32> to vector<8x128xf32>
    %319 = arith.mulf %318, %310 : vector<8x128xf32>
    %320 = arith.addf %317, %319 : vector<8x128xf32>
    %321 = vector.extract_strided_slice %300 {offsets = [0, 256], sizes = [8, 128], strides = [1, 1]} : vector<8x384xf32> to vector<8x128xf32>
    %322 = math.tanh %315 : vector<8x128xf32>
    %323 = arith.mulf %321, %322 : vector<8x128xf32>
    %324 = vector.extract_strided_slice %306 {offsets = [0, 256], sizes = [8, 128], strides = [1, 1]} : vector<8x384xf32> to vector<8x128xf32>
    %325 = math.tanh %320 : vector<8x128xf32>
    %326 = arith.mulf %324, %325 : vector<8x128xf32>
    %327 = arith.maximumf %285, %323 : vector<8x128xf32>
    %328 = arith.maximumf %286, %326 : vector<8x128xf32>
    %329 = tpu.concatenate %323, %326 in 1 : vector<8x128xf32>, vector<8x128xf32> -> vector<8x256xf32>
    %cst_77 = arith.constant dense<0.000000e+00> : vector<8x1024xf32>
    %330 = tpu.matmul %329, %8, %cst_77 {dimension_numbers = #tpu.dot_dimension_numbers<[1], [0], [0], [1], [0, 0, 1, 1], [], []>} : vector<8x256xf32>, vector<256x1024xf32>, vector<8x1024xf32> -> vector<8x1024xf32>
    %331 = vector.extract_strided_slice %330 {offsets = [0, 0], sizes = [8, 512], strides = [1, 1]} : vector<8x1024xf32> to vector<8x512xf32>
    %c56_78 = arith.constant 56 : index
    %c0_79 = arith.constant 0 : index
    %332 = vector.load %arg10[%c56_78, %c0_79] : memref<64x1024xf32, #tpu.memory_space<vmem>>, vector<8x512xf32>
    %333 = arith.addf %331, %332 : vector<8x512xf32>
    %334 = vector.extract_strided_slice %330 {offsets = [0, 512], sizes = [8, 512], strides = [1, 1]} : vector<8x1024xf32> to vector<8x512xf32>
    %c0_80 = arith.constant 0 : index
    %c512_81 = arith.constant 512 : index
    %335 = vector.load %arg10[%c0_80, %c512_81] : memref<64x1024xf32, #tpu.memory_space<vmem>>, vector<8x512xf32>
    %336 = arith.addf %334, %335 : vector<8x512xf32>
    %337 = vector.extract_strided_slice %333 {offsets = [0, 0], sizes = [8, 384], strides = [1, 1]} : vector<8x512xf32> to vector<8x384xf32>
    %338 = arith.negf %337 : vector<8x384xf32>
    %339 = math.exp %338 : vector<8x384xf32>
    %cst_82 = arith.constant 1.000000e+00 : f32
    %340 = vector.broadcast %cst_82 : f32 to vector<8x384xf32>
    %341 = arith.addf %340, %339 : vector<8x384xf32>
    %342 = arith.divf %340, %341 : vector<8x384xf32>
    %343 = vector.extract_strided_slice %336 {offsets = [0, 0], sizes = [8, 384], strides = [1, 1]} : vector<8x512xf32> to vector<8x384xf32>
    %344 = arith.negf %343 : vector<8x384xf32>
    %345 = math.exp %344 : vector<8x384xf32>
    %cst_83 = arith.constant 1.000000e+00 : f32
    %346 = vector.broadcast %cst_83 : f32 to vector<8x384xf32>
    %347 = arith.addf %346, %345 : vector<8x384xf32>
    %348 = arith.divf %346, %347 : vector<8x384xf32>
    %349 = vector.extract_strided_slice %333 {offsets = [0, 384], sizes = [8, 128], strides = [1, 1]} : vector<8x512xf32> to vector<8x128xf32>
    %350 = math.tanh %349 : vector<8x128xf32>
    %351 = vector.extract_strided_slice %336 {offsets = [0, 384], sizes = [8, 128], strides = [1, 1]} : vector<8x512xf32> to vector<8x128xf32>
    %352 = math.tanh %351 : vector<8x128xf32>
    %353 = vector.extract_strided_slice %342 {offsets = [0, 128], sizes = [8, 128], strides = [1, 1]} : vector<8x384xf32> to vector<8x128xf32>
    %354 = arith.mulf %353, %315 : vector<8x128xf32>
    %355 = vector.extract_strided_slice %342 {offsets = [0, 0], sizes = [8, 128], strides = [1, 1]} : vector<8x384xf32> to vector<8x128xf32>
    %356 = arith.mulf %355, %350 : vector<8x128xf32>
    %357 = arith.addf %354, %356 : vector<8x128xf32>
    %358 = vector.extract_strided_slice %348 {offsets = [0, 128], sizes = [8, 128], strides = [1, 1]} : vector<8x384xf32> to vector<8x128xf32>
    %359 = arith.mulf %358, %320 : vector<8x128xf32>
    %360 = vector.extract_strided_slice %348 {offsets = [0, 0], sizes = [8, 128], strides = [1, 1]} : vector<8x384xf32> to vector<8x128xf32>
    %361 = arith.mulf %360, %352 : vector<8x128xf32>
    %362 = arith.addf %359, %361 : vector<8x128xf32>
    %363 = vector.extract_strided_slice %342 {offsets = [0, 256], sizes = [8, 128], strides = [1, 1]} : vector<8x384xf32> to vector<8x128xf32>
    %364 = math.tanh %357 : vector<8x128xf32>
    %365 = arith.mulf %363, %364 : vector<8x128xf32>
    %366 = vector.extract_strided_slice %348 {offsets = [0, 256], sizes = [8, 128], strides = [1, 1]} : vector<8x384xf32> to vector<8x128xf32>
    %367 = math.tanh %362 : vector<8x128xf32>
    %368 = arith.mulf %366, %367 : vector<8x128xf32>
    %369 = arith.maximumf %327, %365 : vector<8x128xf32>
    %370 = arith.maximumf %328, %368 : vector<8x128xf32>
    %c0_84 = arith.constant 0 : index
    %c0_85 = arith.constant 0 : index
    %371 = vector.load %arg5[%c0_84, %c0_85] : memref<32x128xf32, #tpu.memory_space<vmem>>, vector<32x128xf32>
    %cst_86 = arith.constant dense<0.000000e+00> : vector<8x128xf32>
    %372 = tpu.matmul %33, %371, %cst_86 {dimension_numbers = #tpu.dot_dimension_numbers<[1], [0], [0], [1], [0, 0, 1, 1], [], []>} : vector<8x32xf32>, vector<32x128xf32>, vector<8x128xf32> -> vector<8x128xf32>
    %c0_87 = arith.constant 0 : index
    %c0_88 = arith.constant 0 : index
    %373 = vector.load %arg6[%c0_87, %c0_88] : memref<128x128xf32, #tpu.memory_space<vmem>>, vector<128x128xf32>
    %cst_89 = arith.constant dense<0.000000e+00> : vector<8x128xf32>
    %374 = tpu.matmul %369, %373, %cst_89 {dimension_numbers = #tpu.dot_dimension_numbers<[1], [0], [0], [1], [0, 0, 1, 1], [], []>} : vector<8x128xf32>, vector<128x128xf32>, vector<8x128xf32> -> vector<8x128xf32>
    %375 = arith.addf %372, %374 : vector<8x128xf32>
    %c0_90 = arith.constant 0 : index
    %c0_91 = arith.constant 0 : index
    %376 = vector.load %arg7[%c0_90, %c0_91] : memref<128x128xf32, #tpu.memory_space<vmem>>, vector<128x128xf32>
    %cst_92 = arith.constant dense<0.000000e+00> : vector<8x128xf32>
    %377 = tpu.matmul %370, %376, %cst_92 {dimension_numbers = #tpu.dot_dimension_numbers<[1], [0], [0], [1], [0, 0, 1, 1], [], []>} : vector<8x128xf32>, vector<128x128xf32>, vector<8x128xf32> -> vector<8x128xf32>
    %378 = arith.addf %375, %377 : vector<8x128xf32>
    %c0_93 = arith.constant 0 : index
    %c0_94 = arith.constant 0 : index
    %379 = vector.load %arg8[%c0_93, %c0_94] : memref<1x128xf32, #tpu.memory_space<vmem>>, vector<1x128xf32>
    %380 = vector.broadcast %379 : vector<1x128xf32> to vector<8x128xf32>
    %381 = arith.addf %378, %380 : vector<8x128xf32>
    %c0_95 = arith.constant 0 : index
    %c0_96 = arith.constant 0 : index
    %382 = vector.load %arg9[%c0_95, %c0_96] : memref<8x128xf32, #tpu.memory_space<vmem>>, vector<8x128xf32>
    tpu.vector_store %arg9[%c0_95, %c0_96], %381 {strides = array<i32>} : memref<8x128xf32, #tpu.memory_space<vmem>>, vector<8x128xf32>,
    return
  }
  func.func @transform_0(%arg0: i32) -> (i32, i32, i32) {
    %c0_i32 = arith.constant 0 : i32
    %c0_i32_0 = arith.constant 0 : i32
    %c0_i32_1 = arith.constant 0 : i32
    return %arg0, %c0_i32, %c0_i32_0 : i32, i32, i32
  }
  func.func @transform_1(%arg0: i32) -> (i32, i32) {
    %c0_i32 = arith.constant 0 : i32
    %c0_i32_0 = arith.constant 0 : i32
    %c0_i32_1 = arith.constant 0 : i32
    return %c0_i32, %c0_i32_0 : i32, i32
  }
  func.func @transform_2(%arg0: i32) -> (i32, i32) {
    %c0_i32 = arith.constant 0 : i32
    %c0_i32_0 = arith.constant 0 : i32
    %c0_i32_1 = arith.constant 0 : i32
    return %c0_i32, %c0_i32_0 : i32, i32
  }
  func.func @transform_3(%arg0: i32) -> (i32, i32) {
    %c0_i32 = arith.constant 0 : i32
    %c0_i32_0 = arith.constant 0 : i32
    %c0_i32_1 = arith.constant 0 : i32
    return %c0_i32, %c0_i32_0 : i32, i32
  }
  func.func @transform_4(%arg0: i32) -> (i32, i32) {
    %c0_i32 = arith.constant 0 : i32
    %c0_i32_0 = arith.constant 0 : i32
    %c0_i32_1 = arith.constant 0 : i32
    return %c0_i32, %c0_i32_0 : i32, i32
  }
  func.func @transform_5(%arg0: i32) -> (i32, i32) {
    %c0_i32 = arith.constant 0 : i32
    %c0_i32_0 = arith.constant 0 : i32
    %c0_i32_1 = arith.constant 0 : i32
    return %c0_i32, %c0_i32_0 : i32, i32
  }
  func.func @transform_6(%arg0: i32) -> (i32, i32) {
    %c0_i32 = arith.constant 0 : i32
    %c0_i32_0 = arith.constant 0 : i32
    %c0_i32_1 = arith.constant 0 : i32
    return %c0_i32, %c0_i32_0 : i32, i32
  }
  func.func @transform_7(%arg0: i32) -> (i32, i32) {
    %c0_i32 = arith.constant 0 : i32
    %c0_i32_0 = arith.constant 0 : i32
    %c0_i32_1 = arith.constant 0 : i32
    return %c0_i32, %c0_i32_0 : i32, i32
  }
  func.func @transform_8(%arg0: i32) -> (i32, i32) {
    %c0_i32 = arith.constant 0 : i32
    %c0_i32_0 = arith.constant 0 : i32
    return %arg0, %c0_i32 : i32, i32
  }
}

</mosaic_0001>

<bundles_post_ra>
// kernel: custom-call
= control target key start
LH: loop header
LB: loop body
LE: loop exit
PB: predicated region body
PF: predicated region fallthrough
CT: control target
= control target key end

     0   :  { %s6_s0 = inlined_call_operand.vmem [shape: f32[1024], index: 0, kind: output, shape index: {}]  }

// kernel: textrcnn_forward.1
= control target key start
LH: loop header
LB: loop body
LE: loop exit
PB: predicated region body
PF: predicated region fallthrough
CT: control target
= control target key end

     0   :  { %v13294_v3 = vmov 0.0   ;;  %vm111_vm0 = vcmask 261120   ;;  %vm5388_vm1 = vmmov 0   ;;  %s13285_s1 = inlined_call_operand.vmem [shape: f32[32,1024], index: 1, kind: input, shape index: {}]   ;;  %s13286_s0 = inlined_call_operand.vmem [shape: f32[1,64,32], index: 0, kind: input, shape index: {}]   ;;  %s13287_s2 = inlined_call_operand.vmem [shape: f32[256,1024], index: 2, kind: input, shape index: {}]   ;;  %s13288_s3 = inlined_call_operand.vmem [shape: f32[1,1024], index: 3, kind: input, shape index: {}]   ;;  %s13289_s5 = inlined_call_operand.vmem [shape: f32[128,128], index: 5, kind: input, shape index: {}]   ;;  %s13290_s4 = inlined_call_operand.vmem [shape: f32[32,128], index: 4, kind: input, shape index: {}]   ;;  %s13291_s6 = inlined_call_operand.vmem [shape: f32[128,128], index: 6, kind: input, shape index: {}]   ;;  %s13292_s7 = inlined_call_operand.vmem [shape: f32[1,128], index: 7, kind: input, shape index: {}]   ;;  %s13293_s8 = inlined_call_operand.vmem [shape: f32[8,128], index: 8, kind: output, shape index: {}]  }
   0x1   :  { %v62_v0 = vld [vmem:[%s13285_s1 + $0xc8] sm:$0xff]  ;;  %v64_v1 = vld [vmem:[%s13285_s1 + $0xd8] sm:$0xff]  ;;  %v61_v2 = vld [vmem:[%s13285_s1 + $0xc0] sm:$0xff]  ;;  %200 = vmatprep.mubr.f32.mxu0 %v13294_v3  ;;  %313 = vmatprep.mubr.f32.mxu1 %v13294_v3 }
   0x2   :  { %160 = vmatprep.subr.mxu0 %v62_v0  ;;  %273 = vmatprep.subr.mxu1 %v64_v1  ;;  %v63_v4 = vld [vmem:[%s13285_s1 + $0xd0] sm:$0xff]  ;;  %v54_v5 = vld [vmem:[%s13285_s1 + $0x88] sm:$0xff]  ;;  %v56_v6 = vld [vmem:[%s13285_s1 + $0x98] sm:$0xff] }
   0x3   :  { %161 = vmatpush1.msra.mxu0 %v61_v2  ;;  %274 = vmatpush1.msra.mxu1 %v63_v4  ;;  %v53_v7 = vld [vmem:[%s13285_s1 + $0x80] sm:$0xff]  ;;  %v55_v8 = vld [vmem:[%s13285_s1 + $0x90] sm:$0xff]  ;;  %v46_v9 = vld [vmem:[%s13285_s1 + $0x48] sm:$0xff] }
   0x4   :  { %162 = vmatprep.subr.mxu0 %v54_v5  ;;  %275 = vmatprep.subr.mxu1 %v56_v6  ;;  %v48_v10 = vld [vmem:[%s13285_s1 + $0x58] sm:$0xff]  ;;  %v45_v11 = vld [vmem:[%s13285_s1 + $0x40] sm:$0xff]  ;;  %v47_v12 = vld [vmem:[%s13285_s1 + $0x50] sm:$0xff] }
   0x5   :  { %163 = vmatpush1.msra.mxu0 %v53_v7  ;;  %276 = vmatpush1.msra.mxu1 %v55_v8  ;;  %v38_v13 = vld [vmem:[%s13285_s1 + $0x8] sm:$0xff]  ;;  %v40_v14 = vld [vmem:[%s13285_s1 + $0x18] sm:$0xff]  ;;  %v37_v15 = vld [vmem:[%s13285_s1] sm:$0xff] }
   0x6   :  { %164 = vmatprep.subr.mxu0 %v46_v9  ;;  %277 = vmatprep.subr.mxu1 %v48_v10  ;;  %v39_v16 = vld [vmem:[%s13285_s1 + $0x10] sm:$0xff]  ;;  %v5487_v17 = vld [vmem:[%s13286_s0] sm:$0xff]  ;;  %v66_v18 = vld [vmem:[%s13285_s1 + $0xe8] sm:$0xff] }
   0x7   :  { %165 = vmatpush1.msra.mxu0 %v45_v11  ;;  %278 = vmatpush1.msra.mxu1 %v47_v12  ;;  %v65_v19 = vld [vmem:[%s13285_s1 + $0xe0] sm:$0xff]  ;;  %v58_v20 = vld [vmem:[%s13285_s1 + $0xa8] sm:$0xff]  ;;  %v68_v21 = vld [vmem:[%s13285_s1 + $0xf8] sm:$0xff] }
   0x8   :  { %166 = vmatprep.subr.mxu0 %v38_v13  ;;  %279 = vmatprep.subr.mxu1 %v40_v14  ;;  %v5509_v22 = vld [vmem:[%s13286_s0 + $0x8] sm:$0xff]  ;;  %v57_v23 = vld [vmem:[%s13285_s1 + $0xa0] sm:$0xff]  ;;  %v67_v24 = vld [vmem:[%s13285_s1 + $0xf0] sm:$0xff] }
   0x9   :  { %167 = vmatpush1.msra.mxu0 %v37_v15  ;;  %280 = vmatpush1.msra.mxu1 %v39_v16  ;;  %v50_v25 = vld [vmem:[%s13285_s1 + $0x68] sm:$0xff]  ;;  %v60_v26 = vld [vmem:[%s13285_s1 + $0xb8] sm:$0xff]  ;;  %v5533_v27 = vld [vmem:[%s13286_s0 + $0x10] sm:$0xff] }
   0xa   :  { %3987 = vmatmul.mubr.msk.f32.vlgmr.msra.gmra.mxu0 %vm111_vm0, %v5487_v17  ;;  %3995 = vmatmul.mubr.msk.f32.vlgmr.msra.gmra.mxu1 %vm111_vm0, %v5487_v17  ;;  %v49_v28 = vld [vmem:[%s13285_s1 + $0x60] sm:$0xff]  ;;  %v59_v29 = vld [vmem:[%s13285_s1 + $0xb0] sm:$0xff]  ;;  %v42_v30 = vld [vmem:[%s13285_s1 + $0x28] sm:$0xff] }
   0xb   :  { %386 = vmatprep.subr.mxu0 %v66_v18  ;;  %206 = vmatprep.mubr.f32.mxu0 %v13294_v3  ;;  %v52_v31 = vld [vmem:[%s13285_s1 + $0x78] sm:$0xff]  ;;  %v41_v33 = vld [vmem:[%s13285_s1 + $0x20] sm:$0xff]  ;;  %v51_v34 = vld [vmem:[%s13285_s1 + $0x70] sm:$0xff] }
   0xc   :  { %387 = vmatpush1.msra.mxu0 %v65_v19  ;;  %319 = vmatprep.mubr.f32.mxu1 %v13294_v3  ;;  %v5556_v32 = vld [vmem:[%s13286_s0 + $0x18] sm:$0xff]  ;;  %v773_v36 = vld [vmem:[%s13287_s2 + $0x3c8] sm:$0xff]  ;;  %v5579_v37 = vld [vmem:[%s13286_s0 + $0x20] sm:$0xff] }
   0xd   :  { %388 = vmatprep.subr.mxu0 %v58_v20  ;;  %499 = vmatprep.subr.mxu1 %v68_v21  ;;  %v44_v35 = vld [vmem:[%s13285_s1 + $0x38] sm:$0xff]  ;;  %v43_v38 = vld [vmem:[%s13285_s1 + $0x30] sm:$0xff]  ;;  %v5596_v40 = vld [vmem:[%s13286_s0 + $0x28] sm:$0xff] }
   0xe   :  { %3988 = vmatmul.mubr.msk.f32.gmra.mxu0 %vm111_vm0, %v5509_v22  ;;  %3996 = vmatmul.mubr.msk.f32.gmra.mxu1 %vm111_vm0, %v5509_v22  ;;  %v775_v39 = vld [vmem:[%s13287_s2 + $0x3d8] sm:$0xff]  ;;  %v5607_v41 = vld [vmem:[%s13286_s0 + $0x30] sm:$0xff]  ;;  %v772_v43 = vld [vmem:[%s13287_s2 + $0x3c0] sm:$0xff] }
   0xf   :  { %212 = vmatprep.mubr.f32.mxu0 %v13294_v3  ;;  %325 = vmatprep.mubr.f32.mxu1 %v13294_v3  ;;  %v5618_v42 = vld [vmem:[%s13286_s0 + $0x38] sm:$0xff]  ;;  %v774_v44 = vld [vmem:[%s13287_s2 + $0x3d0] sm:$0xff]  ;;  %v765_v45 = vld [vmem:[%s13287_s2 + $0x388] sm:$0xff] }
  0x10   :  { %389 = vmatpush1.msra.mxu0 %v57_v23  ;;  %500 = vmatpush1.msra.mxu1 %v67_v24  ;;  %v767_v46 = vld [vmem:[%s13287_s2 + $0x398] sm:$0xff]  ;;  %v764_v47 = vld [vmem:[%s13287_s2 + $0x380] sm:$0xff]  ;;  %v766_v48 = vld [vmem:[%s13287_s2 + $0x390] sm:$0xff] }
  0x11   :  { %390 = vmatprep.subr.mxu0 %v50_v25  ;;  %501 = vmatprep.subr.mxu1 %v60_v26  ;;  %v757_v49 = vld [vmem:[%s13287_s2 + $0x348] sm:$0xff]  ;;  %v759_v50 = vld [vmem:[%s13287_s2 + $0x358] sm:$0xff]  ;;  %v756_v51 = vld [vmem:[%s13287_s2 + $0x340] sm:$0xff] }
  0x12   :  { %3989 = vmatmul.mubr.msk.f32.gmra.mxu0 %vm111_vm0, %v5533_v27  ;;  %3997 = vmatmul.mubr.msk.f32.gmra.mxu1 %vm111_vm0, %v5533_v27  ;;  %v758_v52 = vld [vmem:[%s13287_s2 + $0x350] sm:$0xff]  ;;  %v749_v53 = vld [vmem:[%s13287_s2 + $0x308] sm:$0xff]  ;;  %v751_v54 = vld [vmem:[%s13287_s2 + $0x318] sm:$0xff] }
  0x13   :  { %218 = vmatprep.mubr.f32.mxu0 %v13294_v3  ;;  %331 = vmatprep.mubr.f32.mxu1 %v13294_v3  ;;  %v748_v55 = vld [vmem:[%s13287_s2 + $0x300] sm:$0xff]  ;;  %v750_v56 = vld [vmem:[%s13287_s2 + $0x310] sm:$0xff]  ;;  %v741_v57 = vld [vmem:[%s13287_s2 + $0x2c8] sm:$0xff] }
  0x14   :  { %391 = vmatpush1.msra.mxu0 %v49_v28  ;;  %502 = vmatpush1.msra.mxu1 %v59_v29  ;;  %v743_v58 = vld [vmem:[%s13287_s2 + $0x2d8] sm:$0xff]  ;;  %v740_v59 = vld [vmem:[%s13287_s2 + $0x2c0] sm:$0xff]  ;;  %v742_v60 = vld [vmem:[%s13287_s2 + $0x2d0] sm:$0xff] }
  0x15   :  { %392 = vmatprep.subr.mxu0 %v42_v30  ;;  %503 = vmatprep.subr.mxu1 %v52_v31  ;;  %v733_v61 = vld [vmem:[%s13287_s2 + $0x288] sm:$0xff]  ;;  %v735_v62 = vld [vmem:[%s13287_s2 + $0x298] sm:$0xff]  ;;  %v732_v63 = vld [vmem:[%s13287_s2 + $0x280] sm:$0xff] }
  0x16   :  { %3990 = vmatmul.mubr.msk.f32.gmra.mxu0 %vm111_vm0, %v5556_v32  ;;  %3998 = vmatmul.mubr.msk.f32.gmra.mxu1 %vm111_vm0, %v5556_v32  ;;  %v734_v0 = vld [vmem:[%s13287_s2 + $0x290] sm:$0xff]  ;;  %v725_v1 = vld [vmem:[%s13287_s2 + $0x248] sm:$0xff]  ;;  %v727_v2 = vld [vmem:[%s13287_s2 + $0x258] sm:$0xff] }
  0x17   :  { %224 = vmatprep.mubr.f32.mxu0 %v13294_v3  ;;  %337 = vmatprep.mubr.f32.mxu1 %v13294_v3  ;;  %v724_v4 = vld [vmem:[%s13287_s2 + $0x240] sm:$0xff]  ;;  %v726_v5 = vld [vmem:[%s13287_s2 + $0x250] sm:$0xff]  ;;  %v717_v6 = vld [vmem:[%s13287_s2 + $0x208] sm:$0xff] }
  0x18   :  { %393 = vmatpush1.msra.mxu0 %v41_v33  ;;  %504 = vmatpush1.msra.mxu1 %v51_v34  ;;  %v719_v7 = vld [vmem:[%s13287_s2 + $0x218] sm:$0xff]  ;;  %v716_v8 = vld [vmem:[%s13287_s2 + $0x200] sm:$0xff]  ;;  %v718_v9 = vld [vmem:[%s13287_s2 + $0x210] sm:$0xff] }
  0x19   :  { %505 = vmatprep.subr.mxu1 %v44_v35  ;;  %924 = vmatprep.subr.mxu0 %v773_v36  ;;  %v709_v10 = vld [vmem:[%s13287_s2 + $0x1c8] sm:$0xff]  ;;  %v711_v11 = vld [vmem:[%s13287_s2 + $0x1d8] sm:$0xff]  ;;  %v708_v12 = vld [vmem:[%s13287_s2 + $0x1c0] sm:$0xff] }
  0x1a   :  { %3991 = vmatmul.mubr.msk.f32.gmra.mxu0 %vm111_vm0, %v5579_v37  ;;  %3999 = vmatmul.mubr.msk.f32.gmra.mxu1 %vm111_vm0, %v5579_v37  ;;  %v710_v13 = vld [vmem:[%s13287_s2 + $0x1d0] sm:$0xff]  ;;  %v701_v14 = vld [vmem:[%s13287_s2 + $0x188] sm:$0xff]  ;;  %v703_v15 = vld [vmem:[%s13287_s2 + $0x198] sm:$0xff] }
  0x1b   :  { %230 = vmatprep.mubr.f32.mxu0 %v13294_v3  ;;  %343 = vmatprep.mubr.f32.mxu1 %v13294_v3  ;;  %v700_v16 = vld [vmem:[%s13287_s2 + $0x180] sm:$0xff]  ;;  %v693_v18 = vld [vmem:[%s13287_s2 + $0x148] sm:$0xff]  ;;  %v695_v19 = vld [vmem:[%s13287_s2 + $0x158] sm:$0xff] }
  0x1c   :  { %506 = vmatpush1.msra.mxu1 %v43_v38  ;;  %v692_v20 = vld [vmem:[%s13287_s2 + $0x140] sm:$0xff]  ;;  %v694_v21 = vld [vmem:[%s13287_s2 + $0x150] sm:$0xff]  ;;  %v685_v23 = vld [vmem:[%s13287_s2 + $0x108] sm:$0xff] }
  0x1d   :  { %995 = vmatprep.subr.mxu1 %v775_v39  ;;  %v687_v24 = vld [vmem:[%s13287_s2 + $0x118] sm:$0xff]  ;;  %v684_v25 = vld [vmem:[%s13287_s2 + $0x100] sm:$0xff]  ;;  %v686_v26 = vld [vmem:[%s13287_s2 + $0x110] sm:$0xff] }
  0x1e   :  { %3992 = vmatmul.mubr.msk.f32.gmra.mxu0 %vm111_vm0, %v5596_v40  ;;  %4000 = vmatmul.mubr.msk.f32.gmra.mxu1 %vm111_vm0, %v5596_v40  ;;  %v677_v28 = vld [vmem:[%s13287_s2 + $0xc8] sm:$0xff]  ;;  %v679_v29 = vld [vmem:[%s13287_s2 + $0xd8] sm:$0xff]  ;;  %v676_v30 = vld [vmem:[%s13287_s2 + $0xc0] sm:$0xff] }
  0x1f   :  { %236 = vmatprep.mubr.f32.mxu0 %v13294_v3  ;;  %349 = vmatprep.mubr.f32.mxu1 %v13294_v3  ;;  %v678_v31 = vld [vmem:[%s13287_s2 + $0xd0] sm:$0xff]  ;;  %v669_v33 = vld [vmem:[%s13287_s2 + $0x88] sm:$0xff]  ;;  %v671_v34 = vld [vmem:[%s13287_s2 + $0x98] sm:$0xff] }
  0x20   :  { %v668_v35 = vld [vmem:[%s13287_s2 + $0x80] sm:$0xff]  ;;  %v670_v36 = vld [vmem:[%s13287_s2 + $0x90] sm:$0xff]  ;;  %v661_v38 = vld [vmem:[%s13287_s2 + $0x48] sm:$0xff] }
  0x21   :  { %v663_v39 = vld [vmem:[%s13287_s2 + $0x58] sm:$0xff] }
  0x22   :  { %3993 = vmatmul.mubr.msk.f32.gmra.mxu0 %vm111_vm0, %v5607_v41  ;;  %4001 = vmatmul.mubr.msk.f32.gmra.mxu1 %vm111_vm0, %v5607_v41 }
  0x23   :  { %242 = vmatprep.mubr.f32.mxu0 %v13294_v3  ;;  %355 = vmatprep.mubr.f32.mxu1 %v13294_v3 }
  0x26   :  { %3994 = vmatmul.mubr.msk.f32.gmra.mxu0 %vm111_vm0, %v5618_v42  ;;  %4002 = vmatmul.mubr.msk.f32.gmra.mxu1 %vm111_vm0, %v5618_v42 }
  0x27   :  { %426 = vmatprep.mubr.f32.mxu0 %v13294_v3  ;;  %539 = vmatprep.mubr.f32.mxu1 %v13294_v3 }
  0x2a   :  { %4003 = vmatmul.mubr.msk.f32.vlgmr.msra.gmra.mxu0 %vm111_vm0, %v5487_v17  ;;  %4011 = vmatmul.mubr.msk.f32.vlgmr.msra.gmra.mxu1 %vm111_vm0, %v5487_v17  ;;  %v702_v17 = vld [vmem:[%s13287_s2 + $0x190] sm:$0xff] }
  0x2b   :  { %925 = vmatpush1.msra.mxu0 %v772_v43  ;;  %996 = vmatpush1.msra.mxu1 %v774_v44  ;;  %v660_v43 = vld [vmem:[%s13287_s2 + $0x40] sm:$0xff]  ;;  %v662_v44 = vld [vmem:[%s13287_s2 + $0x50] sm:$0xff] }
  0x2c   :  { %926 = vmatprep.subr.mxu0 %v765_v45  ;;  %997 = vmatprep.subr.mxu1 %v767_v46  ;;  %v653_v45 = vld [vmem:[%s13287_s2 + $0x8] sm:$0xff]  ;;  %v655_v46 = vld [vmem:[%s13287_s2 + $0x18] sm:$0xff] }
  0x2d   :  { %927 = vmatpush1.msra.mxu0 %v764_v47  ;;  %998 = vmatpush1.msra.mxu1 %v766_v48  ;;  %v652_v47 = vld [vmem:[%s13287_s2] sm:$0xff]  ;;  %v654_v48 = vld [vmem:[%s13287_s2 + $0x10] sm:$0xff] }
  0x2e   :  { %928 = vmatprep.subr.mxu0 %v757_v49  ;;  %999 = vmatprep.subr.mxu1 %v759_v50  ;;  %v901_v49 = vld [vmem:[%s13287_s2 + $0x7c8] sm:$0xff]  ;;  %v903_v50 = vld [vmem:[%s13287_s2 + $0x7d8] sm:$0xff] }
  0x2f   :  { %929 = vmatpush1.msra.mxu0 %v756_v51  ;;  %1000 = vmatpush1.msra.mxu1 %v758_v52  ;;  %v900_v51 = vld [vmem:[%s13287_s2 + $0x7c0] sm:$0xff]  ;;  %v902_v52 = vld [vmem:[%s13287_s2 + $0x7d0] sm:$0xff] }
  0x30   :  { %930 = vmatprep.subr.mxu0 %v749_v53  ;;  %1001 = vmatprep.subr.mxu1 %v751_v54  ;;  %v893_v53 = vld [vmem:[%s13287_s2 + $0x788] sm:$0xff]  ;;  %v895_v54 = vld [vmem:[%s13287_s2 + $0x798] sm:$0xff] }
  0x31   :  { %931 = vmatpush1.msra.mxu0 %v748_v55  ;;  %1002 = vmatpush1.msra.mxu1 %v750_v56  ;;  %v892_v55 = vld [vmem:[%s13287_s2 + $0x780] sm:$0xff]  ;;  %v894_v56 = vld [vmem:[%s13287_s2 + $0x790] sm:$0xff] }
  0x32   :  { %932 = vmatprep.subr.mxu0 %v741_v57  ;;  %1003 = vmatprep.subr.mxu1 %v743_v58  ;;  %v885_v57 = vld [vmem:[%s13287_s2 + $0x748] sm:$0xff]  ;;  %v887_v58 = vld [vmem:[%s13287_s2 + $0x758] sm:$0xff] }
  0x33   :  { %933 = vmatpush1.msra.mxu0 %v740_v59  ;;  %1004 = vmatpush1.msra.mxu1 %v742_v60  ;;  %v884_v59 = vld [vmem:[%s13287_s2 + $0x740] sm:$0xff]  ;;  %v886_v60 = vld [vmem:[%s13287_s2 + $0x750] sm:$0xff] }
  0x34   :  { %934 = vmatprep.subr.mxu0 %v733_v61  ;;  %1005 = vmatprep.subr.mxu1 %v735_v62  ;;  %v877_v61 = vld [vmem:[%s13287_s2 + $0x708] sm:$0xff]  ;;  %v879_v62 = vld [vmem:[%s13287_s2 + $0x718] sm:$0xff] }
  0x35   :  { %935 = vmatpush1.msra.mxu0 %v732_v63  ;;  %1006 = vmatpush1.msra.mxu1 %v734_v0  ;;  %v876_v63 = vld [vmem:[%s13287_s2 + $0x700] sm:$0xff]  ;;  %v869_v0 = vld [vmem:[%s13287_s2 + $0x6c8] sm:$0xff] }
  0x36   :  { %936 = vmatprep.subr.mxu0 %v725_v1  ;;  %1007 = vmatprep.subr.mxu1 %v727_v2  ;;  %v871_v1 = vld [vmem:[%s13287_s2 + $0x6d8] sm:$0xff]  ;;  %v868_v2 = vld [vmem:[%s13287_s2 + $0x6c0] sm:$0xff] }
  0x37   :  { %937 = vmatpush1.msra.mxu0 %v724_v4  ;;  %1008 = vmatpush1.msra.mxu1 %v726_v5  ;;  %v870_v4 = vld [vmem:[%s13287_s2 + $0x6d0] sm:$0xff]  ;;  %v861_v5 = vld [vmem:[%s13287_s2 + $0x688] sm:$0xff] }
  0x38   :  { %938 = vmatprep.subr.mxu0 %v717_v6  ;;  %1009 = vmatprep.subr.mxu1 %v719_v7  ;;  %v863_v6 = vld [vmem:[%s13287_s2 + $0x698] sm:$0xff]  ;;  %v860_v7 = vld [vmem:[%s13287_s2 + $0x680] sm:$0xff] }
  0x39   :  { %939 = vmatpush1.msra.mxu0 %v716_v8  ;;  %1010 = vmatpush1.msra.mxu1 %v718_v9  ;;  %v853_v8 = vld [vmem:[%s13287_s2 + $0x648] sm:$0xff]  ;;  %v855_v9 = vld [vmem:[%s13287_s2 + $0x658] sm:$0xff] }
  0x3a   :  { %940 = vmatprep.subr.mxu0 %v709_v10  ;;  %1011 = vmatprep.subr.mxu1 %v711_v11  ;;  %v852_v10 = vld [vmem:[%s13287_s2 + $0x640] sm:$0xff]  ;;  %v854_v11 = vld [vmem:[%s13287_s2 + $0x650] sm:$0xff] }
  0x3b   :  { %941 = vmatpush1.msra.mxu0 %v708_v12  ;;  %1012 = vmatpush1.msra.mxu1 %v710_v13  ;;  %v845_v12 = vld [vmem:[%s13287_s2 + $0x608] sm:$0xff]  ;;  %v847_v13 = vld [vmem:[%s13287_s2 + $0x618] sm:$0xff] }
  0x3c   :  { %942 = vmatprep.subr.mxu0 %v701_v14  ;;  %1013 = vmatprep.subr.mxu1 %v703_v15  ;;  %v844_v14 = vld [vmem:[%s13287_s2 + $0x600] sm:$0xff]  ;;  %v837_v15 = vld [vmem:[%s13287_s2 + $0x5c8] sm:$0xff] }
  0x3d   :  { %943 = vmatpush1.msra.mxu0 %v700_v16  ;;  %1014 = vmatpush1.msra.mxu1 %v702_v17  ;;  %v839_v16 = vld [vmem:[%s13287_s2 + $0x5d8] sm:$0xff]  ;;  %v5941_v17 = vld [vmem:[%s13287_s2 + $0x5c0] sm:$0xff] }
  0x3e   :  { %944 = vmatprep.subr.mxu0 %v693_v18  ;;  %1015 = vmatprep.subr.mxu1 %v695_v19  ;;  %v5946_v18 = vld [vmem:[%s13287_s2 + $0x5d0] sm:$0xff]  ;;  %v5955_v19 = vld [vmem:[%s13287_s2 + $0x588] sm:$0xff] }
  0x3f   :  { %945 = vmatpush1.msra.mxu0 %v692_v20  ;;  %1016 = vmatpush1.msra.mxu1 %v694_v21  ;;  %v5960_v20 = vld [vmem:[%s13287_s2 + $0x598] sm:$0xff]  ;;  %v5972_v21 = vld [vmem:[%s13287_s2 + $0x590] sm:$0xff] }
  0x40   :  { %946 = vmatprep.subr.mxu0 %v685_v23  ;;  %1017 = vmatprep.subr.mxu1 %v687_v24  ;;  %v5981_v23 = vld [vmem:[%s13287_s2 + $0x548] sm:$0xff]  ;;  %v5986_v24 = vld [vmem:[%s13287_s2 + $0x558] sm:$0xff] }
  0x41   :  { %947 = vmatpush1.msra.mxu0 %v684_v25  ;;  %1018 = vmatpush1.msra.mxu1 %v686_v26  ;;  %v5993_v25 = vld [vmem:[%s13287_s2 + $0x540] sm:$0xff]  ;;  %v5998_v26 = vld [vmem:[%s13287_s2 + $0x550] sm:$0xff] }
  0x42   :  { %948 = vmatprep.subr.mxu0 %v677_v28  ;;  %1019 = vmatprep.subr.mxu1 %v679_v29  ;;  %v6007_v28 = vld [vmem:[%s13287_s2 + $0x508] sm:$0xff]  ;;  %v6012_v29 = vld [vmem:[%s13287_s2 + $0x518] sm:$0xff] }
  0x43   :  { %949 = vmatpush1.msra.mxu0 %v676_v30  ;;  %1020 = vmatpush1.msra.mxu1 %v678_v31  ;;  %v6026_v30 = vld [vmem:[%s13287_s2 + $0x510] sm:$0xff]  ;;  %v6035_v31 = vld [vmem:[%s13287_s2 + $0x4c8] sm:$0xff] }
  0x44   :  { %950 = vmatprep.subr.mxu0 %v669_v33  ;;  %1021 = vmatprep.subr.mxu1 %v671_v34  ;;  %v6040_v33 = vld [vmem:[%s13287_s2 + $0x4d8] sm:$0xff]  ;;  %v6047_v34 = vld [vmem:[%s13287_s2 + $0x4c0] sm:$0xff] }
  0x45   :  { %951 = vmatpush1.msra.mxu0 %v668_v35  ;;  %1022 = vmatpush1.msra.mxu1 %v670_v36  ;;  %v6052_v35 = vld [vmem:[%s13287_s2 + $0x4d0] sm:$0xff]  ;;  %v6061_v36 = vld [vmem:[%s13287_s2 + $0x488] sm:$0xff] }
  0x46   :  { %952 = vmatprep.subr.mxu0 %v661_v38  ;;  %1023 = vmatprep.subr.mxu1 %v663_v39  ;;  %v6066_v38 = vld [vmem:[%s13287_s2 + $0x498] sm:$0xff]  ;;  %v6080_v39 = vld [vmem:[%s13287_s2 + $0x490] sm:$0xff] }
  0x47   :  { %953 = vmatpush1.msra.mxu0 %v660_v43  ;;  %1024 = vmatpush1.msra.mxu1 %v662_v44  ;;  %v6089_v43 = vld [vmem:[%s13287_s2 + $0x448] sm:$0xff]  ;;  %v6094_v44 = vld [vmem:[%s13287_s2 + $0x458] sm:$0xff] }
  0x48   :  { %954 = vmatprep.subr.mxu0 %v653_v45  ;;  %1025 = vmatprep.subr.mxu1 %v655_v46  ;;  %v6101_v45 = vld [vmem:[%s13287_s2 + $0x440] sm:$0xff]  ;;  %v6106_v46 = vld [vmem:[%s13287_s2 + $0x450] sm:$0xff] }
  0x49   :  { %955 = vmatpush1.msra.mxu0 %v652_v47  ;;  %1026 = vmatpush1.msra.mxu1 %v654_v48  ;;  %v6115_v47 = vld [vmem:[%s13287_s2 + $0x408] sm:$0xff]  ;;  %v6120_v48 = vld [vmem:[%s13287_s2 + $0x418] sm:$0xff] }
  0x4a   :  { %956 = vmatprep.subr.mxu0 %v901_v49  ;;  %1027 = vmatprep.subr.mxu1 %v903_v50  ;;  %v6127_v49 = vld [vmem:[%s13287_s2 + $0x400] sm:$0xff]  ;;  %v6143_v50 = vld [vmem:[%s13287_s2 + $0x3e8] sm:$0xff] }
  0x4b   :  { %957 = vmatpush2.msra.mxu0 %v900_v51  ;;  %1028 = vmatpush2.msra.mxu1 %v902_v52  ;;  %v6148_v51 = vld [vmem:[%s13287_s2 + $0x3f8] sm:$0xff]  ;;  %v776_v52 = vld [vmem:[%s13287_s2 + $0x3e0] sm:$0xff] }
  0x4c   :  { %958 = vmatprep.subr.mxu0 %v893_v53  ;;  %1029 = vmatprep.subr.mxu1 %v895_v54  ;;  %v778_v53 = vld [vmem:[%s13287_s2 + $0x3f0] sm:$0xff]  ;;  %v769_v54 = vld [vmem:[%s13287_s2 + $0x3a8] sm:$0xff] }
  0x4d   :  { %432 = vmatprep.mubr.f32.mxu0 %v13294_v3  ;;  %545 = vmatprep.mubr.f32.mxu1 %v13294_v3 }
  0x4e   :  { %959 = vmatpush2.msra.mxu0 %v892_v55  ;;  %1030 = vmatpush2.msra.mxu1 %v894_v56  ;;  %v771_v55 = vld [vmem:[%s13287_s2 + $0x3b8] sm:$0xff]  ;;  %v768_v56 = vld [vmem:[%s13287_s2 + $0x3a0] sm:$0xff] }
  0x4f   :  { %4004 = vmatmul.mubr.msk.f32.gmra.mxu0 %vm111_vm0, %v5509_v22  ;;  %4012 = vmatmul.mubr.msk.f32.gmra.mxu1 %vm111_vm0, %v5509_v22  ;;  %v878_v22 = vld [vmem:[%s13287_s2 + $0x710] sm:$0xff] }
  0x50   :  { %960 = vmatprep.subr.mxu0 %v885_v57  ;;  %1031 = vmatprep.subr.mxu1 %v887_v58  ;;  %v770_v57 = vld [vmem:[%s13287_s2 + $0x3b0] sm:$0xff]  ;;  %v761_v58 = vld [vmem:[%s13287_s2 + $0x368] sm:$0xff] }
  0x51   :  { %961 = vmatpush2.msra.mxu0 %v884_v59  ;;  %1032 = vmatpush2.msra.mxu1 %v886_v60  ;;  %v763_v59 = vld [vmem:[%s13287_s2 + $0x378] sm:$0xff]  ;;  %v760_v60 = vld [vmem:[%s13287_s2 + $0x360] sm:$0xff] }
  0x52   :  { %962 = vmatprep.subr.mxu0 %v877_v61  ;;  %1033 = vmatprep.subr.mxu1 %v879_v62  ;;  %v762_v61 = vld [vmem:[%s13287_s2 + $0x370] sm:$0xff]  ;;  %v753_v62 = vld [vmem:[%s13287_s2 + $0x328] sm:$0xff] }
  0x53   :  { %438 = vmatprep.mubr.f32.mxu0 %v13294_v3  ;;  %551 = vmatprep.mubr.f32.mxu1 %v13294_v3 }
  0x54   :  { %963 = vmatpush2.msra.mxu0 %v876_v63  ;;  %1034 = vmatpush2.msra.mxu1 %v878_v22  ;;  %v755_v63 = vld [vmem:[%s13287_s2 + $0x338] sm:$0xff]  ;;  %v752_v22 = vld [vmem:[%s13287_s2 + $0x320] sm:$0xff] }
  0x55   :  { %4005 = vmatmul.mubr.msk.f32.gmra.mxu0 %vm111_vm0, %v5533_v27  ;;  %4013 = vmatmul.mubr.msk.f32.gmra.mxu1 %vm111_vm0, %v5533_v27  ;;  %v862_v27 = vld [vmem:[%s13287_s2 + $0x690] sm:$0xff] }
  0x56   :  { %964 = vmatprep.subr.mxu0 %v869_v0  ;;  %1035 = vmatprep.subr.mxu1 %v871_v1  ;;  %v754_v0 = vld [vmem:[%s13287_s2 + $0x330] sm:$0xff]  ;;  %v745_v1 = vld [vmem:[%s13287_s2 + $0x2e8] sm:$0xff] }
  0x57   :  { %965 = vmatpush2.msra.mxu0 %v868_v2  ;;  %1036 = vmatpush2.msra.mxu1 %v870_v4  ;;  %v747_v2 = vld [vmem:[%s13287_s2 + $0x2f8] sm:$0xff]  ;;  %v744_v4 = vld [vmem:[%s13287_s2 + $0x2e0] sm:$0xff] }
  0x58   :  { %966 = vmatprep.subr.mxu0 %v861_v5  ;;  %1037 = vmatprep.subr.mxu1 %v863_v6  ;;  %v746_v5 = vld [vmem:[%s13287_s2 + $0x2f0] sm:$0xff]  ;;  %v737_v6 = vld [vmem:[%s13287_s2 + $0x2a8] sm:$0xff] }
  0x59   :  { %444 = vmatprep.mubr.f32.mxu0 %v13294_v3  ;;  %557 = vmatprep.mubr.f32.mxu1 %v13294_v3 }
  0x5a   :  { %967 = vmatpush2.msra.mxu0 %v860_v7  ;;  %1038 = vmatpush2.msra.mxu1 %v862_v27  ;;  %v739_v7 = vld [vmem:[%s13287_s2 + $0x2b8] sm:$0xff]  ;;  %v736_v27 = vld [vmem:[%s13287_s2 + $0x2a0] sm:$0xff] }
  0x5b   :  { %4006 = vmatmul.mubr.msk.f32.gmra.mxu0 %vm111_vm0, %v5556_v32  ;;  %4014 = vmatmul.mubr.msk.f32.gmra.mxu1 %vm111_vm0, %v5556_v32  ;;  %v846_v32 = vld [vmem:[%s13287_s2 + $0x610] sm:$0xff] }
  0x5c   :  { %968 = vmatprep.subr.mxu0 %v853_v8  ;;  %1039 = vmatprep.subr.mxu1 %v855_v9  ;;  %v738_v8 = vld [vmem:[%s13287_s2 + $0x2b0] sm:$0xff]  ;;  %v729_v9 = vld [vmem:[%s13287_s2 + $0x268] sm:$0xff] }
  0x5d   :  { %969 = vmatpush2.msra.mxu0 %v852_v10  ;;  %1040 = vmatpush2.msra.mxu1 %v854_v11  ;;  %v731_v10 = vld [vmem:[%s13287_s2 + $0x278] sm:$0xff]  ;;  %v728_v11 = vld [vmem:[%s13287_s2 + $0x260] sm:$0xff] }
  0x5e   :  { %970 = vmatprep.subr.mxu0 %v845_v12  ;;  %1041 = vmatprep.subr.mxu1 %v847_v13  ;;  %v730_v12 = vld [vmem:[%s13287_s2 + $0x270] sm:$0xff]  ;;  %v721_v13 = vld [vmem:[%s13287_s2 + $0x228] sm:$0xff] }
  0x5f   :  { %450 = vmatprep.mubr.f32.mxu0 %v13294_v3  ;;  %563 = vmatprep.mubr.f32.mxu1 %v13294_v3 }
  0x60   :  { %971 = vmatpush2.msra.mxu0 %v844_v14  ;;  %1042 = vmatpush2.msra.mxu1 %v846_v32  ;;  %v723_v14 = vld [vmem:[%s13287_s2 + $0x238] sm:$0xff]  ;;  %v720_v32 = vld [vmem:[%s13287_s2 + $0x220] sm:$0xff] }
  0x61   :  { %4007 = vmatmul.mubr.msk.f32.gmra.mxu0 %vm111_vm0, %v5579_v37  ;;  %4015 = vmatmul.mubr.msk.f32.gmra.mxu1 %vm111_vm0, %v5579_v37  ;;  %v5967_v37 = vld [vmem:[%s13287_s2 + $0x580] sm:$0xff] }
  0x62   :  { %972 = vmatprep.subr.mxu0 %v837_v15  ;;  %1043 = vmatprep.subr.mxu1 %v839_v16  ;;  %v722_v15 = vld [vmem:[%s13287_s2 + $0x230] sm:$0xff]  ;;  %v713_v16 = vld [vmem:[%s13287_s2 + $0x1e8] sm:$0xff] }
  0x63   :  { %973 = vmatpush2.msra.mxu0 %v5941_v17  ;;  %1044 = vmatpush2.msra.mxu1 %v5946_v18 }
  0x64   :  { %974 = vmatprep.subr.mxu0 %v5955_v19  ;;  %1045 = vmatprep.subr.mxu1 %v5960_v20 }
  0x65   :  { %456 = vmatprep.mubr.f32.mxu0 %v13294_v3  ;;  %569 = vmatprep.mubr.f32.mxu1 %v13294_v3 }
  0x66   :  { %975 = vmatpush2.msra.mxu0 %v5967_v37  ;;  %1046 = vmatpush2.msra.mxu1 %v5972_v21 }
  0x67   :  { %4008 = vmatmul.mubr.msk.f32.gmra.mxu0 %vm111_vm0, %v5596_v40  ;;  %4016 = vmatmul.mubr.msk.f32.gmra.mxu1 %vm111_vm0, %v5596_v40  ;;  %v6021_v40 = vld [vmem:[%s13287_s2 + $0x500] sm:$0xff] }
  0x68   :  { %976 = vmatprep.subr.mxu0 %v5981_v23  ;;  %1047 = vmatprep.subr.mxu1 %v5986_v24 }
  0x69   :  { %977 = vmatpush2.msra.mxu0 %v5993_v25  ;;  %1048 = vmatpush2.msra.mxu1 %v5998_v26 }
  0x6a   :  { %978 = vmatprep.subr.mxu0 %v6007_v28  ;;  %1049 = vmatprep.subr.mxu1 %v6012_v29 }
  0x6b   :  { %462 = vmatprep.mubr.f32.mxu0 %v13294_v3  ;;  %575 = vmatprep.mubr.f32.mxu1 %v13294_v3 }
  0x6c   :  { %979 = vmatpush2.msra.mxu0 %v6021_v40  ;;  %1050 = vmatpush2.msra.mxu1 %v6026_v30 }
  0x6d   :  { %4009 = vmatmul.mubr.msk.f32.gmra.mxu0 %vm111_vm0, %v5607_v41  ;;  %4017 = vmatmul.mubr.msk.f32.gmra.mxu1 %vm111_vm0, %v5607_v41  ;;  %v6075_v41 = vld [vmem:[%s13287_s2 + $0x480] sm:$0xff] }
  0x6e   :  { %980 = vmatprep.subr.mxu0 %v6035_v31  ;;  %1051 = vmatprep.subr.mxu1 %v6040_v33 }
  0x6f   :  { %981 = vmatpush2.msra.mxu0 %v6047_v34  ;;  %1052 = vmatpush2.msra.mxu1 %v6052_v35 }
  0x70   :  { %982 = vmatprep.subr.mxu0 %v6061_v36  ;;  %1053 = vmatprep.subr.mxu1 %v6066_v38 }
  0x71   :  { %468 = vmatprep.mubr.f32.mxu0 %v13294_v3  ;;  %581 = vmatprep.mubr.f32.mxu1 %v13294_v3 }
  0x72   :  { %983 = vmatpush2.msra.mxu0 %v6075_v41  ;;  %1054 = vmatpush2.msra.mxu1 %v6080_v39 }
  0x73   :  { %4010 = vmatmul.mubr.msk.f32.gmra.mxu0 %vm111_vm0, %v5618_v42  ;;  %4018 = vmatmul.mubr.msk.f32.gmra.mxu1 %vm111_vm0, %v5618_v42  ;;  %v6134_v42 = vld [vmem:[%s13287_s2 + $0x410] sm:$0xff] }
  0x74   :  { %984 = vmatprep.subr.mxu0 %v6089_v43  ;;  %1055 = vmatprep.subr.mxu1 %v6094_v44 }
  0x75   :  { %985 = vmatpush2.msra.mxu0 %v6101_v45  ;;  %1056 = vmatpush2.msra.mxu1 %v6106_v46 }
  0x76   :  { %986 = vmatprep.subr.mxu0 %v6115_v47  ;;  %1057 = vmatprep.subr.mxu1 %v6120_v48 }
  0x77   :  { %987 = vmatpush2.msra.mxu0 %v6127_v49  ;;  %988 = vmatprep.mubr.f32.mxu0 %v13294_v3 }
  0x78   :  { %1058 = vmatpush2.msra.mxu1 %v6134_v42  ;;  %1059 = vmatprep.mubr.f32.mxu1 %v13294_v3 }
  0x79   :  { %989 = vmatmul.mubr.f32.vlgmr.msra.gmra.mxu0 %v13294_v3  ;;  %1060 = vmatmul.mubr.f32.vlgmr.msra.gmra.mxu1 %v13294_v3  ;;  %v6562_v3 = vld [vmem:[%s13287_s2 + $0x570] sm:$0xff] }
  0x7a   :  { %1066 = vmatprep.subr.mxu0 %v6143_v50  ;;  %1137 = vmatprep.subr.mxu1 %v6148_v51  ;;  %13899 = vst [vmem:[#allocation19_spill] sm:$0xff] %v6562_v3 }
  0x7b   :  { %1067 = vmatpush1.msra.mxu0 %v776_v52  ;;  %1138 = vmatpush1.msra.mxu1 %v778_v53  ;;  %v715_v52 = vld [vmem:[%s13287_s2 + $0x1f8] sm:$0xff]  ;;  %v712_v53 = vld [vmem:[%s13287_s2 + $0x1e0] sm:$0xff] }
  0x7c   :  { %1068 = vmatprep.subr.mxu0 %v769_v54  ;;  %1139 = vmatprep.subr.mxu1 %v771_v55  ;;  %v714_v54 = vld [vmem:[%s13287_s2 + $0x1f0] sm:$0xff]  ;;  %v705_v55 = vld [vmem:[%s13287_s2 + $0x1a8] sm:$0xff] }
  0x7d   :  { %1069 = vmatpush1.msra.mxu0 %v768_v56  ;;  %1140 = vmatpush1.msra.mxu1 %v770_v57  ;;  %v707_v56 = vld [vmem:[%s13287_s2 + $0x1b8] sm:$0xff]  ;;  %v704_v57 = vld [vmem:[%s13287_s2 + $0x1a0] sm:$0xff] }
  0x7e   :  { %1070 = vmatprep.subr.mxu0 %v761_v58  ;;  %1141 = vmatprep.subr.mxu1 %v763_v59  ;;  %v706_v58 = vld [vmem:[%s13287_s2 + $0x1b0] sm:$0xff]  ;;  %v697_v59 = vld [vmem:[%s13287_s2 + $0x168] sm:$0xff] }
  0x7f   :  { %1071 = vmatpush1.msra.mxu0 %v760_v60  ;;  %1142 = vmatpush1.msra.mxu1 %v762_v61  ;;  %v699_v60 = vld [vmem:[%s13287_s2 + $0x178] sm:$0xff]  ;;  %v696_v61 = vld [vmem:[%s13287_s2 + $0x160] sm:$0xff] }
  0x80   :  { %1072 = vmatprep.subr.mxu0 %v753_v62  ;;  %1143 = vmatprep.subr.mxu1 %v755_v63  ;;  %v698_v62 = vld [vmem:[%s13287_s2 + $0x170] sm:$0xff]  ;;  %v689_v63 = vld [vmem:[%s13287_s2 + $0x128] sm:$0xff] }
  0x81   :  { %1073 = vmatpush1.msra.mxu0 %v752_v22  ;;  %1144 = vmatpush1.msra.mxu1 %v754_v0  ;;  %v691_v22 = vld [vmem:[%s13287_s2 + $0x138] sm:$0xff]  ;;  %v688_v0 = vld [vmem:[%s13287_s2 + $0x120] sm:$0xff] }
  0x82   :  { %1074 = vmatprep.subr.mxu0 %v745_v1  ;;  %1145 = vmatprep.subr.mxu1 %v747_v2  ;;  %v690_v1 = vld [vmem:[%s13287_s2 + $0x130] sm:$0xff]  ;;  %v681_v2 = vld [vmem:[%s13287_s2 + $0xe8] sm:$0xff] }
  0x83   :  { %1075 = vmatpush1.msra.mxu0 %v744_v4  ;;  %1146 = vmatpush1.msra.mxu1 %v746_v5  ;;  %v683_v4 = vld [vmem:[%s13287_s2 + $0xf8] sm:$0xff]  ;;  %v680_v5 = vld [vmem:[%s13287_s2 + $0xe0] sm:$0xff] }
  0x84   :  { %1076 = vmatprep.subr.mxu0 %v737_v6  ;;  %1147 = vmatprep.subr.mxu1 %v739_v7  ;;  %v682_v6 = vld [vmem:[%s13287_s2 + $0xf0] sm:$0xff]  ;;  %v673_v7 = vld [vmem:[%s13287_s2 + $0xa8] sm:$0xff] }
  0x85   :  { %1077 = vmatpush1.msra.mxu0 %v736_v27  ;;  %1148 = vmatpush1.msra.mxu1 %v738_v8  ;;  %v675_v27 = vld [vmem:[%s13287_s2 + $0xb8] sm:$0xff]  ;;  %v672_v8 = vld [vmem:[%s13287_s2 + $0xa0] sm:$0xff] }
  0x86   :  { %1078 = vmatprep.subr.mxu0 %v729_v9  ;;  %1149 = vmatprep.subr.mxu1 %v731_v10  ;;  %v674_v9 = vld [vmem:[%s13287_s2 + $0xb0] sm:$0xff]  ;;  %v665_v10 = vld [vmem:[%s13287_s2 + $0x68] sm:$0xff] }
  0x87   :  { %1079 = vmatpush1.msra.mxu0 %v728_v11  ;;  %1150 = vmatpush1.msra.mxu1 %v730_v12  ;;  %v667_v11 = vld [vmem:[%s13287_s2 + $0x78] sm:$0xff]  ;;  %v664_v12 = vld [vmem:[%s13287_s2 + $0x60] sm:$0xff] }
  0x88   :  { %1080 = vmatprep.subr.mxu0 %v721_v13  ;;  %1151 = vmatprep.subr.mxu1 %v723_v14  ;;  %v666_v13 = vld [vmem:[%s13287_s2 + $0x70] sm:$0xff]  ;;  %v657_v14 = vld [vmem:[%s13287_s2 + $0x28] sm:$0xff] }
  0x89   :  { %1081 = vmatpush1.msra.mxu0 %v720_v32  ;;  %1152 = vmatpush1.msra.mxu1 %v722_v15  ;;  %v659_v32 = vld [vmem:[%s13287_s2 + $0x38] sm:$0xff]  ;;  %v656_v15 = vld [vmem:[%s13287_s2 + $0x20] sm:$0xff] }
  0x8a   :  { %1082 = vmatprep.subr.mxu0 %v713_v16  ;;  %1153 = vmatprep.subr.mxu1 %v715_v52  ;;  %v658_v16 = vld [vmem:[%s13287_s2 + $0x30] sm:$0xff]  ;;  %v905_v52 = vld [vmem:[%s13287_s2 + $0x7e8] sm:$0xff] }
  0x8b   :  { %1083 = vmatpush1.msra.mxu0 %v712_v53  ;;  %1154 = vmatpush1.msra.mxu1 %v714_v54  ;;  %v907_v53 = vld [vmem:[%s13287_s2 + $0x7f8] sm:$0xff]  ;;  %v904_v54 = vld [vmem:[%s13287_s2 + $0x7e0] sm:$0xff] }
  0x8c   :  { %1084 = vmatprep.subr.mxu0 %v705_v55  ;;  %1155 = vmatprep.subr.mxu1 %v707_v56  ;;  %v906_v55 = vld [vmem:[%s13287_s2 + $0x7f0] sm:$0xff]  ;;  %v897_v56 = vld [vmem:[%s13287_s2 + $0x7a8] sm:$0xff] }
  0x8d   :  { %1085 = vmatpush1.msra.mxu0 %v704_v57  ;;  %1156 = vmatpush1.msra.mxu1 %v706_v58  ;;  %v899_v57 = vld [vmem:[%s13287_s2 + $0x7b8] sm:$0xff]  ;;  %v896_v58 = vld [vmem:[%s13287_s2 + $0x7a0] sm:$0xff] }
  0x8e   :  { %1086 = vmatprep.subr.mxu0 %v697_v59  ;;  %1157 = vmatprep.subr.mxu1 %v699_v60  ;;  %v898_v59 = vld [vmem:[%s13287_s2 + $0x7b0] sm:$0xff]  ;;  %v889_v60 = vld [vmem:[%s13287_s2 + $0x768] sm:$0xff] }
  0x8f   :  { %1087 = vmatpush1.msra.mxu0 %v696_v61  ;;  %1158 = vmatpush1.msra.mxu1 %v698_v62  ;;  %v891_v61 = vld [vmem:[%s13287_s2 + $0x778] sm:$0xff]  ;;  %v888_v62 = vld [vmem:[%s13287_s2 + $0x760] sm:$0xff] }
  0x90   :  { %1088 = vmatprep.subr.mxu0 %v689_v63  ;;  %1159 = vmatprep.subr.mxu1 %v691_v22  ;;  %v890_v63 = vld [vmem:[%s13287_s2 + $0x770] sm:$0xff]  ;;  %v6381_v22 = vld [vmem:[%s13287_s2 + $0x728] sm:$0xff] }
  0x91   :  { %1089 = vmatpush1.msra.mxu0 %v688_v0  ;;  %1160 = vmatpush1.msra.mxu1 %v690_v1  ;;  %v6386_v0 = vld [vmem:[%s13287_s2 + $0x738] sm:$0xff]  ;;  %v6391_v1 = vld [vmem:[%s13287_s2 + $0x720] sm:$0xff] }
  0x92   :  { %1090 = vmatprep.subr.mxu0 %v681_v2  ;;  %1161 = vmatprep.subr.mxu1 %v683_v4  ;;  %v6396_v2 = vld [vmem:[%s13287_s2 + $0x730] sm:$0xff]  ;;  %v6401_v4 = vld [vmem:[%s13287_s2 + $0x6e8] sm:$0xff] }
  0x93   :  { %1091 = vmatpush1.msra.mxu0 %v680_v5  ;;  %1162 = vmatpush1.msra.mxu1 %v682_v6  ;;  %v6406_v5 = vld [vmem:[%s13287_s2 + $0x6f8] sm:$0xff]  ;;  %v6413_v6 = vld [vmem:[%s13287_s2 + $0x6e0] sm:$0xff] }
  0x94   :  { %1092 = vmatprep.subr.mxu0 %v673_v7  ;;  %1163 = vmatprep.subr.mxu1 %v675_v27  ;;  %v6418_v7 = vld [vmem:[%s13287_s2 + $0x6f0] sm:$0xff]  ;;  %v6425_v27 = vld [vmem:[%s13287_s2 + $0x6a8] sm:$0xff] }
  0x95   :  { %1093 = vmatpush1.msra.mxu0 %v672_v8  ;;  %1164 = vmatpush1.msra.mxu1 %v674_v9  ;;  %v6430_v8 = vld [vmem:[%s13287_s2 + $0x6b8] sm:$0xff]  ;;  %v6437_v9 = vld [vmem:[%s13287_s2 + $0x6a0] sm:$0xff] }
  0x96   :  { %1094 = vmatprep.subr.mxu0 %v665_v10  ;;  %1165 = vmatprep.subr.mxu1 %v667_v11  ;;  %v6442_v10 = vld [vmem:[%s13287_s2 + $0x6b0] sm:$0xff]  ;;  %v6449_v11 = vld [vmem:[%s13287_s2 + $0x668] sm:$0xff] }
  0x97   :  { %1095 = vmatpush1.msra.mxu0 %v664_v12  ;;  %1166 = vmatpush1.msra.mxu1 %v666_v13  ;;  %v6454_v12 = vld [vmem:[%s13287_s2 + $0x678] sm:$0xff]  ;;  %v6461_v13 = vld [vmem:[%s13287_s2 + $0x660] sm:$0xff] }
  0x98   :  { %1096 = vmatprep.subr.mxu0 %v657_v14  ;;  %1167 = vmatprep.subr.mxu1 %v659_v32  ;;  %v6466_v14 = vld [vmem:[%s13287_s2 + $0x670] sm:$0xff]  ;;  %v6473_v32 = vld [vmem:[%s13287_s2 + $0x628] sm:$0xff] }
  0x99   :  { %1097 = vmatpush1.msra.mxu0 %v656_v15  ;;  %1168 = vmatpush1.msra.mxu1 %v658_v16  ;;  %13883 = vst [vmem:[#allocation3_spill] sm:$0xff] %v6466_v14  ;;  %13884 = vst [vmem:[#allocation4_spill] sm:$0xff] %v6473_v32  ;;  %v6478_v15 = vld [vmem:[%s13287_s2 + $0x638] sm:$0xff]  ;;  %v6485_v16 = vld [vmem:[%s13287_s2 + $0x620] sm:$0xff] }
  0x9a   :  { %1098 = vmatprep.subr.mxu0 %v905_v52  ;;  %1169 = vmatprep.subr.mxu1 %v907_v53  ;;  %13885 = vst [vmem:[#allocation5_spill] sm:$0xff] %v6478_v15  ;;  %13886 = vst [vmem:[#allocation6_spill] sm:$0xff] %v6485_v16  ;;  %v6490_v52 = vld [vmem:[%s13287_s2 + $0x630] sm:$0xff]  ;;  %v6497_v53 = vld [vmem:[%s13287_s2 + $0x5e8] sm:$0xff] }
  0x9b   :  { %1099 = vmatpush2.msra.mxu0 %v904_v54  ;;  %1170 = vmatpush2.msra.mxu1 %v906_v55  ;;  %13887 = vst [vmem:[#allocation7_spill] sm:$0xff] %v6490_v52  ;;  %13888 = vst [vmem:[#allocation8_spill] sm:$0xff] %v6497_v53  ;;  %v6502_v54 = vld [vmem:[%s13287_s2 + $0x5f8] sm:$0xff]  ;;  %v6509_v55 = vld [vmem:[%s13287_s2 + $0x5e0] sm:$0xff] }
  0x9c   :  { %1100 = vmatprep.subr.mxu0 %v897_v56  ;;  %1171 = vmatprep.subr.mxu1 %v899_v57  ;;  %13889 = vst [vmem:[#allocation9_spill] sm:$0xff] %v6502_v54  ;;  %13890 = vst [vmem:[#allocation10_spill] sm:$0xff] %v6509_v55  ;;  %v6514_v56 = vld [vmem:[%s13287_s2 + $0x5f0] sm:$0xff]  ;;  %v6521_v57 = vld [vmem:[%s13287_s2 + $0x5a8] sm:$0xff] }
  0x9d   :  { %1101 = vmatpush2.msra.mxu0 %v896_v58  ;;  %1172 = vmatpush2.msra.mxu1 %v898_v59  ;;  %13891 = vst [vmem:[#allocation11_spill] sm:$0xff] %v6514_v56  ;;  %13892 = vst [vmem:[#allocation12_spill] sm:$0xff] %v6521_v57  ;;  %v6526_v58 = vld [vmem:[%s13287_s2 + $0x5b8] sm:$0xff]  ;;  %v6533_v59 = vld [vmem:[%s13287_s2 + $0x5a0] sm:$0xff] }
  0x9e   :  { %1102 = vmatprep.subr.mxu0 %v889_v60  ;;  %1173 = vmatprep.subr.mxu1 %v891_v61  ;;  %13893 = vst [vmem:[#allocation13_spill] sm:$0xff] %v6526_v58  ;;  %13894 = vst [vmem:[#allocation14_spill] sm:$0xff] %v6533_v59  ;;  %v6538_v60 = vld [vmem:[%s13287_s2 + $0x5b0] sm:$0xff]  ;;  %v6545_v61 = vld [vmem:[%s13287_s2 + $0x568] sm:$0xff] }
  0x9f   :  { %1103 = vmatpush2.msra.mxu0 %v888_v62  ;;  %1174 = vmatpush2.msra.mxu1 %v890_v63  ;;  %13895 = vst [vmem:[#allocation15_spill] sm:$0xff] %v6538_v60  ;;  %13896 = vst [vmem:[#allocation16_spill] sm:$0xff] %v6545_v61  ;;  %v6550_v62 = vld [vmem:[%s13287_s2 + $0x578] sm:$0xff]  ;;  %v6557_v63 = vld [vmem:[%s13287_s2 + $0x560] sm:$0xff] }
  0xa0   :  { %1104 = vmatprep.subr.mxu0 %v6381_v22  ;;  %1175 = vmatprep.subr.mxu1 %v6386_v0  ;;  %13897 = vst [vmem:[#allocation17_spill] sm:$0xff] %v6550_v62  ;;  %13898 = vst [vmem:[#allocation18_spill] sm:$0xff] %v6557_v63 }
  0xa1   :  { %1105 = vmatpush2.msra.mxu0 %v6391_v1  ;;  %1176 = vmatpush2.msra.mxu1 %v6396_v2 }
  0xa2   :  { %1106 = vmatprep.subr.mxu0 %v6401_v4  ;;  %1177 = vmatprep.subr.mxu1 %v6406_v5 }
  0xa3   :  { %1107 = vmatpush2.msra.mxu0 %v6413_v6  ;;  %1178 = vmatpush2.msra.mxu1 %v6418_v7 }
  0xa4   :  { %1108 = vmatprep.subr.mxu0 %v6425_v27  ;;  %1179 = vmatprep.subr.mxu1 %v6430_v8 }
  0xa5   :  { %1109 = vmatpush2.msra.mxu0 %v6437_v9  ;;  %1180 = vmatpush2.msra.mxu1 %v6442_v10 }
  0xa6   :  { %1110 = vmatprep.subr.mxu0 %v6449_v11  ;;  %1181 = vmatprep.subr.mxu1 %v6454_v12 }
  0xa7   :  { %1111 = vmatpush2.msra.mxu0 %v6461_v13  ;;  %1182 = vmatpush2.msra.mxu1 %v6466_v14 }
  0xa8   :  { %1112 = vmatprep.subr.mxu0 %v6473_v32  ;;  %1183 = vmatprep.subr.mxu1 %v6478_v15  ;;  %v6926_v15 = vld [vmem:[%s13287_s2 + $0x1c0] sm:$0xff]  ;;  %v6941_v32 = vld [vmem:[%s13287_s2 + $0x188] sm:$0xff] }
  0xa9   :  { %1113 = vmatpush2.msra.mxu0 %v6485_v16  ;;  %1184 = vmatpush2.msra.mxu1 %v6490_v52  ;;  %13955 = vst [vmem:[#allocation74_spill] sm:$0xff] %v6926_v15  ;;  %13957 = vst [vmem:[#allocation76_spill] sm:$0xff] %v6941_v32 }
  0xaa   :  { %1114 = vmatprep.subr.mxu0 %v6497_v53  ;;  %1185 = vmatprep.subr.mxu1 %v6502_v54  ;;  %v6892_v54 = vld [vmem:[%s13287_s2 + $0x200] sm:$0xff] }
  0xab   :  { %1115 = vmatpush2.msra.mxu0 %v6509_v55  ;;  %1186 = vmatpush2.msra.mxu1 %v6514_v56  ;;  %13951 = vst [vmem:[#allocation70_spill] sm:$0xff] %v6892_v54 }
  0xac   :  { %1116 = vmatprep.subr.mxu0 %v6521_v57  ;;  %1187 = vmatprep.subr.mxu1 %v6526_v58  ;;  %v6569_v57 = vld [vmem:[%s13287_s2 + $0x528] sm:$0xff]  ;;  %v6574_v58 = vld [vmem:[%s13287_s2 + $0x538] sm:$0xff] }
  0xad   :  { %1117 = vmatpush2.msra.mxu0 %v6533_v59  ;;  %1188 = vmatpush2.msra.mxu1 %v6538_v60  ;;  %13900 = vst [vmem:[#allocation20_spill] sm:$0xff] %v6569_v57  ;;  %13901 = vst [vmem:[#allocation21_spill] sm:$0xff] %v6574_v58  ;;  %v6581_v59 = vld [vmem:[%s13287_s2 + $0x520] sm:$0xff]  ;;  %v6586_v60 = vld [vmem:[%s13287_s2 + $0x530] sm:$0xff] }
  0xae   :  { %1118 = vmatprep.subr.mxu0 %v6545_v61  ;;  %1189 = vmatprep.subr.mxu1 %v6550_v62  ;;  %13902 = vst [vmem:[#allocation22_spill] sm:$0xff] %v6581_v59  ;;  %13903 = vst [vmem:[#allocation23_spill] sm:$0xff] %v6586_v60  ;;  %v6593_v61 = vld [vmem:[%s13287_s2 + $0x4e8] sm:$0xff]  ;;  %v6598_v62 = vld [vmem:[%s13287_s2 + $0x4f8] sm:$0xff] }
  0xaf   :  { %1119 = vmatpush2.msra.mxu0 %v6557_v63  ;;  %1190 = vmatpush2.msra.mxu1 %v6562_v3  ;;  %13904 = vst [vmem:[#allocation24_spill] sm:$0xff] %v6593_v61  ;;  %13905 = vst [vmem:[#allocation25_spill] sm:$0xff] %v6598_v62  ;;  %v6605_v63 = vld [vmem:[%s13287_s2 + $0x4e0] sm:$0xff]  ;;  %v6610_v3 = vld [vmem:[%s13287_s2 + $0x4f0] sm:$0xff] }
  0xb0   :  { %1120 = vmatprep.subr.mxu0 %v6569_v57  ;;  %1191 = vmatprep.subr.mxu1 %v6574_v58  ;;  %13906 = vst [vmem:[#allocation26_spill] sm:$0xff] %v6605_v63  ;;  %13907 = vst [vmem:[#allocation27_spill] sm:$0xff] %v6610_v3  ;;  %v6617_v57 = vld [vmem:[%s13287_s2 + $0x4a8] sm:$0xff]  ;;  %v6622_v58 = vld [vmem:[%s13287_s2 + $0x4b8] sm:$0xff] }
  0xb1   :  { %1121 = vmatpush2.msra.mxu0 %v6581_v59  ;;  %1192 = vmatpush2.msra.mxu1 %v6586_v60  ;;  %13908 = vst [vmem:[#allocation28_spill] sm:$0xff] %v6617_v57  ;;  %13909 = vst [vmem:[#allocation29_spill] sm:$0xff] %v6622_v58  ;;  %v6629_v59 = vld [vmem:[%s13287_s2 + $0x4a0] sm:$0xff]  ;;  %v6634_v60 = vld [vmem:[%s13287_s2 + $0x4b0] sm:$0xff] }
  0xb2   :  { %1122 = vmatprep.subr.mxu0 %v6593_v61  ;;  %1193 = vmatprep.subr.mxu1 %v6598_v62  ;;  %13910 = vst [vmem:[#allocation30_spill] sm:$0xff] %v6629_v59  ;;  %13911 = vst [vmem:[#allocation31_spill] sm:$0xff] %v6634_v60  ;;  %v6641_v61 = vld [vmem:[%s13287_s2 + $0x468] sm:$0xff]  ;;  %v6646_v62 = vld [vmem:[%s13287_s2 + $0x478] sm:$0xff] }
  0xb3   :  { %1123 = vmatpush2.msra.mxu0 %v6605_v63  ;;  %1194 = vmatpush2.msra.mxu1 %v6610_v3  ;;  %13912 = vst [vmem:[#allocation32_spill] sm:$0xff] %v6641_v61  ;;  %13913 = vst [vmem:[#allocation33_spill] sm:$0xff] %v6646_v62  ;;  %v6653_v63 = vld [vmem:[%s13287_s2 + $0x460] sm:$0xff]  ;;  %v6658_v3 = vld [vmem:[%s13287_s2 + $0x470] sm:$0xff] }
  0xb4   :  { %1124 = vmatprep.subr.mxu0 %v6617_v57  ;;  %1195 = vmatprep.subr.mxu1 %v6622_v58  ;;  %13914 = vst [vmem:[#allocation34_spill] sm:$0xff] %v6653_v63  ;;  %13915 = vst [vmem:[#allocation35_spill] sm:$0xff] %v6658_v3  ;;  %v6665_v57 = vld [vmem:[%s13287_s2 + $0x428] sm:$0xff]  ;;  %v6670_v58 = vld [vmem:[%s13287_s2 + $0x438] sm:$0xff] }
  0xb5   :  { %1125 = vmatpush2.msra.mxu0 %v6629_v59  ;;  %1196 = vmatpush2.msra.mxu1 %v6634_v60  ;;  %13916 = vst [vmem:[#allocation36_spill] sm:$0xff] %v6665_v57  ;;  %13917 = vst [vmem:[#allocation37_spill] sm:$0xff] %v6670_v58  ;;  %v6677_v59 = vld [vmem:[%s13287_s2 + $0x420] sm:$0xff]  ;;  %v6684_v60 = vld [vmem:[%s13287_s2 + $0x430] sm:$0xff] }
  0xb6   :  { %1126 = vmatprep.subr.mxu0 %v6641_v61  ;;  %1197 = vmatprep.subr.mxu1 %v6646_v62  ;;  %13918 = vst [vmem:[#allocation38_spill] sm:$0xff] %v6677_v59  ;;  %13919 = vst [vmem:[#allocation39_spill] sm:$0xff] %v6684_v60  ;;  %v13920_v62 = vmov 0.0  }
  0xb7   :  { %1127 = vmatpush2.msra.mxu0 %v6653_v63  ;;  %1198 = vmatpush2.msra.mxu1 %v6658_v3  ;;  %v6697_v3 = vld [vmem:[%s13287_s2 + $0x3c8] sm:$0xff] }
  0xb8   :  { %1128 = vmatprep.subr.mxu0 %v6665_v57  ;;  %1199 = vmatprep.subr.mxu1 %v6670_v58  ;;  %13921 = vst [vmem:[#allocation40_spill] sm:$0xff] %v6697_v3  ;;  %v6757_v58 = vld [vmem:[%s13287_s2 + $0x340] sm:$0xff] }
  0xb9   :  { %1129 = vmatpush2.msra.mxu0 %v6677_v59  ;;  %1130 = vmatprep.mubr.f32.mxu0 %v13920_v62  ;;  %v6703_v59 = vld [vmem:[%s13287_s2 + $0x3d8] sm:$0xff]  ;;  %13931 = vst [vmem:[#allocation50_spill] sm:$0xff] %v6757_v58 }
  0xba   :  { %1200 = vmatpush2.msra.mxu1 %v6684_v60  ;;  %1201 = vmatprep.mubr.f32.mxu1 %v13920_v62  ;;  %13922 = vst [vmem:[#allocation41_spill] sm:$0xff] %v6703_v59  ;;  %v6709_v60 = vld [vmem:[%s13287_s2 + $0x3c0] sm:$0xff] }
  0xbb   :  { %1131 = vmatmul.mubr.f32.vlgmr.msra.gmra.mxu0 %v13920_v62  ;;  %1202 = vmatmul.mubr.f32.vlgmr.msra.gmra.mxu1 %v13920_v62  ;;  %13923 = vst [vmem:[#allocation42_spill] sm:$0xff] %v6709_v60  ;;  %v6715_v62 = vld [vmem:[%s13287_s2 + $0x3d0] sm:$0xff] }
  0xbc   :  { %1274 = vmatprep.subr.mxu0 %v6697_v3  ;;  %1345 = vmatprep.subr.mxu1 %v6703_v59  ;;  %13924 = vst [vmem:[#allocation43_spill] sm:$0xff] %v6715_v62  ;;  %v6721_v3 = vld [vmem:[%s13287_s2 + $0x388] sm:$0xff]  ;;  %v6727_v59 = vld [vmem:[%s13287_s2 + $0x398] sm:$0xff] }
  0xbd   :  { %1275 = vmatpush1.msra.mxu0 %v6709_v60  ;;  %1346 = vmatpush1.msra.mxu1 %v6715_v62  ;;  %13925 = vst [vmem:[#allocation44_spill] sm:$0xff] %v6721_v3  ;;  %13926 = vst [vmem:[#allocation45_spill] sm:$0xff] %v6727_v59  ;;  %v6733_v60 = vld [vmem:[%s13287_s2 + $0x380] sm:$0xff]  ;;  %v6739_v62 = vld [vmem:[%s13287_s2 + $0x390] sm:$0xff] }
  0xbe   :  { %1276 = vmatprep.subr.mxu0 %v6721_v3  ;;  %1347 = vmatprep.subr.mxu1 %v6727_v59  ;;  %13927 = vst [vmem:[#allocation46_spill] sm:$0xff] %v6733_v60  ;;  %13928 = vst [vmem:[#allocation47_spill] sm:$0xff] %v6739_v62  ;;  %v6745_v3 = vld [vmem:[%s13287_s2 + $0x348] sm:$0xff]  ;;  %v6751_v59 = vld [vmem:[%s13287_s2 + $0x358] sm:$0xff] }
  0xbf   :  { %1277 = vmatpush1.msra.mxu0 %v6733_v60  ;;  %1348 = vmatpush1.msra.mxu1 %v6739_v62  ;;  %13929 = vst [vmem:[#allocation48_spill] sm:$0xff] %v6745_v3  ;;  %13930 = vst [vmem:[#allocation49_spill] sm:$0xff] %v6751_v59  ;;  %v71_v60 = vlaneseq  ;;  %v6763_v62 = vld [vmem:[%s13287_s2 + $0x350] sm:$0xff] }
  0xc0   :  { %1278 = vmatprep.subr.mxu0 %v6745_v3  ;;  %1349 = vmatprep.subr.mxu1 %v6751_v59  ;;  %13932 = vst [vmem:[#allocation51_spill] sm:$0xff] %v6763_v62  ;;  %v6769_v3 = vld [vmem:[%s13287_s2 + $0x308] sm:$0xff]  ;;  %v6775_v59 = vld [vmem:[%s13287_s2 + $0x318] sm:$0xff] }
  0xc1   :  { %1279 = vmatpush1.msra.mxu0 %v6757_v58  ;;  %1350 = vmatpush1.msra.mxu1 %v6763_v62  ;;  %13933 = vst [vmem:[#allocation52_spill] sm:$0xff] %v6769_v3  ;;  %13934 = vst [vmem:[#allocation53_spill] sm:$0xff] %v6775_v59  ;;  %v6781_v58 = vld [vmem:[%s13287_s2 + $0x300] sm:$0xff]  ;;  %v6787_v62 = vld [vmem:[%s13287_s2 + $0x310] sm:$0xff] }
  0xc2   :  { %1280 = vmatprep.subr.mxu0 %v6769_v3  ;;  %1351 = vmatprep.subr.mxu1 %v6775_v59  ;;  %13935 = vst [vmem:[#allocation54_spill] sm:$0xff] %v6781_v58  ;;  %13936 = vst [vmem:[#allocation55_spill] sm:$0xff] %v6787_v62  ;;  %v6793_v3 = vld [vmem:[%s13287_s2 + $0x2c8] sm:$0xff]  ;;  %v6799_v59 = vld [vmem:[%s13287_s2 + $0x2d8] sm:$0xff] }
  0xc3   :  { %1281 = vmatpush1.msra.mxu0 %v6781_v58  ;;  %1352 = vmatpush1.msra.mxu1 %v6787_v62  ;;  %13937 = vst [vmem:[#allocation56_spill] sm:$0xff] %v6793_v3  ;;  %13938 = vst [vmem:[#allocation57_spill] sm:$0xff] %v6799_v59  ;;  %v6802_v58 = vshrl.u32 %v71_v60, 7  ;;  %v6807_v62 = vld [vmem:[%s13287_s2 + $0x2c0] sm:$0xff]  ;;  %v6825_v60 = vld [vmem:[%s13287_s2 + $0x298] sm:$0xff] }
  0xc4   :  { %1282 = vmatprep.subr.mxu0 %v6793_v3  ;;  %1353 = vmatprep.subr.mxu1 %v6799_v59  ;;  %13939 = vst [vmem:[#allocation58_spill] sm:$0xff] %v6807_v62  ;;  %v6813_v3 = vld [vmem:[%s13287_s2 + $0x2d0] sm:$0xff]  ;;  %v6819_v59 = vld [vmem:[%s13287_s2 + $0x288] sm:$0xff]  ;;  %13942 = vst [vmem:[#allocation61_spill] sm:$0xff] %v6825_v60 }
  0xc5   :  { %1283 = vmatpush1.msra.mxu0 %v6807_v62  ;;  %13940 = vst [vmem:[#allocation59_spill] sm:$0xff] %v6813_v3  ;;  %1354 = vmatpush1.msra.mxu1 %v6813_v3  ;;  %13941 = vst [vmem:[#allocation60_spill] sm:$0xff] %v6819_v59  ;;  %v6831_v62 = vld [vmem:[%s13287_s2 + $0x280] sm:$0xff]  ;;  %v6837_v3 = vld [vmem:[%s13287_s2 + $0x290] sm:$0xff]  ;;  %v81_v57 = vsub.s32 2, %v6802_v58  ;;  %v77_v61 = vsub.s32 1, %v6802_v58 }
  0xc6   :  { %1284 = vmatprep.subr.mxu0 %v6819_v59  ;;  %1355 = vmatprep.subr.mxu1 %v6825_v60  ;;  %13943 = vst [vmem:[#allocation62_spill] sm:$0xff] %v6831_v62  ;;  %13944 = vst [vmem:[#allocation63_spill] sm:$0xff] %v6837_v3  ;;  %v6843_v59 = vld [vmem:[%s13287_s2 + $0x248] sm:$0xff]  ;;  %v6849_v60 = vld [vmem:[%s13287_s2 + $0x258] sm:$0xff]  ;;  %v85_v55 = vsub.s32 3, %v6802_v58 }
  0xc7   :  { %1285 = vmatpush1.msra.mxu0 %v6831_v62  ;;  %1356 = vmatpush1.msra.mxu1 %v6837_v3  ;;  %13945 = vst [vmem:[#allocation64_spill] sm:$0xff] %v6843_v59  ;;  %13946 = vst [vmem:[#allocation65_spill] sm:$0xff] %v6849_v60  ;;  %v73_v62 = vsub.s32 0, %v6802_v58  ;;  %v6857_v3 = vld [vmem:[%s13287_s2 + $0x240] sm:$0xff] }
  0xc8   :  { %1286 = vmatprep.subr.mxu0 %v6843_v59  ;;  %1357 = vmatprep.subr.mxu1 %v6849_v60  ;;  %13947 = vst [vmem:[#allocation66_spill] sm:$0xff] %v6857_v3  ;;  %v6863_v59 = vld [vmem:[%s13287_s2 + $0x250] sm:$0xff]  ;;  %v6869_v60 = vld [vmem:[%s13288_s3] sm:$0xff] }
  0xc9   :  { %1287 = vmatpush1.msra.mxu0 %v6857_v3  ;;  %13948 = vst [vmem:[#allocation67_spill] sm:$0xff] %v6863_v59  ;;  %1358 = vmatpush1.msra.mxu1 %v6863_v59  ;;  %v6879_v3 = vld [vmem:[%s13287_s2 + $0x208] sm:$0xff]  ;;  %v6885_v59 = vld [vmem:[%s13287_s2 + $0x218] sm:$0xff]  ;;  %v6921_v16 = vrot.slane %v6869_v60, %v81_v57 }
  0xca   :  { %v6871_v63 = vpop.f32.mrf.mxu0  ;;  %v6874_v56 = vpop.f32.mrf.mxu1  ;;  %13949 = vst [vmem:[#allocation68_spill] sm:$0xff] %v6879_v3  ;;  %1288 = vmatprep.subr.mxu0 %v6879_v3  ;;  %13950 = vst [vmem:[#allocation69_spill] sm:$0xff] %v6885_v59  ;;  %1359 = vmatprep.subr.mxu1 %v6885_v59  ;;  %v6898_v3 = vld [vmem:[%s13287_s2 + $0x210] sm:$0xff]  ;;  %v6908_v59 = vld [vmem:[%s13287_s2 + $0x1c8] sm:$0xff] }
  0xcb   :  { %1289 = vmatpush1.msra.mxu0 %v6892_v54  ;;  %13952 = vst [vmem:[#allocation71_spill] sm:$0xff] %v6898_v3  ;;  %1360 = vmatpush1.msra.mxu1 %v6898_v3  ;;  %13953 = vst [vmem:[#allocation72_spill] sm:$0xff] %v6908_v59  ;;  %v6914_v54 = vld [vmem:[%s13287_s2 + $0x1d8] sm:$0xff]  ;;  %v6918_v3 = vrot.slane %v6869_v60, %v73_v62  ;;  %v6936_v62 = vrot.slane %v6869_v60, %v77_v61 }
  0xcc   :  { %v6901_v53 = vpop.f32.mrf.mxu0  ;;  %v6903_v52 = vpop.f32.mrf.mxu1  ;;  %1290 = vmatprep.subr.mxu0 %v6908_v59  ;;  %13954 = vst [vmem:[#allocation73_spill] sm:$0xff] %v6914_v54  ;;  %1361 = vmatprep.subr.mxu1 %v6914_v54  ;;  %v6932_v59 = vld [vmem:[%s13287_s2 + $0x1d0] sm:$0xff]  ;;  %v6954_v61 = vrot.slane %v6869_v60, %v85_v55 }
  0xcd   :  { %1291 = vmatpush1.msra.mxu0 %v6926_v15  ;;  %13956 = vst [vmem:[#allocation75_spill] sm:$0xff] %v6932_v59  ;;  %1362 = vmatpush1.msra.mxu1 %v6932_v59  ;;  %v6947_v15 = vld [vmem:[%s13287_s2 + $0x198] sm:$0xff] }
  0xce   :  { %v208_v54 = vpop.f32.mrf.mxu0  ;;  %v321_v57 = vpop.f32.mrf.mxu1  ;;  %1292 = vmatprep.subr.mxu0 %v6941_v32  ;;  %13958 = vst [vmem:[#allocation77_spill] sm:$0xff] %v6947_v15  ;;  %1363 = vmatprep.subr.mxu1 %v6947_v15  ;;  %v6962_v32 = vld [vmem:[%s13287_s2 + $0x180] sm:$0xff]  ;;  %v6968_v15 = vld [vmem:[%s13287_s2 + $0x190] sm:$0xff] }
  0xcf   :  { %v6951_v59 = vadd.f32 %v208_v54, %v6918_v3  ;;  %v6957_v14 = vadd.f32 %v321_v57, %v6921_v16  ;;  %13961 = vst [vmem:[#allocation80_spill] sm:$0xff] %v6962_v32  ;;  %1293 = vmatpush1.msra.mxu0 %v6962_v32  ;;  %13962 = vst [vmem:[#allocation81_spill] sm:$0xff] %v6968_v15  ;;  %1364 = vmatpush1.msra.mxu1 %v6968_v15  ;;  %v6974_v57 = vld [vmem:[%s13287_s2 + $0x148] sm:$0xff]  ;;  %v6992_v32 = vld [vmem:[%s13287_s2 + $0x140] sm:$0xff] }
  0xd0   :  { %v210_v54 = vpop.f32.mrf.mxu0  ;;  %v323_v55 = vpop.f32.mrf.mxu1  ;;  %13963 = vst [vmem:[#allocation82_spill] sm:$0xff] %v6974_v57  ;;  %1294 = vmatprep.subr.mxu0 %v6974_v57  ;;  %13967 = vst [vmem:[#allocation86_spill] sm:$0xff] %v6992_v32  ;;  %v6998_v57 = vld [vmem:[%s13287_s2 + $0x150] sm:$0xff] }
  0xd1   :  { %13959 = vst [vmem:[#allocation78_spill] sm:$0xff] %v6951_v59  ;;  %13960 = vst [vmem:[#allocation79_spill] sm:$0xff] %v6957_v14  ;;  %v6980_v14 = vld [vmem:[%s13287_s2 + $0x158] sm:$0xff]  ;;  %v6984_v59 = vadd.f32 %v210_v54, %v6936_v62  ;;  %v6987_v15 = vadd.f32 %v323_v55, %v6954_v61  ;;  %1295 = vmatpush1.msra.mxu0 %v6992_v32  ;;  %v7004_v55 = vld [vmem:[%s13287_s2 + $0x108] sm:$0xff] }
  0xd2   :  { %13964 = vst [vmem:[#allocation83_spill] sm:$0xff] %v6980_v14  ;;  %1365 = vmatprep.subr.mxu1 %v6980_v14  ;;  %13968 = vst [vmem:[#allocation87_spill] sm:$0xff] %v6998_v57  ;;  %v214_v14 = vpop.f32.mrf.mxu0  ;;  %v327_v54 = vpop.f32.mrf.mxu1  ;;  %1296 = vmatprep.subr.mxu0 %v7004_v55  ;;  %v7022_v32 = vld [vmem:[%s13287_s2 + $0x100] sm:$0xff] }
  0xd3   :  { %13965 = vst [vmem:[#allocation84_spill] sm:$0xff] %v6984_v59  ;;  %13966 = vst [vmem:[#allocation85_spill] sm:$0xff] %v6987_v15  ;;  %1366 = vmatpush1.msra.mxu1 %v6998_v57  ;;  %v7010_v15 = vld [vmem:[%s13287_s2 + $0x118] sm:$0xff]  ;;  %v7014_v59 = vadd.f32 %v214_v14, %v6918_v3  ;;  %v7017_v57 = vadd.f32 %v327_v54, %v6921_v16  ;;  %1297 = vmatpush1.msra.mxu0 %v7022_v32  ;;  %v7034_v54 = vld [vmem:[%s13287_s2 + $0xc8] sm:$0xff] }
  0xd4   :  { %13969 = vst [vmem:[#allocation88_spill] sm:$0xff] %v7004_v55  ;;  %13970 = vst [vmem:[#allocation89_spill] sm:$0xff] %v7010_v15  ;;  %1367 = vmatprep.subr.mxu1 %v7010_v15  ;;  %v7028_v55 = vld [vmem:[%s13287_s2 + $0x110] sm:$0xff]  ;;  %v216_v15 = vpop.f32.mrf.mxu0  ;;  %v329_v14 = vpop.f32.mrf.mxu1  ;;  %1298 = vmatprep.subr.mxu0 %v7034_v54 }
  0xd5   :  { %13971 = vst [vmem:[#allocation90_spill] sm:$0xff] %v7014_v59  ;;  %13972 = vst [vmem:[#allocation91_spill] sm:$0xff] %v7017_v57  ;;  %1368 = vmatpush1.msra.mxu1 %v7028_v55  ;;  %v7040_v57 = vld [vmem:[%s13287_s2 + $0xd8] sm:$0xff]  ;;  %v7044_v59 = vadd.f32 %v216_v15, %v6936_v62 }
  0xd6   :  { %13973 = vst [vmem:[#allocation92_spill] sm:$0xff] %v7022_v32  ;;  %13974 = vst [vmem:[#allocation93_spill] sm:$0xff] %v7028_v55  ;;  %1369 = vmatprep.subr.mxu1 %v7040_v57  ;;  %v7047_v55 = vadd.f32 %v329_v14, %v6954_v61  ;;  %v7052_v32 = vld [vmem:[%s13287_s2 + $0xc0] sm:$0xff]  ;;  %v333_v15 = vpop.f32.mrf.mxu1  ;;  %v7064_v14 = vld [vmem:[%s13287_s2 + $0x88] sm:$0xff] }
  0xd7   :  { %13975 = vst [vmem:[#allocation94_spill] sm:$0xff] %v7034_v54  ;;  %13976 = vst [vmem:[#allocation95_spill] sm:$0xff] %v7040_v57  ;;  %1299 = vmatpush1.msra.mxu0 %v7052_v32  ;;  %v7058_v54 = vld [vmem:[%s13287_s2 + $0xd0] sm:$0xff]  ;;  %v220_v57 = vpop.f32.mrf.mxu0 }
  0xd8   :  { %13977 = vst [vmem:[#allocation96_spill] sm:$0xff] %v7044_v59  ;;  %13978 = vst [vmem:[#allocation97_spill] sm:$0xff] %v7047_v55  ;;  %1370 = vmatpush1.msra.mxu1 %v7058_v54  ;;  %1300 = vmatprep.subr.mxu0 %v7064_v14  ;;  %v7070_v55 = vld [vmem:[%s13287_s2 + $0x98] sm:$0xff]  ;;  %v7074_v59 = vadd.f32 %v220_v57, %v6918_v3  ;;  %v335_v57 = vpop.f32.mrf.mxu1 }
  0xd9   :  { %13979 = vst [vmem:[#allocation98_spill] sm:$0xff] %v7052_v32  ;;  %13980 = vst [vmem:[#allocation99_spill] sm:$0xff] %v7058_v54  ;;  %1371 = vmatprep.subr.mxu1 %v7070_v55  ;;  %v7077_v54 = vadd.f32 %v333_v15, %v6921_v16  ;;  %v7082_v32 = vld [vmem:[%s13287_s2 + $0x80] sm:$0xff]  ;;  %v7094_v15 = vld [vmem:[%s13287_s2 + $0x48] sm:$0xff] }
  0xda   :  { %13981 = vst [vmem:[#allocation100_spill] sm:$0xff] %v7064_v14  ;;  %13982 = vst [vmem:[#allocation101_spill] sm:$0xff] %v7070_v55  ;;  %1301 = vmatpush1.msra.mxu0 %v7082_v32  ;;  %v7088_v14 = vld [vmem:[%s13287_s2 + $0x90] sm:$0xff]  ;;  %v222_v55 = vpop.f32.mrf.mxu0 }
  0xdb   :  { %13983 = vst [vmem:[#allocation102_spill] sm:$0xff] %v7074_v59  ;;  %13984 = vst [vmem:[#allocation103_spill] sm:$0xff] %v7077_v54  ;;  %1372 = vmatpush1.msra.mxu1 %v7088_v14  ;;  %1302 = vmatprep.subr.mxu0 %v7094_v15  ;;  %v7100_v54 = vld [vmem:[%s13287_s2 + $0x58] sm:$0xff]  ;;  %v7104_v59 = vadd.f32 %v222_v55, %v6936_v62  ;;  %v339_v55 = vpop.f32.mrf.mxu1 }
  0xdc   :  { %13985 = vst [vmem:[#allocation104_spill] sm:$0xff] %v7082_v32  ;;  %13986 = vst [vmem:[#allocation105_spill] sm:$0xff] %v7088_v14  ;;  %1373 = vmatprep.subr.mxu1 %v7100_v54  ;;  %v7107_v14 = vadd.f32 %v335_v57, %v6954_v61  ;;  %v7112_v32 = vld [vmem:[%s13287_s2 + $0x40] sm:$0xff]  ;;  %v7124_v57 = vld [vmem:[%s13287_s2 + $0x8] sm:$0xff] }
  0xdd   :  { %13987 = vst [vmem:[#allocation106_spill] sm:$0xff] %v7094_v15  ;;  %13988 = vst [vmem:[#allocation107_spill] sm:$0xff] %v7100_v54  ;;  %1303 = vmatpush1.msra.mxu0 %v7112_v32  ;;  %v7118_v15 = vld [vmem:[%s13287_s2 + $0x50] sm:$0xff]  ;;  %v226_v54 = vpop.f32.mrf.mxu0 }
  0xde   :  { %13989 = vst [vmem:[#allocation108_spill] sm:$0xff] %v7104_v59  ;;  %13990 = vst [vmem:[#allocation109_spill] sm:$0xff] %v7107_v14  ;;  %1374 = vmatpush1.msra.mxu1 %v7118_v15  ;;  %1304 = vmatprep.subr.mxu0 %v7124_v57  ;;  %v7130_v14 = vld [vmem:[%s13287_s2 + $0x18] sm:$0xff]  ;;  %v7134_v59 = vadd.f32 %v226_v54, %v6918_v3  ;;  %v341_v54 = vpop.f32.mrf.mxu1 }
  0xdf   :  { %13991 = vst [vmem:[#allocation110_spill] sm:$0xff] %v7112_v32  ;;  %13992 = vst [vmem:[#allocation111_spill] sm:$0xff] %v7118_v15  ;;  %1375 = vmatprep.subr.mxu1 %v7130_v14  ;;  %v7137_v15 = vadd.f32 %v339_v55, %v6921_v16  ;;  %v7142_v32 = vld [vmem:[%s13287_s2] sm:$0xff]  ;;  %v7154_v55 = vld [vmem:[%s13287_s2 + $0x7c8] sm:$0xff] }
  0xe0   :  { %13993 = vst [vmem:[#allocation112_spill] sm:$0xff] %v7124_v57  ;;  %13994 = vst [vmem:[#allocation113_spill] sm:$0xff] %v7130_v14  ;;  %1305 = vmatpush1.msra.mxu0 %v7142_v32  ;;  %v7148_v57 = vld [vmem:[%s13287_s2 + $0x10] sm:$0xff]  ;;  %v228_v14 = vpop.f32.mrf.mxu0 }
  0xe1   :  { %13995 = vst [vmem:[#allocation114_spill] sm:$0xff] %v7134_v59  ;;  %13996 = vst [vmem:[#allocation115_spill] sm:$0xff] %v7137_v15  ;;  %1376 = vmatpush1.msra.mxu1 %v7148_v57  ;;  %1306 = vmatprep.subr.mxu0 %v7154_v55  ;;  %v7160_v15 = vld [vmem:[%s13287_s2 + $0x7d8] sm:$0xff]  ;;  %v7164_v59 = vadd.f32 %v228_v14, %v6936_v62  ;;  %v345_v14 = vpop.f32.mrf.mxu1 }
  0xe2   :  { %13997 = vst [vmem:[#allocation116_spill] sm:$0xff] %v7142_v32  ;;  %13998 = vst [vmem:[#allocation117_spill] sm:$0xff] %v7148_v57  ;;  %1377 = vmatprep.subr.mxu1 %v7160_v15  ;;  %v7167_v57 = vadd.f32 %v341_v54, %v6954_v61  ;;  %v7172_v32 = vld [vmem:[%s13287_s2 + $0x7c0] sm:$0xff]  ;;  %v7184_v54 = vld [vmem:[%s13287_s2 + $0x788] sm:$0xff] }
  0xe3   :  { %13999 = vst [vmem:[#allocation118_spill] sm:$0xff] %v7154_v55  ;;  %14000 = vst [vmem:[#allocation119_spill] sm:$0xff] %v7160_v15  ;;  %1307 = vmatpush2.msra.mxu0 %v7172_v32  ;;  %v7178_v55 = vld [vmem:[%s13287_s2 + $0x7d0] sm:$0xff]  ;;  %v232_v15 = vpop.f32.mrf.mxu0 }
  0xe4   :  { %14001 = vst [vmem:[#allocation120_spill] sm:$0xff] %v7164_v59  ;;  %14002 = vst [vmem:[#allocation121_spill] sm:$0xff] %v7167_v57  ;;  %1378 = vmatpush2.msra.mxu1 %v7178_v55  ;;  %1308 = vmatprep.subr.mxu0 %v7184_v54  ;;  %v7190_v57 = vld [vmem:[%s13287_s2 + $0x798] sm:$0xff]  ;;  %v7194_v59 = vadd.f32 %v232_v15, %v6918_v3  ;;  %v347_v15 = vpop.f32.mrf.mxu1 }
  0xe5   :  { %14003 = vst [vmem:[#allocation122_spill] sm:$0xff] %v7172_v32  ;;  %14004 = vst [vmem:[#allocation123_spill] sm:$0xff] %v7178_v55  ;;  %1379 = vmatprep.subr.mxu1 %v7190_v57  ;;  %v7197_v55 = vadd.f32 %v345_v14, %v6921_v16  ;;  %v7202_v32 = vld [vmem:[%s13287_s2 + $0x780] sm:$0xff]  ;;  %v7214_v14 = vld [vmem:[%s13287_s2 + $0x748] sm:$0xff] }
  0xe6   :  { %14005 = vst [vmem:[#allocation124_spill] sm:$0xff] %v7184_v54  ;;  %14006 = vst [vmem:[#allocation125_spill] sm:$0xff] %v7190_v57  ;;  %1309 = vmatpush2.msra.mxu0 %v7202_v32  ;;  %v7208_v54 = vld [vmem:[%s13287_s2 + $0x790] sm:$0xff]  ;;  %v234_v57 = vpop.f32.mrf.mxu0 }
  0xe7   :  { %14007 = vst [vmem:[#allocation126_spill] sm:$0xff] %v7194_v59  ;;  %14008 = vst [vmem:[#allocation127_spill] sm:$0xff] %v7197_v55  ;;  %1380 = vmatpush2.msra.mxu1 %v7208_v54  ;;  %1310 = vmatprep.subr.mxu0 %v7214_v14  ;;  %v7220_v55 = vld [vmem:[%s13287_s2 + $0x758] sm:$0xff]  ;;  %v7224_v59 = vadd.f32 %v234_v57, %v6936_v62  ;;  %v351_v57 = vpop.f32.mrf.mxu1 }
  0xe8   :  { %14009 = vst [vmem:[#allocation128_spill] sm:$0xff] %v7202_v32  ;;  %14010 = vst [vmem:[#allocation129_spill] sm:$0xff] %v7208_v54  ;;  %1381 = vmatprep.subr.mxu1 %v7220_v55  ;;  %v7227_v54 = vadd.f32 %v347_v15, %v6954_v61  ;;  %v7232_v32 = vld [vmem:[%s13287_s2 + $0x740] sm:$0xff]  ;;  %v7244_v15 = vld [vmem:[%s13287_s2 + $0x708] sm:$0xff] }
  0xe9   :  { %14011 = vst [vmem:[#allocation130_spill] sm:$0xff] %v7214_v14  ;;  %14012 = vst [vmem:[#allocation131_spill] sm:$0xff] %v7220_v55  ;;  %1311 = vmatpush2.msra.mxu0 %v7232_v32  ;;  %v7238_v14 = vld [vmem:[%s13287_s2 + $0x750] sm:$0xff]  ;;  %v238_v55 = vpop.f32.mrf.mxu0 }
  0xea   :  { %14013 = vst [vmem:[#allocation132_spill] sm:$0xff] %v7224_v59  ;;  %14014 = vst [vmem:[#allocation133_spill] sm:$0xff] %v7227_v54  ;;  %1382 = vmatpush2.msra.mxu1 %v7238_v14  ;;  %1312 = vmatprep.subr.mxu0 %v7244_v15  ;;  %v7250_v54 = vld [vmem:[%s13287_s2 + $0x718] sm:$0xff]  ;;  %v7254_v59 = vadd.f32 %v238_v55, %v6918_v3  ;;  %v353_v55 = vpop.f32.mrf.mxu1 }
  0xeb   :  { %14015 = vst [vmem:[#allocation134_spill] sm:$0xff] %v7232_v32  ;;  %14016 = vst [vmem:[#allocation135_spill] sm:$0xff] %v7238_v14  ;;  %1383 = vmatprep.subr.mxu1 %v7250_v54  ;;  %v7257_v14 = vadd.f32 %v351_v57, %v6921_v16  ;;  %v7262_v32 = vld [vmem:[%s13287_s2 + $0x700] sm:$0xff]  ;;  %v7274_v57 = vld [vmem:[%s13287_s2 + $0x6c8] sm:$0xff] }
  0xec   :  { %14017 = vst [vmem:[#allocation136_spill] sm:$0xff] %v7244_v15  ;;  %14018 = vst [vmem:[#allocation137_spill] sm:$0xff] %v7250_v54  ;;  %1313 = vmatpush2.msra.mxu0 %v7262_v32  ;;  %v7268_v15 = vld [vmem:[%s13287_s2 + $0x710] sm:$0xff]  ;;  %v240_v54 = vpop.f32.mrf.mxu0 }
  0xed   :  { %14019 = vst [vmem:[#allocation138_spill] sm:$0xff] %v7254_v59  ;;  %14020 = vst [vmem:[#allocation139_spill] sm:$0xff] %v7257_v14  ;;  %1384 = vmatpush2.msra.mxu1 %v7268_v15  ;;  %1314 = vmatprep.subr.mxu0 %v7274_v57  ;;  %v7280_v14 = vld [vmem:[%s13287_s2 + $0x6d8] sm:$0xff]  ;;  %v7284_v59 = vadd.f32 %v240_v54, %v6936_v62  ;;  %v357_v54 = vpop.f32.mrf.mxu1 }
  0xee   :  { %14021 = vst [vmem:[#allocation140_spill] sm:$0xff] %v7262_v32  ;;  %14022 = vst [vmem:[#allocation141_spill] sm:$0xff] %v7268_v15  ;;  %1385 = vmatprep.subr.mxu1 %v7280_v14  ;;  %v7287_v15 = vadd.f32 %v353_v55, %v6954_v61  ;;  %v7292_v32 = vld [vmem:[%s13287_s2 + $0x6c0] sm:$0xff]  ;;  %v7304_v55 = vld [vmem:[%s13287_s2 + $0x688] sm:$0xff] }
  0xef   :  { %14023 = vst [vmem:[#allocation142_spill] sm:$0xff] %v7274_v57  ;;  %14024 = vst [vmem:[#allocation143_spill] sm:$0xff] %v7280_v14  ;;  %1315 = vmatpush2.msra.mxu0 %v7292_v32  ;;  %v7298_v57 = vld [vmem:[%s13287_s2 + $0x6d0] sm:$0xff]  ;;  %v244_v14 = vpop.f32.mrf.mxu0 }
  0xf0   :  { %14025 = vst [vmem:[#allocation144_spill] sm:$0xff] %v7284_v59  ;;  %14026 = vst [vmem:[#allocation145_spill] sm:$0xff] %v7287_v15  ;;  %1386 = vmatpush2.msra.mxu1 %v7298_v57  ;;  %1316 = vmatprep.subr.mxu0 %v7304_v55  ;;  %v7310_v15 = vld [vmem:[%s13287_s2 + $0x698] sm:$0xff]  ;;  %v7314_v59 = vadd.f32 %v244_v14, %v6918_v3  ;;  %v359_v14 = vpop.f32.mrf.mxu1 }
  0xf1   :  { %14027 = vst [vmem:[#allocation146_spill] sm:$0xff] %v7292_v32  ;;  %14028 = vst [vmem:[#allocation147_spill] sm:$0xff] %v7298_v57  ;;  %1387 = vmatprep.subr.mxu1 %v7310_v15  ;;  %v7317_v57 = vadd.f32 %v357_v54, %v6921_v16  ;;  %v7322_v32 = vld [vmem:[%s13287_s2 + $0x680] sm:$0xff]  ;;  %v7334_v54 = vld [vmem:[%s13287_s2 + $0x648] sm:$0xff] }
  0xf2   :  { %14029 = vst [vmem:[#allocation148_spill] sm:$0xff] %v7304_v55  ;;  %14030 = vst [vmem:[#allocation149_spill] sm:$0xff] %v7310_v15  ;;  %1317 = vmatpush2.msra.mxu0 %v7322_v32  ;;  %v7328_v55 = vld [vmem:[%s13287_s2 + $0x690] sm:$0xff]  ;;  %v246_v15 = vpop.f32.mrf.mxu0 }
  0xf3   :  { %14031 = vst [vmem:[#allocation150_spill] sm:$0xff] %v7314_v59  ;;  %14032 = vst [vmem:[#allocation151_spill] sm:$0xff] %v7317_v57  ;;  %1388 = vmatpush2.msra.mxu1 %v7328_v55  ;;  %1318 = vmatprep.subr.mxu0 %v7334_v54  ;;  %v7340_v57 = vld [vmem:[%s13287_s2 + $0x658] sm:$0xff]  ;;  %v7344_v59 = vadd.f32 %v246_v15, %v6936_v62  ;;  %v7364_v15 = vld [vmem:[%s13287_s2 + $0x608] sm:$0xff] }
  0xf4   :  { %14033 = vst [vmem:[#allocation152_spill] sm:$0xff] %v7322_v32  ;;  %14034 = vst [vmem:[#allocation153_spill] sm:$0xff] %v7328_v55  ;;  %1389 = vmatprep.subr.mxu1 %v7340_v57  ;;  %v7347_v55 = vadd.f32 %v359_v14, %v6954_v61  ;;  %v7352_v32 = vld [vmem:[%s13287_s2 + $0x640] sm:$0xff]  ;;  %v7370_v14 = vld [vmem:[%s13287_s2 + $0x618] sm:$0xff] }
  0xf5   :  { %14035 = vst [vmem:[#allocation154_spill] sm:$0xff] %v7334_v54  ;;  %14036 = vst [vmem:[#allocation155_spill] sm:$0xff] %v7344_v59  ;;  %1319 = vmatpush2.msra.mxu0 %v7352_v32  ;;  %v7358_v54 = vld [vmem:[%s13287_s2 + $0x650] sm:$0xff] }
  0xf6   :  { %14037 = vst [vmem:[#allocation156_spill] sm:$0xff] %v7347_v55  ;;  %1390 = vmatpush2.msra.mxu1 %v7358_v54  ;;  %14038 = vst [vmem:[#allocation157_spill] sm:$0xff] %v7364_v15  ;;  %1320 = vmatprep.subr.mxu0 %v7364_v15  ;;  %v7376_v55 = vld [vmem:[%s13287_s2 + $0x600] sm:$0xff]  ;;  %v7382_v59 = vld [vmem:[%s13287_s2 + $0x610] sm:$0xff] }
  0xf7   :  { %14039 = vst [vmem:[#allocation158_spill] sm:$0xff] %v7370_v14  ;;  %1391 = vmatprep.subr.mxu1 %v7370_v14  ;;  %1321 = vmatpush2.msra.mxu0 %v7376_v55  ;;  %v7388_v15 = vld [vmem:[%s13287_s2 + $0x5c8] sm:$0xff]  ;;  %v7394_v14 = vld [vmem:[%s13287_s2 + $0x5d8] sm:$0xff] }
  0xf8   :  { %1392 = vmatpush2.msra.mxu1 %v7382_v59  ;;  %1322 = vmatprep.subr.mxu0 %v7388_v15 }
  0xf9   :  { %1393 = vmatprep.subr.mxu1 %v7394_v14  ;;  %1323 = vmatpush2.msra.mxu0 %v5941_v17  ;;  %v7429_v17 = vpop.f32.mrf.mxu0 }
  0xfa   :  { %1394 = vmatpush2.msra.mxu1 %v5946_v18  ;;  %1324 = vmatprep.subr.mxu0 %v5955_v19  ;;  %14040 = vst [vmem:[#allocation159_spill] sm:$0xff] %v7429_v17  ;;  %v7431_v18 = vpop.f32.mrf.mxu1 }
  0xfb   :  { %1395 = vmatprep.subr.mxu1 %v5960_v20  ;;  %1325 = vmatpush2.msra.mxu0 %v5967_v37  ;;  %14041 = vst [vmem:[#allocation160_spill] sm:$0xff] %v7431_v18  ;;  %v7433_v19 = vpop.f32.mrf.mxu0 }
  0xfc   :  { %1396 = vmatpush2.msra.mxu1 %v5972_v21  ;;  %1326 = vmatprep.subr.mxu0 %v5981_v23  ;;  %14042 = vst [vmem:[#allocation161_spill] sm:$0xff] %v7433_v19  ;;  %v7435_v20 = vpop.f32.mrf.mxu1 }
  0xfd   :  { %1397 = vmatprep.subr.mxu1 %v5986_v24  ;;  %1327 = vmatpush2.msra.mxu0 %v5993_v25  ;;  %14043 = vst [vmem:[#allocation162_spill] sm:$0xff] %v7435_v20  ;;  %v205_v20 = vadd.f32 %v6901_v53, %v6936_v62 }
  0xfe   :  { %1398 = vmatpush2.msra.mxu1 %v5998_v26  ;;  %1328 = vmatprep.subr.mxu0 %v6007_v28 }
  0xff   :  { %1399 = vmatprep.subr.mxu1 %v6012_v29  ;;  %1329 = vmatpush2.msra.mxu0 %v6021_v40 }
 0x100   :  { %1400 = vmatpush2.msra.mxu1 %v6026_v30  ;;  %1330 = vmatprep.subr.mxu0 %v6035_v31 }
 0x101   :  { %1401 = vmatprep.subr.mxu1 %v6040_v33  ;;  %1331 = vmatpush2.msra.mxu0 %v6047_v34 }
 0x102   :  { %1402 = vmatpush2.msra.mxu1 %v6052_v35  ;;  %1332 = vmatprep.subr.mxu0 %v6061_v36 }
 0x103   :  { %1403 = vmatprep.subr.mxu1 %v6066_v38  ;;  %1333 = vmatpush2.msra.mxu0 %v6075_v41 }
 0x104   :  { %1404 = vmatpush2.msra.mxu1 %v6080_v39  ;;  %1334 = vmatprep.subr.mxu0 %v6089_v43 }
 0x105   :  { %1405 = vmatprep.subr.mxu1 %v6094_v44  ;;  %1335 = vmatpush2.msra.mxu0 %v6101_v45 }
 0x106   :  { %1406 = vmatpush2.msra.mxu1 %v6106_v46  ;;  %1336 = vmatprep.subr.mxu0 %v6115_v47 }
 0x107   :  { %1407 = vmatprep.subr.mxu1 %v6120_v48  ;;  %1337 = vmatpush2.msra.mxu0 %v6127_v49 }
 0x108   :  { %1408 = vmatpush2.msra.mxu1 %v6134_v42  ;;  %1416 = vmatprep.subr.mxu0 %v6143_v50  ;;  %v203_v50 = vadd.f32 %v6871_v63, %v6918_v3 }
 0x109   :  { %1487 = vmatprep.subr.mxu1 %v6148_v51 }
 0x10f   :  { %v7437_v37 = vpop.f32.mrf.mxu0  ;;  %v7439_v21 = vpop.f32.mrf.mxu1 }
 0x110   :  { %14044 = vst [vmem:[#allocation163_spill] sm:$0xff] %v7437_v37  ;;  %14045 = vst [vmem:[#allocation164_spill] sm:$0xff] %v7439_v21 }
 0x111   :  { %v7441_v23 = vpop.f32.mrf.mxu0  ;;  %v7443_v24 = vpop.f32.mrf.mxu1 }
 0x112   :  { %14046 = vst [vmem:[#allocation165_spill] sm:$0xff] %v7441_v23  ;;  %14047 = vst [vmem:[#allocation166_spill] sm:$0xff] %v7443_v24 }
 0x115   :  { %v7445_v25 = vpop.f32.mrf.mxu0  ;;  %v7447_v26 = vpop.f32.mrf.mxu1 }
 0x116   :  { %14048 = vst [vmem:[#allocation167_spill] sm:$0xff] %v7445_v25  ;;  %14049 = vst [vmem:[#allocation168_spill] sm:$0xff] %v7447_v26 }
 0x117   :  { %v7449_v28 = vpop.f32.mrf.mxu0  ;;  %v7451_v29 = vpop.f32.mrf.mxu1 }
 0x118   :  { %14050 = vst [vmem:[#allocation169_spill] sm:$0xff] %v7449_v28  ;;  %14051 = vst [vmem:[#allocation170_spill] sm:$0xff] %v7451_v29  ;;  %v318_v28 = vadd.f32 %v6903_v52, %v6954_v61 }
 0x11b   :  { %v7453_v40 = vpop.f32.mrf.mxu0  ;;  %v7455_v30 = vpop.f32.mrf.mxu1 }
 0x11c   :  { %14052 = vst [vmem:[#allocation171_spill] sm:$0xff] %v7453_v40  ;;  %14053 = vst [vmem:[#allocation172_spill] sm:$0xff] %v7455_v30  ;;  %v7646_v30 = vld [vmem:[%s13287_s2 + $0x2b8] sm:$0xff]  ;;  %v7658_v40 = vld [vmem:[%s13287_s2 + $0x2b0] sm:$0xff] }
 0x11d   :  { %v7457_v31 = vpop.f32.mrf.mxu0  ;;  %v7459_v33 = vpop.f32.mrf.mxu1 }
 0x11e   :  { %14054 = vst [vmem:[#allocation173_spill] sm:$0xff] %v7457_v31  ;;  %14055 = vst [vmem:[#allocation174_spill] sm:$0xff] %v7459_v33  ;;  %v7652_v31 = vld [vmem:[%s13287_s2 + $0x2a0] sm:$0xff] }
 0x121   :  { %v7461_v34 = vpop.f32.mrf.mxu0  ;;  %v7463_v35 = vpop.f32.mrf.mxu1 }
 0x122   :  { %14056 = vst [vmem:[#allocation175_spill] sm:$0xff] %v7461_v34  ;;  %14057 = vst [vmem:[#allocation176_spill] sm:$0xff] %v7463_v35  ;;  %v7670_v35 = vld [vmem:[%s13287_s2 + $0x278] sm:$0xff]  ;;  %v7682_v34 = vld [vmem:[%s13287_s2 + $0x270] sm:$0xff] }
 0x123   :  { %v7465_v36 = vpop.f32.mrf.mxu0  ;;  %v7467_v38 = vpop.f32.mrf.mxu1 }
 0x124   :  { %14058 = vst [vmem:[#allocation177_spill] sm:$0xff] %v7465_v36  ;;  %14059 = vst [vmem:[#allocation178_spill] sm:$0xff] %v7467_v38  ;;  %v7664_v38 = vld [vmem:[%s13287_s2 + $0x268] sm:$0xff]  ;;  %v7676_v36 = vld [vmem:[%s13287_s2 + $0x260] sm:$0xff] }
 0x127   :  { %v7469_v41 = vpop.f32.mrf.mxu0  ;;  %v7473_v43 = vpop.f32.mrf.mxu1 }
 0x128   :  { %14060 = vst [vmem:[#allocation179_spill] sm:$0xff] %v7469_v41  ;;  %14062 = vst [vmem:[#allocation181_spill] sm:$0xff] %v7473_v43  ;;  %v7694_v43 = vld [vmem:[%s13287_s2 + $0x238] sm:$0xff]  ;;  %v7706_v41 = vld [vmem:[%s13287_s2 + $0x230] sm:$0xff] }
 0x129   :  { %v7471_v39 = vpop.f32.mrf.mxu0  ;;  %v7477_v45 = vpop.f32.mrf.mxu1  ;;  %14067 = vst [vmem:[#allocation186_spill] sm:$0xff] %v7694_v43  ;;  %14069 = vst [vmem:[#allocation188_spill] sm:$0xff] %v7706_v41 }
 0x12a   :  { %14061 = vst [vmem:[#allocation180_spill] sm:$0xff] %v7471_v39  ;;  %14063 = vst [vmem:[#allocation182_spill] sm:$0xff] %v7477_v45  ;;  %v7688_v45 = vld [vmem:[%s13287_s2 + $0x228] sm:$0xff]  ;;  %v7700_v39 = vld [vmem:[%s13287_s2 + $0x220] sm:$0xff] }
 0x12b   :  { %14066 = vst [vmem:[#allocation185_spill] sm:$0xff] %v7688_v45  ;;  %14068 = vst [vmem:[#allocation187_spill] sm:$0xff] %v7700_v39 }
 0x12d   :  { %v7475_v44 = vpop.f32.mrf.mxu0  ;;  %v7481_v47 = vpop.f32.mrf.mxu1 }
 0x12f   :  { %v7479_v46 = vpop.f32.mrf.mxu0  ;;  %v7483_v42 = vpop.f32.mrf.mxu1 }
 0x133   :  { %v470_v48 = vpop.f32.mrf.mxu0  ;;  %v583_v18 = vpop.f32.mrf.mxu1 }
 0x135   :  { %v472_v49 = vpop.f32.mrf.mxu0  ;;  %v585_v23 = vpop.f32.mrf.mxu1 }
 0x139   :  { %v990_v51 = vpop.f32.mrf.mxu0  ;;  %v1061_v29 = vpop.f32.mrf.mxu1 }
 0x13a   :  { %v1212_v19 = vadd.f32 %v990_v51, %v203_v50  ;;  %v93_v50 = vsub.s32 5, %v6802_v58 }
 0x13b   :  { %v992_v17 = vpop.f32.mrf.mxu0  ;;  %v1063_v26 = vpop.f32.mrf.mxu1 }
 0x13c   :  { %v4019_v24 = vmul.f32 -1.442695, %v1212_v19  ;;  %v1213_v21 = vadd.f32 %v992_v17, %v205_v20  ;;  %v1215_v25 = vadd.f32 %v1063_v26, %v318_v28  ;;  %v7499_v61 = vrot.slane %v6869_v60, %v93_v50 }
 0x13e   :  { %4191 = vpow2.f32 %v4019_v24  ;;  %v4020_v37 = vmul.f32 -1.442695, %v1213_v21  ;;  %v473_v28 = vadd.f32 %v472_v49, %v7499_v61 }
 0x140   :  { %4193 = vpow2.f32 %v4020_v37  ;;  %v89_v37 = vsub.s32 4, %v6802_v58 }
 0x141   :  { %4195 = vtanh.f32 %v1215_v25 }
 0x142   :  { %v7496_v52 = vrot.slane %v6869_v60, %v89_v37 }
 0x144   :  { %14064 = vst [vmem:[#allocation183_spill] sm:$0xff] %v7496_v52  ;;  %v471_v25 = vadd.f32 %v470_v48, %v7496_v52  ;;  %v101_v48 = vsub.s32 7, %v6802_v58 }
 0x146   :  { %v7512_v50 = vrot.slane %v6869_v60, %v101_v48 }
 0x14b   :  { %v4192_v3 = vpop.eup %4191 }
 0x14c   :  { %v1233_v63 = vadd.f32 1.0, %v4192_v3 }
 0x14d   :  { %v4194_v33 = vpop.eup %4193 }
 0x14e   :  { %4197 = vrcp.f32 %v1233_v63  ;;  %v1234_v53 = vadd.f32 1.0, %v4194_v33  ;;  %v4196_v62 = vpop.eup %4195 }
 0x150   :  { %4199 = vrcp.f32 %v1234_v53  ;;  %v97_v53 = vsub.s32 6, %v6802_v58 }
 0x15b   :  { %v4198_v19 = vpop.eup %4197 }
 0x15c   :  { %v1263_v17 = vmul.f32 %v4198_v19, %v4196_v62  ;;  %v7505_v19 = vrot.slane %v6869_v60, %v97_v53 }
 0x15d   :  { %v4200_v20 = vpop.eup %4199 }
 0x15e   :  { %v1262_v24 = vmul.f32 0.0, %v4200_v20  ;;  %v584_v49 = vadd.f32 %v583_v18, %v7505_v19 }
 0x160   :  { %v7491_v21 = vadd.f32 %v1263_v17, %v1262_v24  ;;  %v316_v17 = vadd.f32 %v6874_v56, %v6921_v16 }
 0x162   :  { %v1214_v24 = vadd.f32 %v1061_v29, %v316_v17 }
 0x17b   :  { %v1132_v26 = vpop.f32.mrf.mxu0  ;;  %v1203_v20 = vpop.f32.mrf.mxu1 }
 0x17c   :  { %v1220_v33 = vadd.f32 %v1132_v26, %v471_v25  ;;  %v1222_v37 = vadd.f32 %v1203_v20, %v584_v49  ;;  %v4021_v25 = vmul.f32 -1.442695, %v1214_v24 }
 0x17d   :  { %v1134_v51 = vpop.f32.mrf.mxu0  ;;  %v1205_v26 = vpop.f32.mrf.mxu1 }
 0x17e   :  { %v4022_v3 = vmul.f32 -1.442695, %v1220_v33  ;;  %v1221_v63 = vadd.f32 %v1134_v51, %v473_v28  ;;  %v586_v28 = vadd.f32 %v585_v23, %v7512_v50  ;;  %v4024_v33 = vmul.f32 -1.442695, %v1222_v37 }
 0x180   :  { %4201 = vpow2.f32 %v4022_v3  ;;  %v4023_v62 = vmul.f32 -1.442695, %v1221_v63  ;;  %v1223_v3 = vadd.f32 %v1205_v26, %v586_v28 }
 0x182   :  { %4203 = vpow2.f32 %v4023_v62 }
 0x183   :  { %4205 = vpow2.f32 %v4021_v25 }
 0x184   :  { %4207 = vpow2.f32 %v4024_v33  ;;  %v7530_v33 = vld [vmem:[%s13287_s2 + $0x3e0] sm:$0xff] }
 0x18d   :  { %v4202_v51 = vpop.eup %4201 }
 0x18e   :  { %v1251_v63 = vadd.f32 1.0, %v4202_v51  ;;  %v7536_v51 = vld [vmem:[%s13287_s2 + $0x3f0] sm:$0xff] }
 0x18f   :  { %v4204_v16 = vpop.eup %4203 }
 0x190   :  { %4209 = vrcp.f32 %v1251_v63  ;;  %v1252_v56 = vadd.f32 1.0, %v4204_v16  ;;  %v4206_v58 = vpop.eup %4205  ;;  %v7549_v63 = vld [vmem:[%s13287_s2 + $0x3b8] sm:$0xff]  ;;  %v7556_v16 = vld [vmem:[%s13287_s2 + $0x3a0] sm:$0xff] }
 0x191   :  { %4211 = vtanh.f32 %v1223_v3  ;;  %v4208_v18 = vpop.eup %4207  ;;  %v1235_v23 = vadd.f32 1.0, %v4206_v58  ;;  %v7542_v3 = vld [vmem:[%s13287_s2 + $0x3a8] sm:$0xff] }
 0x192   :  { %4213 = vrcp.f32 %v1252_v56  ;;  %v1253_v62 = vadd.f32 1.0, %v4208_v18  ;;  %v7562_v56 = vld [vmem:[%s13287_s2 + $0x3b0] sm:$0xff]  ;;  %v7568_v58 = vld [vmem:[%s13287_s2 + $0x368] sm:$0xff]  ;;  %v7574_v18 = vld [vmem:[%s13287_s2 + $0x378] sm:$0xff] }
 0x193   :  { %4215 = vtanh.f32 %v7491_v21 }
 0x194   :  { %4217 = vrcp.f32 %v1253_v62  ;;  %v7598_v62 = vld [vmem:[%s13287_s2 + $0x338] sm:$0xff] }
 0x19d   :  { %v4210_v29 = vpop.eup %4209 }
 0x19e   :  { %v4212_v60 = vpop.eup %4211 }
 0x19f   :  { %v4214_v53 = vpop.eup %4213  ;;  %v1266_v20 = vmul.f32 %v4212_v60, %v4210_v29  ;;  %v7580_v29 = vld [vmem:[%s13287_s2 + $0x360] sm:$0xff]  ;;  %v7586_v60 = vld [vmem:[%s13287_s2 + $0x370] sm:$0xff] }
 0x1a0   :  { %v1265_v17 = vmul.f32 0.0, %v4214_v53  ;;  %v4216_v49 = vpop.eup %4215  ;;  %v7592_v53 = vld [vmem:[%s13287_s2 + $0x328] sm:$0xff] }
 0x1a1   :  { %v4218_v24 = vpop.eup %4217 }
 0x1a2   :  { %v7516_v48 = vadd.f32 %v1266_v20, %v1265_v17  ;;  %v7604_v17 = vld [vmem:[%s13287_s2 + $0x320] sm:$0xff]  ;;  %v7610_v20 = vld [vmem:[%s13287_s2 + $0x330] sm:$0xff] }
 0x1a4   :  { %4219 = vtanh.f32 %v7516_v48 }
 0x1a5   :  { %4221 = vrcp.f32 %v1235_v23  ;;  %v7616_v23 = vld [vmem:[%s13287_s2 + $0x2e8] sm:$0xff] }
 0x1b1   :  { %v4220_v37 = vpop.eup %4219 }
 0x1b2   :  { %v4222_v25 = vpop.eup %4221  ;;  %v7519_v26 = vmul.f32 %v4220_v37, %v4218_v24  ;;  %v7628_v24 = vld [vmem:[%s13287_s2 + $0x2e0] sm:$0xff]  ;;  %v7634_v37 = vld [vmem:[%s13287_s2 + $0x2f0] sm:$0xff] }
 0x1b3   :  { %v7521_v28 = vmul.f32 %v4222_v25, %v4216_v49  ;;  %v7622_v49 = vld [vmem:[%s13287_s2 + $0x2f8] sm:$0xff]  ;;  %v7640_v25 = vld [vmem:[%s13287_s2 + $0x2a8] sm:$0xff] }
 0x1b4   :  { %1338 = vmatprep.mubr.f32.mxu0 %v7519_v26  ;;  %1409 = vmatprep.mubr.f32.mxu1 %v7519_v26 }
 0x1b5   :  { %14065 = vst [vmem:[#allocation184_spill] sm:$0xff] %v7521_v28  ;;  %1339 = vmatmul.mubr.f32.vlgmr.msra.gmra.mxu0 %v7521_v28  ;;  %1410 = vmatmul.mubr.f32.vlgmr.msra.gmra.mxu1 %v7521_v28 }
 0x1b6   :  { %1417 = vmatpush1.msra.mxu0 %v7530_v33  ;;  %1488 = vmatpush1.msra.mxu1 %v7536_v51 }
 0x1b7   :  { %1418 = vmatprep.subr.mxu0 %v7542_v3  ;;  %1480 = vmatprep.mubr.f32.mxu0 %v7519_v26 }
 0x1b8   :  { %1489 = vmatprep.subr.mxu1 %v7549_v63  ;;  %1551 = vmatprep.mubr.f32.mxu1 %v7519_v26 }
 0x1b9   :  { %1419 = vmatpush1.msra.mxu0 %v7556_v16  ;;  %1490 = vmatpush1.msra.mxu1 %v7562_v56 }
 0x1ba   :  { %1420 = vmatprep.subr.mxu0 %v7568_v58  ;;  %1491 = vmatprep.subr.mxu1 %v7574_v18 }
 0x1bb   :  { %1421 = vmatpush1.msra.mxu0 %v7580_v29  ;;  %1492 = vmatpush1.msra.mxu1 %v7586_v60 }
 0x1bc   :  { %1422 = vmatprep.subr.mxu0 %v7592_v53  ;;  %1493 = vmatprep.subr.mxu1 %v7598_v62 }
 0x1bd   :  { %1423 = vmatpush1.msra.mxu0 %v7604_v17  ;;  %1494 = vmatpush1.msra.mxu1 %v7610_v20 }
 0x1be   :  { %1424 = vmatprep.subr.mxu0 %v7616_v23  ;;  %1495 = vmatprep.subr.mxu1 %v7622_v49 }
 0x1bf   :  { %1425 = vmatpush1.msra.mxu0 %v7628_v24  ;;  %1496 = vmatpush1.msra.mxu1 %v7634_v37 }
 0x1c0   :  { %1426 = vmatprep.subr.mxu0 %v7640_v25  ;;  %1497 = vmatprep.subr.mxu1 %v7646_v30 }
 0x1c1   :  { %1427 = vmatpush1.msra.mxu0 %v7652_v31  ;;  %1498 = vmatpush1.msra.mxu1 %v7658_v40 }
 0x1c2   :  { %1428 = vmatprep.subr.mxu0 %v7664_v38  ;;  %1499 = vmatprep.subr.mxu1 %v7670_v35 }
 0x1c3   :  { %1429 = vmatpush1.msra.mxu0 %v7676_v36  ;;  %1500 = vmatpush1.msra.mxu1 %v7682_v34 }
 0x1c4   :  { %1430 = vmatprep.subr.mxu0 %v7688_v45  ;;  %1501 = vmatprep.subr.mxu1 %v7694_v43  ;;  %v7712_v45 = vld [vmem:[%s13287_s2 + $0x1e8] sm:$0xff]  ;;  %v7718_v43 = vld [vmem:[%s13287_s2 + $0x1f8] sm:$0xff] }
 0x1c5   :  { %1431 = vmatpush1.msra.mxu0 %v7700_v39  ;;  %1502 = vmatpush1.msra.mxu1 %v7706_v41  ;;  %14070 = vst [vmem:[#allocation189_spill] sm:$0xff] %v7712_v45  ;;  %14071 = vst [vmem:[#allocation190_spill] sm:$0xff] %v7718_v43  ;;  %v7724_v39 = vld [vmem:[%s13287_s2 + $0x1e0] sm:$0xff]  ;;  %v7730_v41 = vld [vmem:[%s13287_s2 + $0x1f0] sm:$0xff] }
 0x1c6   :  { %1432 = vmatprep.subr.mxu0 %v7712_v45  ;;  %1503 = vmatprep.subr.mxu1 %v7718_v43  ;;  %14072 = vst [vmem:[#allocation191_spill] sm:$0xff] %v7724_v39  ;;  %14073 = vst [vmem:[#allocation192_spill] sm:$0xff] %v7730_v41  ;;  %v7736_v45 = vld [vmem:[%s13287_s2 + $0x1a8] sm:$0xff]  ;;  %v7742_v43 = vld [vmem:[%s13287_s2 + $0x1b8] sm:$0xff] }
 0x1c7   :  { %1433 = vmatpush1.msra.mxu0 %v7724_v39  ;;  %1504 = vmatpush1.msra.mxu1 %v7730_v41  ;;  %14074 = vst [vmem:[#allocation193_spill] sm:$0xff] %v7736_v45  ;;  %14075 = vst [vmem:[#allocation194_spill] sm:$0xff] %v7742_v43  ;;  %v7748_v39 = vld [vmem:[%s13287_s2 + $0x1a0] sm:$0xff]  ;;  %v7754_v41 = vld [vmem:[%s13287_s2 + $0x1b0] sm:$0xff] }
 0x1c8   :  { %1434 = vmatprep.subr.mxu0 %v7736_v45  ;;  %1505 = vmatprep.subr.mxu1 %v7742_v43  ;;  %14076 = vst [vmem:[#allocation195_spill] sm:$0xff] %v7748_v39  ;;  %14077 = vst [vmem:[#allocation196_spill] sm:$0xff] %v7754_v41  ;;  %v7760_v45 = vld [vmem:[%s13287_s2 + $0x168] sm:$0xff]  ;;  %v7766_v43 = vld [vmem:[%s13287_s2 + $0x178] sm:$0xff] }
 0x1c9   :  { %1435 = vmatpush1.msra.mxu0 %v7748_v39  ;;  %1506 = vmatpush1.msra.mxu1 %v7754_v41  ;;  %14078 = vst [vmem:[#allocation197_spill] sm:$0xff] %v7760_v45  ;;  %14079 = vst [vmem:[#allocation198_spill] sm:$0xff] %v7766_v43  ;;  %v7772_v39 = vld [vmem:[%s13287_s2 + $0x160] sm:$0xff]  ;;  %v7778_v41 = vld [vmem:[%s13287_s2 + $0x170] sm:$0xff] }
 0x1ca   :  { %1436 = vmatprep.subr.mxu0 %v7760_v45  ;;  %1507 = vmatprep.subr.mxu1 %v7766_v43  ;;  %14080 = vst [vmem:[#allocation199_spill] sm:$0xff] %v7772_v39  ;;  %14081 = vst [vmem:[#allocation200_spill] sm:$0xff] %v7778_v41  ;;  %v7784_v45 = vld [vmem:[%s13287_s2 + $0x128] sm:$0xff]  ;;  %v7790_v43 = vld [vmem:[%s13287_s2 + $0x138] sm:$0xff] }
 0x1cb   :  { %1437 = vmatpush1.msra.mxu0 %v7772_v39  ;;  %1508 = vmatpush1.msra.mxu1 %v7778_v41  ;;  %14082 = vst [vmem:[#allocation201_spill] sm:$0xff] %v7784_v45  ;;  %14083 = vst [vmem:[#allocation202_spill] sm:$0xff] %v7790_v43  ;;  %v7796_v39 = vld [vmem:[%s13287_s2 + $0x120] sm:$0xff]  ;;  %v7802_v41 = vld [vmem:[%s13287_s2 + $0x130] sm:$0xff] }
 0x1cc   :  { %1438 = vmatprep.subr.mxu0 %v7784_v45  ;;  %1509 = vmatprep.subr.mxu1 %v7790_v43  ;;  %14084 = vst [vmem:[#allocation203_spill] sm:$0xff] %v7796_v39  ;;  %14085 = vst [vmem:[#allocation204_spill] sm:$0xff] %v7802_v41  ;;  %v7808_v45 = vld [vmem:[%s13287_s2 + $0xe8] sm:$0xff]  ;;  %v7814_v43 = vld [vmem:[%s13287_s2 + $0xf8] sm:$0xff] }
 0x1cd   :  { %1439 = vmatpush1.msra.mxu0 %v7796_v39  ;;  %1510 = vmatpush1.msra.mxu1 %v7802_v41  ;;  %14086 = vst [vmem:[#allocation205_spill] sm:$0xff] %v7808_v45  ;;  %14087 = vst [vmem:[#allocation206_spill] sm:$0xff] %v7814_v43  ;;  %v7820_v39 = vld [vmem:[%s13287_s2 + $0xe0] sm:$0xff]  ;;  %v7826_v41 = vld [vmem:[%s13287_s2 + $0xf0] sm:$0xff] }
 0x1ce   :  { %1440 = vmatprep.subr.mxu0 %v7808_v45  ;;  %1511 = vmatprep.subr.mxu1 %v7814_v43  ;;  %14088 = vst [vmem:[#allocation207_spill] sm:$0xff] %v7820_v39  ;;  %14089 = vst [vmem:[#allocation208_spill] sm:$0xff] %v7826_v41  ;;  %v7832_v45 = vld [vmem:[%s13287_s2 + $0xa8] sm:$0xff]  ;;  %v7838_v43 = vld [vmem:[%s13287_s2 + $0xb8] sm:$0xff] }
 0x1cf   :  { %1441 = vmatpush1.msra.mxu0 %v7820_v39  ;;  %1512 = vmatpush1.msra.mxu1 %v7826_v41  ;;  %14090 = vst [vmem:[#allocation209_spill] sm:$0xff] %v7832_v45  ;;  %14091 = vst [vmem:[#allocation210_spill] sm:$0xff] %v7838_v43  ;;  %v7844_v39 = vld [vmem:[%s13287_s2 + $0xa0] sm:$0xff]  ;;  %v7850_v41 = vld [vmem:[%s13287_s2 + $0xb0] sm:$0xff] }
 0x1d0   :  { %1442 = vmatprep.subr.mxu0 %v7832_v45  ;;  %1513 = vmatprep.subr.mxu1 %v7838_v43  ;;  %14092 = vst [vmem:[#allocation211_spill] sm:$0xff] %v7844_v39  ;;  %14093 = vst [vmem:[#allocation212_spill] sm:$0xff] %v7850_v41  ;;  %v7856_v45 = vld [vmem:[%s13287_s2 + $0x68] sm:$0xff]  ;;  %v7862_v43 = vld [vmem:[%s13287_s2 + $0x78] sm:$0xff] }
 0x1d1   :  { %1443 = vmatpush1.msra.mxu0 %v7844_v39  ;;  %1514 = vmatpush1.msra.mxu1 %v7850_v41  ;;  %14094 = vst [vmem:[#allocation213_spill] sm:$0xff] %v7856_v45  ;;  %14095 = vst [vmem:[#allocation214_spill] sm:$0xff] %v7862_v43  ;;  %v7868_v39 = vld [vmem:[%s13287_s2 + $0x60] sm:$0xff]  ;;  %v7874_v41 = vld [vmem:[%s13287_s2 + $0x70] sm:$0xff] }
 0x1d2   :  { %1444 = vmatprep.subr.mxu0 %v7856_v45  ;;  %1515 = vmatprep.subr.mxu1 %v7862_v43  ;;  %14096 = vst [vmem:[#allocation215_spill] sm:$0xff] %v7868_v39  ;;  %14097 = vst [vmem:[#allocation216_spill] sm:$0xff] %v7874_v41  ;;  %v7880_v45 = vld [vmem:[%s13287_s2 + $0x28] sm:$0xff]  ;;  %v7886_v43 = vld [vmem:[%s13287_s2 + $0x38] sm:$0xff] }
 0x1d3   :  { %1445 = vmatpush1.msra.mxu0 %v7868_v39  ;;  %1516 = vmatpush1.msra.mxu1 %v7874_v41  ;;  %14098 = vst [vmem:[#allocation217_spill] sm:$0xff] %v7880_v45  ;;  %14099 = vst [vmem:[#allocation218_spill] sm:$0xff] %v7886_v43  ;;  %v7892_v39 = vld [vmem:[%s13287_s2 + $0x20] sm:$0xff]  ;;  %v7898_v41 = vld [vmem:[%s13287_s2 + $0x30] sm:$0xff] }
 0x1d4   :  { %1446 = vmatprep.subr.mxu0 %v7880_v45  ;;  %1517 = vmatprep.subr.mxu1 %v7886_v43  ;;  %14100 = vst [vmem:[#allocation219_spill] sm:$0xff] %v7892_v39  ;;  %14101 = vst [vmem:[#allocation220_spill] sm:$0xff] %v7898_v41  ;;  %v7904_v45 = vld [vmem:[%s13287_s2 + $0x7e8] sm:$0xff]  ;;  %v7910_v43 = vld [vmem:[%s13287_s2 + $0x7f8] sm:$0xff] }
 0x1d5   :  { %1447 = vmatpush1.msra.mxu0 %v7892_v39  ;;  %1518 = vmatpush1.msra.mxu1 %v7898_v41  ;;  %14102 = vst [vmem:[#allocation221_spill] sm:$0xff] %v7904_v45  ;;  %14103 = vst [vmem:[#allocation222_spill] sm:$0xff] %v7910_v43  ;;  %v7916_v39 = vld [vmem:[%s13287_s2 + $0x7e0] sm:$0xff]  ;;  %v7922_v41 = vld [vmem:[%s13287_s2 + $0x7f0] sm:$0xff] }
 0x1d6   :  { %1448 = vmatprep.subr.mxu0 %v7904_v45  ;;  %1519 = vmatprep.subr.mxu1 %v7910_v43  ;;  %14104 = vst [vmem:[#allocation223_spill] sm:$0xff] %v7916_v39  ;;  %14105 = vst [vmem:[#allocation224_spill] sm:$0xff] %v7922_v41  ;;  %v7928_v45 = vld [vmem:[%s13287_s2 + $0x7a8] sm:$0xff]  ;;  %v7934_v43 = vld [vmem:[%s13287_s2 + $0x7b8] sm:$0xff] }
 0x1d7   :  { %1449 = vmatpush2.msra.mxu0 %v7916_v39  ;;  %1520 = vmatpush2.msra.mxu1 %v7922_v41  ;;  %14106 = vst [vmem:[#allocation225_spill] sm:$0xff] %v7928_v45  ;;  %14107 = vst [vmem:[#allocation226_spill] sm:$0xff] %v7934_v43  ;;  %v7940_v39 = vld [vmem:[%s13287_s2 + $0x7a0] sm:$0xff]  ;;  %v7946_v41 = vld [vmem:[%s13287_s2 + $0x7b0] sm:$0xff] }
 0x1d8   :  { %1450 = vmatprep.subr.mxu0 %v7928_v45  ;;  %1521 = vmatprep.subr.mxu1 %v7934_v43  ;;  %14108 = vst [vmem:[#allocation227_spill] sm:$0xff] %v7940_v39  ;;  %14109 = vst [vmem:[#allocation228_spill] sm:$0xff] %v7946_v41  ;;  %v7952_v45 = vld [vmem:[%s13287_s2 + $0x768] sm:$0xff]  ;;  %v7958_v43 = vld [vmem:[%s13287_s2 + $0x778] sm:$0xff] }
 0x1d9   :  { %1451 = vmatpush2.msra.mxu0 %v7940_v39  ;;  %1522 = vmatpush2.msra.mxu1 %v7946_v41  ;;  %v7964_v39 = vld [vmem:[%s13287_s2 + $0x760] sm:$0xff]  ;;  %v7970_v41 = vld [vmem:[%s13287_s2 + $0x770] sm:$0xff] }
 0x1da   :  { %1452 = vmatprep.subr.mxu0 %v7952_v45  ;;  %1523 = vmatprep.subr.mxu1 %v7958_v43 }
 0x1db   :  { %1453 = vmatpush2.msra.mxu0 %v7964_v39  ;;  %1524 = vmatpush2.msra.mxu1 %v7970_v41 }
 0x1dc   :  { %1454 = vmatprep.subr.mxu0 %v6381_v22  ;;  %1525 = vmatprep.subr.mxu1 %v6386_v0  ;;  %v14110_v22 = vld [vmem:[#allocation3_spill] sm:$0xff]  ;;  %v14111_v0 = vld [vmem:[#allocation4_spill] sm:$0xff] }
 0x1dd   :  { %1455 = vmatpush2.msra.mxu0 %v6391_v1  ;;  %1526 = vmatpush2.msra.mxu1 %v6396_v2  ;;  %v14112_v1 = vld [vmem:[#allocation5_spill] sm:$0xff]  ;;  %v14113_v2 = vld [vmem:[#allocation6_spill] sm:$0xff] }
 0x1de   :  { %1456 = vmatprep.subr.mxu0 %v6401_v4  ;;  %1527 = vmatprep.subr.mxu1 %v6406_v5  ;;  %v14114_v4 = vld [vmem:[#allocation7_spill] sm:$0xff]  ;;  %v14115_v5 = vld [vmem:[#allocation8_spill] sm:$0xff] }
 0x1df   :  { %1457 = vmatpush2.msra.mxu0 %v6413_v6  ;;  %1528 = vmatpush2.msra.mxu1 %v6418_v7  ;;  %v14116_v6 = vld [vmem:[#allocation9_spill] sm:$0xff]  ;;  %v14117_v7 = vld [vmem:[#allocation10_spill] sm:$0xff] }
 0x1e0   :  { %1458 = vmatprep.subr.mxu0 %v6425_v27  ;;  %1529 = vmatprep.subr.mxu1 %v6430_v8  ;;  %v14118_v27 = vld [vmem:[#allocation11_spill] sm:$0xff]  ;;  %v14119_v8 = vld [vmem:[#allocation12_spill] sm:$0xff] }
 0x1e1   :  { %1459 = vmatpush2.msra.mxu0 %v6437_v9  ;;  %1530 = vmatpush2.msra.mxu1 %v6442_v10  ;;  %v14120_v9 = vld [vmem:[#allocation13_spill] sm:$0xff]  ;;  %v14121_v10 = vld [vmem:[#allocation14_spill] sm:$0xff] }
 0x1e2   :  { %1460 = vmatprep.subr.mxu0 %v6449_v11  ;;  %1531 = vmatprep.subr.mxu1 %v6454_v12  ;;  %v14122_v11 = vld [vmem:[#allocation15_spill] sm:$0xff]  ;;  %v14123_v12 = vld [vmem:[#allocation16_spill] sm:$0xff] }
 0x1e3   :  { %1461 = vmatpush2.msra.mxu0 %v6461_v13  ;;  %1532 = vmatpush2.msra.mxu1 %v14110_v22  ;;  %v14124_v13 = vld [vmem:[#allocation17_spill] sm:$0xff]  ;;  %v14125_v22 = vld [vmem:[#allocation18_spill] sm:$0xff] }
 0x1e4   :  { %1462 = vmatprep.subr.mxu0 %v14111_v0  ;;  %1533 = vmatprep.subr.mxu1 %v14112_v1  ;;  %v14126_v0 = vld [vmem:[#allocation19_spill] sm:$0xff]  ;;  %v14127_v1 = vld [vmem:[#allocation20_spill] sm:$0xff] }
 0x1e5   :  { %1463 = vmatpush2.msra.mxu0 %v14113_v2  ;;  %1534 = vmatpush2.msra.mxu1 %v14114_v4  ;;  %v14128_v2 = vld [vmem:[#allocation21_spill] sm:$0xff]  ;;  %v14129_v4 = vld [vmem:[#allocation22_spill] sm:$0xff] }
 0x1e6   :  { %1464 = vmatprep.subr.mxu0 %v14115_v5  ;;  %1535 = vmatprep.subr.mxu1 %v14116_v6  ;;  %v14130_v5 = vld [vmem:[#allocation23_spill] sm:$0xff]  ;;  %v14131_v6 = vld [vmem:[#allocation24_spill] sm:$0xff] }
 0x1e7   :  { %1465 = vmatpush2.msra.mxu0 %v14117_v7  ;;  %1536 = vmatpush2.msra.mxu1 %v14118_v27  ;;  %v14132_v7 = vld [vmem:[#allocation25_spill] sm:$0xff]  ;;  %v14133_v27 = vld [vmem:[#allocation26_spill] sm:$0xff] }
 0x1e8   :  { %1466 = vmatprep.subr.mxu0 %v14119_v8  ;;  %1537 = vmatprep.subr.mxu1 %v14120_v9  ;;  %v14134_v8 = vld [vmem:[#allocation27_spill] sm:$0xff]  ;;  %v14135_v9 = vld [vmem:[#allocation28_spill] sm:$0xff] }
 0x1e9   :  { %1467 = vmatpush2.msra.mxu0 %v14121_v10  ;;  %1538 = vmatpush2.msra.mxu1 %v14122_v11  ;;  %v14136_v10 = vld [vmem:[#allocation29_spill] sm:$0xff]  ;;  %v14137_v11 = vld [vmem:[#allocation30_spill] sm:$0xff] }
 0x1ea   :  { %1468 = vmatprep.subr.mxu0 %v14123_v12  ;;  %1539 = vmatprep.subr.mxu1 %v14124_v13  ;;  %v14138_v12 = vld [vmem:[#allocation31_spill] sm:$0xff]  ;;  %v14139_v13 = vld [vmem:[#allocation32_spill] sm:$0xff] }
 0x1eb   :  { %1469 = vmatpush2.msra.mxu0 %v14125_v22  ;;  %1540 = vmatpush2.msra.mxu1 %v14126_v0  ;;  %v14140_v22 = vld [vmem:[#allocation33_spill] sm:$0xff]  ;;  %v14141_v0 = vld [vmem:[#allocation34_spill] sm:$0xff] }
 0x1ec   :  { %1470 = vmatprep.subr.mxu0 %v14127_v1  ;;  %1541 = vmatprep.subr.mxu1 %v14128_v2  ;;  %v14142_v1 = vld [vmem:[#allocation35_spill] sm:$0xff]  ;;  %v14143_v2 = vld [vmem:[#allocation36_spill] sm:$0xff] }
 0x1ed   :  { %1471 = vmatpush2.msra.mxu0 %v14129_v4  ;;  %1542 = vmatpush2.msra.mxu1 %v14130_v5  ;;  %v14144_v4 = vld [vmem:[#allocation37_spill] sm:$0xff]  ;;  %v14145_v5 = vld [vmem:[#allocation38_spill] sm:$0xff] }
 0x1ee   :  { %1472 = vmatprep.subr.mxu0 %v14131_v6  ;;  %1543 = vmatprep.subr.mxu1 %v14132_v7  ;;  %v14146_v6 = vld [vmem:[#allocation39_spill] sm:$0xff]  ;;  %v14147_v7 = vld [vmem:[#allocation40_spill] sm:$0xff] }
 0x1ef   :  { %1473 = vmatpush2.msra.mxu0 %v14133_v27  ;;  %1544 = vmatpush2.msra.mxu1 %v14134_v8  ;;  %v14148_v27 = vld [vmem:[#allocation41_spill] sm:$0xff]  ;;  %v14149_v8 = vld [vmem:[#allocation42_spill] sm:$0xff] }
 0x1f0   :  { %1474 = vmatprep.subr.mxu0 %v14135_v9  ;;  %1545 = vmatprep.subr.mxu1 %v14136_v10  ;;  %v14150_v9 = vld [vmem:[#allocation43_spill] sm:$0xff]  ;;  %v14151_v10 = vld [vmem:[#allocation44_spill] sm:$0xff] }
 0x1f1   :  { %1475 = vmatpush2.msra.mxu0 %v14137_v11  ;;  %1546 = vmatpush2.msra.mxu1 %v14138_v12  ;;  %v14152_v11 = vld [vmem:[#allocation45_spill] sm:$0xff]  ;;  %v14153_v12 = vld [vmem:[#allocation46_spill] sm:$0xff] }
 0x1f2   :  { %1476 = vmatprep.subr.mxu0 %v14139_v13  ;;  %1547 = vmatprep.subr.mxu1 %v14140_v22  ;;  %v14154_v13 = vld [vmem:[#allocation47_spill] sm:$0xff]  ;;  %v14155_v22 = vld [vmem:[#allocation48_spill] sm:$0xff] }
 0x1f3   :  { %1477 = vmatpush2.msra.mxu0 %v14141_v0  ;;  %1548 = vmatpush2.msra.mxu1 %v14142_v1  ;;  %v14156_v0 = vld [vmem:[#allocation49_spill] sm:$0xff]  ;;  %v14157_v1 = vld [vmem:[#allocation50_spill] sm:$0xff] }
 0x1f4   :  { %1478 = vmatprep.subr.mxu0 %v14143_v2  ;;  %1549 = vmatprep.subr.mxu1 %v14144_v4  ;;  %v14158_v2 = vld [vmem:[#allocation51_spill] sm:$0xff]  ;;  %v14159_v4 = vld [vmem:[#allocation52_spill] sm:$0xff] }
 0x1f5   :  { %1479 = vmatpush2.msra.mxu0 %v14145_v5  ;;  %1550 = vmatpush2.msra.mxu1 %v14146_v6  ;;  %v14160_v5 = vld [vmem:[#allocation53_spill] sm:$0xff]  ;;  %v14161_v6 = vld [vmem:[#allocation54_spill] sm:$0xff] }
 0x1f6   :  { %1481 = vmatmul.mubr.f32.vlgmr.msra.gmra.mxu0 %v7521_v28  ;;  %1552 = vmatmul.mubr.f32.vlgmr.msra.gmra.mxu1 %v7521_v28  ;;  %v8260_v28 = vld [vmem:[%s13287_s2 + $0x448] sm:$0xff] }
 0x1f7   :  { %1624 = vmatprep.subr.mxu0 %v14147_v7  ;;  %1695 = vmatprep.subr.mxu1 %v14148_v27  ;;  %v14162_v7 = vld [vmem:[#allocation55_spill] sm:$0xff]  ;;  %v14163_v27 = vld [vmem:[#allocation56_spill] sm:$0xff]  ;;  %14254 = vst [vmem:[#allocation19_spill] sm:$0xff] %v8260_v28 }
 0x1f8   :  { %1625 = vmatpush1.msra.mxu0 %v14149_v8  ;;  %1696 = vmatpush1.msra.mxu1 %v14150_v9  ;;  %v14164_v8 = vld [vmem:[#allocation57_spill] sm:$0xff]  ;;  %v14165_v9 = vld [vmem:[#allocation58_spill] sm:$0xff] }
 0x1f9   :  { %1626 = vmatprep.subr.mxu0 %v14151_v10  ;;  %1697 = vmatprep.subr.mxu1 %v14152_v11  ;;  %v14166_v10 = vld [vmem:[#allocation59_spill] sm:$0xff]  ;;  %v14167_v11 = vld [vmem:[#allocation60_spill] sm:$0xff] }
 0x1fa   :  { %1627 = vmatpush1.msra.mxu0 %v14153_v12  ;;  %1698 = vmatpush1.msra.mxu1 %v14154_v13  ;;  %v14168_v12 = vld [vmem:[#allocation61_spill] sm:$0xff]  ;;  %v14169_v13 = vld [vmem:[#allocation62_spill] sm:$0xff] }
 0x1fb   :  { %1628 = vmatprep.subr.mxu0 %v14155_v22  ;;  %1699 = vmatprep.subr.mxu1 %v14156_v0  ;;  %v14170_v22 = vld [vmem:[#allocation63_spill] sm:$0xff]  ;;  %v14171_v0 = vld [vmem:[#allocation64_spill] sm:$0xff] }
 0x1fc   :  { %1629 = vmatpush1.msra.mxu0 %v14157_v1  ;;  %1700 = vmatpush1.msra.mxu1 %v14158_v2  ;;  %v14172_v1 = vld [vmem:[#allocation65_spill] sm:$0xff]  ;;  %v14173_v2 = vld [vmem:[#allocation66_spill] sm:$0xff] }
 0x1fd   :  { %1630 = vmatprep.subr.mxu0 %v14159_v4  ;;  %1701 = vmatprep.subr.mxu1 %v14160_v5  ;;  %v14174_v4 = vld [vmem:[#allocation67_spill] sm:$0xff]  ;;  %v14175_v5 = vld [vmem:[#allocation68_spill] sm:$0xff] }
 0x1fe   :  { %1631 = vmatpush1.msra.mxu0 %v14161_v6  ;;  %1702 = vmatpush1.msra.mxu1 %v14162_v7  ;;  %v14176_v6 = vld [vmem:[#allocation69_spill] sm:$0xff]  ;;  %v14177_v7 = vld [vmem:[#allocation70_spill] sm:$0xff] }
 0x1ff   :  { %1632 = vmatprep.subr.mxu0 %v14163_v27  ;;  %1703 = vmatprep.subr.mxu1 %v14164_v8  ;;  %v14178_v27 = vld [vmem:[#allocation71_spill] sm:$0xff]  ;;  %v14179_v8 = vld [vmem:[#allocation72_spill] sm:$0xff] }
 0x200   :  { %1633 = vmatpush1.msra.mxu0 %v14165_v9  ;;  %1704 = vmatpush1.msra.mxu1 %v14166_v10  ;;  %v14180_v9 = vld [vmem:[#allocation73_spill] sm:$0xff]  ;;  %v14181_v10 = vld [vmem:[#allocation74_spill] sm:$0xff] }
 0x201   :  { %1634 = vmatprep.subr.mxu0 %v14167_v11  ;;  %1705 = vmatprep.subr.mxu1 %v14168_v12  ;;  %v14182_v11 = vld [vmem:[#allocation75_spill] sm:$0xff]  ;;  %v14183_v12 = vld [vmem:[#allocation76_spill] sm:$0xff] }
 0x202   :  { %1635 = vmatpush1.msra.mxu0 %v14169_v13  ;;  %1706 = vmatpush1.msra.mxu1 %v14170_v22  ;;  %v14184_v13 = vld [vmem:[#allocation77_spill] sm:$0xff]  ;;  %v14185_v22 = vld [vmem:[#allocation80_spill] sm:$0xff] }
 0x203   :  { %1636 = vmatprep.subr.mxu0 %v14171_v0  ;;  %1707 = vmatprep.subr.mxu1 %v14172_v1  ;;  %v14186_v0 = vld [vmem:[#allocation81_spill] sm:$0xff]  ;;  %v14187_v1 = vld [vmem:[#allocation82_spill] sm:$0xff] }
 0x204   :  { %1637 = vmatpush1.msra.mxu0 %v14173_v2  ;;  %1708 = vmatpush1.msra.mxu1 %v14174_v4  ;;  %v14188_v2 = vld [vmem:[#allocation83_spill] sm:$0xff]  ;;  %v14189_v4 = vld [vmem:[#allocation86_spill] sm:$0xff] }
 0x205   :  { %1638 = vmatprep.subr.mxu0 %v14175_v5  ;;  %1709 = vmatprep.subr.mxu1 %v14176_v6  ;;  %v14190_v5 = vld [vmem:[#allocation87_spill] sm:$0xff]  ;;  %v14191_v6 = vld [vmem:[#allocation88_spill] sm:$0xff] }
 0x206   :  { %1639 = vmatpush1.msra.mxu0 %v14177_v7  ;;  %1710 = vmatpush1.msra.mxu1 %v14178_v27  ;;  %v14192_v7 = vld [vmem:[#allocation89_spill] sm:$0xff]  ;;  %v14193_v27 = vld [vmem:[#allocation92_spill] sm:$0xff] }
 0x207   :  { %1640 = vmatprep.subr.mxu0 %v14179_v8  ;;  %1711 = vmatprep.subr.mxu1 %v14180_v9  ;;  %v14194_v8 = vld [vmem:[#allocation93_spill] sm:$0xff]  ;;  %v14195_v9 = vld [vmem:[#allocation94_spill] sm:$0xff] }
 0x208   :  { %1641 = vmatpush1.msra.mxu0 %v14181_v10  ;;  %1712 = vmatpush1.msra.mxu1 %v14182_v11  ;;  %v14196_v10 = vld [vmem:[#allocation95_spill] sm:$0xff]  ;;  %v14197_v11 = vld [vmem:[#allocation98_spill] sm:$0xff] }
 0x209   :  { %1642 = vmatprep.subr.mxu0 %v14183_v12  ;;  %1713 = vmatprep.subr.mxu1 %v14184_v13  ;;  %v14198_v12 = vld [vmem:[#allocation99_spill] sm:$0xff]  ;;  %v14199_v13 = vld [vmem:[#allocation100_spill] sm:$0xff] }
 0x20a   :  { %1643 = vmatpush1.msra.mxu0 %v14185_v22  ;;  %1714 = vmatpush1.msra.mxu1 %v14186_v0  ;;  %v14200_v22 = vld [vmem:[#allocation101_spill] sm:$0xff]  ;;  %v14201_v0 = vld [vmem:[#allocation104_spill] sm:$0xff] }
 0x20b   :  { %1644 = vmatprep.subr.mxu0 %v14187_v1  ;;  %1715 = vmatprep.subr.mxu1 %v14188_v2  ;;  %v14202_v1 = vld [vmem:[#allocation105_spill] sm:$0xff]  ;;  %v14203_v2 = vld [vmem:[#allocation106_spill] sm:$0xff] }
 0x20c   :  { %1645 = vmatpush1.msra.mxu0 %v14189_v4  ;;  %1716 = vmatpush1.msra.mxu1 %v14190_v5  ;;  %v14204_v4 = vld [vmem:[#allocation107_spill] sm:$0xff]  ;;  %v14205_v5 = vld [vmem:[#allocation110_spill] sm:$0xff] }
 0x20d   :  { %1646 = vmatprep.subr.mxu0 %v14191_v6  ;;  %1717 = vmatprep.subr.mxu1 %v14192_v7  ;;  %v14206_v6 = vld [vmem:[#allocation111_spill] sm:$0xff]  ;;  %v14207_v7 = vld [vmem:[#allocation112_spill] sm:$0xff] }
 0x20e   :  { %1647 = vmatpush1.msra.mxu0 %v14193_v27  ;;  %1718 = vmatpush1.msra.mxu1 %v14194_v8  ;;  %v14208_v27 = vld [vmem:[#allocation113_spill] sm:$0xff]  ;;  %v14209_v8 = vld [vmem:[#allocation116_spill] sm:$0xff] }
 0x20f   :  { %1648 = vmatprep.subr.mxu0 %v14195_v9  ;;  %1719 = vmatprep.subr.mxu1 %v14196_v10  ;;  %v14210_v9 = vld [vmem:[#allocation117_spill] sm:$0xff]  ;;  %v14211_v10 = vld [vmem:[#allocation118_spill] sm:$0xff] }
 0x210   :  { %1649 = vmatpush1.msra.mxu0 %v14197_v11  ;;  %1720 = vmatpush1.msra.mxu1 %v14198_v12  ;;  %v14212_v11 = vld [vmem:[#allocation119_spill] sm:$0xff]  ;;  %v14213_v12 = vld [vmem:[#allocation122_spill] sm:$0xff] }
 0x211   :  { %1650 = vmatprep.subr.mxu0 %v14199_v13  ;;  %1721 = vmatprep.subr.mxu1 %v14200_v22  ;;  %v14214_v13 = vld [vmem:[#allocation123_spill] sm:$0xff]  ;;  %v14215_v22 = vld [vmem:[#allocation124_spill] sm:$0xff] }
 0x212   :  { %1651 = vmatpush1.msra.mxu0 %v14201_v0  ;;  %1722 = vmatpush1.msra.mxu1 %v14202_v1  ;;  %v14216_v0 = vld [vmem:[#allocation125_spill] sm:$0xff]  ;;  %v14217_v1 = vld [vmem:[#allocation128_spill] sm:$0xff] }
 0x213   :  { %1652 = vmatprep.subr.mxu0 %v14203_v2  ;;  %1723 = vmatprep.subr.mxu1 %v14204_v4  ;;  %v14218_v2 = vld [vmem:[#allocation129_spill] sm:$0xff]  ;;  %v14219_v4 = vld [vmem:[#allocation130_spill] sm:$0xff] }
 0x214   :  { %1653 = vmatpush1.msra.mxu0 %v14205_v5  ;;  %1724 = vmatpush1.msra.mxu1 %v14206_v6  ;;  %v14220_v5 = vld [vmem:[#allocation131_spill] sm:$0xff]  ;;  %v14221_v6 = vld [vmem:[#allocation134_spill] sm:$0xff] }
 0x215   :  { %1654 = vmatprep.subr.mxu0 %v14207_v7  ;;  %1725 = vmatprep.subr.mxu1 %v14208_v27  ;;  %v14222_v7 = vld [vmem:[#allocation135_spill] sm:$0xff]  ;;  %v14223_v27 = vld [vmem:[#allocation136_spill] sm:$0xff] }
 0x216   :  { %1655 = vmatpush1.msra.mxu0 %v14209_v8  ;;  %1726 = vmatpush1.msra.mxu1 %v14210_v9  ;;  %v14224_v8 = vld [vmem:[#allocation137_spill] sm:$0xff]  ;;  %v14225_v9 = vld [vmem:[#allocation140_spill] sm:$0xff] }
 0x217   :  { %1656 = vmatprep.subr.mxu0 %v14211_v10  ;;  %1727 = vmatprep.subr.mxu1 %v14212_v11  ;;  %v14226_v10 = vld [vmem:[#allocation141_spill] sm:$0xff]  ;;  %v14227_v11 = vld [vmem:[#allocation142_spill] sm:$0xff] }
 0x218   :  { %1657 = vmatpush2.msra.mxu0 %v14213_v12  ;;  %1728 = vmatpush2.msra.mxu1 %v14214_v13  ;;  %v14228_v12 = vld [vmem:[#allocation143_spill] sm:$0xff]  ;;  %v14229_v13 = vld [vmem:[#allocation146_spill] sm:$0xff] }
 0x219   :  { %1658 = vmatprep.subr.mxu0 %v14215_v22  ;;  %1729 = vmatprep.subr.mxu1 %v14216_v0  ;;  %v14230_v22 = vld [vmem:[#allocation147_spill] sm:$0xff]  ;;  %v14231_v0 = vld [vmem:[#allocation148_spill] sm:$0xff] }
 0x21a   :  { %1659 = vmatpush2.msra.mxu0 %v14217_v1  ;;  %1730 = vmatpush2.msra.mxu1 %v14218_v2  ;;  %v14232_v1 = vld [vmem:[#allocation149_spill] sm:$0xff]  ;;  %v14233_v2 = vld [vmem:[#allocation152_spill] sm:$0xff] }
 0x21b   :  { %1660 = vmatprep.subr.mxu0 %v14219_v4  ;;  %1731 = vmatprep.subr.mxu1 %v14220_v5  ;;  %v14234_v4 = vld [vmem:[#allocation153_spill] sm:$0xff]  ;;  %v14235_v5 = vld [vmem:[#allocation154_spill] sm:$0xff] }
 0x21c   :  { %1661 = vmatpush2.msra.mxu0 %v14221_v6  ;;  %1732 = vmatpush2.msra.mxu1 %v14222_v7  ;;  %v14236_v6 = vld [vmem:[#allocation157_spill] sm:$0xff]  ;;  %v14237_v7 = vld [vmem:[#allocation158_spill] sm:$0xff] }
 0x21d   :  { %1662 = vmatprep.subr.mxu0 %v14223_v27  ;;  %1733 = vmatprep.subr.mxu1 %v14224_v8  ;;  %v8170_v27 = vld [vmem:[%s13287_s2 + $0x558] sm:$0xff]  ;;  %v8176_v8 = vld [vmem:[%s13287_s2 + $0x540] sm:$0xff] }
 0x21e   :  { %1663 = vmatpush2.msra.mxu0 %v14225_v9  ;;  %1734 = vmatpush2.msra.mxu1 %v14226_v10  ;;  %14239 = vst [vmem:[#allocation4_spill] sm:$0xff] %v8170_v27  ;;  %14240 = vst [vmem:[#allocation5_spill] sm:$0xff] %v8176_v8  ;;  %v8182_v9 = vld [vmem:[%s13287_s2 + $0x550] sm:$0xff]  ;;  %v8188_v10 = vld [vmem:[%s13287_s2 + $0x508] sm:$0xff] }
 0x21f   :  { %1664 = vmatprep.subr.mxu0 %v14227_v11  ;;  %1735 = vmatprep.subr.mxu1 %v14228_v12  ;;  %14241 = vst [vmem:[#allocation6_spill] sm:$0xff] %v8182_v9  ;;  %14242 = vst [vmem:[#allocation7_spill] sm:$0xff] %v8188_v10  ;;  %v8194_v11 = vld [vmem:[%s13287_s2 + $0x518] sm:$0xff]  ;;  %v8200_v12 = vld [vmem:[%s13287_s2 + $0x500] sm:$0xff] }
 0x220   :  { %1665 = vmatpush2.msra.mxu0 %v14229_v13  ;;  %1736 = vmatpush2.msra.mxu1 %v14230_v22  ;;  %14243 = vst [vmem:[#allocation8_spill] sm:$0xff] %v8194_v11  ;;  %14244 = vst [vmem:[#allocation9_spill] sm:$0xff] %v8200_v12  ;;  %v8206_v13 = vld [vmem:[%s13287_s2 + $0x510] sm:$0xff]  ;;  %v8212_v22 = vld [vmem:[%s13287_s2 + $0x4c8] sm:$0xff] }
 0x221   :  { %1666 = vmatprep.subr.mxu0 %v14231_v0  ;;  %1737 = vmatprep.subr.mxu1 %v14232_v1  ;;  %14245 = vst [vmem:[#allocation10_spill] sm:$0xff] %v8206_v13  ;;  %14246 = vst [vmem:[#allocation11_spill] sm:$0xff] %v8212_v22  ;;  %v8218_v0 = vld [vmem:[%s13287_s2 + $0x4d8] sm:$0xff]  ;;  %v8224_v1 = vld [vmem:[%s13287_s2 + $0x4c0] sm:$0xff] }
 0x222   :  { %1667 = vmatpush2.msra.mxu0 %v14233_v2  ;;  %1738 = vmatpush2.msra.mxu1 %v14234_v4  ;;  %14247 = vst [vmem:[#allocation12_spill] sm:$0xff] %v8218_v0  ;;  %14248 = vst [vmem:[#allocation13_spill] sm:$0xff] %v8224_v1  ;;  %v8230_v2 = vld [vmem:[%s13287_s2 + $0x4d0] sm:$0xff]  ;;  %v8236_v4 = vld [vmem:[%s13287_s2 + $0x488] sm:$0xff] }
 0x223   :  { %1668 = vmatprep.subr.mxu0 %v14235_v5  ;;  %1739 = vmatprep.subr.mxu1 %v7340_v57  ;;  %v8128_v57 = vld [vmem:[%s13287_s2 + $0x5c0] sm:$0xff]  ;;  %14249 = vst [vmem:[#allocation14_spill] sm:$0xff] %v8230_v2  ;;  %14250 = vst [vmem:[#allocation15_spill] sm:$0xff] %v8236_v4  ;;  %v8242_v5 = vld [vmem:[%s13287_s2 + $0x498] sm:$0xff] }
 0x224   :  { %1669 = vmatpush2.msra.mxu0 %v7352_v32  ;;  %1740 = vmatpush2.msra.mxu1 %v7358_v54  ;;  %v8134_v32 = vld [vmem:[%s13287_s2 + $0x5d0] sm:$0xff]  ;;  %v8152_v54 = vld [vmem:[%s13287_s2 + $0x580] sm:$0xff]  ;;  %14251 = vst [vmem:[#allocation16_spill] sm:$0xff] %v8242_v5 }
 0x225   :  { %1670 = vmatprep.subr.mxu0 %v14236_v6  ;;  %1741 = vmatprep.subr.mxu1 %v14237_v7  ;;  %v8248_v6 = vld [vmem:[%s13287_s2 + $0x480] sm:$0xff]  ;;  %v8254_v7 = vld [vmem:[%s13287_s2 + $0x490] sm:$0xff] }
 0x226   :  { %1671 = vmatpush2.msra.mxu0 %v7376_v55  ;;  %1742 = vmatpush2.msra.mxu1 %v7382_v59  ;;  %v8140_v59 = vld [vmem:[%s13287_s2 + $0x588] sm:$0xff]  ;;  %v8146_v55 = vld [vmem:[%s13287_s2 + $0x598] sm:$0xff]  ;;  %14252 = vst [vmem:[#allocation17_spill] sm:$0xff] %v8248_v6  ;;  %14253 = vst [vmem:[#allocation18_spill] sm:$0xff] %v8254_v7 }
 0x227   :  { %1672 = vmatprep.subr.mxu0 %v7388_v15  ;;  %1743 = vmatprep.subr.mxu1 %v7394_v14  ;;  %v8158_v15 = vld [vmem:[%s13287_s2 + $0x590] sm:$0xff]  ;;  %v8164_v14 = vld [vmem:[%s13287_s2 + $0x548] sm:$0xff] }
 0x228   :  { %1673 = vmatpush2.msra.mxu0 %v8128_v57  ;;  %1744 = vmatpush2.msra.mxu1 %v8134_v32  ;;  %14238 = vst [vmem:[#allocation3_spill] sm:$0xff] %v8164_v14 }
 0x229   :  { %1674 = vmatprep.subr.mxu0 %v8140_v59  ;;  %1745 = vmatprep.subr.mxu1 %v8146_v55 }
 0x22a   :  { %1675 = vmatpush2.msra.mxu0 %v8152_v54  ;;  %1746 = vmatpush2.msra.mxu1 %v8158_v15 }
 0x22b   :  { %1676 = vmatprep.subr.mxu0 %v8164_v14  ;;  %1747 = vmatprep.subr.mxu1 %v8170_v27 }
 0x22c   :  { %1677 = vmatpush2.msra.mxu0 %v8176_v8  ;;  %1748 = vmatpush2.msra.mxu1 %v8182_v9 }
 0x22d   :  { %1678 = vmatprep.subr.mxu0 %v8188_v10  ;;  %1749 = vmatprep.subr.mxu1 %v8194_v11 }
 0x22e   :  { %1679 = vmatpush2.msra.mxu0 %v8200_v12  ;;  %1750 = vmatpush2.msra.mxu1 %v8206_v13 }
 0x22f   :  { %1680 = vmatprep.subr.mxu0 %v8212_v22  ;;  %1751 = vmatprep.subr.mxu1 %v8218_v0 }
 0x230   :  { %1681 = vmatpush2.msra.mxu0 %v8224_v1  ;;  %1752 = vmatpush2.msra.mxu1 %v8230_v2 }
 0x231   :  { %1682 = vmatprep.subr.mxu0 %v8236_v4  ;;  %1753 = vmatprep.subr.mxu1 %v8242_v5  ;;  %v8266_v5 = vld [vmem:[%s13287_s2 + $0x458] sm:$0xff] }
 0x232   :  { %1683 = vmatpush2.msra.mxu0 %v8248_v6  ;;  %1754 = vmatpush2.msra.mxu1 %v8254_v7  ;;  %14255 = vst [vmem:[#allocation20_spill] sm:$0xff] %v8266_v5  ;;  %v8272_v6 = vld [vmem:[%s13287_s2 + $0x440] sm:$0xff]  ;;  %v8278_v7 = vld [vmem:[%s13287_s2 + $0x450] sm:$0xff]  ;;  %v14264_v4 = vld [vmem:[#allocation78_spill] sm:$0xff] }
 0x233   :  { %1684 = vmatprep.subr.mxu0 %v8260_v28  ;;  %1755 = vmatprep.subr.mxu1 %v8266_v5  ;;  %14256 = vst [vmem:[#allocation21_spill] sm:$0xff] %v8272_v6  ;;  %14257 = vst [vmem:[#allocation22_spill] sm:$0xff] %v8278_v7  ;;  %v8284_v28 = vld [vmem:[%s13287_s2 + $0x408] sm:$0xff]  ;;  %v8290_v5 = vld [vmem:[%s13287_s2 + $0x418] sm:$0xff] }
 0x234   :  { %1685 = vmatpush2.msra.mxu0 %v8272_v6  ;;  %1756 = vmatpush2.msra.mxu1 %v8278_v7  ;;  %14258 = vst [vmem:[#allocation23_spill] sm:$0xff] %v8284_v28  ;;  %14259 = vst [vmem:[#allocation24_spill] sm:$0xff] %v8290_v5  ;;  %v8296_v6 = vld [vmem:[%s13287_s2 + $0x400] sm:$0xff]  ;;  %v8302_v7 = vld [vmem:[%s13287_s2 + $0x410] sm:$0xff] }
 0x235   :  { %1686 = vmatprep.subr.mxu0 %v8284_v28  ;;  %1757 = vmatprep.subr.mxu1 %v8290_v5  ;;  %14260 = vst [vmem:[#allocation25_spill] sm:$0xff] %v8296_v6  ;;  %14261 = vst [vmem:[#allocation26_spill] sm:$0xff] %v8302_v7  ;;  %v8308_v28 = vld [vmem:[%s13287_s2 + $0x3e8] sm:$0xff]  ;;  %v8314_v5 = vld [vmem:[%s13287_s2 + $0x3f8] sm:$0xff] }
 0x236   :  { %1687 = vmatpush2.msra.mxu0 %v8296_v6  ;;  %1758 = vmatpush2.msra.mxu1 %v8302_v7  ;;  %14262 = vst [vmem:[#allocation27_spill] sm:$0xff] %v8308_v28  ;;  %14263 = vst [vmem:[#allocation28_spill] sm:$0xff] %v8314_v5  ;;  %v14265_v7 = vld [vmem:[#allocation84_spill] sm:$0xff] }
 0x237   :  { %1766 = vmatprep.subr.mxu0 %v8308_v28  ;;  %1837 = vmatprep.subr.mxu1 %v8314_v5  ;;  %v14266_v28 = vld [vmem:[#allocation85_spill] sm:$0xff] }
 0x275   :  { %v1340_v6 = vpop.f32.mrf.mxu0  ;;  %v1411_v12 = vpop.f32.mrf.mxu1 }
 0x276   :  { %v1562_v2 = vadd.f32 %v1340_v6, %v14264_v4 }
 0x277   :  { %v1342_v1 = vpop.f32.mrf.mxu0  ;;  %v1413_v11 = vpop.f32.mrf.mxu1 }
 0x278   :  { %v4025_v0 = vmul.f32 -1.442695, %v1562_v2  ;;  %v1563_v22 = vadd.f32 %v1342_v1, %v14265_v7  ;;  %v1565_v10 = vadd.f32 %v1413_v11, %v14266_v28  ;;  %v467_v28 = vadd.f32 %v7479_v46, %v7499_v61 }
 0x27a   :  { %4223 = vpow2.f32 %v4025_v0  ;;  %v4026_v13 = vmul.f32 -1.442695, %v1563_v22 }
 0x27c   :  { %4225 = vpow2.f32 %v4026_v13  ;;  %v465_v13 = vadd.f32 %v7475_v44, %v7496_v52  ;;  %v580_v44 = vadd.f32 %v7483_v42, %v7512_v50 }
 0x27d   :  { %4227 = vtanh.f32 %v1565_v10 }
 0x287   :  { %v4224_v9 = vpop.eup %4223 }
 0x288   :  { %v1583_v8 = vadd.f32 1.0, %v4224_v9 }
 0x289   :  { %v4226_v27 = vpop.eup %4225 }
 0x28a   :  { %4229 = vrcp.f32 %v1583_v8  ;;  %v1584_v5 = vadd.f32 1.0, %v4226_v27  ;;  %v4228_v14 = vpop.eup %4227 }
 0x28c   :  { %4231 = vrcp.f32 %v1584_v5 }
 0x297   :  { %v4230_v4 = vpop.eup %4229 }
 0x298   :  { %v1613_v6 = vmul.f32 %v4230_v4, %v4228_v14  ;;  %v14267_v4 = vld [vmem:[#allocation79_spill] sm:$0xff] }
 0x299   :  { %v4232_v2 = vpop.eup %4231 }
 0x29a   :  { %v1612_v1 = vmul.f32 %v4232_v2, %v7491_v21  ;;  %v578_v21 = vadd.f32 %v7481_v47, %v7505_v19 }
 0x29c   :  { %v8321_v0 = vadd.f32 %v1613_v6, %v1612_v1  ;;  %v1564_v6 = vadd.f32 %v1411_v12, %v14267_v4 }
 0x2b6   :  { %v1482_v22 = vpop.f32.mrf.mxu0  ;;  %v1553_v14 = vpop.f32.mrf.mxu1 }
 0x2b7   :  { %v1570_v9 = vadd.f32 %v1482_v22, %v465_v13  ;;  %v1572_v5 = vadd.f32 %v1553_v14, %v578_v21  ;;  %v4027_v13 = vmul.f32 -1.442695, %v1564_v6 }
 0x2b8   :  { %v1484_v10 = vpop.f32.mrf.mxu0  ;;  %v1555_v7 = vpop.f32.mrf.mxu1 }
 0x2b9   :  { %v4028_v8 = vmul.f32 -1.442695, %v1570_v9  ;;  %v1571_v27 = vadd.f32 %v1484_v10, %v467_v28  ;;  %v4030_v2 = vmul.f32 -1.442695, %v1572_v5  ;;  %v1573_v46 = vadd.f32 %v1555_v7, %v580_v44 }
 0x2bb   :  { %4233 = vpow2.f32 %v4028_v8  ;;  %v4029_v11 = vmul.f32 -1.442695, %v1571_v27 }
 0x2bd   :  { %4235 = vpow2.f32 %v4029_v11 }
 0x2be   :  { %4237 = vpow2.f32 %v4030_v2 }
 0x2bf   :  { %4239 = vtanh.f32 %v1573_v46  ;;  %v1273_v46 = vmax.f32 %v7519_v26, 0.0  ;;  %v14269_v26 = vld [vmem:[#allocation185_spill] sm:$0xff] }
 0x2c8   :  { %v4234_v1 = vpop.eup %4233 }
 0x2c9   :  { %v1601_v22 = vadd.f32 1.0, %v4234_v1 }
 0x2ca   :  { %v4236_v28 = vpop.eup %4235 }
 0x2cb   :  { %4241 = vrcp.f32 %v1601_v22  ;;  %v1602_v9 = vadd.f32 1.0, %v4236_v28  ;;  %v4238_v47 = vpop.eup %4237  ;;  %v14297_v22 = vld [vmem:[#allocation213_spill] sm:$0xff]  ;;  %v14298_v28 = vld [vmem:[#allocation214_spill] sm:$0xff] }
 0x2cc   :  { %4243 = vpow2.f32 %v4027_v13  ;;  %v4240_v10 = vpop.eup %4239  ;;  %v1603_v14 = vadd.f32 1.0, %v4238_v47  ;;  %v14296_v13 = vld [vmem:[#allocation212_spill] sm:$0xff] }
 0x2cd   :  { %4245 = vrcp.f32 %v1602_v9  ;;  %v14299_v9 = vld [vmem:[#allocation215_spill] sm:$0xff]  ;;  %v14300_v47 = vld [vmem:[#allocation216_spill] sm:$0xff] }
 0x2ce   :  { %4247 = vtanh.f32 %v8321_v0 }
 0x2cf   :  { %4249 = vrcp.f32 %v1603_v14  ;;  %v14306_v14 = vld [vmem:[#allocation222_spill] sm:$0xff] }
 0x2d8   :  { %v4242_v8 = vpop.eup %4241 }
 0x2d9   :  { %v4244_v27 = vpop.eup %4243  ;;  %v1616_v11 = vmul.f32 %v4242_v8, %v4240_v10  ;;  %v14301_v10 = vld [vmem:[#allocation217_spill] sm:$0xff]  ;;  %v14302_v8 = vld [vmem:[#allocation218_spill] sm:$0xff] }
 0x2da   :  { %v4246_v42 = vpop.eup %4245  ;;  %v1585_v21 = vadd.f32 1.0, %v4244_v27  ;;  %v14303_v27 = vld [vmem:[#allocation219_spill] sm:$0xff] }
 0x2db   :  { %v1615_v12 = vmul.f32 %v4246_v42, %v7516_v48  ;;  %v4248_v7 = vpop.eup %4247  ;;  %v14305_v42 = vld [vmem:[#allocation221_spill] sm:$0xff] }
 0x2dc   :  { %v4250_v44 = vpop.eup %4249 }
 0x2dd   :  { %v8334_v5 = vadd.f32 %v1616_v11, %v1615_v12  ;;  %v14304_v11 = vld [vmem:[#allocation220_spill] sm:$0xff]  ;;  %v14307_v12 = vld [vmem:[#allocation223_spill] sm:$0xff] }
 0x2df   :  { %4251 = vtanh.f32 %v8334_v5 }
 0x2e0   :  { %4253 = vrcp.f32 %v1585_v21  ;;  %v14308_v21 = vld [vmem:[#allocation224_spill] sm:$0xff] }
 0x2ec   :  { %v4252_v4 = vpop.eup %4251 }
 0x2ed   :  { %v4254_v6 = vpop.eup %4253  ;;  %v1621_v2 = vmul.f32 %v4252_v4, %v4250_v44  ;;  %v14310_v44 = vld [vmem:[#allocation226_spill] sm:$0xff]  ;;  %v14311_v4 = vld [vmem:[#allocation227_spill] sm:$0xff] }
 0x2ee   :  { %v8338_v1 = vmul.f32 %v4254_v6, %v4248_v7  ;;  %v14309_v7 = vld [vmem:[#allocation225_spill] sm:$0xff]  ;;  %v14312_v6 = vld [vmem:[#allocation228_spill] sm:$0xff] }
 0x2ef   :  { %1688 = vmatprep.mubr.f32.mxu0 %v1621_v2  ;;  %1759 = vmatprep.mubr.f32.mxu1 %v1621_v2  ;;  %v8340_v48 = vmax.f32 %v1273_v46, %v1621_v2  ;;  %v8427_v46 = vld [vmem:[%s13287_s2 + $0x738] sm:$0xff] }
 0x2f0   :  { %14268 = vst [vmem:[#allocation29_spill] sm:$0xff] %v8338_v1  ;;  %1689 = vmatmul.mubr.f32.vlgmr.msra.gmra.mxu0 %v8338_v1  ;;  %1760 = vmatmul.mubr.f32.vlgmr.msra.gmra.mxu1 %v8338_v1 }
 0x2f1   :  { %1767 = vmatpush1.msra.mxu0 %v7530_v33  ;;  %1838 = vmatpush1.msra.mxu1 %v7536_v51  ;;  %v14270_v33 = vld [vmem:[#allocation186_spill] sm:$0xff]  ;;  %v14271_v51 = vld [vmem:[#allocation187_spill] sm:$0xff] }
 0x2f2   :  { %1768 = vmatprep.subr.mxu0 %v7542_v3  ;;  %1830 = vmatprep.mubr.f32.mxu0 %v1621_v2  ;;  %v14272_v3 = vld [vmem:[#allocation188_spill] sm:$0xff] }
 0x2f3   :  { %1839 = vmatprep.subr.mxu1 %v7549_v63  ;;  %1901 = vmatprep.mubr.f32.mxu1 %v1621_v2  ;;  %v14280_v63 = vld [vmem:[#allocation196_spill] sm:$0xff] }
 0x2f4   :  { %1769 = vmatpush1.msra.mxu0 %v7556_v16  ;;  %1840 = vmatpush1.msra.mxu1 %v7562_v56  ;;  %v14281_v16 = vld [vmem:[#allocation197_spill] sm:$0xff]  ;;  %v14282_v56 = vld [vmem:[#allocation198_spill] sm:$0xff]  ;;  %v8421_v2 = vld [vmem:[%s13287_s2 + $0x728] sm:$0xff] }
 0x2f5   :  { %1770 = vmatprep.subr.mxu0 %v7568_v58  ;;  %1841 = vmatprep.subr.mxu1 %v7574_v18  ;;  %v14283_v58 = vld [vmem:[#allocation199_spill] sm:$0xff]  ;;  %v14284_v18 = vld [vmem:[#allocation200_spill] sm:$0xff] }
 0x2f6   :  { %1771 = vmatpush1.msra.mxu0 %v7580_v29  ;;  %1842 = vmatpush1.msra.mxu1 %v7586_v60  ;;  %v14285_v29 = vld [vmem:[#allocation201_spill] sm:$0xff]  ;;  %v14286_v60 = vld [vmem:[#allocation202_spill] sm:$0xff] }
 0x2f7   :  { %1772 = vmatprep.subr.mxu0 %v7592_v53  ;;  %1843 = vmatprep.subr.mxu1 %v7598_v62  ;;  %v14287_v53 = vld [vmem:[#allocation203_spill] sm:$0xff]  ;;  %v14288_v62 = vld [vmem:[#allocation204_spill] sm:$0xff] }
 0x2f8   :  { %1773 = vmatpush1.msra.mxu0 %v7604_v17  ;;  %1844 = vmatpush1.msra.mxu1 %v7610_v20  ;;  %v14289_v17 = vld [vmem:[#allocation205_spill] sm:$0xff]  ;;  %v14290_v20 = vld [vmem:[#allocation206_spill] sm:$0xff] }
 0x2f9   :  { %1774 = vmatprep.subr.mxu0 %v7616_v23  ;;  %1845 = vmatprep.subr.mxu1 %v7622_v49  ;;  %v14291_v23 = vld [vmem:[#allocation207_spill] sm:$0xff]  ;;  %v14292_v49 = vld [vmem:[#allocation208_spill] sm:$0xff] }
 0x2fa   :  { %1775 = vmatpush1.msra.mxu0 %v7628_v24  ;;  %1846 = vmatpush1.msra.mxu1 %v7634_v37  ;;  %v14293_v24 = vld [vmem:[#allocation209_spill] sm:$0xff]  ;;  %v14294_v37 = vld [vmem:[#allocation210_spill] sm:$0xff] }
 0x2fb   :  { %1776 = vmatprep.subr.mxu0 %v7640_v25  ;;  %1847 = vmatprep.subr.mxu1 %v7646_v30  ;;  %v14273_v30 = vld [vmem:[#allocation189_spill] sm:$0xff]  ;;  %v14295_v25 = vld [vmem:[#allocation211_spill] sm:$0xff] }
 0x2fc   :  { %1777 = vmatpush1.msra.mxu0 %v7652_v31  ;;  %1848 = vmatpush1.msra.mxu1 %v7658_v40  ;;  %v14274_v31 = vld [vmem:[#allocation190_spill] sm:$0xff]  ;;  %v14275_v40 = vld [vmem:[#allocation191_spill] sm:$0xff] }
 0x2fd   :  { %1778 = vmatprep.subr.mxu0 %v7664_v38  ;;  %1849 = vmatprep.subr.mxu1 %v7670_v35  ;;  %v14276_v38 = vld [vmem:[#allocation192_spill] sm:$0xff]  ;;  %v14277_v35 = vld [vmem:[#allocation193_spill] sm:$0xff] }
 0x2fe   :  { %1779 = vmatpush1.msra.mxu0 %v7676_v36  ;;  %1850 = vmatpush1.msra.mxu1 %v7682_v34  ;;  %v14278_v36 = vld [vmem:[#allocation194_spill] sm:$0xff]  ;;  %v14279_v34 = vld [vmem:[#allocation195_spill] sm:$0xff] }
 0x2ff   :  { %1780 = vmatprep.subr.mxu0 %v14269_v26  ;;  %1851 = vmatprep.subr.mxu1 %v14270_v33  ;;  %v8457_v26 = vld [vmem:[%s13287_s2 + $0x6e0] sm:$0xff]  ;;  %v8463_v33 = vld [vmem:[%s13287_s2 + $0x6f0] sm:$0xff] }
 0x300   :  { %1781 = vmatpush1.msra.mxu0 %v14271_v51  ;;  %1852 = vmatpush1.msra.mxu1 %v14272_v3  ;;  %v8469_v51 = vld [vmem:[%s13287_s2 + $0x6a8] sm:$0xff]  ;;  %v8475_v3 = vld [vmem:[%s13287_s2 + $0x6b8] sm:$0xff] }
 0x301   :  { %1782 = vmatprep.subr.mxu0 %v14273_v30  ;;  %1853 = vmatprep.subr.mxu1 %v14274_v31  ;;  %v8481_v30 = vld [vmem:[%s13287_s2 + $0x6a0] sm:$0xff]  ;;  %v8487_v31 = vld [vmem:[%s13287_s2 + $0x6b0] sm:$0xff] }
 0x302   :  { %1783 = vmatpush1.msra.mxu0 %v14275_v40  ;;  %1854 = vmatpush1.msra.mxu1 %v14276_v38  ;;  %v8493_v40 = vld [vmem:[%s13287_s2 + $0x668] sm:$0xff]  ;;  %v8499_v38 = vld [vmem:[%s13287_s2 + $0x678] sm:$0xff] }
 0x303   :  { %1784 = vmatprep.subr.mxu0 %v14277_v35  ;;  %1855 = vmatprep.subr.mxu1 %v14278_v36  ;;  %v8505_v35 = vld [vmem:[%s13287_s2 + $0x660] sm:$0xff]  ;;  %v8511_v36 = vld [vmem:[%s13287_s2 + $0x670] sm:$0xff] }
 0x304   :  { %1785 = vmatpush1.msra.mxu0 %v14279_v34  ;;  %1856 = vmatpush1.msra.mxu1 %v14280_v63  ;;  %v8517_v34 = vld [vmem:[%s13287_s2 + $0x628] sm:$0xff]  ;;  %v8523_v63 = vld [vmem:[%s13287_s2 + $0x638] sm:$0xff] }
 0x305   :  { %1786 = vmatprep.subr.mxu0 %v14281_v16  ;;  %1857 = vmatprep.subr.mxu1 %v14282_v56  ;;  %v8529_v16 = vld [vmem:[%s13287_s2 + $0x620] sm:$0xff]  ;;  %v8535_v56 = vld [vmem:[%s13287_s2 + $0x630] sm:$0xff] }
 0x306   :  { %1787 = vmatpush1.msra.mxu0 %v14283_v58  ;;  %1858 = vmatpush1.msra.mxu1 %v14284_v18  ;;  %v8541_v58 = vld [vmem:[%s13287_s2 + $0x5e8] sm:$0xff]  ;;  %v8547_v18 = vld [vmem:[%s13287_s2 + $0x5f8] sm:$0xff] }
 0x307   :  { %1788 = vmatprep.subr.mxu0 %v14285_v29  ;;  %1859 = vmatprep.subr.mxu1 %v14286_v60  ;;  %v8553_v29 = vld [vmem:[%s13287_s2 + $0x5e0] sm:$0xff]  ;;  %v8559_v60 = vld [vmem:[%s13287_s2 + $0x5f0] sm:$0xff] }
 0x308   :  { %1789 = vmatpush1.msra.mxu0 %v14287_v53  ;;  %1860 = vmatpush1.msra.mxu1 %v14288_v62  ;;  %v8565_v53 = vld [vmem:[%s13287_s2 + $0x5a8] sm:$0xff]  ;;  %v8571_v62 = vld [vmem:[%s13287_s2 + $0x5b8] sm:$0xff] }
 0x309   :  { %1790 = vmatprep.subr.mxu0 %v14289_v17  ;;  %1861 = vmatprep.subr.mxu1 %v14290_v20  ;;  %v8577_v17 = vld [vmem:[%s13287_s2 + $0x5a0] sm:$0xff]  ;;  %v8583_v20 = vld [vmem:[%s13287_s2 + $0x5b0] sm:$0xff] }
 0x30a   :  { %1791 = vmatpush1.msra.mxu0 %v14291_v23  ;;  %1862 = vmatpush1.msra.mxu1 %v14292_v49  ;;  %v8589_v23 = vld [vmem:[%s13287_s2 + $0x568] sm:$0xff]  ;;  %v8595_v49 = vld [vmem:[%s13287_s2 + $0x578] sm:$0xff] }
 0x30b   :  { %1792 = vmatprep.subr.mxu0 %v14293_v24  ;;  %1863 = vmatprep.subr.mxu1 %v14294_v37  ;;  %v8601_v24 = vld [vmem:[%s13287_s2 + $0x560] sm:$0xff]  ;;  %v8607_v37 = vld [vmem:[%s13287_s2 + $0x570] sm:$0xff] }
 0x30c   :  { %1793 = vmatpush1.msra.mxu0 %v14295_v25  ;;  %1864 = vmatpush1.msra.mxu1 %v14296_v13  ;;  %v8613_v25 = vld [vmem:[%s13287_s2 + $0x528] sm:$0xff]  ;;  %v8619_v13 = vld [vmem:[%s13287_s2 + $0x538] sm:$0xff] }
 0x30d   :  { %1794 = vmatprep.subr.mxu0 %v14297_v22  ;;  %1865 = vmatprep.subr.mxu1 %v14298_v28  ;;  %v8625_v22 = vld [vmem:[%s13287_s2 + $0x520] sm:$0xff]  ;;  %v8631_v28 = vld [vmem:[%s13287_s2 + $0x530] sm:$0xff] }
 0x30e   :  { %1795 = vmatpush1.msra.mxu0 %v14299_v9  ;;  %1866 = vmatpush1.msra.mxu1 %v14300_v47  ;;  %v8637_v9 = vld [vmem:[%s13287_s2 + $0x4e8] sm:$0xff]  ;;  %v8643_v47 = vld [vmem:[%s13287_s2 + $0x4f8] sm:$0xff] }
 0x30f   :  { %1796 = vmatprep.subr.mxu0 %v14301_v10  ;;  %1867 = vmatprep.subr.mxu1 %v14302_v8  ;;  %v8649_v10 = vld [vmem:[%s13287_s2 + $0x4e0] sm:$0xff]  ;;  %v8655_v8 = vld [vmem:[%s13287_s2 + $0x4f0] sm:$0xff] }
 0x310   :  { %1797 = vmatpush1.msra.mxu0 %v14303_v27  ;;  %1868 = vmatpush1.msra.mxu1 %v14304_v11  ;;  %14313 = vst [vmem:[#allocation30_spill] sm:$0xff] %v8649_v10  ;;  %14314 = vst [vmem:[#allocation31_spill] sm:$0xff] %v8655_v8  ;;  %v8661_v27 = vld [vmem:[%s13287_s2 + $0x4a8] sm:$0xff]  ;;  %v8667_v11 = vld [vmem:[%s13287_s2 + $0x4b8] sm:$0xff] }
 0x311   :  { %1798 = vmatprep.subr.mxu0 %v14305_v42  ;;  %1869 = vmatprep.subr.mxu1 %v14306_v14  ;;  %14315 = vst [vmem:[#allocation32_spill] sm:$0xff] %v8661_v27  ;;  %14316 = vst [vmem:[#allocation33_spill] sm:$0xff] %v8667_v11  ;;  %v8673_v42 = vld [vmem:[%s13287_s2 + $0x4a0] sm:$0xff]  ;;  %v8679_v14 = vld [vmem:[%s13287_s2 + $0x4b0] sm:$0xff] }
 0x312   :  { %1799 = vmatpush2.msra.mxu0 %v14307_v12  ;;  %1870 = vmatpush2.msra.mxu1 %v14308_v21  ;;  %14317 = vst [vmem:[#allocation34_spill] sm:$0xff] %v8673_v42  ;;  %14318 = vst [vmem:[#allocation35_spill] sm:$0xff] %v8679_v14  ;;  %v8685_v12 = vld [vmem:[%s13287_s2 + $0x468] sm:$0xff]  ;;  %v8691_v21 = vld [vmem:[%s13287_s2 + $0x478] sm:$0xff] }
 0x313   :  { %1800 = vmatprep.subr.mxu0 %v14309_v7  ;;  %1871 = vmatprep.subr.mxu1 %v14310_v44  ;;  %14319 = vst [vmem:[#allocation36_spill] sm:$0xff] %v8685_v12  ;;  %14320 = vst [vmem:[#allocation37_spill] sm:$0xff] %v8691_v21  ;;  %v8697_v7 = vld [vmem:[%s13287_s2 + $0x460] sm:$0xff]  ;;  %v8703_v44 = vld [vmem:[%s13287_s2 + $0x470] sm:$0xff] }
 0x314   :  { %1801 = vmatpush2.msra.mxu0 %v14311_v4  ;;  %1872 = vmatpush2.msra.mxu1 %v14312_v6  ;;  %14321 = vst [vmem:[#allocation38_spill] sm:$0xff] %v8697_v7  ;;  %14322 = vst [vmem:[#allocation39_spill] sm:$0xff] %v8703_v44  ;;  %v8709_v4 = vld [vmem:[%s13287_s2 + $0x428] sm:$0xff]  ;;  %v8715_v6 = vld [vmem:[%s13287_s2 + $0x438] sm:$0xff] }
 0x315   :  { %1802 = vmatprep.subr.mxu0 %v7952_v45  ;;  %1873 = vmatprep.subr.mxu1 %v7958_v43  ;;  %v8445_v43 = vld [vmem:[%s13287_s2 + $0x6e8] sm:$0xff]  ;;  %v8451_v45 = vld [vmem:[%s13287_s2 + $0x6f8] sm:$0xff]  ;;  %14323 = vst [vmem:[#allocation40_spill] sm:$0xff] %v8709_v4  ;;  %14324 = vst [vmem:[#allocation41_spill] sm:$0xff] %v8715_v6 }
 0x316   :  { %1803 = vmatpush2.msra.mxu0 %v7964_v39  ;;  %1874 = vmatpush2.msra.mxu1 %v7970_v41  ;;  %v8433_v39 = vld [vmem:[%s13287_s2 + $0x720] sm:$0xff]  ;;  %v8439_v41 = vld [vmem:[%s13287_s2 + $0x730] sm:$0xff] }
 0x317   :  { %1804 = vmatprep.subr.mxu0 %v8421_v2  ;;  %1875 = vmatprep.subr.mxu1 %v8427_v46 }
 0x318   :  { %1805 = vmatpush2.msra.mxu0 %v8433_v39  ;;  %1876 = vmatpush2.msra.mxu1 %v8439_v41 }
 0x319   :  { %1806 = vmatprep.subr.mxu0 %v8445_v43  ;;  %1877 = vmatprep.subr.mxu1 %v8451_v45 }
 0x31a   :  { %1807 = vmatpush2.msra.mxu0 %v8457_v26  ;;  %1878 = vmatpush2.msra.mxu1 %v8463_v33 }
 0x31b   :  { %1808 = vmatprep.subr.mxu0 %v8469_v51  ;;  %1879 = vmatprep.subr.mxu1 %v8475_v3 }
 0x31c   :  { %1809 = vmatpush2.msra.mxu0 %v8481_v30  ;;  %1880 = vmatpush2.msra.mxu1 %v8487_v31 }
 0x31d   :  { %1810 = vmatprep.subr.mxu0 %v8493_v40  ;;  %1881 = vmatprep.subr.mxu1 %v8499_v38 }
 0x31e   :  { %1811 = vmatpush2.msra.mxu0 %v8505_v35  ;;  %1882 = vmatpush2.msra.mxu1 %v8511_v36 }
 0x31f   :  { %1812 = vmatprep.subr.mxu0 %v8517_v34  ;;  %1883 = vmatprep.subr.mxu1 %v8523_v63 }
 0x320   :  { %1813 = vmatpush2.msra.mxu0 %v8529_v16  ;;  %1884 = vmatpush2.msra.mxu1 %v8535_v56 }
 0x321   :  { %1814 = vmatprep.subr.mxu0 %v8541_v58  ;;  %1885 = vmatprep.subr.mxu1 %v8547_v18 }
 0x322   :  { %1815 = vmatpush2.msra.mxu0 %v8553_v29  ;;  %1886 = vmatpush2.msra.mxu1 %v8559_v60 }
 0x323   :  { %1816 = vmatprep.subr.mxu0 %v8565_v53  ;;  %1887 = vmatprep.subr.mxu1 %v8571_v62 }
 0x324   :  { %1817 = vmatpush2.msra.mxu0 %v8577_v17  ;;  %1888 = vmatpush2.msra.mxu1 %v8583_v20 }
 0x325   :  { %1818 = vmatprep.subr.mxu0 %v8589_v23  ;;  %1889 = vmatprep.subr.mxu1 %v8595_v49 }
 0x326   :  { %1819 = vmatpush2.msra.mxu0 %v8601_v24  ;;  %1890 = vmatpush2.msra.mxu1 %v8607_v37 }
 0x327   :  { %1820 = vmatprep.subr.mxu0 %v8613_v25  ;;  %1891 = vmatprep.subr.mxu1 %v8619_v13 }
 0x328   :  { %1821 = vmatpush2.msra.mxu0 %v8625_v22  ;;  %1892 = vmatpush2.msra.mxu1 %v8631_v28 }
 0x329   :  { %1822 = vmatprep.subr.mxu0 %v8637_v9  ;;  %1893 = vmatprep.subr.mxu1 %v8643_v47 }
 0x32a   :  { %1823 = vmatpush2.msra.mxu0 %v8649_v10  ;;  %1894 = vmatpush2.msra.mxu1 %v8655_v8 }
 0x32b   :  { %1824 = vmatprep.subr.mxu0 %v8661_v27  ;;  %1895 = vmatprep.subr.mxu1 %v8667_v11 }
 0x32c   :  { %1825 = vmatpush2.msra.mxu0 %v8673_v42  ;;  %1896 = vmatpush2.msra.mxu1 %v8679_v14  ;;  %v14453_v42 = vld [vmem:[#allocation97_spill] sm:$0xff] }
 0x32d   :  { %1826 = vmatprep.subr.mxu0 %v8685_v12  ;;  %1897 = vmatprep.subr.mxu1 %v8691_v21 }
 0x32e   :  { %1827 = vmatpush2.msra.mxu0 %v8697_v7  ;;  %1898 = vmatpush2.msra.mxu1 %v8703_v44  ;;  %v8721_v7 = vld [vmem:[%s13287_s2 + $0x420] sm:$0xff]  ;;  %v8727_v44 = vld [vmem:[%s13287_s2 + $0x430] sm:$0xff] }
 0x32f   :  { %1828 = vmatprep.subr.mxu0 %v8709_v4  ;;  %1899 = vmatprep.subr.mxu1 %v8715_v6  ;;  %14325 = vst [vmem:[#allocation42_spill] sm:$0xff] %v8721_v7  ;;  %14326 = vst [vmem:[#allocation43_spill] sm:$0xff] %v8727_v44  ;;  %v8735_v6 = vld [vmem:[%s13287_s2 + $0x3c8] sm:$0xff]  ;;  %v14428_v4 = vld [vmem:[#allocation6_spill] sm:$0xff] }
 0x330   :  { %1829 = vmatpush2.msra.mxu0 %v8721_v7  ;;  %1900 = vmatpush2.msra.mxu1 %v8727_v44  ;;  %14327 = vst [vmem:[#allocation44_spill] sm:$0xff] %v8735_v6  ;;  %v8741_v7 = vld [vmem:[%s13287_s2 + $0x3d8] sm:$0xff]  ;;  %v8747_v44 = vld [vmem:[%s13287_s2 + $0x3c0] sm:$0xff] }
 0x331   :  { %1831 = vmatmul.mubr.f32.vlgmr.msra.gmra.mxu0 %v8338_v1  ;;  %1902 = vmatmul.mubr.f32.vlgmr.msra.gmra.mxu1 %v8338_v1  ;;  %14328 = vst [vmem:[#allocation45_spill] sm:$0xff] %v8741_v7  ;;  %14329 = vst [vmem:[#allocation46_spill] sm:$0xff] %v8747_v44  ;;  %v8753_v1 = vld [vmem:[%s13287_s2 + $0x3d0] sm:$0xff] }
 0x332   :  { %1974 = vmatprep.subr.mxu0 %v8735_v6  ;;  %2045 = vmatprep.subr.mxu1 %v8741_v7  ;;  %14330 = vst [vmem:[#allocation47_spill] sm:$0xff] %v8753_v1  ;;  %v8759_v6 = vld [vmem:[%s13287_s2 + $0x388] sm:$0xff]  ;;  %v8765_v7 = vld [vmem:[%s13287_s2 + $0x398] sm:$0xff] }
 0x333   :  { %1975 = vmatpush1.msra.mxu0 %v8747_v44  ;;  %2046 = vmatpush1.msra.mxu1 %v8753_v1  ;;  %14331 = vst [vmem:[#allocation48_spill] sm:$0xff] %v8759_v6  ;;  %14332 = vst [vmem:[#allocation49_spill] sm:$0xff] %v8765_v7  ;;  %v8771_v44 = vld [vmem:[%s13287_s2 + $0x380] sm:$0xff]  ;;  %v8777_v1 = vld [vmem:[%s13287_s2 + $0x390] sm:$0xff] }
 0x334   :  { %1976 = vmatprep.subr.mxu0 %v8759_v6  ;;  %2047 = vmatprep.subr.mxu1 %v8765_v7  ;;  %14333 = vst [vmem:[#allocation50_spill] sm:$0xff] %v8771_v44  ;;  %14334 = vst [vmem:[#allocation51_spill] sm:$0xff] %v8777_v1  ;;  %v8783_v6 = vld [vmem:[%s13287_s2 + $0x348] sm:$0xff]  ;;  %v8789_v7 = vld [vmem:[%s13287_s2 + $0x358] sm:$0xff] }
 0x335   :  { %1977 = vmatpush1.msra.mxu0 %v8771_v44  ;;  %2048 = vmatpush1.msra.mxu1 %v8777_v1  ;;  %14335 = vst [vmem:[#allocation52_spill] sm:$0xff] %v8783_v6  ;;  %14336 = vst [vmem:[#allocation53_spill] sm:$0xff] %v8789_v7  ;;  %v8795_v44 = vld [vmem:[%s13287_s2 + $0x340] sm:$0xff]  ;;  %v8801_v1 = vld [vmem:[%s13287_s2 + $0x350] sm:$0xff] }
 0x336   :  { %1978 = vmatprep.subr.mxu0 %v8783_v6  ;;  %2049 = vmatprep.subr.mxu1 %v8789_v7  ;;  %14337 = vst [vmem:[#allocation54_spill] sm:$0xff] %v8795_v44  ;;  %14338 = vst [vmem:[#allocation55_spill] sm:$0xff] %v8801_v1  ;;  %v8807_v6 = vld [vmem:[%s13287_s2 + $0x308] sm:$0xff]  ;;  %v8813_v7 = vld [vmem:[%s13287_s2 + $0x318] sm:$0xff] }
 0x337   :  { %1979 = vmatpush1.msra.mxu0 %v8795_v44  ;;  %2050 = vmatpush1.msra.mxu1 %v8801_v1  ;;  %14339 = vst [vmem:[#allocation56_spill] sm:$0xff] %v8807_v6  ;;  %14340 = vst [vmem:[#allocation57_spill] sm:$0xff] %v8813_v7  ;;  %v8819_v44 = vld [vmem:[%s13287_s2 + $0x300] sm:$0xff]  ;;  %v8825_v1 = vld [vmem:[%s13287_s2 + $0x310] sm:$0xff] }
 0x338   :  { %1980 = vmatprep.subr.mxu0 %v8807_v6  ;;  %2051 = vmatprep.subr.mxu1 %v8813_v7  ;;  %14341 = vst [vmem:[#allocation58_spill] sm:$0xff] %v8819_v44  ;;  %14342 = vst [vmem:[#allocation59_spill] sm:$0xff] %v8825_v1  ;;  %v8831_v6 = vld [vmem:[%s13287_s2 + $0x2c8] sm:$0xff]  ;;  %v8837_v7 = vld [vmem:[%s13287_s2 + $0x2d8] sm:$0xff] }
 0x339   :  { %1981 = vmatpush1.msra.mxu0 %v8819_v44  ;;  %2052 = vmatpush1.msra.mxu1 %v8825_v1  ;;  %14343 = vst [vmem:[#allocation60_spill] sm:$0xff] %v8831_v6  ;;  %14344 = vst [vmem:[#allocation61_spill] sm:$0xff] %v8837_v7  ;;  %v8843_v44 = vld [vmem:[%s13287_s2 + $0x2c0] sm:$0xff]  ;;  %v8849_v1 = vld [vmem:[%s13287_s2 + $0x2d0] sm:$0xff] }
 0x33a   :  { %1982 = vmatprep.subr.mxu0 %v8831_v6  ;;  %2053 = vmatprep.subr.mxu1 %v8837_v7  ;;  %14345 = vst [vmem:[#allocation62_spill] sm:$0xff] %v8843_v44  ;;  %14346 = vst [vmem:[#allocation63_spill] sm:$0xff] %v8849_v1  ;;  %v8855_v6 = vld [vmem:[%s13287_s2 + $0x288] sm:$0xff]  ;;  %v8861_v7 = vld [vmem:[%s13287_s2 + $0x298] sm:$0xff] }
 0x33b   :  { %1983 = vmatpush1.msra.mxu0 %v8843_v44  ;;  %2054 = vmatpush1.msra.mxu1 %v8849_v1  ;;  %14347 = vst [vmem:[#allocation64_spill] sm:$0xff] %v8855_v6  ;;  %14348 = vst [vmem:[#allocation65_spill] sm:$0xff] %v8861_v7  ;;  %v8867_v44 = vld [vmem:[%s13287_s2 + $0x280] sm:$0xff]  ;;  %v8873_v1 = vld [vmem:[%s13287_s2 + $0x290] sm:$0xff] }
 0x33c   :  { %1984 = vmatprep.subr.mxu0 %v8855_v6  ;;  %2055 = vmatprep.subr.mxu1 %v8861_v7  ;;  %14349 = vst [vmem:[#allocation66_spill] sm:$0xff] %v8867_v44  ;;  %14350 = vst [vmem:[#allocation67_spill] sm:$0xff] %v8873_v1  ;;  %v8879_v6 = vld [vmem:[%s13287_s2 + $0x248] sm:$0xff]  ;;  %v8885_v7 = vld [vmem:[%s13287_s2 + $0x258] sm:$0xff] }
 0x33d   :  { %1985 = vmatpush1.msra.mxu0 %v8867_v44  ;;  %2056 = vmatpush1.msra.mxu1 %v8873_v1  ;;  %14351 = vst [vmem:[#allocation68_spill] sm:$0xff] %v8879_v6  ;;  %14352 = vst [vmem:[#allocation69_spill] sm:$0xff] %v8885_v7  ;;  %v8891_v44 = vld [vmem:[%s13287_s2 + $0x240] sm:$0xff]  ;;  %v8897_v1 = vld [vmem:[%s13287_s2 + $0x250] sm:$0xff] }
 0x33e   :  { %1986 = vmatprep.subr.mxu0 %v8879_v6  ;;  %2057 = vmatprep.subr.mxu1 %v8885_v7  ;;  %14353 = vst [vmem:[#allocation70_spill] sm:$0xff] %v8891_v44  ;;  %14354 = vst [vmem:[#allocation71_spill] sm:$0xff] %v8897_v1  ;;  %v8903_v6 = vld [vmem:[%s13287_s2 + $0x208] sm:$0xff]  ;;  %v8909_v7 = vld [vmem:[%s13287_s2 + $0x218] sm:$0xff] }
 0x33f   :  { %1987 = vmatpush1.msra.mxu0 %v8891_v44  ;;  %2058 = vmatpush1.msra.mxu1 %v8897_v1  ;;  %14355 = vst [vmem:[#allocation72_spill] sm:$0xff] %v8903_v6  ;;  %14356 = vst [vmem:[#allocation73_spill] sm:$0xff] %v8909_v7  ;;  %v8915_v44 = vld [vmem:[%s13287_s2 + $0x200] sm:$0xff]  ;;  %v8921_v1 = vld [vmem:[%s13287_s2 + $0x210] sm:$0xff] }
 0x340   :  { %1988 = vmatprep.subr.mxu0 %v8903_v6  ;;  %2059 = vmatprep.subr.mxu1 %v8909_v7  ;;  %14357 = vst [vmem:[#allocation74_spill] sm:$0xff] %v8915_v44  ;;  %14358 = vst [vmem:[#allocation75_spill] sm:$0xff] %v8921_v1  ;;  %v8927_v6 = vld [vmem:[%s13287_s2 + $0x1c8] sm:$0xff]  ;;  %v8933_v7 = vld [vmem:[%s13287_s2 + $0x1d8] sm:$0xff] }
 0x341   :  { %1989 = vmatpush1.msra.mxu0 %v8915_v44  ;;  %2060 = vmatpush1.msra.mxu1 %v8921_v1  ;;  %14359 = vst [vmem:[#allocation76_spill] sm:$0xff] %v8927_v6  ;;  %14360 = vst [vmem:[#allocation77_spill] sm:$0xff] %v8933_v7  ;;  %v8939_v44 = vld [vmem:[%s13287_s2 + $0x1c0] sm:$0xff]  ;;  %v8945_v1 = vld [vmem:[%s13287_s2 + $0x1d0] sm:$0xff] }
 0x342   :  { %1990 = vmatprep.subr.mxu0 %v8927_v6  ;;  %2061 = vmatprep.subr.mxu1 %v8933_v7  ;;  %14361 = vst [vmem:[#allocation80_spill] sm:$0xff] %v8939_v44  ;;  %14362 = vst [vmem:[#allocation81_spill] sm:$0xff] %v8945_v1  ;;  %v8951_v6 = vld [vmem:[%s13287_s2 + $0x188] sm:$0xff]  ;;  %v8957_v7 = vld [vmem:[%s13287_s2 + $0x198] sm:$0xff] }
 0x343   :  { %1991 = vmatpush1.msra.mxu0 %v8939_v44  ;;  %2062 = vmatpush1.msra.mxu1 %v8945_v1  ;;  %14363 = vst [vmem:[#allocation82_spill] sm:$0xff] %v8951_v6  ;;  %14364 = vst [vmem:[#allocation83_spill] sm:$0xff] %v8957_v7  ;;  %v8963_v44 = vld [vmem:[%s13287_s2 + $0x180] sm:$0xff]  ;;  %v8969_v1 = vld [vmem:[%s13287_s2 + $0x190] sm:$0xff] }
 0x344   :  { %1992 = vmatprep.subr.mxu0 %v8951_v6  ;;  %2063 = vmatprep.subr.mxu1 %v8957_v7  ;;  %14365 = vst [vmem:[#allocation86_spill] sm:$0xff] %v8963_v44  ;;  %14366 = vst [vmem:[#allocation87_spill] sm:$0xff] %v8969_v1  ;;  %v8975_v6 = vld [vmem:[%s13287_s2 + $0x148] sm:$0xff]  ;;  %v8981_v7 = vld [vmem:[%s13287_s2 + $0x158] sm:$0xff] }
 0x345   :  { %1993 = vmatpush1.msra.mxu0 %v8963_v44  ;;  %2064 = vmatpush1.msra.mxu1 %v8969_v1  ;;  %14367 = vst [vmem:[#allocation88_spill] sm:$0xff] %v8975_v6  ;;  %14368 = vst [vmem:[#allocation89_spill] sm:$0xff] %v8981_v7  ;;  %v8987_v44 = vld [vmem:[%s13287_s2 + $0x140] sm:$0xff]  ;;  %v8993_v1 = vld [vmem:[%s13287_s2 + $0x150] sm:$0xff] }
 0x346   :  { %1994 = vmatprep.subr.mxu0 %v8975_v6  ;;  %2065 = vmatprep.subr.mxu1 %v8981_v7  ;;  %14369 = vst [vmem:[#allocation92_spill] sm:$0xff] %v8987_v44  ;;  %14370 = vst [vmem:[#allocation93_spill] sm:$0xff] %v8993_v1  ;;  %v8999_v6 = vld [vmem:[%s13287_s2 + $0x108] sm:$0xff]  ;;  %v9005_v7 = vld [vmem:[%s13287_s2 + $0x118] sm:$0xff] }
 0x347   :  { %1995 = vmatpush1.msra.mxu0 %v8987_v44  ;;  %2066 = vmatpush1.msra.mxu1 %v8993_v1  ;;  %14371 = vst [vmem:[#allocation94_spill] sm:$0xff] %v8999_v6  ;;  %14372 = vst [vmem:[#allocation95_spill] sm:$0xff] %v9005_v7  ;;  %v9011_v44 = vld [vmem:[%s13287_s2 + $0x100] sm:$0xff]  ;;  %v9017_v1 = vld [vmem:[%s13287_s2 + $0x110] sm:$0xff] }
 0x348   :  { %1996 = vmatprep.subr.mxu0 %v8999_v6  ;;  %2067 = vmatprep.subr.mxu1 %v9005_v7  ;;  %14373 = vst [vmem:[#allocation98_spill] sm:$0xff] %v9011_v44  ;;  %14374 = vst [vmem:[#allocation99_spill] sm:$0xff] %v9017_v1  ;;  %v9023_v6 = vld [vmem:[%s13287_s2 + $0xc8] sm:$0xff]  ;;  %v9029_v7 = vld [vmem:[%s13287_s2 + $0xd8] sm:$0xff] }
 0x349   :  { %1997 = vmatpush1.msra.mxu0 %v9011_v44  ;;  %2068 = vmatpush1.msra.mxu1 %v9017_v1  ;;  %14375 = vst [vmem:[#allocation100_spill] sm:$0xff] %v9023_v6  ;;  %14376 = vst [vmem:[#allocation101_spill] sm:$0xff] %v9029_v7  ;;  %v9035_v44 = vld [vmem:[%s13287_s2 + $0xc0] sm:$0xff]  ;;  %v9041_v1 = vld [vmem:[%s13287_s2 + $0xd0] sm:$0xff] }
 0x34a   :  { %1998 = vmatprep.subr.mxu0 %v9023_v6  ;;  %2069 = vmatprep.subr.mxu1 %v9029_v7  ;;  %14377 = vst [vmem:[#allocation104_spill] sm:$0xff] %v9035_v44  ;;  %14378 = vst [vmem:[#allocation105_spill] sm:$0xff] %v9041_v1  ;;  %v9047_v6 = vld [vmem:[%s13287_s2 + $0x88] sm:$0xff]  ;;  %v9053_v7 = vld [vmem:[%s13287_s2 + $0x98] sm:$0xff] }
 0x34b   :  { %1999 = vmatpush1.msra.mxu0 %v9035_v44  ;;  %2070 = vmatpush1.msra.mxu1 %v9041_v1  ;;  %14379 = vst [vmem:[#allocation106_spill] sm:$0xff] %v9047_v6  ;;  %14380 = vst [vmem:[#allocation107_spill] sm:$0xff] %v9053_v7  ;;  %v9059_v44 = vld [vmem:[%s13287_s2 + $0x80] sm:$0xff]  ;;  %v9065_v1 = vld [vmem:[%s13287_s2 + $0x90] sm:$0xff] }
 0x34c   :  { %2000 = vmatprep.subr.mxu0 %v9047_v6  ;;  %2071 = vmatprep.subr.mxu1 %v9053_v7  ;;  %14381 = vst [vmem:[#allocation110_spill] sm:$0xff] %v9059_v44  ;;  %14382 = vst [vmem:[#allocation111_spill] sm:$0xff] %v9065_v1  ;;  %v9071_v6 = vld [vmem:[%s13287_s2 + $0x48] sm:$0xff]  ;;  %v9077_v7 = vld [vmem:[%s13287_s2 + $0x58] sm:$0xff] }
 0x34d   :  { %2001 = vmatpush1.msra.mxu0 %v9059_v44  ;;  %2072 = vmatpush1.msra.mxu1 %v9065_v1  ;;  %14383 = vst [vmem:[#allocation112_spill] sm:$0xff] %v9071_v6  ;;  %14384 = vst [vmem:[#allocation113_spill] sm:$0xff] %v9077_v7  ;;  %v9083_v44 = vld [vmem:[%s13287_s2 + $0x40] sm:$0xff]  ;;  %v9089_v1 = vld [vmem:[%s13287_s2 + $0x50] sm:$0xff] }
 0x34e   :  { %2002 = vmatprep.subr.mxu0 %v9071_v6  ;;  %2073 = vmatprep.subr.mxu1 %v9077_v7  ;;  %14385 = vst [vmem:[#allocation116_spill] sm:$0xff] %v9083_v44  ;;  %14386 = vst [vmem:[#allocation117_spill] sm:$0xff] %v9089_v1  ;;  %v9095_v6 = vld [vmem:[%s13287_s2 + $0x8] sm:$0xff]  ;;  %v9101_v7 = vld [vmem:[%s13287_s2 + $0x18] sm:$0xff] }
 0x34f   :  { %2003 = vmatpush1.msra.mxu0 %v9083_v44  ;;  %2074 = vmatpush1.msra.mxu1 %v9089_v1  ;;  %14387 = vst [vmem:[#allocation118_spill] sm:$0xff] %v9095_v6  ;;  %14388 = vst [vmem:[#allocation119_spill] sm:$0xff] %v9101_v7  ;;  %v9107_v44 = vld [vmem:[%s13287_s2] sm:$0xff]  ;;  %v9113_v1 = vld [vmem:[%s13287_s2 + $0x10] sm:$0xff] }
 0x350   :  { %2004 = vmatprep.subr.mxu0 %v9095_v6  ;;  %2075 = vmatprep.subr.mxu1 %v9101_v7  ;;  %14389 = vst [vmem:[#allocation122_spill] sm:$0xff] %v9107_v44  ;;  %14390 = vst [vmem:[#allocation123_spill] sm:$0xff] %v9113_v1  ;;  %v9119_v6 = vld [vmem:[%s13287_s2 + $0x7c8] sm:$0xff]  ;;  %v9125_v7 = vld [vmem:[%s13287_s2 + $0x7d8] sm:$0xff] }
 0x351   :  { %2005 = vmatpush1.msra.mxu0 %v9107_v44  ;;  %2076 = vmatpush1.msra.mxu1 %v9113_v1  ;;  %14391 = vst [vmem:[#allocation124_spill] sm:$0xff] %v9119_v6  ;;  %14392 = vst [vmem:[#allocation125_spill] sm:$0xff] %v9125_v7  ;;  %v9131_v44 = vld [vmem:[%s13287_s2 + $0x7c0] sm:$0xff]  ;;  %v9137_v1 = vld [vmem:[%s13287_s2 + $0x7d0] sm:$0xff] }
 0x352   :  { %2006 = vmatprep.subr.mxu0 %v9119_v6  ;;  %2077 = vmatprep.subr.mxu1 %v9125_v7  ;;  %14393 = vst [vmem:[#allocation128_spill] sm:$0xff] %v9131_v44  ;;  %14394 = vst [vmem:[#allocation129_spill] sm:$0xff] %v9137_v1  ;;  %v9143_v6 = vld [vmem:[%s13287_s2 + $0x788] sm:$0xff]  ;;  %v9149_v7 = vld [vmem:[%s13287_s2 + $0x798] sm:$0xff] }
 0x353   :  { %2007 = vmatpush2.msra.mxu0 %v9131_v44  ;;  %2078 = vmatpush2.msra.mxu1 %v9137_v1  ;;  %14395 = vst [vmem:[#allocation130_spill] sm:$0xff] %v9143_v6  ;;  %14396 = vst [vmem:[#allocation131_spill] sm:$0xff] %v9149_v7  ;;  %v9155_v44 = vld [vmem:[%s13287_s2 + $0x780] sm:$0xff]  ;;  %v9161_v1 = vld [vmem:[%s13287_s2 + $0x790] sm:$0xff] }
 0x354   :  { %2008 = vmatprep.subr.mxu0 %v9143_v6  ;;  %2079 = vmatprep.subr.mxu1 %v9149_v7  ;;  %14397 = vst [vmem:[#allocation134_spill] sm:$0xff] %v9155_v44  ;;  %14398 = vst [vmem:[#allocation135_spill] sm:$0xff] %v9161_v1  ;;  %v9167_v6 = vld [vmem:[%s13287_s2 + $0x748] sm:$0xff]  ;;  %v9173_v7 = vld [vmem:[%s13287_s2 + $0x758] sm:$0xff] }
 0x355   :  { %2009 = vmatpush2.msra.mxu0 %v9155_v44  ;;  %2080 = vmatpush2.msra.mxu1 %v9161_v1  ;;  %14399 = vst [vmem:[#allocation136_spill] sm:$0xff] %v9167_v6  ;;  %14400 = vst [vmem:[#allocation137_spill] sm:$0xff] %v9173_v7  ;;  %v9179_v44 = vld [vmem:[%s13287_s2 + $0x740] sm:$0xff]  ;;  %v9185_v1 = vld [vmem:[%s13287_s2 + $0x750] sm:$0xff] }
 0x356   :  { %2010 = vmatprep.subr.mxu0 %v9167_v6  ;;  %2081 = vmatprep.subr.mxu1 %v9173_v7  ;;  %14401 = vst [vmem:[#allocation140_spill] sm:$0xff] %v9179_v44  ;;  %14402 = vst [vmem:[#allocation141_spill] sm:$0xff] %v9185_v1  ;;  %v9191_v6 = vld [vmem:[%s13287_s2 + $0x708] sm:$0xff]  ;;  %v9197_v7 = vld [vmem:[%s13287_s2 + $0x718] sm:$0xff] }
 0x357   :  { %2011 = vmatpush2.msra.mxu0 %v9179_v44  ;;  %2082 = vmatpush2.msra.mxu1 %v9185_v1  ;;  %14403 = vst [vmem:[#allocation142_spill] sm:$0xff] %v9191_v6  ;;  %14404 = vst [vmem:[#allocation143_spill] sm:$0xff] %v9197_v7  ;;  %v9203_v44 = vld [vmem:[%s13287_s2 + $0x700] sm:$0xff]  ;;  %v9209_v1 = vld [vmem:[%s13287_s2 + $0x710] sm:$0xff] }
 0x358   :  { %2012 = vmatprep.subr.mxu0 %v9191_v6  ;;  %2083 = vmatprep.subr.mxu1 %v9197_v7  ;;  %14405 = vst [vmem:[#allocation146_spill] sm:$0xff] %v9203_v44  ;;  %14406 = vst [vmem:[#allocation147_spill] sm:$0xff] %v9209_v1  ;;  %v9215_v6 = vld [vmem:[%s13287_s2 + $0x6c8] sm:$0xff]  ;;  %v9221_v7 = vld [vmem:[%s13287_s2 + $0x6d8] sm:$0xff] }
 0x359   :  { %2013 = vmatpush2.msra.mxu0 %v9203_v44  ;;  %2084 = vmatpush2.msra.mxu1 %v9209_v1  ;;  %14407 = vst [vmem:[#allocation148_spill] sm:$0xff] %v9215_v6  ;;  %14408 = vst [vmem:[#allocation149_spill] sm:$0xff] %v9221_v7  ;;  %v9227_v44 = vld [vmem:[%s13287_s2 + $0x6c0] sm:$0xff]  ;;  %v9233_v1 = vld [vmem:[%s13287_s2 + $0x6d0] sm:$0xff] }
 0x35a   :  { %2014 = vmatprep.subr.mxu0 %v9215_v6  ;;  %2085 = vmatprep.subr.mxu1 %v9221_v7  ;;  %14409 = vst [vmem:[#allocation152_spill] sm:$0xff] %v9227_v44  ;;  %14410 = vst [vmem:[#allocation153_spill] sm:$0xff] %v9233_v1  ;;  %v9239_v6 = vld [vmem:[%s13287_s2 + $0x688] sm:$0xff]  ;;  %v9245_v7 = vld [vmem:[%s13287_s2 + $0x698] sm:$0xff] }
 0x35b   :  { %2015 = vmatpush2.msra.mxu0 %v9227_v44  ;;  %2086 = vmatpush2.msra.mxu1 %v9233_v1  ;;  %14411 = vst [vmem:[#allocation154_spill] sm:$0xff] %v9239_v6  ;;  %14412 = vst [vmem:[#allocation157_spill] sm:$0xff] %v9245_v7  ;;  %v9251_v44 = vld [vmem:[%s13287_s2 + $0x680] sm:$0xff]  ;;  %v9257_v1 = vld [vmem:[%s13287_s2 + $0x690] sm:$0xff] }
 0x35c   :  { %2016 = vmatprep.subr.mxu0 %v9239_v6  ;;  %2087 = vmatprep.subr.mxu1 %v9245_v7  ;;  %14413 = vst [vmem:[#allocation158_spill] sm:$0xff] %v9251_v44  ;;  %14414 = vst [vmem:[#allocation78_spill] sm:$0xff] %v9257_v1  ;;  %v9263_v6 = vld [vmem:[%s13287_s2 + $0x648] sm:$0xff]  ;;  %v9269_v7 = vld [vmem:[%s13287_s2 + $0x658] sm:$0xff] }
 0x35d   :  { %2017 = vmatpush2.msra.mxu0 %v9251_v44  ;;  %2088 = vmatpush2.msra.mxu1 %v9257_v1  ;;  %14415 = vst [vmem:[#allocation84_spill] sm:$0xff] %v9263_v6  ;;  %14416 = vst [vmem:[#allocation85_spill] sm:$0xff] %v9269_v7  ;;  %v9275_v44 = vld [vmem:[%s13287_s2 + $0x640] sm:$0xff]  ;;  %v9281_v1 = vld [vmem:[%s13287_s2 + $0x650] sm:$0xff] }
 0x35e   :  { %2018 = vmatprep.subr.mxu0 %v9263_v6  ;;  %2089 = vmatprep.subr.mxu1 %v9269_v7  ;;  %14417 = vst [vmem:[#allocation79_spill] sm:$0xff] %v9275_v44  ;;  %14418 = vst [vmem:[#allocation185_spill] sm:$0xff] %v9281_v1  ;;  %v9287_v6 = vld [vmem:[%s13287_s2 + $0x608] sm:$0xff]  ;;  %v9293_v7 = vld [vmem:[%s13287_s2 + $0x618] sm:$0xff] }
 0x35f   :  { %2019 = vmatpush2.msra.mxu0 %v9275_v44  ;;  %2090 = vmatpush2.msra.mxu1 %v9281_v1  ;;  %14419 = vst [vmem:[#allocation186_spill] sm:$0xff] %v9287_v6  ;;  %14420 = vst [vmem:[#allocation187_spill] sm:$0xff] %v9293_v7  ;;  %v9299_v44 = vld [vmem:[%s13287_s2 + $0x600] sm:$0xff]  ;;  %v9305_v1 = vld [vmem:[%s13287_s2 + $0x610] sm:$0xff] }
 0x360   :  { %2020 = vmatprep.subr.mxu0 %v9287_v6  ;;  %2091 = vmatprep.subr.mxu1 %v9293_v7  ;;  %14421 = vst [vmem:[#allocation188_spill] sm:$0xff] %v9299_v44  ;;  %14422 = vst [vmem:[#allocation189_spill] sm:$0xff] %v9305_v1  ;;  %v9311_v6 = vld [vmem:[%s13287_s2 + $0x5c8] sm:$0xff]  ;;  %v9317_v7 = vld [vmem:[%s13287_s2 + $0x5d8] sm:$0xff] }
 0x361   :  { %2021 = vmatpush2.msra.mxu0 %v9299_v44  ;;  %2092 = vmatpush2.msra.mxu1 %v9305_v1  ;;  %14423 = vst [vmem:[#allocation190_spill] sm:$0xff] %v9311_v6  ;;  %14424 = vst [vmem:[#allocation191_spill] sm:$0xff] %v9317_v7  ;;  %v14426_v1 = vld [vmem:[#allocation4_spill] sm:$0xff]  ;;  %v14427_v44 = vld [vmem:[#allocation5_spill] sm:$0xff] }
 0x362   :  { %2022 = vmatprep.subr.mxu0 %v9311_v6  ;;  %2093 = vmatprep.subr.mxu1 %v9317_v7  ;;  %v14425_v6 = vld [vmem:[#allocation3_spill] sm:$0xff] }
 0x363   :  { %2023 = vmatpush2.msra.mxu0 %v8128_v57  ;;  %2094 = vmatpush2.msra.mxu1 %v8134_v32  ;;  %v14429_v7 = vld [vmem:[#allocation7_spill] sm:$0xff]  ;;  %v14430_v57 = vld [vmem:[#allocation8_spill] sm:$0xff]  ;;  %v14431_v32 = vld [vmem:[#allocation9_spill] sm:$0xff] }
 0x364   :  { %2024 = vmatprep.subr.mxu0 %v8140_v59  ;;  %2095 = vmatprep.subr.mxu1 %v8146_v55  ;;  %v14432_v59 = vld [vmem:[#allocation10_spill] sm:$0xff]  ;;  %v14433_v55 = vld [vmem:[#allocation11_spill] sm:$0xff] }
 0x365   :  { %2025 = vmatpush2.msra.mxu0 %v8152_v54  ;;  %2096 = vmatpush2.msra.mxu1 %v8158_v15  ;;  %v14434_v54 = vld [vmem:[#allocation12_spill] sm:$0xff]  ;;  %v14435_v15 = vld [vmem:[#allocation13_spill] sm:$0xff] }
 0x366   :  { %2026 = vmatprep.subr.mxu0 %v14425_v6  ;;  %2097 = vmatprep.subr.mxu1 %v14426_v1  ;;  %v14436_v6 = vld [vmem:[#allocation14_spill] sm:$0xff]  ;;  %v14437_v1 = vld [vmem:[#allocation15_spill] sm:$0xff] }
 0x367   :  { %2027 = vmatpush2.msra.mxu0 %v14427_v44  ;;  %2098 = vmatpush2.msra.mxu1 %v14428_v4  ;;  %v14438_v44 = vld [vmem:[#allocation16_spill] sm:$0xff]  ;;  %v14439_v4 = vld [vmem:[#allocation17_spill] sm:$0xff] }
 0x368   :  { %2028 = vmatprep.subr.mxu0 %v14429_v7  ;;  %2099 = vmatprep.subr.mxu1 %v14430_v57  ;;  %v14440_v7 = vld [vmem:[#allocation18_spill] sm:$0xff]  ;;  %v14441_v57 = vld [vmem:[#allocation19_spill] sm:$0xff] }
 0x369   :  { %2029 = vmatpush2.msra.mxu0 %v14431_v32  ;;  %2100 = vmatpush2.msra.mxu1 %v14432_v59  ;;  %v14442_v32 = vld [vmem:[#allocation20_spill] sm:$0xff]  ;;  %v14443_v59 = vld [vmem:[#allocation21_spill] sm:$0xff] }
 0x36a   :  { %2030 = vmatprep.subr.mxu0 %v14433_v55  ;;  %2101 = vmatprep.subr.mxu1 %v14434_v54  ;;  %v14444_v55 = vld [vmem:[#allocation22_spill] sm:$0xff]  ;;  %v14445_v54 = vld [vmem:[#allocation23_spill] sm:$0xff] }
 0x36b   :  { %2031 = vmatpush2.msra.mxu0 %v14435_v15  ;;  %2102 = vmatpush2.msra.mxu1 %v14436_v6  ;;  %v14446_v15 = vld [vmem:[#allocation24_spill] sm:$0xff]  ;;  %v14447_v6 = vld [vmem:[#allocation25_spill] sm:$0xff] }
 0x36c   :  { %2032 = vmatprep.subr.mxu0 %v14437_v1  ;;  %2103 = vmatprep.subr.mxu1 %v14438_v44  ;;  %v14448_v1 = vld [vmem:[#allocation26_spill] sm:$0xff]  ;;  %v14449_v44 = vld [vmem:[#allocation27_spill] sm:$0xff] }
 0x36d   :  { %2033 = vmatpush2.msra.mxu0 %v14439_v4  ;;  %2104 = vmatpush2.msra.mxu1 %v14440_v7  ;;  %v14450_v4 = vld [vmem:[#allocation28_spill] sm:$0xff] }
 0x36e   :  { %2034 = vmatprep.subr.mxu0 %v14441_v57  ;;  %2105 = vmatprep.subr.mxu1 %v14442_v32  ;;  %v14451_v57 = vld [vmem:[#allocation90_spill] sm:$0xff] }
 0x36f   :  { %2035 = vmatpush2.msra.mxu0 %v14443_v59  ;;  %2106 = vmatpush2.msra.mxu1 %v14444_v55  ;;  %v14452_v59 = vld [vmem:[#allocation96_spill] sm:$0xff] }
 0x370   :  { %2036 = vmatprep.subr.mxu0 %v14445_v54  ;;  %2107 = vmatprep.subr.mxu1 %v14446_v15 }
 0x371   :  { %2037 = vmatpush2.msra.mxu0 %v14447_v6  ;;  %2108 = vmatpush2.msra.mxu1 %v14448_v1 }
 0x372   :  { %2116 = vmatprep.subr.mxu0 %v14449_v44  ;;  %2187 = vmatprep.subr.mxu1 %v14450_v4 }
 0x3b0   :  { %v1690_v7 = vpop.f32.mrf.mxu0  ;;  %v1761_v54 = vpop.f32.mrf.mxu1 }
 0x3b1   :  { %v1912_v21 = vadd.f32 %v1690_v7, %v14451_v57 }
 0x3b2   :  { %v1692_v32 = vpop.f32.mrf.mxu0  ;;  %v1763_v15 = vpop.f32.mrf.mxu1 }
 0x3b3   :  { %v4031_v12 = vmul.f32 -1.442695, %v1912_v21  ;;  %v1913_v14 = vadd.f32 %v1692_v32, %v14452_v59  ;;  %v1915_v6 = vadd.f32 %v1763_v15, %v14453_v42  ;;  %v14455_v42 = vld [vmem:[#allocation180_spill] sm:$0xff] }
 0x3b5   :  { %4255 = vpow2.f32 %v4031_v12  ;;  %v4032_v55 = vmul.f32 -1.442695, %v1913_v14  ;;  %v14454_v14 = vld [vmem:[#allocation179_spill] sm:$0xff] }
 0x3b6   :  { %v459_v59 = vadd.f32 %v14454_v14, %v7496_v52  ;;  %v14458_v52 = vld [vmem:[#allocation91_spill] sm:$0xff] }
 0x3b7   :  { %4257 = vpow2.f32 %v4032_v55  ;;  %v1914_v8 = vadd.f32 %v1761_v54, %v14458_v52 }
 0x3b8   :  { %4259 = vtanh.f32 %v1915_v6 }
 0x3c2   :  { %v4256_v11 = vpop.eup %4255 }
 0x3c3   :  { %v1933_v1 = vadd.f32 1.0, %v4256_v11  ;;  %v461_v11 = vadd.f32 %v14455_v42, %v7499_v61 }
 0x3c4   :  { %v4258_v27 = vpop.eup %4257 }
 0x3c5   :  { %4261 = vrcp.f32 %v1933_v1  ;;  %v1934_v44 = vadd.f32 1.0, %v4258_v27  ;;  %v4260_v4 = vpop.eup %4259 }
 0x3c7   :  { %4263 = vrcp.f32 %v1934_v44 }
 0x3d2   :  { %v4262_v7 = vpop.eup %4261 }
 0x3d3   :  { %v1963_v57 = vmul.f32 %v4262_v7, %v4260_v4  ;;  %v14456_v7 = vld [vmem:[#allocation181_spill] sm:$0xff] }
 0x3d4   :  { %v4264_v21 = vpop.eup %4263 }
 0x3d5   :  { %v1962_v32 = vmul.f32 %v4264_v21, %v8321_v0  ;;  %v572_v0 = vadd.f32 %v14456_v7, %v7505_v19 }
 0x3d7   :  { %v9356_v12 = vadd.f32 %v1963_v57, %v1962_v32  ;;  %v14457_v32 = vld [vmem:[#allocation182_spill] sm:$0xff] }
 0x3d8   :  { %v574_v14 = vadd.f32 %v14457_v32, %v7512_v50 }
 0x3f1   :  { %v1832_v55 = vpop.f32.mrf.mxu0  ;;  %v1903_v4 = vpop.f32.mrf.mxu1 }
 0x3f2   :  { %v1920_v15 = vadd.f32 %v1832_v55, %v459_v59  ;;  %v1922_v57 = vadd.f32 %v1903_v4, %v572_v0  ;;  %v4033_v55 = vmul.f32 -1.442695, %v1914_v8 }
 0x3f3   :  { %v1834_v6 = vpop.f32.mrf.mxu0  ;;  %v1905_v21 = vpop.f32.mrf.mxu1 }
 0x3f4   :  { %v4034_v1 = vmul.f32 -1.442695, %v1920_v15  ;;  %v1921_v27 = vadd.f32 %v1834_v6, %v461_v11  ;;  %v4036_v10 = vmul.f32 -1.442695, %v1922_v57  ;;  %v1923_v42 = vadd.f32 %v1905_v21, %v574_v14 }
 0x3f6   :  { %4265 = vpow2.f32 %v4034_v1  ;;  %v4035_v44 = vmul.f32 -1.442695, %v1921_v27 }
 0x3f8   :  { %4267 = vpow2.f32 %v4035_v44 }
 0x3f9   :  { %4269 = vpow2.f32 %v4036_v10 }
 0x3fa   :  { %4271 = vtanh.f32 %v1923_v42 }
 0x403   :  { %v4266_v59 = vpop.eup %4265 }
 0x404   :  { %v1951_v15 = vadd.f32 1.0, %v4266_v59 }
 0x405   :  { %v4268_v11 = vpop.eup %4267 }
 0x406   :  { %4273 = vrcp.f32 %v1951_v15  ;;  %v1952_v6 = vadd.f32 1.0, %v4268_v11  ;;  %v4270_v1 = vpop.eup %4269  ;;  %v9391_v15 = vld [vmem:[%s13287_s2 + $0x3f0] sm:$0xff]  ;;  %v9397_v11 = vld [vmem:[%s13287_s2 + $0x3a8] sm:$0xff] }
 0x407   :  { %4275 = vpow2.f32 %v4033_v55  ;;  %v4272_v27 = vpop.eup %4271  ;;  %v1953_v32 = vadd.f32 1.0, %v4270_v1  ;;  %v9385_v55 = vld [vmem:[%s13287_s2 + $0x3e0] sm:$0xff] }
 0x408   :  { %4277 = vrcp.f32 %v1952_v6  ;;  %v9404_v6 = vld [vmem:[%s13287_s2 + $0x3b8] sm:$0xff]  ;;  %v9411_v1 = vld [vmem:[%s13287_s2 + $0x3a0] sm:$0xff] }
 0x409   :  { %4279 = vtanh.f32 %v9356_v12 }
 0x40a   :  { %4281 = vrcp.f32 %v1953_v32  ;;  %v9447_v32 = vld [vmem:[%s13287_s2 + $0x328] sm:$0xff] }
 0x413   :  { %v4274_v44 = vpop.eup %4273 }
 0x414   :  { %v4276_v4 = vpop.eup %4275  ;;  %v1966_v7 = vmul.f32 %v4274_v44, %v4272_v27  ;;  %v9417_v27 = vld [vmem:[%s13287_s2 + $0x3b0] sm:$0xff]  ;;  %v9423_v44 = vld [vmem:[%s13287_s2 + $0x368] sm:$0xff] }
 0x415   :  { %v4278_v0 = vpop.eup %4277  ;;  %v1935_v54 = vadd.f32 1.0, %v4276_v4  ;;  %v9429_v4 = vld [vmem:[%s13287_s2 + $0x378] sm:$0xff] }
 0x416   :  { %v1965_v52 = vmul.f32 %v4278_v0, %v8334_v5  ;;  %v4280_v10 = vpop.eup %4279  ;;  %v9441_v0 = vld [vmem:[%s13287_s2 + $0x370] sm:$0xff] }
 0x417   :  { %v4282_v57 = vpop.eup %4281  ;;  %v9489_v5 = vld [vmem:[%s13287_s2 + $0x2f0] sm:$0xff] }
 0x418   :  { %v9369_v8 = vadd.f32 %v1966_v7, %v1965_v52  ;;  %v9435_v7 = vld [vmem:[%s13287_s2 + $0x360] sm:$0xff]  ;;  %v9453_v52 = vld [vmem:[%s13287_s2 + $0x338] sm:$0xff]  ;;  %14463 = vst [vmem:[#allocation196_spill] sm:$0xff] %v9489_v5 }
 0x41a   :  { %4283 = vtanh.f32 %v9369_v8 }
 0x41b   :  { %4285 = vrcp.f32 %v1935_v54  ;;  %v9459_v54 = vld [vmem:[%s13287_s2 + $0x320] sm:$0xff] }
 0x427   :  { %v4284_v21 = vpop.eup %4283 }
 0x428   :  { %v4286_v14 = vpop.eup %4285  ;;  %v9372_v42 = vmul.f32 %v4284_v21, %v4282_v57  ;;  %v9471_v57 = vld [vmem:[%s13287_s2 + $0x2e8] sm:$0xff]  ;;  %v9477_v21 = vld [vmem:[%s13287_s2 + $0x2f8] sm:$0xff] }
 0x429   :  { %v9374_v59 = vmul.f32 %v4286_v14, %v4280_v10  ;;  %v9465_v10 = vld [vmem:[%s13287_s2 + $0x330] sm:$0xff]  ;;  %14460 = vst [vmem:[#allocation193_spill] sm:$0xff] %v9471_v57  ;;  %14461 = vst [vmem:[#allocation194_spill] sm:$0xff] %v9477_v21  ;;  %v9483_v14 = vld [vmem:[%s13287_s2 + $0x2e0] sm:$0xff] }
 0x42a   :  { %2038 = vmatprep.mubr.f32.mxu0 %v9372_v42  ;;  %2109 = vmatprep.mubr.f32.mxu1 %v9372_v42  ;;  %14462 = vst [vmem:[#allocation195_spill] sm:$0xff] %v9483_v14 }
 0x42b   :  { %14459 = vst [vmem:[#allocation192_spill] sm:$0xff] %v9374_v59  ;;  %2039 = vmatmul.mubr.f32.vlgmr.msra.gmra.mxu0 %v9374_v59  ;;  %2110 = vmatmul.mubr.f32.vlgmr.msra.gmra.mxu1 %v9374_v59 }
 0x42c   :  { %2117 = vmatpush1.msra.mxu0 %v9385_v55  ;;  %2188 = vmatpush1.msra.mxu1 %v9391_v15 }
 0x42d   :  { %2118 = vmatprep.subr.mxu0 %v9397_v11  ;;  %2180 = vmatprep.mubr.f32.mxu0 %v9372_v42 }
 0x42e   :  { %2189 = vmatprep.subr.mxu1 %v9404_v6  ;;  %2251 = vmatprep.mubr.f32.mxu1 %v9372_v42 }
 0x42f   :  { %2119 = vmatpush1.msra.mxu0 %v9411_v1  ;;  %2190 = vmatpush1.msra.mxu1 %v9417_v27 }
 0x430   :  { %2120 = vmatprep.subr.mxu0 %v9423_v44  ;;  %2191 = vmatprep.subr.mxu1 %v9429_v4 }
 0x431   :  { %2121 = vmatpush1.msra.mxu0 %v9435_v7  ;;  %2192 = vmatpush1.msra.mxu1 %v9441_v0 }
 0x432   :  { %2122 = vmatprep.subr.mxu0 %v9447_v32  ;;  %2193 = vmatprep.subr.mxu1 %v9453_v52 }
 0x433   :  { %2123 = vmatpush1.msra.mxu0 %v9459_v54  ;;  %2194 = vmatpush1.msra.mxu1 %v9465_v10 }
 0x434   :  { %2124 = vmatprep.subr.mxu0 %v9471_v57  ;;  %2195 = vmatprep.subr.mxu1 %v9477_v21  ;;  %v9495_v57 = vld [vmem:[%s13287_s2 + $0x2a8] sm:$0xff]  ;;  %v9501_v21 = vld [vmem:[%s13287_s2 + $0x2b8] sm:$0xff] }
 0x435   :  { %2125 = vmatpush1.msra.mxu0 %v9483_v14  ;;  %2196 = vmatpush1.msra.mxu1 %v9489_v5  ;;  %14464 = vst [vmem:[#allocation197_spill] sm:$0xff] %v9495_v57  ;;  %14465 = vst [vmem:[#allocation198_spill] sm:$0xff] %v9501_v21  ;;  %v9507_v14 = vld [vmem:[%s13287_s2 + $0x2a0] sm:$0xff]  ;;  %v9513_v5 = vld [vmem:[%s13287_s2 + $0x2b0] sm:$0xff] }
 0x436   :  { %2126 = vmatprep.subr.mxu0 %v9495_v57  ;;  %2197 = vmatprep.subr.mxu1 %v9501_v21  ;;  %14466 = vst [vmem:[#allocation199_spill] sm:$0xff] %v9507_v14  ;;  %14467 = vst [vmem:[#allocation200_spill] sm:$0xff] %v9513_v5  ;;  %v9519_v57 = vld [vmem:[%s13287_s2 + $0x268] sm:$0xff]  ;;  %v9525_v21 = vld [vmem:[%s13287_s2 + $0x278] sm:$0xff] }
 0x437   :  { %2127 = vmatpush1.msra.mxu0 %v9507_v14  ;;  %2198 = vmatpush1.msra.mxu1 %v9513_v5  ;;  %14468 = vst [vmem:[#allocation201_spill] sm:$0xff] %v9519_v57  ;;  %14469 = vst [vmem:[#allocation202_spill] sm:$0xff] %v9525_v21  ;;  %v9531_v14 = vld [vmem:[%s13287_s2 + $0x260] sm:$0xff]  ;;  %v9537_v5 = vld [vmem:[%s13287_s2 + $0x270] sm:$0xff] }
 0x438   :  { %2128 = vmatprep.subr.mxu0 %v9519_v57  ;;  %2199 = vmatprep.subr.mxu1 %v9525_v21  ;;  %14470 = vst [vmem:[#allocation203_spill] sm:$0xff] %v9531_v14  ;;  %14471 = vst [vmem:[#allocation204_spill] sm:$0xff] %v9537_v5  ;;  %v9543_v57 = vld [vmem:[%s13287_s2 + $0x228] sm:$0xff]  ;;  %v9549_v21 = vld [vmem:[%s13287_s2 + $0x238] sm:$0xff] }
 0x439   :  { %2129 = vmatpush1.msra.mxu0 %v9531_v14  ;;  %2200 = vmatpush1.msra.mxu1 %v9537_v5  ;;  %14472 = vst [vmem:[#allocation205_spill] sm:$0xff] %v9543_v57  ;;  %14473 = vst [vmem:[#allocation206_spill] sm:$0xff] %v9549_v21  ;;  %v9555_v14 = vld [vmem:[%s13287_s2 + $0x220] sm:$0xff]  ;;  %v9561_v5 = vld [vmem:[%s13287_s2 + $0x230] sm:$0xff] }
 0x43a   :  { %2130 = vmatprep.subr.mxu0 %v9543_v57  ;;  %2201 = vmatprep.subr.mxu1 %v9549_v21  ;;  %14474 = vst [vmem:[#allocation207_spill] sm:$0xff] %v9555_v14  ;;  %14475 = vst [vmem:[#allocation208_spill] sm:$0xff] %v9561_v5  ;;  %v9567_v57 = vld [vmem:[%s13287_s2 + $0x1e8] sm:$0xff]  ;;  %v9573_v21 = vld [vmem:[%s13287_s2 + $0x1f8] sm:$0xff] }
 0x43b   :  { %2131 = vmatpush1.msra.mxu0 %v9555_v14  ;;  %2202 = vmatpush1.msra.mxu1 %v9561_v5  ;;  %14476 = vst [vmem:[#allocation209_spill] sm:$0xff] %v9567_v57  ;;  %14477 = vst [vmem:[#allocation210_spill] sm:$0xff] %v9573_v21  ;;  %v9579_v14 = vld [vmem:[%s13287_s2 + $0x1e0] sm:$0xff]  ;;  %v9585_v5 = vld [vmem:[%s13287_s2 + $0x1f0] sm:$0xff] }
 0x43c   :  { %2132 = vmatprep.subr.mxu0 %v9567_v57  ;;  %2203 = vmatprep.subr.mxu1 %v9573_v21  ;;  %14478 = vst [vmem:[#allocation211_spill] sm:$0xff] %v9579_v14  ;;  %14479 = vst [vmem:[#allocation212_spill] sm:$0xff] %v9585_v5  ;;  %v9591_v57 = vld [vmem:[%s13287_s2 + $0x1a8] sm:$0xff]  ;;  %v9597_v21 = vld [vmem:[%s13287_s2 + $0x1b8] sm:$0xff] }
 0x43d   :  { %2133 = vmatpush1.msra.mxu0 %v9579_v14  ;;  %2204 = vmatpush1.msra.mxu1 %v9585_v5  ;;  %14480 = vst [vmem:[#allocation213_spill] sm:$0xff] %v9591_v57  ;;  %14481 = vst [vmem:[#allocation214_spill] sm:$0xff] %v9597_v21  ;;  %v9603_v14 = vld [vmem:[%s13287_s2 + $0x1a0] sm:$0xff]  ;;  %v9609_v5 = vld [vmem:[%s13287_s2 + $0x1b0] sm:$0xff] }
 0x43e   :  { %2134 = vmatprep.subr.mxu0 %v9591_v57  ;;  %2205 = vmatprep.subr.mxu1 %v9597_v21  ;;  %14482 = vst [vmem:[#allocation215_spill] sm:$0xff] %v9603_v14  ;;  %14483 = vst [vmem:[#allocation216_spill] sm:$0xff] %v9609_v5  ;;  %v9615_v57 = vld [vmem:[%s13287_s2 + $0x168] sm:$0xff]  ;;  %v9621_v21 = vld [vmem:[%s13287_s2 + $0x178] sm:$0xff] }
 0x43f   :  { %2135 = vmatpush1.msra.mxu0 %v9603_v14  ;;  %2206 = vmatpush1.msra.mxu1 %v9609_v5  ;;  %14484 = vst [vmem:[#allocation217_spill] sm:$0xff] %v9615_v57  ;;  %14485 = vst [vmem:[#allocation218_spill] sm:$0xff] %v9621_v21  ;;  %v9627_v14 = vld [vmem:[%s13287_s2 + $0x160] sm:$0xff]  ;;  %v9633_v5 = vld [vmem:[%s13287_s2 + $0x170] sm:$0xff] }
 0x440   :  { %2136 = vmatprep.subr.mxu0 %v9615_v57  ;;  %2207 = vmatprep.subr.mxu1 %v9621_v21  ;;  %14486 = vst [vmem:[#allocation219_spill] sm:$0xff] %v9627_v14  ;;  %14487 = vst [vmem:[#allocation220_spill] sm:$0xff] %v9633_v5  ;;  %v9639_v57 = vld [vmem:[%s13287_s2 + $0x128] sm:$0xff]  ;;  %v9645_v21 = vld [vmem:[%s13287_s2 + $0x138] sm:$0xff] }
 0x441   :  { %2137 = vmatpush1.msra.mxu0 %v9627_v14  ;;  %2208 = vmatpush1.msra.mxu1 %v9633_v5  ;;  %14488 = vst [vmem:[#allocation221_spill] sm:$0xff] %v9639_v57  ;;  %14489 = vst [vmem:[#allocation222_spill] sm:$0xff] %v9645_v21  ;;  %v9651_v14 = vld [vmem:[%s13287_s2 + $0x120] sm:$0xff]  ;;  %v9657_v5 = vld [vmem:[%s13287_s2 + $0x130] sm:$0xff] }
 0x442   :  { %2138 = vmatprep.subr.mxu0 %v9639_v57  ;;  %2209 = vmatprep.subr.mxu1 %v9645_v21  ;;  %14490 = vst [vmem:[#allocation223_spill] sm:$0xff] %v9651_v14  ;;  %14491 = vst [vmem:[#allocation224_spill] sm:$0xff] %v9657_v5  ;;  %v9663_v57 = vld [vmem:[%s13287_s2 + $0xe8] sm:$0xff]  ;;  %v9669_v21 = vld [vmem:[%s13287_s2 + $0xf8] sm:$0xff] }
 0x443   :  { %2139 = vmatpush1.msra.mxu0 %v9651_v14  ;;  %2210 = vmatpush1.msra.mxu1 %v9657_v5  ;;  %14492 = vst [vmem:[#allocation225_spill] sm:$0xff] %v9663_v57  ;;  %14493 = vst [vmem:[#allocation226_spill] sm:$0xff] %v9669_v21  ;;  %v9675_v14 = vld [vmem:[%s13287_s2 + $0xe0] sm:$0xff]  ;;  %v9681_v5 = vld [vmem:[%s13287_s2 + $0xf0] sm:$0xff] }
 0x444   :  { %2140 = vmatprep.subr.mxu0 %v9663_v57  ;;  %2211 = vmatprep.subr.mxu1 %v9669_v21  ;;  %14494 = vst [vmem:[#allocation227_spill] sm:$0xff] %v9675_v14  ;;  %14495 = vst [vmem:[#allocation228_spill] sm:$0xff] %v9681_v5  ;;  %v9687_v57 = vld [vmem:[%s13287_s2 + $0xa8] sm:$0xff]  ;;  %v9693_v21 = vld [vmem:[%s13287_s2 + $0xb8] sm:$0xff] }
 0x445   :  { %2141 = vmatpush1.msra.mxu0 %v9675_v14  ;;  %2212 = vmatpush1.msra.mxu1 %v9681_v5  ;;  %14496 = vst [vmem:[#allocation3_spill] sm:$0xff] %v9687_v57  ;;  %14497 = vst [vmem:[#allocation4_spill] sm:$0xff] %v9693_v21  ;;  %v9699_v14 = vld [vmem:[%s13287_s2 + $0xa0] sm:$0xff]  ;;  %v9705_v5 = vld [vmem:[%s13287_s2 + $0xb0] sm:$0xff] }
 0x446   :  { %2142 = vmatprep.subr.mxu0 %v9687_v57  ;;  %2213 = vmatprep.subr.mxu1 %v9693_v21  ;;  %14498 = vst [vmem:[#allocation5_spill] sm:$0xff] %v9699_v14  ;;  %14499 = vst [vmem:[#allocation6_spill] sm:$0xff] %v9705_v5  ;;  %v9711_v57 = vld [vmem:[%s13287_s2 + $0x68] sm:$0xff]  ;;  %v9717_v21 = vld [vmem:[%s13287_s2 + $0x78] sm:$0xff] }
 0x447   :  { %2143 = vmatpush1.msra.mxu0 %v9699_v14  ;;  %2214 = vmatpush1.msra.mxu1 %v9705_v5  ;;  %14500 = vst [vmem:[#allocation7_spill] sm:$0xff] %v9711_v57  ;;  %14501 = vst [vmem:[#allocation8_spill] sm:$0xff] %v9717_v21  ;;  %v9723_v14 = vld [vmem:[%s13287_s2 + $0x60] sm:$0xff]  ;;  %v9729_v5 = vld [vmem:[%s13287_s2 + $0x70] sm:$0xff] }
 0x448   :  { %2144 = vmatprep.subr.mxu0 %v9711_v57  ;;  %2215 = vmatprep.subr.mxu1 %v9717_v21  ;;  %14502 = vst [vmem:[#allocation9_spill] sm:$0xff] %v9723_v14  ;;  %14503 = vst [vmem:[#allocation10_spill] sm:$0xff] %v9729_v5  ;;  %v9735_v57 = vld [vmem:[%s13287_s2 + $0x28] sm:$0xff]  ;;  %v9741_v21 = vld [vmem:[%s13287_s2 + $0x38] sm:$0xff] }
 0x449   :  { %2145 = vmatpush1.msra.mxu0 %v9723_v14  ;;  %2216 = vmatpush1.msra.mxu1 %v9729_v5  ;;  %14504 = vst [vmem:[#allocation11_spill] sm:$0xff] %v9735_v57  ;;  %14505 = vst [vmem:[#allocation12_spill] sm:$0xff] %v9741_v21  ;;  %v9747_v14 = vld [vmem:[%s13287_s2 + $0x20] sm:$0xff]  ;;  %v9753_v5 = vld [vmem:[%s13287_s2 + $0x30] sm:$0xff] }
 0x44a   :  { %2146 = vmatprep.subr.mxu0 %v9735_v57  ;;  %2217 = vmatprep.subr.mxu1 %v9741_v21  ;;  %14506 = vst [vmem:[#allocation13_spill] sm:$0xff] %v9747_v14  ;;  %14507 = vst [vmem:[#allocation14_spill] sm:$0xff] %v9753_v5  ;;  %v9759_v57 = vld [vmem:[%s13287_s2 + $0x7e8] sm:$0xff]  ;;  %v9765_v21 = vld [vmem:[%s13287_s2 + $0x7f8] sm:$0xff] }
 0x44b   :  { %2147 = vmatpush1.msra.mxu0 %v9747_v14  ;;  %2218 = vmatpush1.msra.mxu1 %v9753_v5  ;;  %14508 = vst [vmem:[#allocation15_spill] sm:$0xff] %v9759_v57  ;;  %14509 = vst [vmem:[#allocation16_spill] sm:$0xff] %v9765_v21  ;;  %v9771_v14 = vld [vmem:[%s13287_s2 + $0x7e0] sm:$0xff]  ;;  %v9777_v5 = vld [vmem:[%s13287_s2 + $0x7f0] sm:$0xff] }
 0x44c   :  { %2148 = vmatprep.subr.mxu0 %v9759_v57  ;;  %2219 = vmatprep.subr.mxu1 %v9765_v21  ;;  %14510 = vst [vmem:[#allocation17_spill] sm:$0xff] %v9771_v14  ;;  %14511 = vst [vmem:[#allocation18_spill] sm:$0xff] %v9777_v5  ;;  %v9783_v57 = vld [vmem:[%s13287_s2 + $0x7a8] sm:$0xff]  ;;  %v9789_v21 = vld [vmem:[%s13287_s2 + $0x7b8] sm:$0xff] }
 0x44d   :  { %2149 = vmatpush2.msra.mxu0 %v9771_v14  ;;  %2220 = vmatpush2.msra.mxu1 %v9777_v5  ;;  %14512 = vst [vmem:[#allocation19_spill] sm:$0xff] %v9783_v57  ;;  %14513 = vst [vmem:[#allocation20_spill] sm:$0xff] %v9789_v21  ;;  %v9795_v14 = vld [vmem:[%s13287_s2 + $0x7a0] sm:$0xff]  ;;  %v9801_v5 = vld [vmem:[%s13287_s2 + $0x7b0] sm:$0xff] }
 0x44e   :  { %2150 = vmatprep.subr.mxu0 %v9783_v57  ;;  %2221 = vmatprep.subr.mxu1 %v9789_v21  ;;  %14514 = vst [vmem:[#allocation21_spill] sm:$0xff] %v9795_v14  ;;  %14515 = vst [vmem:[#allocation22_spill] sm:$0xff] %v9801_v5  ;;  %v9807_v57 = vld [vmem:[%s13287_s2 + $0x768] sm:$0xff]  ;;  %v9813_v21 = vld [vmem:[%s13287_s2 + $0x778] sm:$0xff] }
 0x44f   :  { %2151 = vmatpush2.msra.mxu0 %v9795_v14  ;;  %2222 = vmatpush2.msra.mxu1 %v9801_v5  ;;  %v9819_v14 = vld [vmem:[%s13287_s2 + $0x760] sm:$0xff]  ;;  %v9825_v5 = vld [vmem:[%s13287_s2 + $0x770] sm:$0xff] }
 0x450   :  { %2152 = vmatprep.subr.mxu0 %v9807_v57  ;;  %2223 = vmatprep.subr.mxu1 %v9813_v21 }
 0x451   :  { %2153 = vmatpush2.msra.mxu0 %v9819_v14  ;;  %2224 = vmatpush2.msra.mxu1 %v9825_v5 }
 0x452   :  { %2154 = vmatprep.subr.mxu0 %v8421_v2  ;;  %2225 = vmatprep.subr.mxu1 %v8427_v46  ;;  %v14516_v2 = vld [vmem:[#allocation30_spill] sm:$0xff]  ;;  %v14517_v46 = vld [vmem:[#allocation31_spill] sm:$0xff] }
 0x453   :  { %2155 = vmatpush2.msra.mxu0 %v8433_v39  ;;  %2226 = vmatpush2.msra.mxu1 %v8439_v41  ;;  %v14518_v39 = vld [vmem:[#allocation32_spill] sm:$0xff]  ;;  %v14519_v41 = vld [vmem:[#allocation33_spill] sm:$0xff] }
 0x454   :  { %2156 = vmatprep.subr.mxu0 %v8445_v43  ;;  %2227 = vmatprep.subr.mxu1 %v8451_v45  ;;  %v14520_v43 = vld [vmem:[#allocation34_spill] sm:$0xff]  ;;  %v14521_v45 = vld [vmem:[#allocation35_spill] sm:$0xff] }
 0x455   :  { %2157 = vmatpush2.msra.mxu0 %v8457_v26  ;;  %2228 = vmatpush2.msra.mxu1 %v8463_v33  ;;  %v14522_v26 = vld [vmem:[#allocation36_spill] sm:$0xff]  ;;  %v14523_v33 = vld [vmem:[#allocation37_spill] sm:$0xff] }
 0x456   :  { %2158 = vmatprep.subr.mxu0 %v8469_v51  ;;  %2229 = vmatprep.subr.mxu1 %v8475_v3  ;;  %v14524_v51 = vld [vmem:[#allocation38_spill] sm:$0xff]  ;;  %v14525_v3 = vld [vmem:[#allocation39_spill] sm:$0xff] }
 0x457   :  { %2159 = vmatpush2.msra.mxu0 %v8481_v30  ;;  %2230 = vmatpush2.msra.mxu1 %v8487_v31  ;;  %v14526_v30 = vld [vmem:[#allocation40_spill] sm:$0xff]  ;;  %v14527_v31 = vld [vmem:[#allocation41_spill] sm:$0xff] }
 0x458   :  { %2160 = vmatprep.subr.mxu0 %v8493_v40  ;;  %2231 = vmatprep.subr.mxu1 %v8499_v38  ;;  %v14528_v40 = vld [vmem:[#allocation42_spill] sm:$0xff]  ;;  %v14529_v38 = vld [vmem:[#allocation43_spill] sm:$0xff] }
 0x459   :  { %2161 = vmatpush2.msra.mxu0 %v8505_v35  ;;  %2232 = vmatpush2.msra.mxu1 %v8511_v36  ;;  %v14530_v35 = vld [vmem:[#allocation44_spill] sm:$0xff]  ;;  %v14531_v36 = vld [vmem:[#allocation45_spill] sm:$0xff] }
 0x45a   :  { %2162 = vmatprep.subr.mxu0 %v8517_v34  ;;  %2233 = vmatprep.subr.mxu1 %v8523_v63  ;;  %v14532_v34 = vld [vmem:[#allocation46_spill] sm:$0xff]  ;;  %v14533_v63 = vld [vmem:[#allocation47_spill] sm:$0xff] }
 0x45b   :  { %2163 = vmatpush2.msra.mxu0 %v8529_v16  ;;  %2234 = vmatpush2.msra.mxu1 %v8535_v56  ;;  %v14534_v16 = vld [vmem:[#allocation48_spill] sm:$0xff]  ;;  %v14535_v56 = vld [vmem:[#allocation49_spill] sm:$0xff] }
 0x45c   :  { %2164 = vmatprep.subr.mxu0 %v8541_v58  ;;  %2235 = vmatprep.subr.mxu1 %v8547_v18  ;;  %v14536_v58 = vld [vmem:[#allocation50_spill] sm:$0xff]  ;;  %v14537_v18 = vld [vmem:[#allocation51_spill] sm:$0xff] }
 0x45d   :  { %2165 = vmatpush2.msra.mxu0 %v8553_v29  ;;  %2236 = vmatpush2.msra.mxu1 %v8559_v60  ;;  %v14538_v29 = vld [vmem:[#allocation52_spill] sm:$0xff]  ;;  %v14539_v60 = vld [vmem:[#allocation53_spill] sm:$0xff] }
 0x45e   :  { %2166 = vmatprep.subr.mxu0 %v8565_v53  ;;  %2237 = vmatprep.subr.mxu1 %v8571_v62  ;;  %v14540_v53 = vld [vmem:[#allocation54_spill] sm:$0xff]  ;;  %v14541_v62 = vld [vmem:[#allocation55_spill] sm:$0xff] }
 0x45f   :  { %2167 = vmatpush2.msra.mxu0 %v8577_v17  ;;  %2238 = vmatpush2.msra.mxu1 %v8583_v20  ;;  %v14542_v17 = vld [vmem:[#allocation56_spill] sm:$0xff]  ;;  %v14543_v20 = vld [vmem:[#allocation57_spill] sm:$0xff] }
 0x460   :  { %2168 = vmatprep.subr.mxu0 %v8589_v23  ;;  %2239 = vmatprep.subr.mxu1 %v8595_v49  ;;  %v14544_v23 = vld [vmem:[#allocation58_spill] sm:$0xff]  ;;  %v14545_v49 = vld [vmem:[#allocation59_spill] sm:$0xff] }
 0x461   :  { %2169 = vmatpush2.msra.mxu0 %v8601_v24  ;;  %2240 = vmatpush2.msra.mxu1 %v8607_v37  ;;  %v14546_v24 = vld [vmem:[#allocation60_spill] sm:$0xff]  ;;  %v14547_v37 = vld [vmem:[#allocation61_spill] sm:$0xff] }
 0x462   :  { %2170 = vmatprep.subr.mxu0 %v8613_v25  ;;  %2241 = vmatprep.subr.mxu1 %v8619_v13  ;;  %v14548_v25 = vld [vmem:[#allocation62_spill] sm:$0xff]  ;;  %v14549_v13 = vld [vmem:[#allocation63_spill] sm:$0xff] }
 0x463   :  { %2171 = vmatpush2.msra.mxu0 %v8625_v22  ;;  %2242 = vmatpush2.msra.mxu1 %v8631_v28  ;;  %v14550_v22 = vld [vmem:[#allocation64_spill] sm:$0xff]  ;;  %v14551_v28 = vld [vmem:[#allocation65_spill] sm:$0xff] }
 0x464   :  { %2172 = vmatprep.subr.mxu0 %v8637_v9  ;;  %2243 = vmatprep.subr.mxu1 %v8643_v47  ;;  %v14552_v9 = vld [vmem:[#allocation66_spill] sm:$0xff]  ;;  %v14553_v47 = vld [vmem:[#allocation67_spill] sm:$0xff] }
 0x465   :  { %2173 = vmatpush2.msra.mxu0 %v14516_v2  ;;  %2244 = vmatpush2.msra.mxu1 %v14517_v46  ;;  %v14554_v2 = vld [vmem:[#allocation68_spill] sm:$0xff]  ;;  %v14555_v46 = vld [vmem:[#allocation69_spill] sm:$0xff] }
 0x466   :  { %2174 = vmatprep.subr.mxu0 %v14518_v39  ;;  %2245 = vmatprep.subr.mxu1 %v14519_v41  ;;  %v14556_v39 = vld [vmem:[#allocation70_spill] sm:$0xff]  ;;  %v14557_v41 = vld [vmem:[#allocation71_spill] sm:$0xff] }
 0x467   :  { %2175 = vmatpush2.msra.mxu0 %v14520_v43  ;;  %2246 = vmatpush2.msra.mxu1 %v14521_v45  ;;  %v14558_v43 = vld [vmem:[#allocation72_spill] sm:$0xff]  ;;  %v14559_v45 = vld [vmem:[#allocation73_spill] sm:$0xff] }
 0x468   :  { %2176 = vmatprep.subr.mxu0 %v14522_v26  ;;  %2247 = vmatprep.subr.mxu1 %v14523_v33  ;;  %v14560_v26 = vld [vmem:[#allocation74_spill] sm:$0xff]  ;;  %v14561_v33 = vld [vmem:[#allocation75_spill] sm:$0xff] }
 0x469   :  { %2177 = vmatpush2.msra.mxu0 %v14524_v51  ;;  %2248 = vmatpush2.msra.mxu1 %v14525_v3  ;;  %v14562_v51 = vld [vmem:[#allocation76_spill] sm:$0xff]  ;;  %v14563_v3 = vld [vmem:[#allocation77_spill] sm:$0xff] }
 0x46a   :  { %2178 = vmatprep.subr.mxu0 %v14526_v30  ;;  %2249 = vmatprep.subr.mxu1 %v14527_v31  ;;  %v14564_v30 = vld [vmem:[#allocation80_spill] sm:$0xff]  ;;  %v14565_v31 = vld [vmem:[#allocation81_spill] sm:$0xff] }
 0x46b   :  { %2179 = vmatpush2.msra.mxu0 %v14528_v40  ;;  %2250 = vmatpush2.msra.mxu1 %v14529_v38  ;;  %v14566_v40 = vld [vmem:[#allocation82_spill] sm:$0xff]  ;;  %v14567_v38 = vld [vmem:[#allocation83_spill] sm:$0xff] }
 0x46c   :  { %2181 = vmatmul.mubr.f32.vlgmr.msra.gmra.mxu0 %v9374_v59  ;;  %2252 = vmatmul.mubr.f32.vlgmr.msra.gmra.mxu1 %v9374_v59 }
 0x46d   :  { %2324 = vmatprep.subr.mxu0 %v14530_v35  ;;  %2395 = vmatprep.subr.mxu1 %v14531_v36  ;;  %v14568_v35 = vld [vmem:[#allocation86_spill] sm:$0xff]  ;;  %v14569_v36 = vld [vmem:[#allocation87_spill] sm:$0xff] }
 0x46e   :  { %2325 = vmatpush1.msra.mxu0 %v14532_v34  ;;  %2396 = vmatpush1.msra.mxu1 %v14533_v63  ;;  %v14570_v34 = vld [vmem:[#allocation88_spill] sm:$0xff]  ;;  %v14571_v63 = vld [vmem:[#allocation89_spill] sm:$0xff] }
 0x46f   :  { %2326 = vmatprep.subr.mxu0 %v14534_v16  ;;  %2397 = vmatprep.subr.mxu1 %v14535_v56  ;;  %v14572_v16 = vld [vmem:[#allocation92_spill] sm:$0xff]  ;;  %v14573_v56 = vld [vmem:[#allocation93_spill] sm:$0xff] }
 0x470   :  { %2327 = vmatpush1.msra.mxu0 %v14536_v58  ;;  %2398 = vmatpush1.msra.mxu1 %v14537_v18  ;;  %v14574_v58 = vld [vmem:[#allocation94_spill] sm:$0xff]  ;;  %v14575_v18 = vld [vmem:[#allocation95_spill] sm:$0xff] }
 0x471   :  { %2328 = vmatprep.subr.mxu0 %v14538_v29  ;;  %2399 = vmatprep.subr.mxu1 %v14539_v60  ;;  %v14576_v29 = vld [vmem:[#allocation98_spill] sm:$0xff]  ;;  %v14577_v60 = vld [vmem:[#allocation99_spill] sm:$0xff] }
 0x472   :  { %2329 = vmatpush1.msra.mxu0 %v14540_v53  ;;  %2400 = vmatpush1.msra.mxu1 %v14541_v62  ;;  %v14578_v53 = vld [vmem:[#allocation100_spill] sm:$0xff]  ;;  %v14579_v62 = vld [vmem:[#allocation101_spill] sm:$0xff] }
 0x473   :  { %2330 = vmatprep.subr.mxu0 %v14542_v17  ;;  %2401 = vmatprep.subr.mxu1 %v14543_v20  ;;  %v14580_v17 = vld [vmem:[#allocation104_spill] sm:$0xff]  ;;  %v14581_v20 = vld [vmem:[#allocation105_spill] sm:$0xff] }
 0x474   :  { %2331 = vmatpush1.msra.mxu0 %v14544_v23  ;;  %2402 = vmatpush1.msra.mxu1 %v14545_v49  ;;  %v14582_v23 = vld [vmem:[#allocation106_spill] sm:$0xff]  ;;  %v14583_v49 = vld [vmem:[#allocation107_spill] sm:$0xff] }
 0x475   :  { %2332 = vmatprep.subr.mxu0 %v14546_v24  ;;  %2403 = vmatprep.subr.mxu1 %v14547_v37  ;;  %v14584_v24 = vld [vmem:[#allocation110_spill] sm:$0xff]  ;;  %v14585_v37 = vld [vmem:[#allocation111_spill] sm:$0xff] }
 0x476   :  { %2333 = vmatpush1.msra.mxu0 %v14548_v25  ;;  %2404 = vmatpush1.msra.mxu1 %v14549_v13  ;;  %v14586_v25 = vld [vmem:[#allocation112_spill] sm:$0xff]  ;;  %v14587_v13 = vld [vmem:[#allocation113_spill] sm:$0xff] }
 0x477   :  { %2334 = vmatprep.subr.mxu0 %v14550_v22  ;;  %2405 = vmatprep.subr.mxu1 %v14551_v28  ;;  %v14588_v22 = vld [vmem:[#allocation116_spill] sm:$0xff]  ;;  %v14589_v28 = vld [vmem:[#allocation117_spill] sm:$0xff] }
 0x478   :  { %2335 = vmatpush1.msra.mxu0 %v14552_v9  ;;  %2406 = vmatpush1.msra.mxu1 %v14553_v47  ;;  %v14590_v9 = vld [vmem:[#allocation118_spill] sm:$0xff]  ;;  %v14591_v47 = vld [vmem:[#allocation119_spill] sm:$0xff] }
 0x479   :  { %2336 = vmatprep.subr.mxu0 %v14554_v2  ;;  %2407 = vmatprep.subr.mxu1 %v14555_v46  ;;  %v14592_v2 = vld [vmem:[#allocation122_spill] sm:$0xff]  ;;  %v14593_v46 = vld [vmem:[#allocation123_spill] sm:$0xff] }
 0x47a   :  { %2337 = vmatpush1.msra.mxu0 %v14556_v39  ;;  %2408 = vmatpush1.msra.mxu1 %v14557_v41  ;;  %v14594_v39 = vld [vmem:[#allocation124_spill] sm:$0xff]  ;;  %v14595_v41 = vld [vmem:[#allocation125_spill] sm:$0xff] }
 0x47b   :  { %2338 = vmatprep.subr.mxu0 %v14558_v43  ;;  %2409 = vmatprep.subr.mxu1 %v14559_v45  ;;  %v14596_v43 = vld [vmem:[#allocation128_spill] sm:$0xff]  ;;  %v14597_v45 = vld [vmem:[#allocation129_spill] sm:$0xff] }
 0x47c   :  { %2339 = vmatpush1.msra.mxu0 %v14560_v26  ;;  %2410 = vmatpush1.msra.mxu1 %v14561_v33  ;;  %v14598_v26 = vld [vmem:[#allocation130_spill] sm:$0xff]  ;;  %v14599_v33 = vld [vmem:[#allocation131_spill] sm:$0xff] }
 0x47d   :  { %2340 = vmatprep.subr.mxu0 %v14562_v51  ;;  %2411 = vmatprep.subr.mxu1 %v14563_v3  ;;  %v14600_v51 = vld [vmem:[#allocation134_spill] sm:$0xff]  ;;  %v14601_v3 = vld [vmem:[#allocation135_spill] sm:$0xff] }
 0x47e   :  { %2341 = vmatpush1.msra.mxu0 %v14564_v30  ;;  %2412 = vmatpush1.msra.mxu1 %v14565_v31  ;;  %v14602_v30 = vld [vmem:[#allocation136_spill] sm:$0xff]  ;;  %v14603_v31 = vld [vmem:[#allocation137_spill] sm:$0xff] }
 0x47f   :  { %2342 = vmatprep.subr.mxu0 %v14566_v40  ;;  %2413 = vmatprep.subr.mxu1 %v14567_v38  ;;  %v14604_v40 = vld [vmem:[#allocation140_spill] sm:$0xff]  ;;  %v14605_v38 = vld [vmem:[#allocation141_spill] sm:$0xff] }
 0x480   :  { %2343 = vmatpush1.msra.mxu0 %v14568_v35  ;;  %2414 = vmatpush1.msra.mxu1 %v14569_v36  ;;  %v14606_v35 = vld [vmem:[#allocation142_spill] sm:$0xff]  ;;  %v14607_v36 = vld [vmem:[#allocation143_spill] sm:$0xff] }
 0x481   :  { %2344 = vmatprep.subr.mxu0 %v14570_v34  ;;  %2415 = vmatprep.subr.mxu1 %v14571_v63  ;;  %v14608_v34 = vld [vmem:[#allocation146_spill] sm:$0xff]  ;;  %v14609_v63 = vld [vmem:[#allocation147_spill] sm:$0xff] }
 0x482   :  { %2345 = vmatpush1.msra.mxu0 %v14572_v16  ;;  %2416 = vmatpush1.msra.mxu1 %v14573_v56  ;;  %v14610_v16 = vld [vmem:[#allocation148_spill] sm:$0xff]  ;;  %v14611_v56 = vld [vmem:[#allocation149_spill] sm:$0xff] }
 0x483   :  { %2346 = vmatprep.subr.mxu0 %v14574_v58  ;;  %2417 = vmatprep.subr.mxu1 %v14575_v18  ;;  %v14612_v58 = vld [vmem:[#allocation152_spill] sm:$0xff]  ;;  %v14613_v18 = vld [vmem:[#allocation153_spill] sm:$0xff] }
 0x484   :  { %2347 = vmatpush1.msra.mxu0 %v14576_v29  ;;  %2418 = vmatpush1.msra.mxu1 %v14577_v60  ;;  %v14614_v29 = vld [vmem:[#allocation154_spill] sm:$0xff]  ;;  %v14615_v60 = vld [vmem:[#allocation157_spill] sm:$0xff] }
 0x485   :  { %2348 = vmatprep.subr.mxu0 %v14578_v53  ;;  %2419 = vmatprep.subr.mxu1 %v14579_v62  ;;  %v14616_v53 = vld [vmem:[#allocation158_spill] sm:$0xff] }
 0x486   :  { %2349 = vmatpush1.msra.mxu0 %v14580_v17  ;;  %2420 = vmatpush1.msra.mxu1 %v14581_v20  ;;  %v14617_v62 = vld [vmem:[#allocation78_spill] sm:$0xff]  ;;  %v14618_v17 = vld [vmem:[#allocation84_spill] sm:$0xff]  ;;  %v14619_v20 = vld [vmem:[#allocation85_spill] sm:$0xff] }
 0x487   :  { %2350 = vmatprep.subr.mxu0 %v14582_v23  ;;  %2421 = vmatprep.subr.mxu1 %v14583_v49  ;;  %v14620_v23 = vld [vmem:[#allocation79_spill] sm:$0xff]  ;;  %v14621_v49 = vld [vmem:[#allocation185_spill] sm:$0xff] }
 0x488   :  { %2351 = vmatpush1.msra.mxu0 %v14584_v24  ;;  %2422 = vmatpush1.msra.mxu1 %v14585_v37  ;;  %v14622_v24 = vld [vmem:[#allocation186_spill] sm:$0xff]  ;;  %v14623_v37 = vld [vmem:[#allocation187_spill] sm:$0xff] }
 0x489   :  { %2352 = vmatprep.subr.mxu0 %v14586_v25  ;;  %2423 = vmatprep.subr.mxu1 %v14587_v13  ;;  %v14624_v25 = vld [vmem:[#allocation188_spill] sm:$0xff]  ;;  %v14625_v13 = vld [vmem:[#allocation189_spill] sm:$0xff] }
 0x48a   :  { %2353 = vmatpush1.msra.mxu0 %v14588_v22  ;;  %2424 = vmatpush1.msra.mxu1 %v14589_v28  ;;  %v14626_v22 = vld [vmem:[#allocation190_spill] sm:$0xff]  ;;  %v14627_v28 = vld [vmem:[#allocation191_spill] sm:$0xff] }
 0x48b   :  { %2354 = vmatprep.subr.mxu0 %v14590_v9  ;;  %2425 = vmatprep.subr.mxu1 %v14591_v47  ;;  %v9983_v9 = vld [vmem:[%s13287_s2 + $0x5c0] sm:$0xff]  ;;  %v9989_v47 = vld [vmem:[%s13287_s2 + $0x5d0] sm:$0xff] }
 0x48c   :  { %2355 = vmatpush1.msra.mxu0 %v14592_v2  ;;  %2426 = vmatpush1.msra.mxu1 %v14593_v46  ;;  %v9995_v2 = vld [vmem:[%s13287_s2 + $0x588] sm:$0xff]  ;;  %v10001_v46 = vld [vmem:[%s13287_s2 + $0x598] sm:$0xff] }
 0x48d   :  { %2356 = vmatprep.subr.mxu0 %v14594_v39  ;;  %2427 = vmatprep.subr.mxu1 %v14595_v41  ;;  %v10007_v39 = vld [vmem:[%s13287_s2 + $0x580] sm:$0xff]  ;;  %v10013_v41 = vld [vmem:[%s13287_s2 + $0x590] sm:$0xff] }
 0x48e   :  { %2357 = vmatpush2.msra.mxu0 %v14596_v43  ;;  %2428 = vmatpush2.msra.mxu1 %v14597_v45  ;;  %v10019_v43 = vld [vmem:[%s13287_s2 + $0x548] sm:$0xff]  ;;  %v10025_v45 = vld [vmem:[%s13287_s2 + $0x558] sm:$0xff] }
 0x48f   :  { %2358 = vmatprep.subr.mxu0 %v14598_v26  ;;  %2429 = vmatprep.subr.mxu1 %v14599_v33  ;;  %v10031_v26 = vld [vmem:[%s13287_s2 + $0x540] sm:$0xff]  ;;  %v10037_v33 = vld [vmem:[%s13287_s2 + $0x550] sm:$0xff] }
 0x490   :  { %2359 = vmatpush2.msra.mxu0 %v14600_v51  ;;  %2430 = vmatpush2.msra.mxu1 %v14601_v3  ;;  %v10043_v51 = vld [vmem:[%s13287_s2 + $0x508] sm:$0xff]  ;;  %v10049_v3 = vld [vmem:[%s13287_s2 + $0x518] sm:$0xff] }
 0x491   :  { %2360 = vmatprep.subr.mxu0 %v14602_v30  ;;  %2431 = vmatprep.subr.mxu1 %v14603_v31  ;;  %v10055_v30 = vld [vmem:[%s13287_s2 + $0x500] sm:$0xff]  ;;  %v10061_v31 = vld [vmem:[%s13287_s2 + $0x510] sm:$0xff] }
 0x492   :  { %2361 = vmatpush2.msra.mxu0 %v14604_v40  ;;  %2432 = vmatpush2.msra.mxu1 %v14605_v38  ;;  %v10067_v40 = vld [vmem:[%s13287_s2 + $0x4c8] sm:$0xff]  ;;  %v10073_v38 = vld [vmem:[%s13287_s2 + $0x4d8] sm:$0xff] }
 0x493   :  { %2362 = vmatprep.subr.mxu0 %v14606_v35  ;;  %2433 = vmatprep.subr.mxu1 %v14607_v36  ;;  %v10079_v35 = vld [vmem:[%s13287_s2 + $0x4c0] sm:$0xff]  ;;  %v10085_v36 = vld [vmem:[%s13287_s2 + $0x4d0] sm:$0xff] }
 0x494   :  { %2363 = vmatpush2.msra.mxu0 %v14608_v34  ;;  %2434 = vmatpush2.msra.mxu1 %v14609_v63  ;;  %v10091_v34 = vld [vmem:[%s13287_s2 + $0x488] sm:$0xff]  ;;  %v10097_v63 = vld [vmem:[%s13287_s2 + $0x498] sm:$0xff] }
 0x495   :  { %2364 = vmatprep.subr.mxu0 %v14610_v16  ;;  %2435 = vmatprep.subr.mxu1 %v14611_v56  ;;  %14628 = vst [vmem:[#allocation23_spill] sm:$0xff] %v10097_v63  ;;  %v10103_v16 = vld [vmem:[%s13287_s2 + $0x480] sm:$0xff]  ;;  %v10109_v56 = vld [vmem:[%s13287_s2 + $0x490] sm:$0xff] }
 0x496   :  { %2365 = vmatpush2.msra.mxu0 %v14612_v58  ;;  %2436 = vmatpush2.msra.mxu1 %v14613_v18  ;;  %14629 = vst [vmem:[#allocation24_spill] sm:$0xff] %v10103_v16  ;;  %14630 = vst [vmem:[#allocation25_spill] sm:$0xff] %v10109_v56  ;;  %v10115_v58 = vld [vmem:[%s13287_s2 + $0x448] sm:$0xff]  ;;  %v10121_v18 = vld [vmem:[%s13287_s2 + $0x458] sm:$0xff] }
 0x497   :  { %2366 = vmatprep.subr.mxu0 %v14614_v29  ;;  %2437 = vmatprep.subr.mxu1 %v14615_v60  ;;  %14631 = vst [vmem:[#allocation26_spill] sm:$0xff] %v10115_v58  ;;  %14632 = vst [vmem:[#allocation27_spill] sm:$0xff] %v10121_v18  ;;  %v10127_v29 = vld [vmem:[%s13287_s2 + $0x440] sm:$0xff]  ;;  %v10133_v60 = vld [vmem:[%s13287_s2 + $0x450] sm:$0xff] }
 0x498   :  { %2367 = vmatpush2.msra.mxu0 %v14616_v53  ;;  %2438 = vmatpush2.msra.mxu1 %v14617_v62  ;;  %14633 = vst [vmem:[#allocation28_spill] sm:$0xff] %v10127_v29  ;;  %14634 = vst [vmem:[#allocation90_spill] sm:$0xff] %v10133_v60  ;;  %v10139_v53 = vld [vmem:[%s13287_s2 + $0x408] sm:$0xff]  ;;  %v10145_v62 = vld [vmem:[%s13287_s2 + $0x418] sm:$0xff] }
 0x499   :  { %2368 = vmatprep.subr.mxu0 %v14618_v17  ;;  %2439 = vmatprep.subr.mxu1 %v14619_v20  ;;  %14635 = vst [vmem:[#allocation96_spill] sm:$0xff] %v10139_v53  ;;  %14636 = vst [vmem:[#allocation97_spill] sm:$0xff] %v10145_v62  ;;  %v10151_v17 = vld [vmem:[%s13287_s2 + $0x400] sm:$0xff]  ;;  %v10157_v20 = vld [vmem:[%s13287_s2 + $0x410] sm:$0xff] }
 0x49a   :  { %2369 = vmatpush2.msra.mxu0 %v14620_v23  ;;  %2440 = vmatpush2.msra.mxu1 %v14621_v49  ;;  %14637 = vst [vmem:[#allocation179_spill] sm:$0xff] %v10151_v17  ;;  %14638 = vst [vmem:[#allocation180_spill] sm:$0xff] %v10157_v20  ;;  %v10163_v23 = vld [vmem:[%s13287_s2 + $0x3e8] sm:$0xff]  ;;  %v10169_v49 = vld [vmem:[%s13287_s2 + $0x3f8] sm:$0xff] }
 0x49b   :  { %2370 = vmatprep.subr.mxu0 %v14622_v24  ;;  %2441 = vmatprep.subr.mxu1 %v14623_v37  ;;  %14639 = vst [vmem:[#allocation181_spill] sm:$0xff] %v10163_v23  ;;  %14640 = vst [vmem:[#allocation182_spill] sm:$0xff] %v10169_v49  ;;  %v14641_v37 = vld [vmem:[#allocation102_spill] sm:$0xff] }
 0x49c   :  { %2371 = vmatpush2.msra.mxu0 %v14624_v25  ;;  %2442 = vmatpush2.msra.mxu1 %v14625_v13 }
 0x49d   :  { %2372 = vmatprep.subr.mxu0 %v14626_v22  ;;  %2443 = vmatprep.subr.mxu1 %v14627_v28  ;;  %v14642_v28 = vld [vmem:[#allocation108_spill] sm:$0xff] }
 0x49e   :  { %2373 = vmatpush2.msra.mxu0 %v9983_v9  ;;  %2444 = vmatpush2.msra.mxu1 %v9989_v47 }
 0x49f   :  { %2374 = vmatprep.subr.mxu0 %v9995_v2  ;;  %2445 = vmatprep.subr.mxu1 %v10001_v46 }
 0x4a0   :  { %2375 = vmatpush2.msra.mxu0 %v10007_v39  ;;  %2446 = vmatpush2.msra.mxu1 %v10013_v41 }
 0x4a1   :  { %2376 = vmatprep.subr.mxu0 %v10019_v43  ;;  %2447 = vmatprep.subr.mxu1 %v10025_v45 }
 0x4a2   :  { %2377 = vmatpush2.msra.mxu0 %v10031_v26  ;;  %2448 = vmatpush2.msra.mxu1 %v10037_v33 }
 0x4a3   :  { %2378 = vmatprep.subr.mxu0 %v10043_v51  ;;  %2449 = vmatprep.subr.mxu1 %v10049_v3 }
 0x4a4   :  { %2379 = vmatpush2.msra.mxu0 %v10055_v30  ;;  %2450 = vmatpush2.msra.mxu1 %v10061_v31 }
 0x4a5   :  { %2380 = vmatprep.subr.mxu0 %v10067_v40  ;;  %2451 = vmatprep.subr.mxu1 %v10073_v38 }
 0x4a6   :  { %2381 = vmatpush2.msra.mxu0 %v10079_v35  ;;  %2452 = vmatpush2.msra.mxu1 %v10085_v36 }
 0x4a7   :  { %2382 = vmatprep.subr.mxu0 %v10091_v34  ;;  %2453 = vmatprep.subr.mxu1 %v10097_v63 }
 0x4a8   :  { %2383 = vmatpush2.msra.mxu0 %v10103_v16  ;;  %2454 = vmatpush2.msra.mxu1 %v10109_v56 }
 0x4a9   :  { %2384 = vmatprep.subr.mxu0 %v10115_v58  ;;  %2455 = vmatprep.subr.mxu1 %v10121_v18 }
 0x4aa   :  { %2385 = vmatpush2.msra.mxu0 %v10127_v29  ;;  %2456 = vmatpush2.msra.mxu1 %v10133_v60 }
 0x4ab   :  { %2386 = vmatprep.subr.mxu0 %v10139_v53  ;;  %2457 = vmatprep.subr.mxu1 %v10145_v62 }
 0x4ac   :  { %2387 = vmatpush2.msra.mxu0 %v10151_v17  ;;  %2458 = vmatpush2.msra.mxu1 %v10157_v20 }
 0x4ad   :  { %2466 = vmatprep.subr.mxu0 %v10163_v23  ;;  %2537 = vmatprep.subr.mxu1 %v10169_v49  ;;  %v14643_v23 = vld [vmem:[#allocation109_spill] sm:$0xff] }
 0x4eb   :  { %v2040_v24 = vpop.f32.mrf.mxu0  ;;  %v2111_v17 = vpop.f32.mrf.mxu1 }
 0x4ec   :  { %v2262_v25 = vadd.f32 %v2040_v24, %v14641_v37 }
 0x4ed   :  { %v2042_v13 = vpop.f32.mrf.mxu0  ;;  %v2113_v62 = vpop.f32.mrf.mxu1 }
 0x4ee   :  { %v4037_v22 = vmul.f32 -1.442695, %v2262_v25  ;;  %v2263_v59 = vadd.f32 %v2042_v13, %v14642_v28  ;;  %v2265_v53 = vadd.f32 %v2113_v62, %v14643_v23  ;;  %v14646_v62 = vld [vmem:[#allocation177_spill] sm:$0xff] }
 0x4f0   :  { %4287 = vpow2.f32 %v4037_v22  ;;  %v4038_v20 = vmul.f32 -1.442695, %v2263_v59  ;;  %v14644_v59 = vld [vmem:[#allocation183_spill] sm:$0xff] }
 0x4f2   :  { %4289 = vpow2.f32 %v4038_v20  ;;  %v14645_v20 = vld [vmem:[#allocation175_spill] sm:$0xff] }
 0x4f3   :  { %4291 = vtanh.f32 %v2265_v53  ;;  %v453_v28 = vadd.f32 %v14645_v20, %v14644_v59  ;;  %v14649_v59 = vld [vmem:[#allocation103_spill] sm:$0xff] }
 0x4f4   :  { %v2264_v16 = vadd.f32 %v2111_v17, %v14649_v59 }
 0x4fd   :  { %v4288_v60 = vpop.eup %4287 }
 0x4fe   :  { %v2283_v29 = vadd.f32 1.0, %v4288_v60  ;;  %v455_v60 = vadd.f32 %v14646_v62, %v7499_v61 }
 0x4ff   :  { %v4290_v18 = vpop.eup %4289 }
 0x500   :  { %4293 = vrcp.f32 %v2283_v29  ;;  %v2284_v49 = vadd.f32 1.0, %v4290_v18  ;;  %v4292_v58 = vpop.eup %4291 }
 0x502   :  { %4295 = vrcp.f32 %v2284_v49 }
 0x50d   :  { %v4294_v24 = vpop.eup %4293 }
 0x50e   :  { %v2313_v37 = vmul.f32 %v4294_v24, %v4292_v58  ;;  %v14647_v24 = vld [vmem:[#allocation176_spill] sm:$0xff] }
 0x50f   :  { %v4296_v25 = vpop.eup %4295 }
 0x510   :  { %v2312_v13 = vmul.f32 %v4296_v25, %v9356_v12  ;;  %v566_v12 = vadd.f32 %v14647_v24, %v7505_v19 }
 0x512   :  { %v10176_v22 = vadd.f32 %v2313_v37, %v2312_v13  ;;  %v14648_v13 = vld [vmem:[#allocation178_spill] sm:$0xff] }
 0x513   :  { %v568_v20 = vadd.f32 %v14648_v13, %v7512_v50 }
 0x52c   :  { %v2182_v56 = vpop.f32.mrf.mxu0  ;;  %v2253_v58 = vpop.f32.mrf.mxu1 }
 0x52d   :  { %v2270_v23 = vadd.f32 %v2182_v56, %v453_v28  ;;  %v2272_v37 = vadd.f32 %v2253_v58, %v566_v12  ;;  %v4039_v28 = vmul.f32 -1.442695, %v2264_v16 }
 0x52e   :  { %v2184_v53 = vpop.f32.mrf.mxu0  ;;  %v2255_v25 = vpop.f32.mrf.mxu1 }
 0x52f   :  { %v4040_v29 = vmul.f32 -1.442695, %v2270_v23  ;;  %v2271_v18 = vadd.f32 %v2184_v53, %v455_v60  ;;  %v4042_v63 = vmul.f32 -1.442695, %v2272_v37  ;;  %v2273_v62 = vadd.f32 %v2255_v25, %v568_v20 }
 0x531   :  { %4297 = vpow2.f32 %v4040_v29  ;;  %v4041_v49 = vmul.f32 -1.442695, %v2271_v18 }
 0x533   :  { %4299 = vpow2.f32 %v4041_v49 }
 0x534   :  { %4301 = vpow2.f32 %v4042_v63 }
 0x535   :  { %4303 = vtanh.f32 %v2273_v62 }
 0x53e   :  { %v4298_v56 = vpop.eup %4297 }
 0x53f   :  { %v2301_v23 = vadd.f32 1.0, %v4298_v56 }
 0x540   :  { %v4300_v60 = vpop.eup %4299 }
 0x541   :  { %4305 = vrcp.f32 %v2301_v23  ;;  %v2302_v53 = vadd.f32 1.0, %v4300_v60  ;;  %v4302_v29 = vpop.eup %4301  ;;  %v14668_v23 = vld [vmem:[#allocation209_spill] sm:$0xff]  ;;  %v14669_v60 = vld [vmem:[#allocation210_spill] sm:$0xff] }
 0x542   :  { %4307 = vpow2.f32 %v4039_v28  ;;  %v4304_v18 = vpop.eup %4303  ;;  %v2303_v13 = vadd.f32 1.0, %v4302_v29  ;;  %v14671_v29 = vld [vmem:[#allocation212_spill] sm:$0xff] }
 0x543   :  { %4309 = vrcp.f32 %v2302_v53  ;;  %v14670_v53 = vld [vmem:[#allocation211_spill] sm:$0xff] }
 0x544   :  { %4311 = vtanh.f32 %v10176_v22 }
 0x545   :  { %4313 = vrcp.f32 %v2303_v13  ;;  %v14677_v13 = vld [vmem:[#allocation218_spill] sm:$0xff] }
 0x54e   :  { %v4306_v49 = vpop.eup %4305 }
 0x54f   :  { %v4308_v58 = vpop.eup %4307  ;;  %v2316_v24 = vmul.f32 %v4306_v49, %v4304_v18  ;;  %v14672_v18 = vld [vmem:[#allocation213_spill] sm:$0xff]  ;;  %v14673_v49 = vld [vmem:[#allocation214_spill] sm:$0xff] }
 0x550   :  { %v4310_v12 = vpop.eup %4309  ;;  %v2285_v59 = vadd.f32 1.0, %v4308_v58  ;;  %v14674_v58 = vld [vmem:[#allocation215_spill] sm:$0xff] }
 0x551   :  { %v2315_v17 = vmul.f32 %v4310_v12, %v9369_v8  ;;  %v4312_v63 = vpop.eup %4311  ;;  %v14651_v8 = vmax.f32 %v8340_v48, %v9372_v42  ;;  %v14652_v48 = vld [vmem:[#allocation193_spill] sm:$0xff]  ;;  %v14653_v42 = vld [vmem:[#allocation194_spill] sm:$0xff] }
 0x552   :  { %v4314_v37 = vpop.eup %4313  ;;  %v14676_v12 = vld [vmem:[#allocation217_spill] sm:$0xff] }
 0x553   :  { %v10189_v16 = vadd.f32 %v2316_v24, %v2315_v17  ;;  %v14675_v24 = vld [vmem:[#allocation216_spill] sm:$0xff]  ;;  %v14678_v17 = vld [vmem:[#allocation219_spill] sm:$0xff] }
 0x555   :  { %4315 = vtanh.f32 %v10189_v16 }
 0x556   :  { %4317 = vrcp.f32 %v2285_v59  ;;  %v14679_v59 = vld [vmem:[#allocation220_spill] sm:$0xff] }
 0x562   :  { %v4316_v25 = vpop.eup %4315 }
 0x563   :  { %v4318_v20 = vpop.eup %4317  ;;  %v2321_v62 = vmul.f32 %v4316_v25, %v4314_v37  ;;  %v14681_v37 = vld [vmem:[#allocation222_spill] sm:$0xff]  ;;  %v14682_v25 = vld [vmem:[#allocation223_spill] sm:$0xff] }
 0x564   :  { %v10192_v56 = vmul.f32 %v4318_v20, %v4312_v63  ;;  %v14680_v63 = vld [vmem:[#allocation221_spill] sm:$0xff]  ;;  %v14683_v20 = vld [vmem:[#allocation224_spill] sm:$0xff] }
 0x565   :  { %2388 = vmatprep.mubr.f32.mxu0 %v2321_v62  ;;  %2459 = vmatprep.mubr.f32.mxu1 %v2321_v62  ;;  %v10197_v28 = vmax.f32 %v14651_v8, %v2321_v62  ;;  %v14685_v8 = vld [vmem:[#allocation226_spill] sm:$0xff] }
 0x566   :  { %14650 = vst [vmem:[#allocation91_spill] sm:$0xff] %v10192_v56  ;;  %2389 = vmatmul.mubr.f32.vlgmr.msra.gmra.mxu0 %v10192_v56  ;;  %2460 = vmatmul.mubr.f32.vlgmr.msra.gmra.mxu1 %v10192_v56 }
 0x567   :  { %2467 = vmatpush1.msra.mxu0 %v9385_v55  ;;  %2538 = vmatpush1.msra.mxu1 %v9391_v15  ;;  %v14654_v55 = vld [vmem:[#allocation195_spill] sm:$0xff]  ;;  %v14655_v15 = vld [vmem:[#allocation196_spill] sm:$0xff] }
 0x568   :  { %2468 = vmatprep.subr.mxu0 %v9397_v11  ;;  %2530 = vmatprep.mubr.f32.mxu0 %v2321_v62  ;;  %v14656_v11 = vld [vmem:[#allocation197_spill] sm:$0xff] }
 0x569   :  { %2539 = vmatprep.subr.mxu1 %v9404_v6  ;;  %2601 = vmatprep.mubr.f32.mxu1 %v2321_v62  ;;  %v14657_v6 = vld [vmem:[#allocation198_spill] sm:$0xff]  ;;  %v14684_v62 = vld [vmem:[#allocation225_spill] sm:$0xff] }
 0x56a   :  { %2469 = vmatpush1.msra.mxu0 %v9411_v1  ;;  %2540 = vmatpush1.msra.mxu1 %v9417_v27  ;;  %v14658_v1 = vld [vmem:[#allocation199_spill] sm:$0xff]  ;;  %v14659_v27 = vld [vmem:[#allocation200_spill] sm:$0xff] }
 0x56b   :  { %2470 = vmatprep.subr.mxu0 %v9423_v44  ;;  %2541 = vmatprep.subr.mxu1 %v9429_v4  ;;  %v14660_v44 = vld [vmem:[#allocation201_spill] sm:$0xff]  ;;  %v14661_v4 = vld [vmem:[#allocation202_spill] sm:$0xff] }
 0x56c   :  { %2471 = vmatpush1.msra.mxu0 %v9435_v7  ;;  %2542 = vmatpush1.msra.mxu1 %v9441_v0  ;;  %v14662_v7 = vld [vmem:[#allocation203_spill] sm:$0xff]  ;;  %v14663_v0 = vld [vmem:[#allocation204_spill] sm:$0xff] }
 0x56d   :  { %2472 = vmatprep.subr.mxu0 %v9447_v32  ;;  %2543 = vmatprep.subr.mxu1 %v9453_v52  ;;  %v14664_v32 = vld [vmem:[#allocation205_spill] sm:$0xff]  ;;  %v14665_v52 = vld [vmem:[#allocation206_spill] sm:$0xff] }
 0x56e   :  { %2473 = vmatpush1.msra.mxu0 %v9459_v54  ;;  %2544 = vmatpush1.msra.mxu1 %v9465_v10  ;;  %v14666_v54 = vld [vmem:[#allocation207_spill] sm:$0xff]  ;;  %v14667_v10 = vld [vmem:[#allocation208_spill] sm:$0xff] }
 0x56f   :  { %2474 = vmatprep.subr.mxu0 %v14652_v48  ;;  %2545 = vmatprep.subr.mxu1 %v14653_v42  ;;  %v14686_v48 = vld [vmem:[#allocation227_spill] sm:$0xff]  ;;  %v14687_v42 = vld [vmem:[#allocation228_spill] sm:$0xff] }
 0x570   :  { %2475 = vmatpush1.msra.mxu0 %v14654_v55  ;;  %2546 = vmatpush1.msra.mxu1 %v14655_v15  ;;  %v14688_v55 = vld [vmem:[#allocation3_spill] sm:$0xff]  ;;  %v14689_v15 = vld [vmem:[#allocation4_spill] sm:$0xff] }
 0x571   :  { %2476 = vmatprep.subr.mxu0 %v14656_v11  ;;  %2547 = vmatprep.subr.mxu1 %v14657_v6  ;;  %v14690_v11 = vld [vmem:[#allocation5_spill] sm:$0xff]  ;;  %v14691_v6 = vld [vmem:[#allocation6_spill] sm:$0xff] }
 0x572   :  { %2477 = vmatpush1.msra.mxu0 %v14658_v1  ;;  %2548 = vmatpush1.msra.mxu1 %v14659_v27  ;;  %v14692_v1 = vld [vmem:[#allocation7_spill] sm:$0xff]  ;;  %v14693_v27 = vld [vmem:[#allocation8_spill] sm:$0xff] }
 0x573   :  { %2478 = vmatprep.subr.mxu0 %v14660_v44  ;;  %2549 = vmatprep.subr.mxu1 %v14661_v4  ;;  %v14694_v44 = vld [vmem:[#allocation9_spill] sm:$0xff]  ;;  %v14695_v4 = vld [vmem:[#allocation10_spill] sm:$0xff] }
 0x574   :  { %2479 = vmatpush1.msra.mxu0 %v14662_v7  ;;  %2550 = vmatpush1.msra.mxu1 %v14663_v0  ;;  %v14696_v7 = vld [vmem:[#allocation11_spill] sm:$0xff]  ;;  %v14697_v0 = vld [vmem:[#allocation12_spill] sm:$0xff] }
 0x575   :  { %2480 = vmatprep.subr.mxu0 %v14664_v32  ;;  %2551 = vmatprep.subr.mxu1 %v14665_v52  ;;  %v14698_v32 = vld [vmem:[#allocation13_spill] sm:$0xff]  ;;  %v14699_v52 = vld [vmem:[#allocation14_spill] sm:$0xff] }
 0x576   :  { %2481 = vmatpush1.msra.mxu0 %v14666_v54  ;;  %2552 = vmatpush1.msra.mxu1 %v14667_v10  ;;  %v14700_v54 = vld [vmem:[#allocation15_spill] sm:$0xff]  ;;  %v14701_v10 = vld [vmem:[#allocation16_spill] sm:$0xff] }
 0x577   :  { %2482 = vmatprep.subr.mxu0 %v14668_v23  ;;  %2553 = vmatprep.subr.mxu1 %v14669_v60  ;;  %v14702_v23 = vld [vmem:[#allocation17_spill] sm:$0xff]  ;;  %v14703_v60 = vld [vmem:[#allocation18_spill] sm:$0xff] }
 0x578   :  { %2483 = vmatpush1.msra.mxu0 %v14670_v53  ;;  %2554 = vmatpush1.msra.mxu1 %v14671_v29  ;;  %v14704_v53 = vld [vmem:[#allocation19_spill] sm:$0xff]  ;;  %v14705_v29 = vld [vmem:[#allocation20_spill] sm:$0xff] }
 0x579   :  { %2484 = vmatprep.subr.mxu0 %v14672_v18  ;;  %2555 = vmatprep.subr.mxu1 %v14673_v49  ;;  %v14706_v18 = vld [vmem:[#allocation21_spill] sm:$0xff]  ;;  %v14707_v49 = vld [vmem:[#allocation22_spill] sm:$0xff] }
 0x57a   :  { %2485 = vmatpush1.msra.mxu0 %v14674_v58  ;;  %2556 = vmatpush1.msra.mxu1 %v14675_v24  ;;  %v10278_v58 = vld [vmem:[%s13287_s2 + $0x728] sm:$0xff]  ;;  %v10284_v24 = vld [vmem:[%s13287_s2 + $0x738] sm:$0xff] }
 0x57b   :  { %2486 = vmatprep.subr.mxu0 %v14676_v12  ;;  %2557 = vmatprep.subr.mxu1 %v14677_v13  ;;  %v10314_v12 = vld [vmem:[%s13287_s2 + $0x6e0] sm:$0xff]  ;;  %v10320_v13 = vld [vmem:[%s13287_s2 + $0x6f0] sm:$0xff] }
 0x57c   :  { %2487 = vmatpush1.msra.mxu0 %v14678_v17  ;;  %2558 = vmatpush1.msra.mxu1 %v14679_v59  ;;  %v10326_v17 = vld [vmem:[%s13287_s2 + $0x6a8] sm:$0xff]  ;;  %v10332_v59 = vld [vmem:[%s13287_s2 + $0x6b8] sm:$0xff] }
 0x57d   :  { %2488 = vmatprep.subr.mxu0 %v14680_v63  ;;  %2559 = vmatprep.subr.mxu1 %v14681_v37  ;;  %v10338_v63 = vld [vmem:[%s13287_s2 + $0x6a0] sm:$0xff]  ;;  %v10344_v37 = vld [vmem:[%s13287_s2 + $0x6b0] sm:$0xff] }
 0x57e   :  { %2489 = vmatpush1.msra.mxu0 %v14682_v25  ;;  %2560 = vmatpush1.msra.mxu1 %v14683_v20  ;;  %v10350_v25 = vld [vmem:[%s13287_s2 + $0x668] sm:$0xff]  ;;  %v10356_v20 = vld [vmem:[%s13287_s2 + $0x678] sm:$0xff] }
 0x57f   :  { %2490 = vmatprep.subr.mxu0 %v14684_v62  ;;  %2561 = vmatprep.subr.mxu1 %v14685_v8  ;;  %v10362_v62 = vld [vmem:[%s13287_s2 + $0x660] sm:$0xff]  ;;  %v10368_v8 = vld [vmem:[%s13287_s2 + $0x670] sm:$0xff] }
 0x580   :  { %2491 = vmatpush1.msra.mxu0 %v14686_v48  ;;  %2562 = vmatpush1.msra.mxu1 %v14687_v42  ;;  %v10374_v48 = vld [vmem:[%s13287_s2 + $0x628] sm:$0xff]  ;;  %v10380_v42 = vld [vmem:[%s13287_s2 + $0x638] sm:$0xff] }
 0x581   :  { %2492 = vmatprep.subr.mxu0 %v14688_v55  ;;  %2563 = vmatprep.subr.mxu1 %v14689_v15  ;;  %v10386_v55 = vld [vmem:[%s13287_s2 + $0x620] sm:$0xff]  ;;  %v10392_v15 = vld [vmem:[%s13287_s2 + $0x630] sm:$0xff] }
 0x582   :  { %2493 = vmatpush1.msra.mxu0 %v14690_v11  ;;  %2564 = vmatpush1.msra.mxu1 %v14691_v6  ;;  %v10398_v11 = vld [vmem:[%s13287_s2 + $0x5e8] sm:$0xff]  ;;  %v10404_v6 = vld [vmem:[%s13287_s2 + $0x5f8] sm:$0xff] }
 0x583   :  { %2494 = vmatprep.subr.mxu0 %v14692_v1  ;;  %2565 = vmatprep.subr.mxu1 %v14693_v27  ;;  %v10410_v1 = vld [vmem:[%s13287_s2 + $0x5e0] sm:$0xff]  ;;  %v10416_v27 = vld [vmem:[%s13287_s2 + $0x5f0] sm:$0xff] }
 0x584   :  { %2495 = vmatpush1.msra.mxu0 %v14694_v44  ;;  %2566 = vmatpush1.msra.mxu1 %v14695_v4  ;;  %v10422_v44 = vld [vmem:[%s13287_s2 + $0x5a8] sm:$0xff]  ;;  %v10428_v4 = vld [vmem:[%s13287_s2 + $0x5b8] sm:$0xff] }
 0x585   :  { %2496 = vmatprep.subr.mxu0 %v14696_v7  ;;  %2567 = vmatprep.subr.mxu1 %v14697_v0  ;;  %v10434_v7 = vld [vmem:[%s13287_s2 + $0x5a0] sm:$0xff]  ;;  %v10440_v0 = vld [vmem:[%s13287_s2 + $0x5b0] sm:$0xff] }
 0x586   :  { %2497 = vmatpush1.msra.mxu0 %v14698_v32  ;;  %2568 = vmatpush1.msra.mxu1 %v14699_v52  ;;  %v10446_v32 = vld [vmem:[%s13287_s2 + $0x568] sm:$0xff]  ;;  %v10452_v52 = vld [vmem:[%s13287_s2 + $0x578] sm:$0xff] }
 0x587   :  { %2498 = vmatprep.subr.mxu0 %v14700_v54  ;;  %2569 = vmatprep.subr.mxu1 %v14701_v10  ;;  %v10458_v54 = vld [vmem:[%s13287_s2 + $0x560] sm:$0xff]  ;;  %v10464_v10 = vld [vmem:[%s13287_s2 + $0x570] sm:$0xff] }
 0x588   :  { %2499 = vmatpush2.msra.mxu0 %v14702_v23  ;;  %2570 = vmatpush2.msra.mxu1 %v14703_v60  ;;  %v10470_v23 = vld [vmem:[%s13287_s2 + $0x528] sm:$0xff]  ;;  %v10476_v60 = vld [vmem:[%s13287_s2 + $0x538] sm:$0xff] }
 0x589   :  { %2500 = vmatprep.subr.mxu0 %v14704_v53  ;;  %2571 = vmatprep.subr.mxu1 %v14705_v29  ;;  %v10482_v53 = vld [vmem:[%s13287_s2 + $0x520] sm:$0xff]  ;;  %v10488_v29 = vld [vmem:[%s13287_s2 + $0x530] sm:$0xff] }
 0x58a   :  { %2501 = vmatpush2.msra.mxu0 %v14706_v18  ;;  %2572 = vmatpush2.msra.mxu1 %v14707_v49  ;;  %14708 = vst [vmem:[#allocation30_spill] sm:$0xff] %v10482_v53  ;;  %14709 = vst [vmem:[#allocation31_spill] sm:$0xff] %v10488_v29  ;;  %v10494_v18 = vld [vmem:[%s13287_s2 + $0x4e8] sm:$0xff]  ;;  %v10500_v49 = vld [vmem:[%s13287_s2 + $0x4f8] sm:$0xff] }
 0x58b   :  { %2502 = vmatprep.subr.mxu0 %v9807_v57  ;;  %2573 = vmatprep.subr.mxu1 %v9813_v21  ;;  %v10290_v57 = vld [vmem:[%s13287_s2 + $0x720] sm:$0xff]  ;;  %v10302_v21 = vld [vmem:[%s13287_s2 + $0x6e8] sm:$0xff]  ;;  %14710 = vst [vmem:[#allocation32_spill] sm:$0xff] %v10494_v18  ;;  %14711 = vst [vmem:[#allocation33_spill] sm:$0xff] %v10500_v49 }
 0x58c   :  { %2503 = vmatpush2.msra.mxu0 %v9819_v14  ;;  %2574 = vmatpush2.msra.mxu1 %v9825_v5  ;;  %v10296_v5 = vld [vmem:[%s13287_s2 + $0x730] sm:$0xff]  ;;  %v10308_v14 = vld [vmem:[%s13287_s2 + $0x6f8] sm:$0xff] }
 0x58d   :  { %2504 = vmatprep.subr.mxu0 %v10278_v58  ;;  %2575 = vmatprep.subr.mxu1 %v10284_v24 }
 0x58e   :  { %2505 = vmatpush2.msra.mxu0 %v10290_v57  ;;  %2576 = vmatpush2.msra.mxu1 %v10296_v5 }
 0x58f   :  { %2506 = vmatprep.subr.mxu0 %v10302_v21  ;;  %2577 = vmatprep.subr.mxu1 %v10308_v14 }
 0x590   :  { %2507 = vmatpush2.msra.mxu0 %v10314_v12  ;;  %2578 = vmatpush2.msra.mxu1 %v10320_v13 }
 0x591   :  { %2508 = vmatprep.subr.mxu0 %v10326_v17  ;;  %2579 = vmatprep.subr.mxu1 %v10332_v59 }
 0x592   :  { %2509 = vmatpush2.msra.mxu0 %v10338_v63  ;;  %2580 = vmatpush2.msra.mxu1 %v10344_v37 }
 0x593   :  { %2510 = vmatprep.subr.mxu0 %v10350_v25  ;;  %2581 = vmatprep.subr.mxu1 %v10356_v20 }
 0x594   :  { %2511 = vmatpush2.msra.mxu0 %v10362_v62  ;;  %2582 = vmatpush2.msra.mxu1 %v10368_v8 }
 0x595   :  { %2512 = vmatprep.subr.mxu0 %v10374_v48  ;;  %2583 = vmatprep.subr.mxu1 %v10380_v42 }
 0x596   :  { %2513 = vmatpush2.msra.mxu0 %v10386_v55  ;;  %2584 = vmatpush2.msra.mxu1 %v10392_v15 }
 0x597   :  { %2514 = vmatprep.subr.mxu0 %v10398_v11  ;;  %2585 = vmatprep.subr.mxu1 %v10404_v6 }
 0x598   :  { %2515 = vmatpush2.msra.mxu0 %v10410_v1  ;;  %2586 = vmatpush2.msra.mxu1 %v10416_v27 }
 0x599   :  { %2516 = vmatprep.subr.mxu0 %v10422_v44  ;;  %2587 = vmatprep.subr.mxu1 %v10428_v4 }
 0x59a   :  { %2517 = vmatpush2.msra.mxu0 %v10434_v7  ;;  %2588 = vmatpush2.msra.mxu1 %v10440_v0 }
 0x59b   :  { %2518 = vmatprep.subr.mxu0 %v10446_v32  ;;  %2589 = vmatprep.subr.mxu1 %v10452_v52 }
 0x59c   :  { %2519 = vmatpush2.msra.mxu0 %v10458_v54  ;;  %2590 = vmatpush2.msra.mxu1 %v10464_v10 }
 0x59d   :  { %2520 = vmatprep.subr.mxu0 %v10470_v23  ;;  %2591 = vmatprep.subr.mxu1 %v10476_v60 }
 0x59e   :  { %2521 = vmatpush2.msra.mxu0 %v10482_v53  ;;  %2592 = vmatpush2.msra.mxu1 %v10488_v29  ;;  %v10506_v53 = vld [vmem:[%s13287_s2 + $0x4e0] sm:$0xff]  ;;  %v10512_v29 = vld [vmem:[%s13287_s2 + $0x4f0] sm:$0xff] }
 0x59f   :  { %2522 = vmatprep.subr.mxu0 %v10494_v18  ;;  %2593 = vmatprep.subr.mxu1 %v10500_v49  ;;  %14712 = vst [vmem:[#allocation34_spill] sm:$0xff] %v10506_v53  ;;  %14713 = vst [vmem:[#allocation35_spill] sm:$0xff] %v10512_v29  ;;  %v10518_v18 = vld [vmem:[%s13287_s2 + $0x4a8] sm:$0xff]  ;;  %v10524_v49 = vld [vmem:[%s13287_s2 + $0x4b8] sm:$0xff] }
 0x5a0   :  { %2523 = vmatpush2.msra.mxu0 %v10506_v53  ;;  %2594 = vmatpush2.msra.mxu1 %v10512_v29  ;;  %14714 = vst [vmem:[#allocation36_spill] sm:$0xff] %v10518_v18  ;;  %14715 = vst [vmem:[#allocation37_spill] sm:$0xff] %v10524_v49  ;;  %v10530_v53 = vld [vmem:[%s13287_s2 + $0x4a0] sm:$0xff]  ;;  %v10536_v29 = vld [vmem:[%s13287_s2 + $0x4b0] sm:$0xff] }
 0x5a1   :  { %2524 = vmatprep.subr.mxu0 %v10518_v18  ;;  %2595 = vmatprep.subr.mxu1 %v10524_v49  ;;  %14716 = vst [vmem:[#allocation38_spill] sm:$0xff] %v10530_v53  ;;  %14717 = vst [vmem:[#allocation39_spill] sm:$0xff] %v10536_v29  ;;  %v10542_v18 = vld [vmem:[%s13287_s2 + $0x468] sm:$0xff]  ;;  %v10548_v49 = vld [vmem:[%s13287_s2 + $0x478] sm:$0xff] }
 0x5a2   :  { %2525 = vmatpush2.msra.mxu0 %v10530_v53  ;;  %2596 = vmatpush2.msra.mxu1 %v10536_v29  ;;  %14718 = vst [vmem:[#allocation40_spill] sm:$0xff] %v10542_v18  ;;  %14719 = vst [vmem:[#allocation41_spill] sm:$0xff] %v10548_v49  ;;  %v10554_v53 = vld [vmem:[%s13287_s2 + $0x460] sm:$0xff]  ;;  %v10560_v29 = vld [vmem:[%s13287_s2 + $0x470] sm:$0xff] }
 0x5a3   :  { %2526 = vmatprep.subr.mxu0 %v10542_v18  ;;  %2597 = vmatprep.subr.mxu1 %v10548_v49  ;;  %14720 = vst [vmem:[#allocation42_spill] sm:$0xff] %v10554_v53  ;;  %14721 = vst [vmem:[#allocation43_spill] sm:$0xff] %v10560_v29  ;;  %v10566_v18 = vld [vmem:[%s13287_s2 + $0x428] sm:$0xff]  ;;  %v10572_v49 = vld [vmem:[%s13287_s2 + $0x438] sm:$0xff] }
 0x5a4   :  { %2527 = vmatpush2.msra.mxu0 %v10554_v53  ;;  %2598 = vmatpush2.msra.mxu1 %v10560_v29  ;;  %14722 = vst [vmem:[#allocation44_spill] sm:$0xff] %v10572_v49  ;;  %v10578_v53 = vld [vmem:[%s13287_s2 + $0x420] sm:$0xff]  ;;  %v10584_v29 = vld [vmem:[%s13287_s2 + $0x430] sm:$0xff] }
 0x5a5   :  { %2528 = vmatprep.subr.mxu0 %v10566_v18  ;;  %2599 = vmatprep.subr.mxu1 %v10572_v49  ;;  %14723 = vst [vmem:[#allocation45_spill] sm:$0xff] %v10578_v53  ;;  %14724 = vst [vmem:[#allocation46_spill] sm:$0xff] %v10584_v29  ;;  %v10592_v49 = vld [vmem:[%s13287_s2 + $0x3c8] sm:$0xff] }
 0x5a6   :  { %2529 = vmatpush2.msra.mxu0 %v10578_v53  ;;  %2600 = vmatpush2.msra.mxu1 %v10584_v29  ;;  %14725 = vst [vmem:[#allocation47_spill] sm:$0xff] %v10592_v49  ;;  %v10598_v53 = vld [vmem:[%s13287_s2 + $0x3d8] sm:$0xff]  ;;  %v10604_v29 = vld [vmem:[%s13287_s2 + $0x3c0] sm:$0xff] }
 0x5a7   :  { %2531 = vmatmul.mubr.f32.vlgmr.msra.gmra.mxu0 %v10192_v56  ;;  %2602 = vmatmul.mubr.f32.vlgmr.msra.gmra.mxu1 %v10192_v56  ;;  %14726 = vst [vmem:[#allocation48_spill] sm:$0xff] %v10598_v53  ;;  %14727 = vst [vmem:[#allocation49_spill] sm:$0xff] %v10604_v29  ;;  %v10610_v56 = vld [vmem:[%s13287_s2 + $0x3d0] sm:$0xff] }
 0x5a8   :  { %2674 = vmatprep.subr.mxu0 %v10592_v49  ;;  %2745 = vmatprep.subr.mxu1 %v10598_v53  ;;  %14728 = vst [vmem:[#allocation50_spill] sm:$0xff] %v10610_v56  ;;  %v10616_v49 = vld [vmem:[%s13287_s2 + $0x388] sm:$0xff]  ;;  %v10622_v53 = vld [vmem:[%s13287_s2 + $0x398] sm:$0xff] }
 0x5a9   :  { %2675 = vmatpush1.msra.mxu0 %v10604_v29  ;;  %2746 = vmatpush1.msra.mxu1 %v10610_v56  ;;  %14729 = vst [vmem:[#allocation51_spill] sm:$0xff] %v10616_v49  ;;  %14730 = vst [vmem:[#allocation52_spill] sm:$0xff] %v10622_v53  ;;  %v10628_v29 = vld [vmem:[%s13287_s2 + $0x380] sm:$0xff]  ;;  %v10634_v56 = vld [vmem:[%s13287_s2 + $0x390] sm:$0xff] }
 0x5aa   :  { %2676 = vmatprep.subr.mxu0 %v10616_v49  ;;  %2747 = vmatprep.subr.mxu1 %v10622_v53  ;;  %14731 = vst [vmem:[#allocation53_spill] sm:$0xff] %v10628_v29  ;;  %14732 = vst [vmem:[#allocation54_spill] sm:$0xff] %v10634_v56  ;;  %v10640_v49 = vld [vmem:[%s13287_s2 + $0x348] sm:$0xff]  ;;  %v10646_v53 = vld [vmem:[%s13287_s2 + $0x358] sm:$0xff] }
 0x5ab   :  { %2677 = vmatpush1.msra.mxu0 %v10628_v29  ;;  %2748 = vmatpush1.msra.mxu1 %v10634_v56  ;;  %14733 = vst [vmem:[#allocation55_spill] sm:$0xff] %v10640_v49  ;;  %14734 = vst [vmem:[#allocation56_spill] sm:$0xff] %v10646_v53  ;;  %v10652_v29 = vld [vmem:[%s13287_s2 + $0x340] sm:$0xff]  ;;  %v10658_v56 = vld [vmem:[%s13287_s2 + $0x350] sm:$0xff] }
 0x5ac   :  { %2678 = vmatprep.subr.mxu0 %v10640_v49  ;;  %2749 = vmatprep.subr.mxu1 %v10646_v53  ;;  %14735 = vst [vmem:[#allocation57_spill] sm:$0xff] %v10652_v29  ;;  %14736 = vst [vmem:[#allocation58_spill] sm:$0xff] %v10658_v56  ;;  %v10664_v49 = vld [vmem:[%s13287_s2 + $0x308] sm:$0xff]  ;;  %v10670_v53 = vld [vmem:[%s13287_s2 + $0x318] sm:$0xff] }
 0x5ad   :  { %2679 = vmatpush1.msra.mxu0 %v10652_v29  ;;  %2750 = vmatpush1.msra.mxu1 %v10658_v56  ;;  %14737 = vst [vmem:[#allocation59_spill] sm:$0xff] %v10664_v49  ;;  %14738 = vst [vmem:[#allocation60_spill] sm:$0xff] %v10670_v53  ;;  %v10676_v29 = vld [vmem:[%s13287_s2 + $0x300] sm:$0xff]  ;;  %v10682_v56 = vld [vmem:[%s13287_s2 + $0x310] sm:$0xff] }
 0x5ae   :  { %2680 = vmatprep.subr.mxu0 %v10664_v49  ;;  %2751 = vmatprep.subr.mxu1 %v10670_v53  ;;  %14739 = vst [vmem:[#allocation61_spill] sm:$0xff] %v10676_v29  ;;  %14740 = vst [vmem:[#allocation62_spill] sm:$0xff] %v10682_v56  ;;  %v10688_v49 = vld [vmem:[%s13287_s2 + $0x2c8] sm:$0xff]  ;;  %v10694_v53 = vld [vmem:[%s13287_s2 + $0x2d8] sm:$0xff] }
 0x5af   :  { %2681 = vmatpush1.msra.mxu0 %v10676_v29  ;;  %2752 = vmatpush1.msra.mxu1 %v10682_v56  ;;  %14741 = vst [vmem:[#allocation63_spill] sm:$0xff] %v10688_v49  ;;  %14742 = vst [vmem:[#allocation64_spill] sm:$0xff] %v10694_v53  ;;  %v10700_v29 = vld [vmem:[%s13287_s2 + $0x2c0] sm:$0xff]  ;;  %v10706_v56 = vld [vmem:[%s13287_s2 + $0x2d0] sm:$0xff] }
 0x5b0   :  { %2682 = vmatprep.subr.mxu0 %v10688_v49  ;;  %2753 = vmatprep.subr.mxu1 %v10694_v53  ;;  %14743 = vst [vmem:[#allocation65_spill] sm:$0xff] %v10700_v29  ;;  %14744 = vst [vmem:[#allocation66_spill] sm:$0xff] %v10706_v56  ;;  %v10712_v49 = vld [vmem:[%s13287_s2 + $0x288] sm:$0xff]  ;;  %v10718_v53 = vld [vmem:[%s13287_s2 + $0x298] sm:$0xff] }
 0x5b1   :  { %2683 = vmatpush1.msra.mxu0 %v10700_v29  ;;  %2754 = vmatpush1.msra.mxu1 %v10706_v56  ;;  %14745 = vst [vmem:[#allocation67_spill] sm:$0xff] %v10712_v49  ;;  %14746 = vst [vmem:[#allocation68_spill] sm:$0xff] %v10718_v53  ;;  %v10724_v29 = vld [vmem:[%s13287_s2 + $0x280] sm:$0xff]  ;;  %v10730_v56 = vld [vmem:[%s13287_s2 + $0x290] sm:$0xff] }
 0x5b2   :  { %2684 = vmatprep.subr.mxu0 %v10712_v49  ;;  %2755 = vmatprep.subr.mxu1 %v10718_v53  ;;  %14747 = vst [vmem:[#allocation69_spill] sm:$0xff] %v10724_v29  ;;  %14748 = vst [vmem:[#allocation70_spill] sm:$0xff] %v10730_v56  ;;  %v10736_v49 = vld [vmem:[%s13287_s2 + $0x248] sm:$0xff]  ;;  %v10742_v53 = vld [vmem:[%s13287_s2 + $0x258] sm:$0xff] }
 0x5b3   :  { %2685 = vmatpush1.msra.mxu0 %v10724_v29  ;;  %2756 = vmatpush1.msra.mxu1 %v10730_v56  ;;  %14749 = vst [vmem:[#allocation71_spill] sm:$0xff] %v10736_v49  ;;  %14750 = vst [vmem:[#allocation72_spill] sm:$0xff] %v10742_v53  ;;  %v10748_v29 = vld [vmem:[%s13287_s2 + $0x240] sm:$0xff]  ;;  %v10754_v56 = vld [vmem:[%s13287_s2 + $0x250] sm:$0xff] }
 0x5b4   :  { %2686 = vmatprep.subr.mxu0 %v10736_v49  ;;  %2757 = vmatprep.subr.mxu1 %v10742_v53  ;;  %14751 = vst [vmem:[#allocation73_spill] sm:$0xff] %v10748_v29  ;;  %14752 = vst [vmem:[#allocation74_spill] sm:$0xff] %v10754_v56  ;;  %v10760_v49 = vld [vmem:[%s13287_s2 + $0x208] sm:$0xff]  ;;  %v10766_v53 = vld [vmem:[%s13287_s2 + $0x218] sm:$0xff] }
 0x5b5   :  { %2687 = vmatpush1.msra.mxu0 %v10748_v29  ;;  %2758 = vmatpush1.msra.mxu1 %v10754_v56  ;;  %14753 = vst [vmem:[#allocation75_spill] sm:$0xff] %v10760_v49  ;;  %14754 = vst [vmem:[#allocation76_spill] sm:$0xff] %v10766_v53  ;;  %v10772_v29 = vld [vmem:[%s13287_s2 + $0x200] sm:$0xff]  ;;  %v10778_v56 = vld [vmem:[%s13287_s2 + $0x210] sm:$0xff] }
 0x5b6   :  { %2688 = vmatprep.subr.mxu0 %v10760_v49  ;;  %2759 = vmatprep.subr.mxu1 %v10766_v53  ;;  %14755 = vst [vmem:[#allocation77_spill] sm:$0xff] %v10772_v29  ;;  %14756 = vst [vmem:[#allocation80_spill] sm:$0xff] %v10778_v56  ;;  %v10784_v49 = vld [vmem:[%s13287_s2 + $0x1c8] sm:$0xff]  ;;  %v10790_v53 = vld [vmem:[%s13287_s2 + $0x1d8] sm:$0xff] }
 0x5b7   :  { %2689 = vmatpush1.msra.mxu0 %v10772_v29  ;;  %2760 = vmatpush1.msra.mxu1 %v10778_v56  ;;  %14757 = vst [vmem:[#allocation81_spill] sm:$0xff] %v10784_v49  ;;  %14758 = vst [vmem:[#allocation82_spill] sm:$0xff] %v10790_v53  ;;  %v10796_v29 = vld [vmem:[%s13287_s2 + $0x1c0] sm:$0xff]  ;;  %v10802_v56 = vld [vmem:[%s13287_s2 + $0x1d0] sm:$0xff] }
 0x5b8   :  { %2690 = vmatprep.subr.mxu0 %v10784_v49  ;;  %2761 = vmatprep.subr.mxu1 %v10790_v53  ;;  %14759 = vst [vmem:[#allocation83_spill] sm:$0xff] %v10796_v29  ;;  %14760 = vst [vmem:[#allocation86_spill] sm:$0xff] %v10802_v56  ;;  %v10808_v49 = vld [vmem:[%s13287_s2 + $0x188] sm:$0xff]  ;;  %v10814_v53 = vld [vmem:[%s13287_s2 + $0x198] sm:$0xff] }
 0x5b9   :  { %2691 = vmatpush1.msra.mxu0 %v10796_v29  ;;  %2762 = vmatpush1.msra.mxu1 %v10802_v56  ;;  %14761 = vst [vmem:[#allocation87_spill] sm:$0xff] %v10808_v49  ;;  %14762 = vst [vmem:[#allocation88_spill] sm:$0xff] %v10814_v53  ;;  %v10820_v29 = vld [vmem:[%s13287_s2 + $0x180] sm:$0xff]  ;;  %v10826_v56 = vld [vmem:[%s13287_s2 + $0x190] sm:$0xff] }
 0x5ba   :  { %2692 = vmatprep.subr.mxu0 %v10808_v49  ;;  %2763 = vmatprep.subr.mxu1 %v10814_v53  ;;  %14763 = vst [vmem:[#allocation89_spill] sm:$0xff] %v10820_v29  ;;  %14764 = vst [vmem:[#allocation92_spill] sm:$0xff] %v10826_v56  ;;  %v10832_v49 = vld [vmem:[%s13287_s2 + $0x148] sm:$0xff]  ;;  %v10838_v53 = vld [vmem:[%s13287_s2 + $0x158] sm:$0xff] }
 0x5bb   :  { %2693 = vmatpush1.msra.mxu0 %v10820_v29  ;;  %2764 = vmatpush1.msra.mxu1 %v10826_v56  ;;  %14765 = vst [vmem:[#allocation93_spill] sm:$0xff] %v10832_v49  ;;  %14766 = vst [vmem:[#allocation94_spill] sm:$0xff] %v10838_v53  ;;  %v10844_v29 = vld [vmem:[%s13287_s2 + $0x140] sm:$0xff]  ;;  %v10850_v56 = vld [vmem:[%s13287_s2 + $0x150] sm:$0xff] }
 0x5bc   :  { %2694 = vmatprep.subr.mxu0 %v10832_v49  ;;  %2765 = vmatprep.subr.mxu1 %v10838_v53  ;;  %14767 = vst [vmem:[#allocation95_spill] sm:$0xff] %v10844_v29  ;;  %14768 = vst [vmem:[#allocation98_spill] sm:$0xff] %v10850_v56  ;;  %v10856_v49 = vld [vmem:[%s13287_s2 + $0x108] sm:$0xff]  ;;  %v10862_v53 = vld [vmem:[%s13287_s2 + $0x118] sm:$0xff] }
 0x5bd   :  { %2695 = vmatpush1.msra.mxu0 %v10844_v29  ;;  %2766 = vmatpush1.msra.mxu1 %v10850_v56  ;;  %14769 = vst [vmem:[#allocation99_spill] sm:$0xff] %v10856_v49  ;;  %14770 = vst [vmem:[#allocation100_spill] sm:$0xff] %v10862_v53  ;;  %v10868_v29 = vld [vmem:[%s13287_s2 + $0x100] sm:$0xff]  ;;  %v10874_v56 = vld [vmem:[%s13287_s2 + $0x110] sm:$0xff] }
 0x5be   :  { %2696 = vmatprep.subr.mxu0 %v10856_v49  ;;  %2767 = vmatprep.subr.mxu1 %v10862_v53  ;;  %14771 = vst [vmem:[#allocation101_spill] sm:$0xff] %v10868_v29  ;;  %14772 = vst [vmem:[#allocation104_spill] sm:$0xff] %v10874_v56  ;;  %v10880_v49 = vld [vmem:[%s13287_s2 + $0xc8] sm:$0xff]  ;;  %v10886_v53 = vld [vmem:[%s13287_s2 + $0xd8] sm:$0xff] }
 0x5bf   :  { %2697 = vmatpush1.msra.mxu0 %v10868_v29  ;;  %2768 = vmatpush1.msra.mxu1 %v10874_v56  ;;  %14773 = vst [vmem:[#allocation105_spill] sm:$0xff] %v10880_v49  ;;  %14774 = vst [vmem:[#allocation106_spill] sm:$0xff] %v10886_v53  ;;  %v10892_v29 = vld [vmem:[%s13287_s2 + $0xc0] sm:$0xff]  ;;  %v10898_v56 = vld [vmem:[%s13287_s2 + $0xd0] sm:$0xff] }
 0x5c0   :  { %2698 = vmatprep.subr.mxu0 %v10880_v49  ;;  %2769 = vmatprep.subr.mxu1 %v10886_v53  ;;  %14775 = vst [vmem:[#allocation107_spill] sm:$0xff] %v10892_v29  ;;  %14776 = vst [vmem:[#allocation110_spill] sm:$0xff] %v10898_v56  ;;  %v10904_v49 = vld [vmem:[%s13287_s2 + $0x88] sm:$0xff]  ;;  %v10910_v53 = vld [vmem:[%s13287_s2 + $0x98] sm:$0xff] }
 0x5c1   :  { %2699 = vmatpush1.msra.mxu0 %v10892_v29  ;;  %2770 = vmatpush1.msra.mxu1 %v10898_v56  ;;  %14777 = vst [vmem:[#allocation111_spill] sm:$0xff] %v10904_v49  ;;  %14778 = vst [vmem:[#allocation112_spill] sm:$0xff] %v10910_v53  ;;  %v10916_v29 = vld [vmem:[%s13287_s2 + $0x80] sm:$0xff]  ;;  %v10922_v56 = vld [vmem:[%s13287_s2 + $0x90] sm:$0xff] }
 0x5c2   :  { %2700 = vmatprep.subr.mxu0 %v10904_v49  ;;  %2771 = vmatprep.subr.mxu1 %v10910_v53  ;;  %14779 = vst [vmem:[#allocation113_spill] sm:$0xff] %v10916_v29  ;;  %14780 = vst [vmem:[#allocation116_spill] sm:$0xff] %v10922_v56  ;;  %v10928_v49 = vld [vmem:[%s13287_s2 + $0x48] sm:$0xff]  ;;  %v10934_v53 = vld [vmem:[%s13287_s2 + $0x58] sm:$0xff] }
 0x5c3   :  { %2701 = vmatpush1.msra.mxu0 %v10916_v29  ;;  %2772 = vmatpush1.msra.mxu1 %v10922_v56  ;;  %14781 = vst [vmem:[#allocation117_spill] sm:$0xff] %v10928_v49  ;;  %14782 = vst [vmem:[#allocation118_spill] sm:$0xff] %v10934_v53  ;;  %v10940_v29 = vld [vmem:[%s13287_s2 + $0x40] sm:$0xff]  ;;  %v10946_v56 = vld [vmem:[%s13287_s2 + $0x50] sm:$0xff] }
 0x5c4   :  { %2702 = vmatprep.subr.mxu0 %v10928_v49  ;;  %2773 = vmatprep.subr.mxu1 %v10934_v53  ;;  %14783 = vst [vmem:[#allocation119_spill] sm:$0xff] %v10940_v29  ;;  %14784 = vst [vmem:[#allocation122_spill] sm:$0xff] %v10946_v56  ;;  %v10952_v49 = vld [vmem:[%s13287_s2 + $0x8] sm:$0xff]  ;;  %v10958_v53 = vld [vmem:[%s13287_s2 + $0x18] sm:$0xff] }
 0x5c5   :  { %2703 = vmatpush1.msra.mxu0 %v10940_v29  ;;  %2774 = vmatpush1.msra.mxu1 %v10946_v56  ;;  %14785 = vst [vmem:[#allocation123_spill] sm:$0xff] %v10952_v49  ;;  %14786 = vst [vmem:[#allocation124_spill] sm:$0xff] %v10958_v53  ;;  %v10964_v29 = vld [vmem:[%s13287_s2] sm:$0xff]  ;;  %v10970_v56 = vld [vmem:[%s13287_s2 + $0x10] sm:$0xff] }
 0x5c6   :  { %2704 = vmatprep.subr.mxu0 %v10952_v49  ;;  %2775 = vmatprep.subr.mxu1 %v10958_v53  ;;  %14787 = vst [vmem:[#allocation125_spill] sm:$0xff] %v10964_v29  ;;  %14788 = vst [vmem:[#allocation128_spill] sm:$0xff] %v10970_v56  ;;  %v10976_v49 = vld [vmem:[%s13287_s2 + $0x7c8] sm:$0xff]  ;;  %v10982_v53 = vld [vmem:[%s13287_s2 + $0x7d8] sm:$0xff] }
 0x5c7   :  { %2705 = vmatpush1.msra.mxu0 %v10964_v29  ;;  %2776 = vmatpush1.msra.mxu1 %v10970_v56  ;;  %14789 = vst [vmem:[#allocation129_spill] sm:$0xff] %v10976_v49  ;;  %14790 = vst [vmem:[#allocation130_spill] sm:$0xff] %v10982_v53  ;;  %v10988_v29 = vld [vmem:[%s13287_s2 + $0x7c0] sm:$0xff]  ;;  %v10994_v56 = vld [vmem:[%s13287_s2 + $0x7d0] sm:$0xff] }
 0x5c8   :  { %2706 = vmatprep.subr.mxu0 %v10976_v49  ;;  %2777 = vmatprep.subr.mxu1 %v10982_v53  ;;  %14791 = vst [vmem:[#allocation131_spill] sm:$0xff] %v10988_v29  ;;  %14792 = vst [vmem:[#allocation134_spill] sm:$0xff] %v10994_v56  ;;  %v11000_v49 = vld [vmem:[%s13287_s2 + $0x788] sm:$0xff]  ;;  %v11006_v53 = vld [vmem:[%s13287_s2 + $0x798] sm:$0xff] }
 0x5c9   :  { %2707 = vmatpush2.msra.mxu0 %v10988_v29  ;;  %2778 = vmatpush2.msra.mxu1 %v10994_v56  ;;  %14793 = vst [vmem:[#allocation135_spill] sm:$0xff] %v11000_v49  ;;  %14794 = vst [vmem:[#allocation136_spill] sm:$0xff] %v11006_v53  ;;  %v11012_v29 = vld [vmem:[%s13287_s2 + $0x780] sm:$0xff]  ;;  %v11018_v56 = vld [vmem:[%s13287_s2 + $0x790] sm:$0xff] }
 0x5ca   :  { %2708 = vmatprep.subr.mxu0 %v11000_v49  ;;  %2779 = vmatprep.subr.mxu1 %v11006_v53  ;;  %14795 = vst [vmem:[#allocation137_spill] sm:$0xff] %v11012_v29  ;;  %14796 = vst [vmem:[#allocation140_spill] sm:$0xff] %v11018_v56  ;;  %v11024_v49 = vld [vmem:[%s13287_s2 + $0x748] sm:$0xff]  ;;  %v11030_v53 = vld [vmem:[%s13287_s2 + $0x758] sm:$0xff] }
 0x5cb   :  { %2709 = vmatpush2.msra.mxu0 %v11012_v29  ;;  %2780 = vmatpush2.msra.mxu1 %v11018_v56  ;;  %14797 = vst [vmem:[#allocation141_spill] sm:$0xff] %v11024_v49  ;;  %14798 = vst [vmem:[#allocation142_spill] sm:$0xff] %v11030_v53  ;;  %v11036_v29 = vld [vmem:[%s13287_s2 + $0x740] sm:$0xff]  ;;  %v11042_v56 = vld [vmem:[%s13287_s2 + $0x750] sm:$0xff] }
 0x5cc   :  { %2710 = vmatprep.subr.mxu0 %v11024_v49  ;;  %2781 = vmatprep.subr.mxu1 %v11030_v53  ;;  %14799 = vst [vmem:[#allocation143_spill] sm:$0xff] %v11036_v29  ;;  %14800 = vst [vmem:[#allocation146_spill] sm:$0xff] %v11042_v56  ;;  %v11048_v49 = vld [vmem:[%s13287_s2 + $0x708] sm:$0xff]  ;;  %v11054_v53 = vld [vmem:[%s13287_s2 + $0x718] sm:$0xff] }
 0x5cd   :  { %2711 = vmatpush2.msra.mxu0 %v11036_v29  ;;  %2782 = vmatpush2.msra.mxu1 %v11042_v56  ;;  %14801 = vst [vmem:[#allocation147_spill] sm:$0xff] %v11048_v49  ;;  %14802 = vst [vmem:[#allocation148_spill] sm:$0xff] %v11054_v53  ;;  %v11060_v29 = vld [vmem:[%s13287_s2 + $0x700] sm:$0xff]  ;;  %v11066_v56 = vld [vmem:[%s13287_s2 + $0x710] sm:$0xff] }
 0x5ce   :  { %2712 = vmatprep.subr.mxu0 %v11048_v49  ;;  %2783 = vmatprep.subr.mxu1 %v11054_v53  ;;  %14803 = vst [vmem:[#allocation149_spill] sm:$0xff] %v11060_v29  ;;  %14804 = vst [vmem:[#allocation152_spill] sm:$0xff] %v11066_v56  ;;  %v11072_v49 = vld [vmem:[%s13287_s2 + $0x6c8] sm:$0xff]  ;;  %v11078_v53 = vld [vmem:[%s13287_s2 + $0x6d8] sm:$0xff] }
 0x5cf   :  { %2713 = vmatpush2.msra.mxu0 %v11060_v29  ;;  %2784 = vmatpush2.msra.mxu1 %v11066_v56  ;;  %14805 = vst [vmem:[#allocation153_spill] sm:$0xff] %v11072_v49  ;;  %14806 = vst [vmem:[#allocation154_spill] sm:$0xff] %v11078_v53  ;;  %v11084_v29 = vld [vmem:[%s13287_s2 + $0x6c0] sm:$0xff]  ;;  %v11090_v56 = vld [vmem:[%s13287_s2 + $0x6d0] sm:$0xff] }
 0x5d0   :  { %2714 = vmatprep.subr.mxu0 %v11072_v49  ;;  %2785 = vmatprep.subr.mxu1 %v11078_v53  ;;  %14807 = vst [vmem:[#allocation157_spill] sm:$0xff] %v11084_v29  ;;  %14808 = vst [vmem:[#allocation158_spill] sm:$0xff] %v11090_v56  ;;  %v11096_v49 = vld [vmem:[%s13287_s2 + $0x688] sm:$0xff]  ;;  %v11102_v53 = vld [vmem:[%s13287_s2 + $0x698] sm:$0xff] }
 0x5d1   :  { %2715 = vmatpush2.msra.mxu0 %v11084_v29  ;;  %2786 = vmatpush2.msra.mxu1 %v11090_v56  ;;  %14809 = vst [vmem:[#allocation78_spill] sm:$0xff] %v11096_v49  ;;  %14810 = vst [vmem:[#allocation84_spill] sm:$0xff] %v11102_v53  ;;  %v11108_v29 = vld [vmem:[%s13287_s2 + $0x680] sm:$0xff]  ;;  %v11114_v56 = vld [vmem:[%s13287_s2 + $0x690] sm:$0xff] }
 0x5d2   :  { %2716 = vmatprep.subr.mxu0 %v11096_v49  ;;  %2787 = vmatprep.subr.mxu1 %v11102_v53  ;;  %14811 = vst [vmem:[#allocation85_spill] sm:$0xff] %v11108_v29  ;;  %14812 = vst [vmem:[#allocation79_spill] sm:$0xff] %v11114_v56  ;;  %v11120_v49 = vld [vmem:[%s13287_s2 + $0x648] sm:$0xff]  ;;  %v11126_v53 = vld [vmem:[%s13287_s2 + $0x658] sm:$0xff] }
 0x5d3   :  { %2717 = vmatpush2.msra.mxu0 %v11108_v29  ;;  %2788 = vmatpush2.msra.mxu1 %v11114_v56  ;;  %14813 = vst [vmem:[#allocation185_spill] sm:$0xff] %v11120_v49  ;;  %14814 = vst [vmem:[#allocation186_spill] sm:$0xff] %v11126_v53  ;;  %v11132_v29 = vld [vmem:[%s13287_s2 + $0x640] sm:$0xff]  ;;  %v11138_v56 = vld [vmem:[%s13287_s2 + $0x650] sm:$0xff] }
 0x5d4   :  { %2718 = vmatprep.subr.mxu0 %v11120_v49  ;;  %2789 = vmatprep.subr.mxu1 %v11126_v53  ;;  %14815 = vst [vmem:[#allocation187_spill] sm:$0xff] %v11132_v29  ;;  %14816 = vst [vmem:[#allocation188_spill] sm:$0xff] %v11138_v56  ;;  %v11144_v49 = vld [vmem:[%s13287_s2 + $0x608] sm:$0xff]  ;;  %v11150_v53 = vld [vmem:[%s13287_s2 + $0x618] sm:$0xff] }
 0x5d5   :  { %2719 = vmatpush2.msra.mxu0 %v11132_v29  ;;  %2790 = vmatpush2.msra.mxu1 %v11138_v56  ;;  %14817 = vst [vmem:[#allocation189_spill] sm:$0xff] %v11144_v49  ;;  %14818 = vst [vmem:[#allocation190_spill] sm:$0xff] %v11150_v53  ;;  %v11156_v29 = vld [vmem:[%s13287_s2 + $0x600] sm:$0xff]  ;;  %v11162_v56 = vld [vmem:[%s13287_s2 + $0x610] sm:$0xff] }
 0x5d6   :  { %2720 = vmatprep.subr.mxu0 %v11144_v49  ;;  %2791 = vmatprep.subr.mxu1 %v11150_v53  ;;  %v11168_v49 = vld [vmem:[%s13287_s2 + $0x5c8] sm:$0xff]  ;;  %v11174_v53 = vld [vmem:[%s13287_s2 + $0x5d8] sm:$0xff] }
 0x5d7   :  { %2721 = vmatpush2.msra.mxu0 %v11156_v29  ;;  %2792 = vmatpush2.msra.mxu1 %v11162_v56  ;;  %14819 = vst [vmem:[#allocation191_spill] sm:$0xff] %v11174_v53 }
 0x5d8   :  { %2722 = vmatprep.subr.mxu0 %v11168_v49  ;;  %2793 = vmatprep.subr.mxu1 %v11174_v53 }
 0x5d9   :  { %2723 = vmatpush2.msra.mxu0 %v9983_v9  ;;  %2794 = vmatpush2.msra.mxu1 %v9989_v47  ;;  %v14820_v9 = vld [vmem:[#allocation23_spill] sm:$0xff]  ;;  %v14821_v47 = vld [vmem:[#allocation24_spill] sm:$0xff] }
 0x5da   :  { %2724 = vmatprep.subr.mxu0 %v9995_v2  ;;  %2795 = vmatprep.subr.mxu1 %v10001_v46  ;;  %v14822_v2 = vld [vmem:[#allocation25_spill] sm:$0xff]  ;;  %v14823_v46 = vld [vmem:[#allocation26_spill] sm:$0xff] }
 0x5db   :  { %2725 = vmatpush2.msra.mxu0 %v10007_v39  ;;  %2796 = vmatpush2.msra.mxu1 %v10013_v41  ;;  %v14824_v39 = vld [vmem:[#allocation27_spill] sm:$0xff]  ;;  %v14825_v41 = vld [vmem:[#allocation28_spill] sm:$0xff] }
 0x5dc   :  { %2726 = vmatprep.subr.mxu0 %v10019_v43  ;;  %2797 = vmatprep.subr.mxu1 %v10025_v45  ;;  %v14826_v43 = vld [vmem:[#allocation90_spill] sm:$0xff]  ;;  %v14827_v45 = vld [vmem:[#allocation96_spill] sm:$0xff] }
 0x5dd   :  { %2727 = vmatpush2.msra.mxu0 %v10031_v26  ;;  %2798 = vmatpush2.msra.mxu1 %v10037_v33  ;;  %v14828_v26 = vld [vmem:[#allocation97_spill] sm:$0xff]  ;;  %v14829_v33 = vld [vmem:[#allocation179_spill] sm:$0xff] }
 0x5de   :  { %2728 = vmatprep.subr.mxu0 %v10043_v51  ;;  %2799 = vmatprep.subr.mxu1 %v10049_v3  ;;  %v14830_v51 = vld [vmem:[#allocation180_spill] sm:$0xff]  ;;  %v14831_v3 = vld [vmem:[#allocation181_spill] sm:$0xff] }
 0x5df   :  { %2729 = vmatpush2.msra.mxu0 %v10055_v30  ;;  %2800 = vmatpush2.msra.mxu1 %v10061_v31  ;;  %v14832_v30 = vld [vmem:[#allocation182_spill] sm:$0xff] }
 0x5e0   :  { %2730 = vmatprep.subr.mxu0 %v10067_v40  ;;  %2801 = vmatprep.subr.mxu1 %v10073_v38  ;;  %v14833_v40 = vld [vmem:[#allocation114_spill] sm:$0xff] }
 0x5e1   :  { %2731 = vmatpush2.msra.mxu0 %v10079_v35  ;;  %2802 = vmatpush2.msra.mxu1 %v10085_v36 }
 0x5e2   :  { %2732 = vmatprep.subr.mxu0 %v10091_v34  ;;  %2803 = vmatprep.subr.mxu1 %v14820_v9  ;;  %v14834_v34 = vld [vmem:[#allocation120_spill] sm:$0xff] }
 0x5e3   :  { %2733 = vmatpush2.msra.mxu0 %v14821_v47  ;;  %2804 = vmatpush2.msra.mxu1 %v14822_v2 }
 0x5e4   :  { %2734 = vmatprep.subr.mxu0 %v14823_v46  ;;  %2805 = vmatprep.subr.mxu1 %v14824_v39  ;;  %v14835_v39 = vld [vmem:[#allocation121_spill] sm:$0xff] }
 0x5e5   :  { %2735 = vmatpush2.msra.mxu0 %v14825_v41  ;;  %2806 = vmatpush2.msra.mxu1 %v14826_v43 }
 0x5e6   :  { %2736 = vmatprep.subr.mxu0 %v14827_v45  ;;  %2807 = vmatprep.subr.mxu1 %v14828_v26 }
 0x5e7   :  { %2737 = vmatpush2.msra.mxu0 %v14829_v33  ;;  %2808 = vmatpush2.msra.mxu1 %v14830_v51 }
 0x5e8   :  { %2816 = vmatprep.subr.mxu0 %v14831_v3  ;;  %2887 = vmatprep.subr.mxu1 %v14832_v30 }
 0x626   :  { %v2390_v31 = vpop.f32.mrf.mxu0  ;;  %v2461_v2 = vpop.f32.mrf.mxu1 }
 0x627   :  { %v2612_v38 = vadd.f32 %v2390_v31, %v14833_v40 }
 0x628   :  { %v2392_v35 = vpop.f32.mrf.mxu0  ;;  %v2463_v46 = vpop.f32.mrf.mxu1 }
 0x629   :  { %v4043_v36 = vmul.f32 -1.442695, %v2612_v38  ;;  %v2613_v9 = vadd.f32 %v2392_v35, %v14834_v34  ;;  %v2615_v41 = vadd.f32 %v2463_v46, %v14835_v39  ;;  %v14836_v35 = vld [vmem:[#allocation183_spill] sm:$0xff] }
 0x62b   :  { %4319 = vpow2.f32 %v4043_v36  ;;  %v4044_v47 = vmul.f32 -1.442695, %v2613_v9  ;;  %v14837_v36 = vld [vmem:[#allocation171_spill] sm:$0xff] }
 0x62c   :  { %v447_v34 = vadd.f32 %v14837_v36, %v14836_v35  ;;  %v14841_v36 = vld [vmem:[#allocation115_spill] sm:$0xff] }
 0x62d   :  { %4321 = vpow2.f32 %v4044_v47  ;;  %v14838_v47 = vld [vmem:[#allocation173_spill] sm:$0xff]  ;;  %v2614_v35 = vadd.f32 %v2461_v2, %v14841_v36 }
 0x62e   :  { %4323 = vtanh.f32 %v2615_v41  ;;  %v449_v46 = vadd.f32 %v14838_v47, %v7499_v61 }
 0x638   :  { %v4320_v43 = vpop.eup %4319 }
 0x639   :  { %v2633_v45 = vadd.f32 1.0, %v4320_v43 }
 0x63a   :  { %v4322_v26 = vpop.eup %4321 }
 0x63b   :  { %4325 = vrcp.f32 %v2633_v45  ;;  %v2634_v33 = vadd.f32 1.0, %v4322_v26  ;;  %v4324_v51 = vpop.eup %4323 }
 0x63d   :  { %4327 = vrcp.f32 %v2634_v33 }
 0x648   :  { %v4326_v3 = vpop.eup %4325 }
 0x649   :  { %v2663_v30 = vmul.f32 %v4326_v3, %v4324_v51  ;;  %v14839_v51 = vld [vmem:[#allocation172_spill] sm:$0xff] }
 0x64a   :  { %v4328_v31 = vpop.eup %4327 }
 0x64b   :  { %v2662_v40 = vmul.f32 %v4328_v31, %v10176_v22  ;;  %v560_v22 = vadd.f32 %v14839_v51, %v7505_v19  ;;  %v14840_v31 = vld [vmem:[#allocation174_spill] sm:$0xff] }
 0x64d   :  { %v11213_v38 = vadd.f32 %v2663_v30, %v2662_v40  ;;  %v562_v40 = vadd.f32 %v14840_v31, %v7512_v50 }
 0x667   :  { %v2532_v9 = vpop.f32.mrf.mxu0  ;;  %v2603_v33 = vpop.f32.mrf.mxu1 }
 0x668   :  { %v2620_v39 = vadd.f32 %v2532_v9, %v447_v34  ;;  %v2622_v3 = vadd.f32 %v2603_v33, %v560_v22  ;;  %v4045_v9 = vmul.f32 -1.442695, %v2614_v35 }
 0x669   :  { %v2534_v41 = vpop.f32.mrf.mxu0  ;;  %v2605_v30 = vpop.f32.mrf.mxu1 }
 0x66a   :  { %v4046_v43 = vmul.f32 -1.442695, %v2620_v39  ;;  %v2621_v45 = vadd.f32 %v2534_v41, %v449_v46  ;;  %v4048_v53 = vmul.f32 -1.442695, %v2622_v3  ;;  %v2623_v47 = vadd.f32 %v2605_v30, %v562_v40 }
 0x66c   :  { %4329 = vpow2.f32 %v4046_v43  ;;  %v4047_v26 = vmul.f32 -1.442695, %v2621_v45 }
 0x66e   :  { %4331 = vpow2.f32 %v4047_v26 }
 0x66f   :  { %4333 = vpow2.f32 %v4048_v53 }
 0x670   :  { %4335 = vtanh.f32 %v2623_v47 }
 0x679   :  { %v4330_v34 = vpop.eup %4329 }
 0x67a   :  { %v2651_v39 = vadd.f32 1.0, %v4330_v34 }
 0x67b   :  { %v4332_v46 = vpop.eup %4331 }
 0x67c   :  { %4337 = vrcp.f32 %v2651_v39  ;;  %v2652_v41 = vadd.f32 1.0, %v4332_v46  ;;  %v4334_v43 = vpop.eup %4333  ;;  %v11248_v39 = vld [vmem:[%s13287_s2 + $0x3f0] sm:$0xff]  ;;  %v11254_v46 = vld [vmem:[%s13287_s2 + $0x3a8] sm:$0xff] }
 0x67d   :  { %4339 = vpow2.f32 %v4045_v9  ;;  %v4336_v45 = vpop.eup %4335  ;;  %v2653_v31 = vadd.f32 1.0, %v4334_v43  ;;  %v11242_v9 = vld [vmem:[%s13287_s2 + $0x3e0] sm:$0xff] }
 0x67e   :  { %4341 = vrcp.f32 %v2652_v41  ;;  %v11261_v41 = vld [vmem:[%s13287_s2 + $0x3b8] sm:$0xff]  ;;  %v11268_v43 = vld [vmem:[%s13287_s2 + $0x3a0] sm:$0xff] }
 0x67f   :  { %4343 = vtanh.f32 %v11213_v38 }
 0x680   :  { %4345 = vrcp.f32 %v2653_v31  ;;  %v11304_v31 = vld [vmem:[%s13287_s2 + $0x328] sm:$0xff] }
 0x689   :  { %v4338_v26 = vpop.eup %4337 }
 0x68a   :  { %v4340_v33 = vpop.eup %4339  ;;  %v2666_v51 = vmul.f32 %v4338_v26, %v4336_v45  ;;  %v11274_v45 = vld [vmem:[%s13287_s2 + $0x3b0] sm:$0xff]  ;;  %v11280_v26 = vld [vmem:[%s13287_s2 + $0x368] sm:$0xff] }
 0x68b   :  { %v4342_v22 = vpop.eup %4341  ;;  %v2635_v3 = vadd.f32 1.0, %v4340_v33  ;;  %v11286_v33 = vld [vmem:[%s13287_s2 + $0x378] sm:$0xff] }
 0x68c   :  { %v2665_v2 = vmul.f32 %v4342_v22, %v10189_v16  ;;  %v4344_v53 = vpop.eup %4343  ;;  %v11298_v22 = vld [vmem:[%s13287_s2 + $0x370] sm:$0xff] }
 0x68d   :  { %v4346_v30 = vpop.eup %4345  ;;  %v11346_v16 = vld [vmem:[%s13287_s2 + $0x2f0] sm:$0xff] }
 0x68e   :  { %v11226_v35 = vadd.f32 %v2666_v51, %v2665_v2  ;;  %v11292_v51 = vld [vmem:[%s13287_s2 + $0x360] sm:$0xff]  ;;  %v11310_v2 = vld [vmem:[%s13287_s2 + $0x338] sm:$0xff]  ;;  %14846 = vst [vmem:[#allocation177_spill] sm:$0xff] %v11346_v16 }
 0x690   :  { %4347 = vtanh.f32 %v11226_v35 }
 0x691   :  { %4349 = vrcp.f32 %v2635_v3  ;;  %v11316_v3 = vld [vmem:[%s13287_s2 + $0x320] sm:$0xff] }
 0x69d   :  { %v4348_v40 = vpop.eup %4347 }
 0x69e   :  { %v4350_v36 = vpop.eup %4349  ;;  %v11229_v47 = vmul.f32 %v4348_v40, %v4346_v30  ;;  %v11328_v30 = vld [vmem:[%s13287_s2 + $0x2e8] sm:$0xff]  ;;  %v11334_v40 = vld [vmem:[%s13287_s2 + $0x2f8] sm:$0xff] }
 0x69f   :  { %v11231_v34 = vmul.f32 %v4350_v36, %v4344_v53  ;;  %v11322_v53 = vld [vmem:[%s13287_s2 + $0x330] sm:$0xff]  ;;  %14843 = vst [vmem:[#allocation108_spill] sm:$0xff] %v11328_v30  ;;  %14844 = vst [vmem:[#allocation109_spill] sm:$0xff] %v11334_v40  ;;  %v11340_v36 = vld [vmem:[%s13287_s2 + $0x2e0] sm:$0xff] }
 0x6a0   :  { %2738 = vmatprep.mubr.f32.mxu0 %v11229_v47  ;;  %2809 = vmatprep.mubr.f32.mxu1 %v11229_v47  ;;  %14845 = vst [vmem:[#allocation175_spill] sm:$0xff] %v11340_v36 }
 0x6a1   :  { %14842 = vst [vmem:[#allocation102_spill] sm:$0xff] %v11231_v34  ;;  %2739 = vmatmul.mubr.f32.vlgmr.msra.gmra.mxu0 %v11231_v34  ;;  %2810 = vmatmul.mubr.f32.vlgmr.msra.gmra.mxu1 %v11231_v34 }
 0x6a2   :  { %2817 = vmatpush1.msra.mxu0 %v11242_v9  ;;  %2888 = vmatpush1.msra.mxu1 %v11248_v39 }
 0x6a3   :  { %2818 = vmatprep.subr.mxu0 %v11254_v46  ;;  %2880 = vmatprep.mubr.f32.mxu0 %v11229_v47 }
 0x6a4   :  { %2889 = vmatprep.subr.mxu1 %v11261_v41  ;;  %2951 = vmatprep.mubr.f32.mxu1 %v11229_v47 }
 0x6a5   :  { %2819 = vmatpush1.msra.mxu0 %v11268_v43  ;;  %2890 = vmatpush1.msra.mxu1 %v11274_v45 }
 0x6a6   :  { %2820 = vmatprep.subr.mxu0 %v11280_v26  ;;  %2891 = vmatprep.subr.mxu1 %v11286_v33 }
 0x6a7   :  { %2821 = vmatpush1.msra.mxu0 %v11292_v51  ;;  %2892 = vmatpush1.msra.mxu1 %v11298_v22 }
 0x6a8   :  { %2822 = vmatprep.subr.mxu0 %v11304_v31  ;;  %2893 = vmatprep.subr.mxu1 %v11310_v2 }
 0x6a9   :  { %2823 = vmatpush1.msra.mxu0 %v11316_v3  ;;  %2894 = vmatpush1.msra.mxu1 %v11322_v53 }
 0x6aa   :  { %2824 = vmatprep.subr.mxu0 %v11328_v30  ;;  %2895 = vmatprep.subr.mxu1 %v11334_v40  ;;  %v11352_v30 = vld [vmem:[%s13287_s2 + $0x2a8] sm:$0xff]  ;;  %v11358_v40 = vld [vmem:[%s13287_s2 + $0x2b8] sm:$0xff] }
 0x6ab   :  { %2825 = vmatpush1.msra.mxu0 %v11340_v36  ;;  %2896 = vmatpush1.msra.mxu1 %v11346_v16  ;;  %14847 = vst [vmem:[#allocation176_spill] sm:$0xff] %v11352_v30  ;;  %14848 = vst [vmem:[#allocation178_spill] sm:$0xff] %v11358_v40  ;;  %v11364_v36 = vld [vmem:[%s13287_s2 + $0x2a0] sm:$0xff]  ;;  %v11370_v16 = vld [vmem:[%s13287_s2 + $0x2b0] sm:$0xff] }
 0x6ac   :  { %2826 = vmatprep.subr.mxu0 %v11352_v30  ;;  %2897 = vmatprep.subr.mxu1 %v11358_v40  ;;  %14849 = vst [vmem:[#allocation103_spill] sm:$0xff] %v11364_v36  ;;  %14850 = vst [vmem:[#allocation193_spill] sm:$0xff] %v11370_v16  ;;  %v11376_v30 = vld [vmem:[%s13287_s2 + $0x268] sm:$0xff]  ;;  %v11382_v40 = vld [vmem:[%s13287_s2 + $0x278] sm:$0xff] }
 0x6ad   :  { %2827 = vmatpush1.msra.mxu0 %v11364_v36  ;;  %2898 = vmatpush1.msra.mxu1 %v11370_v16  ;;  %14851 = vst [vmem:[#allocation194_spill] sm:$0xff] %v11376_v30  ;;  %14852 = vst [vmem:[#allocation195_spill] sm:$0xff] %v11382_v40  ;;  %v11388_v36 = vld [vmem:[%s13287_s2 + $0x260] sm:$0xff]  ;;  %v11394_v16 = vld [vmem:[%s13287_s2 + $0x270] sm:$0xff] }
 0x6ae   :  { %2828 = vmatprep.subr.mxu0 %v11376_v30  ;;  %2899 = vmatprep.subr.mxu1 %v11382_v40  ;;  %14853 = vst [vmem:[#allocation196_spill] sm:$0xff] %v11388_v36  ;;  %14854 = vst [vmem:[#allocation197_spill] sm:$0xff] %v11394_v16  ;;  %v11400_v30 = vld [vmem:[%s13287_s2 + $0x228] sm:$0xff]  ;;  %v11406_v40 = vld [vmem:[%s13287_s2 + $0x238] sm:$0xff] }
 0x6af   :  { %2829 = vmatpush1.msra.mxu0 %v11388_v36  ;;  %2900 = vmatpush1.msra.mxu1 %v11394_v16  ;;  %14855 = vst [vmem:[#allocation198_spill] sm:$0xff] %v11400_v30  ;;  %14856 = vst [vmem:[#allocation199_spill] sm:$0xff] %v11406_v40  ;;  %v11412_v36 = vld [vmem:[%s13287_s2 + $0x220] sm:$0xff]  ;;  %v11418_v16 = vld [vmem:[%s13287_s2 + $0x230] sm:$0xff] }
 0x6b0   :  { %2830 = vmatprep.subr.mxu0 %v11400_v30  ;;  %2901 = vmatprep.subr.mxu1 %v11406_v40  ;;  %14857 = vst [vmem:[#allocation200_spill] sm:$0xff] %v11412_v36  ;;  %14858 = vst [vmem:[#allocation201_spill] sm:$0xff] %v11418_v16  ;;  %v11424_v30 = vld [vmem:[%s13287_s2 + $0x1e8] sm:$0xff]  ;;  %v11430_v40 = vld [vmem:[%s13287_s2 + $0x1f8] sm:$0xff] }
 0x6b1   :  { %2831 = vmatpush1.msra.mxu0 %v11412_v36  ;;  %2902 = vmatpush1.msra.mxu1 %v11418_v16  ;;  %14859 = vst [vmem:[#allocation202_spill] sm:$0xff] %v11424_v30  ;;  %14860 = vst [vmem:[#allocation203_spill] sm:$0xff] %v11430_v40  ;;  %v11436_v36 = vld [vmem:[%s13287_s2 + $0x1e0] sm:$0xff]  ;;  %v11442_v16 = vld [vmem:[%s13287_s2 + $0x1f0] sm:$0xff] }
 0x6b2   :  { %2832 = vmatprep.subr.mxu0 %v11424_v30  ;;  %2903 = vmatprep.subr.mxu1 %v11430_v40  ;;  %14861 = vst [vmem:[#allocation204_spill] sm:$0xff] %v11436_v36  ;;  %14862 = vst [vmem:[#allocation205_spill] sm:$0xff] %v11442_v16  ;;  %v11448_v30 = vld [vmem:[%s13287_s2 + $0x1a8] sm:$0xff]  ;;  %v11454_v40 = vld [vmem:[%s13287_s2 + $0x1b8] sm:$0xff] }
 0x6b3   :  { %2833 = vmatpush1.msra.mxu0 %v11436_v36  ;;  %2904 = vmatpush1.msra.mxu1 %v11442_v16  ;;  %14863 = vst [vmem:[#allocation206_spill] sm:$0xff] %v11448_v30  ;;  %14864 = vst [vmem:[#allocation207_spill] sm:$0xff] %v11454_v40  ;;  %v11460_v36 = vld [vmem:[%s13287_s2 + $0x1a0] sm:$0xff]  ;;  %v11466_v16 = vld [vmem:[%s13287_s2 + $0x1b0] sm:$0xff] }
 0x6b4   :  { %2834 = vmatprep.subr.mxu0 %v11448_v30  ;;  %2905 = vmatprep.subr.mxu1 %v11454_v40  ;;  %14865 = vst [vmem:[#allocation208_spill] sm:$0xff] %v11460_v36  ;;  %14866 = vst [vmem:[#allocation209_spill] sm:$0xff] %v11466_v16  ;;  %v11472_v30 = vld [vmem:[%s13287_s2 + $0x168] sm:$0xff]  ;;  %v11478_v40 = vld [vmem:[%s13287_s2 + $0x178] sm:$0xff] }
 0x6b5   :  { %2835 = vmatpush1.msra.mxu0 %v11460_v36  ;;  %2906 = vmatpush1.msra.mxu1 %v11466_v16  ;;  %14867 = vst [vmem:[#allocation210_spill] sm:$0xff] %v11472_v30  ;;  %14868 = vst [vmem:[#allocation211_spill] sm:$0xff] %v11478_v40  ;;  %v11484_v36 = vld [vmem:[%s13287_s2 + $0x160] sm:$0xff]  ;;  %v11490_v16 = vld [vmem:[%s13287_s2 + $0x170] sm:$0xff] }
 0x6b6   :  { %2836 = vmatprep.subr.mxu0 %v11472_v30  ;;  %2907 = vmatprep.subr.mxu1 %v11478_v40  ;;  %14869 = vst [vmem:[#allocation212_spill] sm:$0xff] %v11484_v36  ;;  %14870 = vst [vmem:[#allocation213_spill] sm:$0xff] %v11490_v16  ;;  %v11496_v30 = vld [vmem:[%s13287_s2 + $0x128] sm:$0xff]  ;;  %v11502_v40 = vld [vmem:[%s13287_s2 + $0x138] sm:$0xff] }
 0x6b7   :  { %2837 = vmatpush1.msra.mxu0 %v11484_v36  ;;  %2908 = vmatpush1.msra.mxu1 %v11490_v16  ;;  %14871 = vst [vmem:[#allocation214_spill] sm:$0xff] %v11496_v30  ;;  %14872 = vst [vmem:[#allocation215_spill] sm:$0xff] %v11502_v40  ;;  %v11508_v36 = vld [vmem:[%s13287_s2 + $0x120] sm:$0xff]  ;;  %v11514_v16 = vld [vmem:[%s13287_s2 + $0x130] sm:$0xff] }
 0x6b8   :  { %2838 = vmatprep.subr.mxu0 %v11496_v30  ;;  %2909 = vmatprep.subr.mxu1 %v11502_v40  ;;  %14873 = vst [vmem:[#allocation216_spill] sm:$0xff] %v11508_v36  ;;  %14874 = vst [vmem:[#allocation217_spill] sm:$0xff] %v11514_v16  ;;  %v11520_v30 = vld [vmem:[%s13287_s2 + $0xe8] sm:$0xff]  ;;  %v11526_v40 = vld [vmem:[%s13287_s2 + $0xf8] sm:$0xff] }
 0x6b9   :  { %2839 = vmatpush1.msra.mxu0 %v11508_v36  ;;  %2910 = vmatpush1.msra.mxu1 %v11514_v16  ;;  %14875 = vst [vmem:[#allocation218_spill] sm:$0xff] %v11520_v30  ;;  %14876 = vst [vmem:[#allocation219_spill] sm:$0xff] %v11526_v40  ;;  %v11532_v36 = vld [vmem:[%s13287_s2 + $0xe0] sm:$0xff]  ;;  %v11538_v16 = vld [vmem:[%s13287_s2 + $0xf0] sm:$0xff] }
 0x6ba   :  { %2840 = vmatprep.subr.mxu0 %v11520_v30  ;;  %2911 = vmatprep.subr.mxu1 %v11526_v40  ;;  %14877 = vst [vmem:[#allocation220_spill] sm:$0xff] %v11532_v36  ;;  %14878 = vst [vmem:[#allocation221_spill] sm:$0xff] %v11538_v16  ;;  %v11544_v30 = vld [vmem:[%s13287_s2 + $0xa8] sm:$0xff]  ;;  %v11550_v40 = vld [vmem:[%s13287_s2 + $0xb8] sm:$0xff] }
 0x6bb   :  { %2841 = vmatpush1.msra.mxu0 %v11532_v36  ;;  %2912 = vmatpush1.msra.mxu1 %v11538_v16  ;;  %14879 = vst [vmem:[#allocation222_spill] sm:$0xff] %v11544_v30  ;;  %14880 = vst [vmem:[#allocation223_spill] sm:$0xff] %v11550_v40  ;;  %v11556_v36 = vld [vmem:[%s13287_s2 + $0xa0] sm:$0xff]  ;;  %v11562_v16 = vld [vmem:[%s13287_s2 + $0xb0] sm:$0xff] }
 0x6bc   :  { %2842 = vmatprep.subr.mxu0 %v11544_v30  ;;  %2913 = vmatprep.subr.mxu1 %v11550_v40  ;;  %14881 = vst [vmem:[#allocation224_spill] sm:$0xff] %v11556_v36  ;;  %14882 = vst [vmem:[#allocation225_spill] sm:$0xff] %v11562_v16  ;;  %v11568_v30 = vld [vmem:[%s13287_s2 + $0x68] sm:$0xff]  ;;  %v11574_v40 = vld [vmem:[%s13287_s2 + $0x78] sm:$0xff] }
 0x6bd   :  { %2843 = vmatpush1.msra.mxu0 %v11556_v36  ;;  %2914 = vmatpush1.msra.mxu1 %v11562_v16  ;;  %14883 = vst [vmem:[#allocation226_spill] sm:$0xff] %v11568_v30  ;;  %14884 = vst [vmem:[#allocation227_spill] sm:$0xff] %v11574_v40  ;;  %v11580_v36 = vld [vmem:[%s13287_s2 + $0x60] sm:$0xff]  ;;  %v11586_v16 = vld [vmem:[%s13287_s2 + $0x70] sm:$0xff] }
 0x6be   :  { %2844 = vmatprep.subr.mxu0 %v11568_v30  ;;  %2915 = vmatprep.subr.mxu1 %v11574_v40  ;;  %14885 = vst [vmem:[#allocation228_spill] sm:$0xff] %v11580_v36  ;;  %14886 = vst [vmem:[#allocation3_spill] sm:$0xff] %v11586_v16  ;;  %v11592_v30 = vld [vmem:[%s13287_s2 + $0x28] sm:$0xff]  ;;  %v11598_v40 = vld [vmem:[%s13287_s2 + $0x38] sm:$0xff] }
 0x6bf   :  { %2845 = vmatpush1.msra.mxu0 %v11580_v36  ;;  %2916 = vmatpush1.msra.mxu1 %v11586_v16  ;;  %14887 = vst [vmem:[#allocation4_spill] sm:$0xff] %v11592_v30  ;;  %14888 = vst [vmem:[#allocation5_spill] sm:$0xff] %v11598_v40  ;;  %v11604_v36 = vld [vmem:[%s13287_s2 + $0x20] sm:$0xff]  ;;  %v11610_v16 = vld [vmem:[%s13287_s2 + $0x30] sm:$0xff] }
 0x6c0   :  { %2846 = vmatprep.subr.mxu0 %v11592_v30  ;;  %2917 = vmatprep.subr.mxu1 %v11598_v40  ;;  %14889 = vst [vmem:[#allocation6_spill] sm:$0xff] %v11604_v36  ;;  %14890 = vst [vmem:[#allocation7_spill] sm:$0xff] %v11610_v16  ;;  %v11616_v30 = vld [vmem:[%s13287_s2 + $0x7e8] sm:$0xff]  ;;  %v11622_v40 = vld [vmem:[%s13287_s2 + $0x7f8] sm:$0xff] }
 0x6c1   :  { %2847 = vmatpush1.msra.mxu0 %v11604_v36  ;;  %2918 = vmatpush1.msra.mxu1 %v11610_v16  ;;  %14891 = vst [vmem:[#allocation8_spill] sm:$0xff] %v11616_v30  ;;  %14892 = vst [vmem:[#allocation9_spill] sm:$0xff] %v11622_v40  ;;  %v11628_v36 = vld [vmem:[%s13287_s2 + $0x7e0] sm:$0xff]  ;;  %v11634_v16 = vld [vmem:[%s13287_s2 + $0x7f0] sm:$0xff] }
 0x6c2   :  { %2848 = vmatprep.subr.mxu0 %v11616_v30  ;;  %2919 = vmatprep.subr.mxu1 %v11622_v40  ;;  %14893 = vst [vmem:[#allocation10_spill] sm:$0xff] %v11628_v36  ;;  %14894 = vst [vmem:[#allocation11_spill] sm:$0xff] %v11634_v16  ;;  %v11640_v30 = vld [vmem:[%s13287_s2 + $0x7a8] sm:$0xff]  ;;  %v11646_v40 = vld [vmem:[%s13287_s2 + $0x7b8] sm:$0xff] }
 0x6c3   :  { %2849 = vmatpush2.msra.mxu0 %v11628_v36  ;;  %2920 = vmatpush2.msra.mxu1 %v11634_v16  ;;  %14895 = vst [vmem:[#allocation12_spill] sm:$0xff] %v11640_v30  ;;  %14896 = vst [vmem:[#allocation13_spill] sm:$0xff] %v11646_v40  ;;  %v11652_v36 = vld [vmem:[%s13287_s2 + $0x7a0] sm:$0xff]  ;;  %v11658_v16 = vld [vmem:[%s13287_s2 + $0x7b0] sm:$0xff] }
 0x6c4   :  { %2850 = vmatprep.subr.mxu0 %v11640_v30  ;;  %2921 = vmatprep.subr.mxu1 %v11646_v40  ;;  %14897 = vst [vmem:[#allocation14_spill] sm:$0xff] %v11652_v36  ;;  %14898 = vst [vmem:[#allocation15_spill] sm:$0xff] %v11658_v16  ;;  %v11664_v30 = vld [vmem:[%s13287_s2 + $0x768] sm:$0xff]  ;;  %v11670_v40 = vld [vmem:[%s13287_s2 + $0x778] sm:$0xff] }
 0x6c5   :  { %2851 = vmatpush2.msra.mxu0 %v11652_v36  ;;  %2922 = vmatpush2.msra.mxu1 %v11658_v16  ;;  %v11676_v36 = vld [vmem:[%s13287_s2 + $0x760] sm:$0xff]  ;;  %v11682_v16 = vld [vmem:[%s13287_s2 + $0x770] sm:$0xff] }
 0x6c6   :  { %2852 = vmatprep.subr.mxu0 %v11664_v30  ;;  %2923 = vmatprep.subr.mxu1 %v11670_v40 }
 0x6c7   :  { %2853 = vmatpush2.msra.mxu0 %v11676_v36  ;;  %2924 = vmatpush2.msra.mxu1 %v11682_v16 }
 0x6c8   :  { %2854 = vmatprep.subr.mxu0 %v10278_v58  ;;  %2925 = vmatprep.subr.mxu1 %v10284_v24  ;;  %v14899_v58 = vld [vmem:[#allocation30_spill] sm:$0xff]  ;;  %v14900_v24 = vld [vmem:[#allocation31_spill] sm:$0xff] }
 0x6c9   :  { %2855 = vmatpush2.msra.mxu0 %v10290_v57  ;;  %2926 = vmatpush2.msra.mxu1 %v10296_v5  ;;  %v14901_v57 = vld [vmem:[#allocation32_spill] sm:$0xff]  ;;  %v14902_v5 = vld [vmem:[#allocation33_spill] sm:$0xff] }
 0x6ca   :  { %2856 = vmatprep.subr.mxu0 %v10302_v21  ;;  %2927 = vmatprep.subr.mxu1 %v10308_v14  ;;  %v14903_v21 = vld [vmem:[#allocation34_spill] sm:$0xff]  ;;  %v14904_v14 = vld [vmem:[#allocation35_spill] sm:$0xff] }
 0x6cb   :  { %2857 = vmatpush2.msra.mxu0 %v10314_v12  ;;  %2928 = vmatpush2.msra.mxu1 %v10320_v13  ;;  %v14905_v12 = vld [vmem:[#allocation36_spill] sm:$0xff]  ;;  %v14906_v13 = vld [vmem:[#allocation37_spill] sm:$0xff] }
 0x6cc   :  { %2858 = vmatprep.subr.mxu0 %v10326_v17  ;;  %2929 = vmatprep.subr.mxu1 %v10332_v59  ;;  %v14907_v17 = vld [vmem:[#allocation38_spill] sm:$0xff]  ;;  %v14908_v59 = vld [vmem:[#allocation39_spill] sm:$0xff] }
 0x6cd   :  { %2859 = vmatpush2.msra.mxu0 %v10338_v63  ;;  %2930 = vmatpush2.msra.mxu1 %v10344_v37  ;;  %v14909_v63 = vld [vmem:[#allocation40_spill] sm:$0xff]  ;;  %v14910_v37 = vld [vmem:[#allocation41_spill] sm:$0xff] }
 0x6ce   :  { %2860 = vmatprep.subr.mxu0 %v10350_v25  ;;  %2931 = vmatprep.subr.mxu1 %v10356_v20  ;;  %v14911_v25 = vld [vmem:[#allocation42_spill] sm:$0xff]  ;;  %v14912_v20 = vld [vmem:[#allocation43_spill] sm:$0xff] }
 0x6cf   :  { %2861 = vmatpush2.msra.mxu0 %v10362_v62  ;;  %2932 = vmatpush2.msra.mxu1 %v10368_v8  ;;  %v14913_v62 = vld [vmem:[#allocation44_spill] sm:$0xff]  ;;  %v14914_v8 = vld [vmem:[#allocation45_spill] sm:$0xff] }
 0x6d0   :  { %2862 = vmatprep.subr.mxu0 %v10374_v48  ;;  %2933 = vmatprep.subr.mxu1 %v10380_v42  ;;  %v14915_v48 = vld [vmem:[#allocation46_spill] sm:$0xff]  ;;  %v14916_v42 = vld [vmem:[#allocation47_spill] sm:$0xff] }
 0x6d1   :  { %2863 = vmatpush2.msra.mxu0 %v10386_v55  ;;  %2934 = vmatpush2.msra.mxu1 %v10392_v15  ;;  %v14917_v55 = vld [vmem:[#allocation48_spill] sm:$0xff]  ;;  %v14918_v15 = vld [vmem:[#allocation49_spill] sm:$0xff] }
 0x6d2   :  { %2864 = vmatprep.subr.mxu0 %v10398_v11  ;;  %2935 = vmatprep.subr.mxu1 %v10404_v6  ;;  %v14919_v11 = vld [vmem:[#allocation50_spill] sm:$0xff]  ;;  %v14920_v6 = vld [vmem:[#allocation51_spill] sm:$0xff] }
 0x6d3   :  { %2865 = vmatpush2.msra.mxu0 %v10410_v1  ;;  %2936 = vmatpush2.msra.mxu1 %v10416_v27  ;;  %v14921_v1 = vld [vmem:[#allocation52_spill] sm:$0xff]  ;;  %v14922_v27 = vld [vmem:[#allocation53_spill] sm:$0xff] }
 0x6d4   :  { %2866 = vmatprep.subr.mxu0 %v10422_v44  ;;  %2937 = vmatprep.subr.mxu1 %v10428_v4  ;;  %v14923_v44 = vld [vmem:[#allocation54_spill] sm:$0xff]  ;;  %v14924_v4 = vld [vmem:[#allocation55_spill] sm:$0xff] }
 0x6d5   :  { %2867 = vmatpush2.msra.mxu0 %v10434_v7  ;;  %2938 = vmatpush2.msra.mxu1 %v10440_v0  ;;  %v14925_v7 = vld [vmem:[#allocation56_spill] sm:$0xff]  ;;  %v14926_v0 = vld [vmem:[#allocation57_spill] sm:$0xff] }
 0x6d6   :  { %2868 = vmatprep.subr.mxu0 %v10446_v32  ;;  %2939 = vmatprep.subr.mxu1 %v10452_v52  ;;  %v14927_v32 = vld [vmem:[#allocation58_spill] sm:$0xff]  ;;  %v14928_v52 = vld [vmem:[#allocation59_spill] sm:$0xff] }
 0x6d7   :  { %2869 = vmatpush2.msra.mxu0 %v10458_v54  ;;  %2940 = vmatpush2.msra.mxu1 %v10464_v10  ;;  %v14929_v54 = vld [vmem:[#allocation60_spill] sm:$0xff]  ;;  %v14930_v10 = vld [vmem:[#allocation61_spill] sm:$0xff] }
 0x6d8   :  { %2870 = vmatprep.subr.mxu0 %v10470_v23  ;;  %2941 = vmatprep.subr.mxu1 %v10476_v60  ;;  %v14931_v23 = vld [vmem:[#allocation62_spill] sm:$0xff]  ;;  %v14932_v60 = vld [vmem:[#allocation63_spill] sm:$0xff] }
 0x6d9   :  { %2871 = vmatpush2.msra.mxu0 %v14899_v58  ;;  %2942 = vmatpush2.msra.mxu1 %v14900_v24  ;;  %v14934_v58 = vld [vmem:[#allocation65_spill] sm:$0xff]  ;;  %v14935_v24 = vld [vmem:[#allocation66_spill] sm:$0xff] }
 0x6da   :  { %2872 = vmatprep.subr.mxu0 %v14901_v57  ;;  %2943 = vmatprep.subr.mxu1 %v14902_v5  ;;  %v14936_v57 = vld [vmem:[#allocation67_spill] sm:$0xff]  ;;  %v14937_v5 = vld [vmem:[#allocation68_spill] sm:$0xff] }
 0x6db   :  { %2873 = vmatpush2.msra.mxu0 %v14903_v21  ;;  %2944 = vmatpush2.msra.mxu1 %v14904_v14  ;;  %v14938_v21 = vld [vmem:[#allocation69_spill] sm:$0xff]  ;;  %v14939_v14 = vld [vmem:[#allocation70_spill] sm:$0xff] }
 0x6dc   :  { %2874 = vmatprep.subr.mxu0 %v14905_v12  ;;  %2945 = vmatprep.subr.mxu1 %v14906_v13  ;;  %v14940_v12 = vld [vmem:[#allocation71_spill] sm:$0xff]  ;;  %v14941_v13 = vld [vmem:[#allocation72_spill] sm:$0xff] }
 0x6dd   :  { %2875 = vmatpush2.msra.mxu0 %v14907_v17  ;;  %2946 = vmatpush2.msra.mxu1 %v14908_v59  ;;  %v14942_v17 = vld [vmem:[#allocation73_spill] sm:$0xff]  ;;  %v14943_v59 = vld [vmem:[#allocation74_spill] sm:$0xff] }
 0x6de   :  { %2876 = vmatprep.subr.mxu0 %v14909_v63  ;;  %2947 = vmatprep.subr.mxu1 %v14910_v37  ;;  %v14944_v63 = vld [vmem:[#allocation75_spill] sm:$0xff]  ;;  %v14945_v37 = vld [vmem:[#allocation76_spill] sm:$0xff] }
 0x6df   :  { %2877 = vmatpush2.msra.mxu0 %v14911_v25  ;;  %2948 = vmatpush2.msra.mxu1 %v14912_v20  ;;  %v14946_v25 = vld [vmem:[#allocation77_spill] sm:$0xff]  ;;  %v14947_v20 = vld [vmem:[#allocation80_spill] sm:$0xff] }
 0x6e0   :  { %2878 = vmatprep.subr.mxu0 %v10566_v18  ;;  %2949 = vmatprep.subr.mxu1 %v14913_v62  ;;  %v14933_v18 = vld [vmem:[#allocation64_spill] sm:$0xff]  ;;  %v14948_v62 = vld [vmem:[#allocation81_spill] sm:$0xff] }
 0x6e1   :  { %2879 = vmatpush2.msra.mxu0 %v14914_v8  ;;  %2950 = vmatpush2.msra.mxu1 %v14915_v48  ;;  %v14949_v8 = vld [vmem:[#allocation82_spill] sm:$0xff]  ;;  %v14950_v48 = vld [vmem:[#allocation83_spill] sm:$0xff] }
 0x6e2   :  { %2881 = vmatmul.mubr.f32.vlgmr.msra.gmra.mxu0 %v11231_v34  ;;  %2952 = vmatmul.mubr.f32.vlgmr.msra.gmra.mxu1 %v11231_v34 }
 0x6e3   :  { %3024 = vmatprep.subr.mxu0 %v14916_v42  ;;  %3095 = vmatprep.subr.mxu1 %v14917_v55  ;;  %v14951_v42 = vld [vmem:[#allocation86_spill] sm:$0xff]  ;;  %v14952_v55 = vld [vmem:[#allocation87_spill] sm:$0xff] }
 0x6e4   :  { %3025 = vmatpush1.msra.mxu0 %v14918_v15  ;;  %3096 = vmatpush1.msra.mxu1 %v14919_v11  ;;  %v14953_v15 = vld [vmem:[#allocation88_spill] sm:$0xff]  ;;  %v14954_v11 = vld [vmem:[#allocation89_spill] sm:$0xff] }
 0x6e5   :  { %3026 = vmatprep.subr.mxu0 %v14920_v6  ;;  %3097 = vmatprep.subr.mxu1 %v14921_v1  ;;  %v14955_v6 = vld [vmem:[#allocation92_spill] sm:$0xff]  ;;  %v14956_v1 = vld [vmem:[#allocation93_spill] sm:$0xff] }
 0x6e6   :  { %3027 = vmatpush1.msra.mxu0 %v14922_v27  ;;  %3098 = vmatpush1.msra.mxu1 %v14923_v44  ;;  %v14957_v27 = vld [vmem:[#allocation94_spill] sm:$0xff]  ;;  %v14958_v44 = vld [vmem:[#allocation95_spill] sm:$0xff] }
 0x6e7   :  { %3028 = vmatprep.subr.mxu0 %v14924_v4  ;;  %3099 = vmatprep.subr.mxu1 %v14925_v7  ;;  %v14959_v4 = vld [vmem:[#allocation98_spill] sm:$0xff]  ;;  %v14960_v7 = vld [vmem:[#allocation99_spill] sm:$0xff] }
 0x6e8   :  { %3029 = vmatpush1.msra.mxu0 %v14926_v0  ;;  %3100 = vmatpush1.msra.mxu1 %v14927_v32  ;;  %v14961_v0 = vld [vmem:[#allocation100_spill] sm:$0xff]  ;;  %v14962_v32 = vld [vmem:[#allocation101_spill] sm:$0xff] }
 0x6e9   :  { %3030 = vmatprep.subr.mxu0 %v14928_v52  ;;  %3101 = vmatprep.subr.mxu1 %v14929_v54  ;;  %v14963_v52 = vld [vmem:[#allocation104_spill] sm:$0xff]  ;;  %v14964_v54 = vld [vmem:[#allocation105_spill] sm:$0xff] }
 0x6ea   :  { %3031 = vmatpush1.msra.mxu0 %v14930_v10  ;;  %3102 = vmatpush1.msra.mxu1 %v14931_v23  ;;  %v14965_v10 = vld [vmem:[#allocation106_spill] sm:$0xff]  ;;  %v14966_v23 = vld [vmem:[#allocation107_spill] sm:$0xff] }
 0x6eb   :  { %3032 = vmatprep.subr.mxu0 %v14932_v60  ;;  %3103 = vmatprep.subr.mxu1 %v14933_v18  ;;  %v14967_v60 = vld [vmem:[#allocation110_spill] sm:$0xff]  ;;  %v14968_v18 = vld [vmem:[#allocation111_spill] sm:$0xff] }
 0x6ec   :  { %3033 = vmatpush1.msra.mxu0 %v14934_v58  ;;  %3104 = vmatpush1.msra.mxu1 %v14935_v24  ;;  %v14969_v58 = vld [vmem:[#allocation112_spill] sm:$0xff]  ;;  %v14970_v24 = vld [vmem:[#allocation113_spill] sm:$0xff] }
 0x6ed   :  { %3034 = vmatprep.subr.mxu0 %v14936_v57  ;;  %3105 = vmatprep.subr.mxu1 %v14937_v5  ;;  %v14971_v57 = vld [vmem:[#allocation116_spill] sm:$0xff]  ;;  %v14972_v5 = vld [vmem:[#allocation117_spill] sm:$0xff] }
 0x6ee   :  { %3035 = vmatpush1.msra.mxu0 %v14938_v21  ;;  %3106 = vmatpush1.msra.mxu1 %v14939_v14  ;;  %v14973_v21 = vld [vmem:[#allocation118_spill] sm:$0xff]  ;;  %v14974_v14 = vld [vmem:[#allocation119_spill] sm:$0xff] }
 0x6ef   :  { %3036 = vmatprep.subr.mxu0 %v14940_v12  ;;  %3107 = vmatprep.subr.mxu1 %v14941_v13  ;;  %v14975_v12 = vld [vmem:[#allocation122_spill] sm:$0xff]  ;;  %v14976_v13 = vld [vmem:[#allocation123_spill] sm:$0xff] }
 0x6f0   :  { %3037 = vmatpush1.msra.mxu0 %v14942_v17  ;;  %3108 = vmatpush1.msra.mxu1 %v14943_v59  ;;  %v14977_v17 = vld [vmem:[#allocation124_spill] sm:$0xff]  ;;  %v14978_v59 = vld [vmem:[#allocation125_spill] sm:$0xff] }
 0x6f1   :  { %3038 = vmatprep.subr.mxu0 %v14944_v63  ;;  %3109 = vmatprep.subr.mxu1 %v14945_v37  ;;  %v14979_v63 = vld [vmem:[#allocation128_spill] sm:$0xff]  ;;  %v14980_v37 = vld [vmem:[#allocation129_spill] sm:$0xff] }
 0x6f2   :  { %3039 = vmatpush1.msra.mxu0 %v14946_v25  ;;  %3110 = vmatpush1.msra.mxu1 %v14947_v20  ;;  %v14981_v25 = vld [vmem:[#allocation130_spill] sm:$0xff]  ;;  %v14982_v20 = vld [vmem:[#allocation131_spill] sm:$0xff] }
 0x6f3   :  { %3040 = vmatprep.subr.mxu0 %v14948_v62  ;;  %3111 = vmatprep.subr.mxu1 %v14949_v8  ;;  %v14983_v62 = vld [vmem:[#allocation134_spill] sm:$0xff]  ;;  %v14984_v8 = vld [vmem:[#allocation135_spill] sm:$0xff] }
 0x6f4   :  { %3041 = vmatpush1.msra.mxu0 %v14950_v48  ;;  %3112 = vmatpush1.msra.mxu1 %v14951_v42  ;;  %v14985_v48 = vld [vmem:[#allocation136_spill] sm:$0xff]  ;;  %v14986_v42 = vld [vmem:[#allocation137_spill] sm:$0xff] }
 0x6f5   :  { %3042 = vmatprep.subr.mxu0 %v14952_v55  ;;  %3113 = vmatprep.subr.mxu1 %v14953_v15  ;;  %v14987_v55 = vld [vmem:[#allocation140_spill] sm:$0xff]  ;;  %v14988_v15 = vld [vmem:[#allocation141_spill] sm:$0xff] }
 0x6f6   :  { %3043 = vmatpush1.msra.mxu0 %v14954_v11  ;;  %3114 = vmatpush1.msra.mxu1 %v14955_v6  ;;  %v14989_v11 = vld [vmem:[#allocation142_spill] sm:$0xff]  ;;  %v14990_v6 = vld [vmem:[#allocation143_spill] sm:$0xff] }
 0x6f7   :  { %3044 = vmatprep.subr.mxu0 %v14956_v1  ;;  %3115 = vmatprep.subr.mxu1 %v14957_v27  ;;  %v14991_v1 = vld [vmem:[#allocation146_spill] sm:$0xff]  ;;  %v14992_v27 = vld [vmem:[#allocation147_spill] sm:$0xff] }
 0x6f8   :  { %3045 = vmatpush1.msra.mxu0 %v14958_v44  ;;  %3116 = vmatpush1.msra.mxu1 %v14959_v4  ;;  %v14993_v44 = vld [vmem:[#allocation148_spill] sm:$0xff]  ;;  %v14994_v4 = vld [vmem:[#allocation149_spill] sm:$0xff] }
 0x6f9   :  { %3046 = vmatprep.subr.mxu0 %v14960_v7  ;;  %3117 = vmatprep.subr.mxu1 %v14961_v0  ;;  %v14995_v7 = vld [vmem:[#allocation152_spill] sm:$0xff]  ;;  %v14996_v0 = vld [vmem:[#allocation153_spill] sm:$0xff] }
 0x6fa   :  { %3047 = vmatpush1.msra.mxu0 %v14962_v32  ;;  %3118 = vmatpush1.msra.mxu1 %v14963_v52  ;;  %v14997_v32 = vld [vmem:[#allocation154_spill] sm:$0xff]  ;;  %v14998_v52 = vld [vmem:[#allocation157_spill] sm:$0xff] }
 0x6fb   :  { %3048 = vmatprep.subr.mxu0 %v14964_v54  ;;  %3119 = vmatprep.subr.mxu1 %v14965_v10  ;;  %v14999_v54 = vld [vmem:[#allocation158_spill] sm:$0xff] }
 0x6fc   :  { %3049 = vmatpush1.msra.mxu0 %v14966_v23  ;;  %3120 = vmatpush1.msra.mxu1 %v14967_v60  ;;  %v15000_v10 = vld [vmem:[#allocation78_spill] sm:$0xff]  ;;  %v15001_v23 = vld [vmem:[#allocation84_spill] sm:$0xff]  ;;  %v15002_v60 = vld [vmem:[#allocation85_spill] sm:$0xff] }
 0x6fd   :  { %3050 = vmatprep.subr.mxu0 %v14968_v18  ;;  %3121 = vmatprep.subr.mxu1 %v14969_v58  ;;  %v15003_v18 = vld [vmem:[#allocation79_spill] sm:$0xff]  ;;  %v15004_v58 = vld [vmem:[#allocation185_spill] sm:$0xff] }
 0x6fe   :  { %3051 = vmatpush1.msra.mxu0 %v14970_v24  ;;  %3122 = vmatpush1.msra.mxu1 %v14971_v57  ;;  %v15005_v24 = vld [vmem:[#allocation186_spill] sm:$0xff]  ;;  %v15006_v57 = vld [vmem:[#allocation187_spill] sm:$0xff] }
 0x6ff   :  { %3052 = vmatprep.subr.mxu0 %v14972_v5  ;;  %3123 = vmatprep.subr.mxu1 %v14973_v21  ;;  %v15007_v5 = vld [vmem:[#allocation188_spill] sm:$0xff]  ;;  %v15008_v21 = vld [vmem:[#allocation189_spill] sm:$0xff] }
 0x700   :  { %3053 = vmatpush1.msra.mxu0 %v14974_v14  ;;  %3124 = vmatpush1.msra.mxu1 %v14975_v12  ;;  %v15009_v14 = vld [vmem:[#allocation190_spill] sm:$0xff]  ;;  %v15010_v12 = vld [vmem:[#allocation191_spill] sm:$0xff] }
 0x701   :  { %3054 = vmatprep.subr.mxu0 %v14976_v13  ;;  %3125 = vmatprep.subr.mxu1 %v14977_v17  ;;  %v11840_v13 = vld [vmem:[%s13287_s2 + $0x5c0] sm:$0xff]  ;;  %v11846_v17 = vld [vmem:[%s13287_s2 + $0x5d0] sm:$0xff] }
 0x702   :  { %3055 = vmatpush1.msra.mxu0 %v14978_v59  ;;  %3126 = vmatpush1.msra.mxu1 %v14979_v63  ;;  %v11870_v59 = vld [vmem:[%s13287_s2 + $0x590] sm:$0xff]  ;;  %v11876_v63 = vld [vmem:[%s13287_s2 + $0x548] sm:$0xff] }
 0x703   :  { %3056 = vmatprep.subr.mxu0 %v14980_v37  ;;  %3127 = vmatprep.subr.mxu1 %v14981_v25  ;;  %v11882_v37 = vld [vmem:[%s13287_s2 + $0x558] sm:$0xff]  ;;  %v11888_v25 = vld [vmem:[%s13287_s2 + $0x540] sm:$0xff] }
 0x704   :  { %3057 = vmatpush2.msra.mxu0 %v14982_v20  ;;  %3128 = vmatpush2.msra.mxu1 %v14983_v62  ;;  %v11894_v20 = vld [vmem:[%s13287_s2 + $0x550] sm:$0xff]  ;;  %v11900_v62 = vld [vmem:[%s13287_s2 + $0x508] sm:$0xff] }
 0x705   :  { %3058 = vmatprep.subr.mxu0 %v14984_v8  ;;  %3129 = vmatprep.subr.mxu1 %v14985_v48  ;;  %v11906_v8 = vld [vmem:[%s13287_s2 + $0x518] sm:$0xff]  ;;  %v11912_v48 = vld [vmem:[%s13287_s2 + $0x500] sm:$0xff] }
 0x706   :  { %3059 = vmatpush2.msra.mxu0 %v14986_v42  ;;  %3130 = vmatpush2.msra.mxu1 %v14987_v55  ;;  %v11918_v42 = vld [vmem:[%s13287_s2 + $0x510] sm:$0xff]  ;;  %v11924_v55 = vld [vmem:[%s13287_s2 + $0x4c8] sm:$0xff] }
 0x707   :  { %3060 = vmatprep.subr.mxu0 %v14988_v15  ;;  %3131 = vmatprep.subr.mxu1 %v14989_v11  ;;  %v11930_v15 = vld [vmem:[%s13287_s2 + $0x4d8] sm:$0xff]  ;;  %v11936_v11 = vld [vmem:[%s13287_s2 + $0x4c0] sm:$0xff] }
 0x708   :  { %3061 = vmatpush2.msra.mxu0 %v14990_v6  ;;  %3132 = vmatpush2.msra.mxu1 %v14991_v1  ;;  %v11942_v6 = vld [vmem:[%s13287_s2 + $0x4d0] sm:$0xff]  ;;  %v11948_v1 = vld [vmem:[%s13287_s2 + $0x488] sm:$0xff] }
 0x709   :  { %3062 = vmatprep.subr.mxu0 %v14992_v27  ;;  %3133 = vmatprep.subr.mxu1 %v14993_v44  ;;  %v11954_v27 = vld [vmem:[%s13287_s2 + $0x498] sm:$0xff]  ;;  %v11960_v44 = vld [vmem:[%s13287_s2 + $0x480] sm:$0xff] }
 0x70a   :  { %3063 = vmatpush2.msra.mxu0 %v14994_v4  ;;  %3134 = vmatpush2.msra.mxu1 %v14995_v7  ;;  %15011 = vst [vmem:[#allocation16_spill] sm:$0xff] %v11954_v27  ;;  %15012 = vst [vmem:[#allocation17_spill] sm:$0xff] %v11960_v44  ;;  %v11966_v4 = vld [vmem:[%s13287_s2 + $0x490] sm:$0xff]  ;;  %v11972_v7 = vld [vmem:[%s13287_s2 + $0x448] sm:$0xff] }
 0x70b   :  { %3064 = vmatprep.subr.mxu0 %v14996_v0  ;;  %3135 = vmatprep.subr.mxu1 %v14997_v32  ;;  %15013 = vst [vmem:[#allocation18_spill] sm:$0xff] %v11966_v4  ;;  %15014 = vst [vmem:[#allocation19_spill] sm:$0xff] %v11972_v7  ;;  %v11978_v0 = vld [vmem:[%s13287_s2 + $0x458] sm:$0xff]  ;;  %v11984_v32 = vld [vmem:[%s13287_s2 + $0x440] sm:$0xff] }
 0x70c   :  { %3065 = vmatpush2.msra.mxu0 %v14998_v52  ;;  %3136 = vmatpush2.msra.mxu1 %v14999_v54  ;;  %15015 = vst [vmem:[#allocation20_spill] sm:$0xff] %v11978_v0  ;;  %15016 = vst [vmem:[#allocation21_spill] sm:$0xff] %v11984_v32  ;;  %v11990_v52 = vld [vmem:[%s13287_s2 + $0x450] sm:$0xff]  ;;  %v11996_v54 = vld [vmem:[%s13287_s2 + $0x408] sm:$0xff] }
 0x70d   :  { %3066 = vmatprep.subr.mxu0 %v15000_v10  ;;  %3137 = vmatprep.subr.mxu1 %v15001_v23  ;;  %15017 = vst [vmem:[#allocation22_spill] sm:$0xff] %v11990_v52  ;;  %15018 = vst [vmem:[#allocation23_spill] sm:$0xff] %v11996_v54  ;;  %v12002_v10 = vld [vmem:[%s13287_s2 + $0x418] sm:$0xff]  ;;  %v12008_v23 = vld [vmem:[%s13287_s2 + $0x400] sm:$0xff] }
 0x70e   :  { %3067 = vmatpush2.msra.mxu0 %v15002_v60  ;;  %3138 = vmatpush2.msra.mxu1 %v15003_v18  ;;  %15019 = vst [vmem:[#allocation24_spill] sm:$0xff] %v12002_v10  ;;  %15020 = vst [vmem:[#allocation25_spill] sm:$0xff] %v12008_v23  ;;  %v12014_v60 = vld [vmem:[%s13287_s2 + $0x410] sm:$0xff]  ;;  %v12020_v18 = vld [vmem:[%s13287_s2 + $0x3e8] sm:$0xff] }
 0x70f   :  { %3068 = vmatprep.subr.mxu0 %v15004_v58  ;;  %3139 = vmatprep.subr.mxu1 %v15005_v24  ;;  %15021 = vst [vmem:[#allocation26_spill] sm:$0xff] %v12014_v60  ;;  %15022 = vst [vmem:[#allocation27_spill] sm:$0xff] %v12020_v18  ;;  %v12026_v58 = vld [vmem:[%s13287_s2 + $0x3f8] sm:$0xff] }
 0x710   :  { %3069 = vmatpush2.msra.mxu0 %v15006_v57  ;;  %3140 = vmatpush2.msra.mxu1 %v15007_v5  ;;  %15023 = vst [vmem:[#allocation28_spill] sm:$0xff] %v12026_v58  ;;  %v15024_v57 = vld [vmem:[#allocation126_spill] sm:$0xff] }
 0x711   :  { %3070 = vmatprep.subr.mxu0 %v15008_v21  ;;  %3141 = vmatprep.subr.mxu1 %v15009_v14 }
 0x712   :  { %3071 = vmatpush2.msra.mxu0 %v11156_v29  ;;  %3142 = vmatpush2.msra.mxu1 %v11162_v56  ;;  %v11852_v56 = vld [vmem:[%s13287_s2 + $0x588] sm:$0xff]  ;;  %v11858_v29 = vld [vmem:[%s13287_s2 + $0x598] sm:$0xff] }
 0x713   :  { %3072 = vmatprep.subr.mxu0 %v11168_v49  ;;  %3143 = vmatprep.subr.mxu1 %v15010_v12  ;;  %v11864_v49 = vld [vmem:[%s13287_s2 + $0x580] sm:$0xff]  ;;  %v15025_v12 = vld [vmem:[#allocation132_spill] sm:$0xff] }
 0x714   :  { %3073 = vmatpush2.msra.mxu0 %v11840_v13  ;;  %3144 = vmatpush2.msra.mxu1 %v11846_v17 }
 0x715   :  { %3074 = vmatprep.subr.mxu0 %v11852_v56  ;;  %3145 = vmatprep.subr.mxu1 %v11858_v29 }
 0x716   :  { %3075 = vmatpush2.msra.mxu0 %v11864_v49  ;;  %3146 = vmatpush2.msra.mxu1 %v11870_v59 }
 0x717   :  { %3076 = vmatprep.subr.mxu0 %v11876_v63  ;;  %3147 = vmatprep.subr.mxu1 %v11882_v37 }
 0x718   :  { %3077 = vmatpush2.msra.mxu0 %v11888_v25  ;;  %3148 = vmatpush2.msra.mxu1 %v11894_v20 }
 0x719   :  { %3078 = vmatprep.subr.mxu0 %v11900_v62  ;;  %3149 = vmatprep.subr.mxu1 %v11906_v8 }
 0x71a   :  { %3079 = vmatpush2.msra.mxu0 %v11912_v48  ;;  %3150 = vmatpush2.msra.mxu1 %v11918_v42 }
 0x71b   :  { %3080 = vmatprep.subr.mxu0 %v11924_v55  ;;  %3151 = vmatprep.subr.mxu1 %v11930_v15 }
 0x71c   :  { %3081 = vmatpush2.msra.mxu0 %v11936_v11  ;;  %3152 = vmatpush2.msra.mxu1 %v11942_v6 }
 0x71d   :  { %3082 = vmatprep.subr.mxu0 %v11948_v1  ;;  %3153 = vmatprep.subr.mxu1 %v11954_v27 }
 0x71e   :  { %3083 = vmatpush2.msra.mxu0 %v11960_v44  ;;  %3154 = vmatpush2.msra.mxu1 %v11966_v4 }
 0x71f   :  { %3084 = vmatprep.subr.mxu0 %v11972_v7  ;;  %3155 = vmatprep.subr.mxu1 %v11978_v0 }
 0x720   :  { %3085 = vmatpush2.msra.mxu0 %v11984_v32  ;;  %3156 = vmatpush2.msra.mxu1 %v11990_v52 }
 0x721   :  { %3086 = vmatprep.subr.mxu0 %v11996_v54  ;;  %3157 = vmatprep.subr.mxu1 %v12002_v10 }
 0x722   :  { %3087 = vmatpush2.msra.mxu0 %v12008_v23  ;;  %3158 = vmatpush2.msra.mxu1 %v12014_v60 }
 0x723   :  { %3166 = vmatprep.subr.mxu0 %v12020_v18  ;;  %3237 = vmatprep.subr.mxu1 %v12026_v58  ;;  %v15026_v18 = vld [vmem:[#allocation133_spill] sm:$0xff] }
 0x761   :  { %v2740_v24 = vpop.f32.mrf.mxu0  ;;  %v2811_v23 = vpop.f32.mrf.mxu1 }
 0x762   :  { %v2962_v5 = vadd.f32 %v2740_v24, %v15024_v57 }
 0x763   :  { %v2742_v21 = vpop.f32.mrf.mxu0  ;;  %v2813_v10 = vpop.f32.mrf.mxu1 }
 0x764   :  { %v4049_v14 = vmul.f32 -1.442695, %v2962_v5  ;;  %v2963_v34 = vadd.f32 %v2742_v21, %v15025_v12  ;;  %v2965_v54 = vadd.f32 %v2813_v10, %v15026_v18  ;;  %v15029_v10 = vld [vmem:[#allocation169_spill] sm:$0xff] }
 0x766   :  { %4351 = vpow2.f32 %v4049_v14  ;;  %v4050_v60 = vmul.f32 -1.442695, %v2963_v34  ;;  %v15027_v34 = vld [vmem:[#allocation183_spill] sm:$0xff] }
 0x768   :  { %4353 = vpow2.f32 %v4050_v60  ;;  %v15028_v60 = vld [vmem:[#allocation167_spill] sm:$0xff] }
 0x769   :  { %4355 = vtanh.f32 %v2965_v54  ;;  %v441_v12 = vadd.f32 %v15028_v60, %v15027_v34  ;;  %v15032_v34 = vld [vmem:[#allocation127_spill] sm:$0xff] }
 0x76a   :  { %v2964_v44 = vadd.f32 %v2811_v23, %v15032_v34 }
 0x773   :  { %v4352_v52 = vpop.eup %4351 }
 0x774   :  { %v2983_v32 = vadd.f32 1.0, %v4352_v52  ;;  %v443_v52 = vadd.f32 %v15029_v10, %v7499_v61 }
 0x775   :  { %v4354_v0 = vpop.eup %4353 }
 0x776   :  { %4357 = vrcp.f32 %v2983_v32  ;;  %v2984_v58 = vadd.f32 1.0, %v4354_v0  ;;  %v4356_v7 = vpop.eup %4355 }
 0x778   :  { %4359 = vrcp.f32 %v2984_v58 }
 0x783   :  { %v4358_v24 = vpop.eup %4357 }
 0x784   :  { %v3013_v57 = vmul.f32 %v4358_v24, %v4356_v7  ;;  %v15030_v24 = vld [vmem:[#allocation168_spill] sm:$0xff] }
 0x785   :  { %v4360_v5 = vpop.eup %4359 }
 0x786   :  { %v3012_v21 = vmul.f32 %v4360_v5, %v11213_v38  ;;  %v554_v38 = vadd.f32 %v15030_v24, %v7505_v19 }
 0x788   :  { %v12033_v14 = vadd.f32 %v3013_v57, %v3012_v21  ;;  %v15031_v21 = vld [vmem:[#allocation170_spill] sm:$0xff] }
 0x789   :  { %v556_v60 = vadd.f32 %v15031_v21, %v7512_v50 }
 0x7a2   :  { %v2882_v4 = vpop.f32.mrf.mxu0  ;;  %v2953_v7 = vpop.f32.mrf.mxu1 }
 0x7a3   :  { %v2970_v18 = vadd.f32 %v2882_v4, %v441_v12  ;;  %v2972_v57 = vadd.f32 %v2953_v7, %v554_v38  ;;  %v4051_v12 = vmul.f32 -1.442695, %v2964_v44 }
 0x7a4   :  { %v2884_v54 = vpop.f32.mrf.mxu0  ;;  %v2955_v5 = vpop.f32.mrf.mxu1 }
 0x7a5   :  { %v4052_v32 = vmul.f32 -1.442695, %v2970_v18  ;;  %v2971_v0 = vadd.f32 %v2884_v54, %v443_v52  ;;  %v4054_v27 = vmul.f32 -1.442695, %v2972_v57  ;;  %v2973_v10 = vadd.f32 %v2955_v5, %v556_v60 }
 0x7a7   :  { %4361 = vpow2.f32 %v4052_v32  ;;  %v4053_v58 = vmul.f32 -1.442695, %v2971_v0 }
 0x7a9   :  { %4363 = vpow2.f32 %v4053_v58 }
 0x7aa   :  { %4365 = vpow2.f32 %v4054_v27 }
 0x7ab   :  { %4367 = vtanh.f32 %v2973_v10 }
 0x7b4   :  { %v4362_v4 = vpop.eup %4361 }
 0x7b5   :  { %v3001_v18 = vadd.f32 1.0, %v4362_v4 }
 0x7b6   :  { %v4364_v52 = vpop.eup %4363 }
 0x7b7   :  { %4369 = vrcp.f32 %v3001_v18  ;;  %v3002_v54 = vadd.f32 1.0, %v4364_v52  ;;  %v4366_v32 = vpop.eup %4365  ;;  %v15051_v18 = vld [vmem:[#allocation202_spill] sm:$0xff]  ;;  %v15052_v52 = vld [vmem:[#allocation203_spill] sm:$0xff] }
 0x7b8   :  { %4371 = vpow2.f32 %v4051_v12  ;;  %v4368_v0 = vpop.eup %4367  ;;  %v3003_v21 = vadd.f32 1.0, %v4366_v32  ;;  %v15054_v32 = vld [vmem:[#allocation205_spill] sm:$0xff] }
 0x7b9   :  { %4373 = vrcp.f32 %v3002_v54  ;;  %v15053_v54 = vld [vmem:[#allocation204_spill] sm:$0xff] }
 0x7ba   :  { %4375 = vtanh.f32 %v12033_v14 }
 0x7bb   :  { %4377 = vrcp.f32 %v3003_v21  ;;  %v15060_v21 = vld [vmem:[#allocation211_spill] sm:$0xff] }
 0x7c4   :  { %v4370_v58 = vpop.eup %4369 }
 0x7c5   :  { %v4372_v7 = vpop.eup %4371  ;;  %v3016_v24 = vmul.f32 %v4370_v58, %v4368_v0  ;;  %v15055_v0 = vld [vmem:[#allocation206_spill] sm:$0xff]  ;;  %v15056_v58 = vld [vmem:[#allocation207_spill] sm:$0xff] }
 0x7c6   :  { %v4374_v38 = vpop.eup %4373  ;;  %v2985_v34 = vadd.f32 1.0, %v4372_v7  ;;  %v15057_v7 = vld [vmem:[#allocation208_spill] sm:$0xff] }
 0x7c7   :  { %v3015_v23 = vmul.f32 %v4374_v38, %v11226_v35  ;;  %v4376_v27 = vpop.eup %4375  ;;  %v15034_v35 = vmax.f32 %v10197_v28, %v11229_v47  ;;  %v15035_v28 = vld [vmem:[#allocation108_spill] sm:$0xff]  ;;  %v15036_v47 = vld [vmem:[#allocation109_spill] sm:$0xff]  ;;  %v15059_v38 = vld [vmem:[#allocation210_spill] sm:$0xff] }
 0x7c8   :  { %v4378_v57 = vpop.eup %4377 }
 0x7c9   :  { %v12046_v44 = vadd.f32 %v3016_v24, %v3015_v23  ;;  %v15058_v24 = vld [vmem:[#allocation209_spill] sm:$0xff]  ;;  %v15061_v23 = vld [vmem:[#allocation212_spill] sm:$0xff] }
 0x7cb   :  { %4379 = vtanh.f32 %v12046_v44 }
 0x7cc   :  { %4381 = vrcp.f32 %v2985_v34  ;;  %v15062_v34 = vld [vmem:[#allocation213_spill] sm:$0xff] }
 0x7d8   :  { %v4380_v5 = vpop.eup %4379 }
 0x7d9   :  { %v4382_v60 = vpop.eup %4381  ;;  %v3021_v10 = vmul.f32 %v4380_v5, %v4378_v57  ;;  %v15064_v57 = vld [vmem:[#allocation215_spill] sm:$0xff]  ;;  %v15065_v5 = vld [vmem:[#allocation216_spill] sm:$0xff] }
 0x7da   :  { %v12049_v4 = vmul.f32 %v4382_v60, %v4376_v27  ;;  %v15063_v27 = vld [vmem:[#allocation214_spill] sm:$0xff]  ;;  %v15066_v60 = vld [vmem:[#allocation217_spill] sm:$0xff] }
 0x7db   :  { %3088 = vmatprep.mubr.f32.mxu0 %v3021_v10  ;;  %3159 = vmatprep.mubr.f32.mxu1 %v3021_v10  ;;  %v12054_v12 = vmax.f32 %v15034_v35, %v3021_v10  ;;  %v15068_v35 = vld [vmem:[#allocation219_spill] sm:$0xff] }
 0x7dc   :  { %15033 = vst [vmem:[#allocation90_spill] sm:$0xff] %v12049_v4  ;;  %3089 = vmatmul.mubr.f32.vlgmr.msra.gmra.mxu0 %v12049_v4  ;;  %3160 = vmatmul.mubr.f32.vlgmr.msra.gmra.mxu1 %v12049_v4 }
 0x7dd   :  { %3167 = vmatpush1.msra.mxu0 %v11242_v9  ;;  %3238 = vmatpush1.msra.mxu1 %v11248_v39  ;;  %v15037_v9 = vld [vmem:[#allocation175_spill] sm:$0xff]  ;;  %v15038_v39 = vld [vmem:[#allocation177_spill] sm:$0xff] }
 0x7de   :  { %3168 = vmatprep.subr.mxu0 %v11254_v46  ;;  %3230 = vmatprep.mubr.f32.mxu0 %v3021_v10  ;;  %v15039_v46 = vld [vmem:[#allocation176_spill] sm:$0xff] }
 0x7df   :  { %3239 = vmatprep.subr.mxu1 %v11261_v41  ;;  %3301 = vmatprep.mubr.f32.mxu1 %v3021_v10  ;;  %v15040_v41 = vld [vmem:[#allocation178_spill] sm:$0xff] }
 0x7e0   :  { %3169 = vmatpush1.msra.mxu0 %v11268_v43  ;;  %3240 = vmatpush1.msra.mxu1 %v11274_v45  ;;  %v15041_v43 = vld [vmem:[#allocation103_spill] sm:$0xff]  ;;  %v15042_v45 = vld [vmem:[#allocation193_spill] sm:$0xff]  ;;  %v15067_v10 = vld [vmem:[#allocation218_spill] sm:$0xff] }
 0x7e1   :  { %3170 = vmatprep.subr.mxu0 %v11280_v26  ;;  %3241 = vmatprep.subr.mxu1 %v11286_v33  ;;  %v15043_v26 = vld [vmem:[#allocation194_spill] sm:$0xff]  ;;  %v15044_v33 = vld [vmem:[#allocation195_spill] sm:$0xff] }
 0x7e2   :  { %3171 = vmatpush1.msra.mxu0 %v11292_v51  ;;  %3242 = vmatpush1.msra.mxu1 %v11298_v22  ;;  %v15045_v51 = vld [vmem:[#allocation196_spill] sm:$0xff]  ;;  %v15046_v22 = vld [vmem:[#allocation197_spill] sm:$0xff] }
 0x7e3   :  { %3172 = vmatprep.subr.mxu0 %v11304_v31  ;;  %3243 = vmatprep.subr.mxu1 %v11310_v2  ;;  %v15047_v31 = vld [vmem:[#allocation198_spill] sm:$0xff]  ;;  %v15048_v2 = vld [vmem:[#allocation199_spill] sm:$0xff] }
 0x7e4   :  { %3173 = vmatpush1.msra.mxu0 %v11316_v3  ;;  %3244 = vmatpush1.msra.mxu1 %v11322_v53  ;;  %v15049_v3 = vld [vmem:[#allocation200_spill] sm:$0xff]  ;;  %v15050_v53 = vld [vmem:[#allocation201_spill] sm:$0xff] }
 0x7e5   :  { %3174 = vmatprep.subr.mxu0 %v15035_v28  ;;  %3245 = vmatprep.subr.mxu1 %v15036_v47  ;;  %v15069_v28 = vld [vmem:[#allocation220_spill] sm:$0xff]  ;;  %v15070_v47 = vld [vmem:[#allocation221_spill] sm:$0xff] }
 0x7e6   :  { %3175 = vmatpush1.msra.mxu0 %v15037_v9  ;;  %3246 = vmatpush1.msra.mxu1 %v15038_v39  ;;  %v15071_v9 = vld [vmem:[#allocation222_spill] sm:$0xff]  ;;  %v15072_v39 = vld [vmem:[#allocation223_spill] sm:$0xff] }
 0x7e7   :  { %3176 = vmatprep.subr.mxu0 %v15039_v46  ;;  %3247 = vmatprep.subr.mxu1 %v15040_v41  ;;  %v15073_v46 = vld [vmem:[#allocation224_spill] sm:$0xff]  ;;  %v15074_v41 = vld [vmem:[#allocation225_spill] sm:$0xff] }
 0x7e8   :  { %3177 = vmatpush1.msra.mxu0 %v15041_v43  ;;  %3248 = vmatpush1.msra.mxu1 %v15042_v45  ;;  %v15075_v43 = vld [vmem:[#allocation226_spill] sm:$0xff]  ;;  %v15076_v45 = vld [vmem:[#allocation227_spill] sm:$0xff] }
 0x7e9   :  { %3178 = vmatprep.subr.mxu0 %v15043_v26  ;;  %3249 = vmatprep.subr.mxu1 %v15044_v33  ;;  %v15077_v26 = vld [vmem:[#allocation228_spill] sm:$0xff]  ;;  %v15078_v33 = vld [vmem:[#allocation3_spill] sm:$0xff] }
 0x7ea   :  { %3179 = vmatpush1.msra.mxu0 %v15045_v51  ;;  %3250 = vmatpush1.msra.mxu1 %v15046_v22  ;;  %v15079_v51 = vld [vmem:[#allocation4_spill] sm:$0xff]  ;;  %v15080_v22 = vld [vmem:[#allocation5_spill] sm:$0xff] }
 0x7eb   :  { %3180 = vmatprep.subr.mxu0 %v15047_v31  ;;  %3251 = vmatprep.subr.mxu1 %v15048_v2  ;;  %v15081_v31 = vld [vmem:[#allocation6_spill] sm:$0xff]  ;;  %v15082_v2 = vld [vmem:[#allocation7_spill] sm:$0xff] }
 0x7ec   :  { %3181 = vmatpush1.msra.mxu0 %v15049_v3  ;;  %3252 = vmatpush1.msra.mxu1 %v15050_v53  ;;  %v15083_v3 = vld [vmem:[#allocation8_spill] sm:$0xff]  ;;  %v15084_v53 = vld [vmem:[#allocation9_spill] sm:$0xff] }
 0x7ed   :  { %3182 = vmatprep.subr.mxu0 %v15051_v18  ;;  %3253 = vmatprep.subr.mxu1 %v15052_v52  ;;  %v15085_v18 = vld [vmem:[#allocation10_spill] sm:$0xff]  ;;  %v15086_v52 = vld [vmem:[#allocation11_spill] sm:$0xff] }
 0x7ee   :  { %3183 = vmatpush1.msra.mxu0 %v15053_v54  ;;  %3254 = vmatpush1.msra.mxu1 %v15054_v32  ;;  %v15087_v54 = vld [vmem:[#allocation12_spill] sm:$0xff]  ;;  %v15088_v32 = vld [vmem:[#allocation13_spill] sm:$0xff] }
 0x7ef   :  { %3184 = vmatprep.subr.mxu0 %v15055_v0  ;;  %3255 = vmatprep.subr.mxu1 %v15056_v58  ;;  %v15089_v0 = vld [vmem:[#allocation14_spill] sm:$0xff]  ;;  %v15090_v58 = vld [vmem:[#allocation15_spill] sm:$0xff] }
 0x7f0   :  { %3185 = vmatpush1.msra.mxu0 %v15057_v7  ;;  %3256 = vmatpush1.msra.mxu1 %v15058_v24  ;;  %v12135_v7 = vld [vmem:[%s13287_s2 + $0x728] sm:$0xff]  ;;  %v12141_v24 = vld [vmem:[%s13287_s2 + $0x738] sm:$0xff] }
 0x7f1   :  { %3186 = vmatprep.subr.mxu0 %v15059_v38  ;;  %3257 = vmatprep.subr.mxu1 %v15060_v21  ;;  %v12171_v38 = vld [vmem:[%s13287_s2 + $0x6e0] sm:$0xff]  ;;  %v12177_v21 = vld [vmem:[%s13287_s2 + $0x6f0] sm:$0xff] }
 0x7f2   :  { %3187 = vmatpush1.msra.mxu0 %v15061_v23  ;;  %3258 = vmatpush1.msra.mxu1 %v15062_v34  ;;  %v12183_v23 = vld [vmem:[%s13287_s2 + $0x6a8] sm:$0xff]  ;;  %v12189_v34 = vld [vmem:[%s13287_s2 + $0x6b8] sm:$0xff] }
 0x7f3   :  { %3188 = vmatprep.subr.mxu0 %v15063_v27  ;;  %3259 = vmatprep.subr.mxu1 %v15064_v57  ;;  %v12195_v27 = vld [vmem:[%s13287_s2 + $0x6a0] sm:$0xff]  ;;  %v12201_v57 = vld [vmem:[%s13287_s2 + $0x6b0] sm:$0xff] }
 0x7f4   :  { %3189 = vmatpush1.msra.mxu0 %v15065_v5  ;;  %3260 = vmatpush1.msra.mxu1 %v15066_v60  ;;  %v12207_v5 = vld [vmem:[%s13287_s2 + $0x668] sm:$0xff]  ;;  %v12213_v60 = vld [vmem:[%s13287_s2 + $0x678] sm:$0xff] }
 0x7f5   :  { %3190 = vmatprep.subr.mxu0 %v15067_v10  ;;  %3261 = vmatprep.subr.mxu1 %v15068_v35  ;;  %v12219_v10 = vld [vmem:[%s13287_s2 + $0x660] sm:$0xff]  ;;  %v12225_v35 = vld [vmem:[%s13287_s2 + $0x670] sm:$0xff] }
 0x7f6   :  { %3191 = vmatpush1.msra.mxu0 %v15069_v28  ;;  %3262 = vmatpush1.msra.mxu1 %v15070_v47  ;;  %v12231_v28 = vld [vmem:[%s13287_s2 + $0x628] sm:$0xff]  ;;  %v12237_v47 = vld [vmem:[%s13287_s2 + $0x638] sm:$0xff] }
 0x7f7   :  { %3192 = vmatprep.subr.mxu0 %v15071_v9  ;;  %3263 = vmatprep.subr.mxu1 %v15072_v39  ;;  %v12243_v9 = vld [vmem:[%s13287_s2 + $0x620] sm:$0xff]  ;;  %v12249_v39 = vld [vmem:[%s13287_s2 + $0x630] sm:$0xff] }
 0x7f8   :  { %3193 = vmatpush1.msra.mxu0 %v15073_v46  ;;  %3264 = vmatpush1.msra.mxu1 %v15074_v41  ;;  %v12255_v46 = vld [vmem:[%s13287_s2 + $0x5e8] sm:$0xff]  ;;  %v12261_v41 = vld [vmem:[%s13287_s2 + $0x5f8] sm:$0xff] }
 0x7f9   :  { %3194 = vmatprep.subr.mxu0 %v15075_v43  ;;  %3265 = vmatprep.subr.mxu1 %v15076_v45  ;;  %v12267_v43 = vld [vmem:[%s13287_s2 + $0x5e0] sm:$0xff]  ;;  %v12273_v45 = vld [vmem:[%s13287_s2 + $0x5f0] sm:$0xff] }
 0x7fa   :  { %3195 = vmatpush1.msra.mxu0 %v15077_v26  ;;  %3266 = vmatpush1.msra.mxu1 %v15078_v33  ;;  %v12279_v26 = vld [vmem:[%s13287_s2 + $0x5a8] sm:$0xff]  ;;  %v12285_v33 = vld [vmem:[%s13287_s2 + $0x5b8] sm:$0xff] }
 0x7fb   :  { %3196 = vmatprep.subr.mxu0 %v15079_v51  ;;  %3267 = vmatprep.subr.mxu1 %v15080_v22  ;;  %v12291_v51 = vld [vmem:[%s13287_s2 + $0x5a0] sm:$0xff]  ;;  %v12297_v22 = vld [vmem:[%s13287_s2 + $0x5b0] sm:$0xff] }
 0x7fc   :  { %3197 = vmatpush1.msra.mxu0 %v15081_v31  ;;  %3268 = vmatpush1.msra.mxu1 %v15082_v2  ;;  %v12303_v31 = vld [vmem:[%s13287_s2 + $0x568] sm:$0xff]  ;;  %v12309_v2 = vld [vmem:[%s13287_s2 + $0x578] sm:$0xff] }
 0x7fd   :  { %3198 = vmatprep.subr.mxu0 %v15083_v3  ;;  %3269 = vmatprep.subr.mxu1 %v15084_v53  ;;  %v12315_v3 = vld [vmem:[%s13287_s2 + $0x560] sm:$0xff]  ;;  %v12321_v53 = vld [vmem:[%s13287_s2 + $0x570] sm:$0xff] }
 0x7fe   :  { %3199 = vmatpush2.msra.mxu0 %v15085_v18  ;;  %3270 = vmatpush2.msra.mxu1 %v15086_v52  ;;  %v12327_v18 = vld [vmem:[%s13287_s2 + $0x528] sm:$0xff]  ;;  %v12333_v52 = vld [vmem:[%s13287_s2 + $0x538] sm:$0xff] }
 0x7ff   :  { %3200 = vmatprep.subr.mxu0 %v15087_v54  ;;  %3271 = vmatprep.subr.mxu1 %v15088_v32  ;;  %v12339_v54 = vld [vmem:[%s13287_s2 + $0x520] sm:$0xff]  ;;  %v12345_v32 = vld [vmem:[%s13287_s2 + $0x530] sm:$0xff] }
 0x800   :  { %3201 = vmatpush2.msra.mxu0 %v15089_v0  ;;  %3272 = vmatpush2.msra.mxu1 %v15090_v58  ;;  %15091 = vst [vmem:[#allocation96_spill] sm:$0xff] %v12339_v54  ;;  %15092 = vst [vmem:[#allocation97_spill] sm:$0xff] %v12345_v32  ;;  %v12351_v0 = vld [vmem:[%s13287_s2 + $0x4e8] sm:$0xff]  ;;  %v12357_v58 = vld [vmem:[%s13287_s2 + $0x4f8] sm:$0xff] }
 0x801   :  { %3202 = vmatprep.subr.mxu0 %v11664_v30  ;;  %3273 = vmatprep.subr.mxu1 %v11670_v40  ;;  %v12147_v30 = vld [vmem:[%s13287_s2 + $0x720] sm:$0xff]  ;;  %v12159_v40 = vld [vmem:[%s13287_s2 + $0x6e8] sm:$0xff]  ;;  %15093 = vst [vmem:[#allocation179_spill] sm:$0xff] %v12351_v0  ;;  %15094 = vst [vmem:[#allocation180_spill] sm:$0xff] %v12357_v58 }
 0x802   :  { %3203 = vmatpush2.msra.mxu0 %v11676_v36  ;;  %3274 = vmatpush2.msra.mxu1 %v11682_v16  ;;  %v12153_v16 = vld [vmem:[%s13287_s2 + $0x730] sm:$0xff]  ;;  %v12165_v36 = vld [vmem:[%s13287_s2 + $0x6f8] sm:$0xff] }
 0x803   :  { %3204 = vmatprep.subr.mxu0 %v12135_v7  ;;  %3275 = vmatprep.subr.mxu1 %v12141_v24 }
 0x804   :  { %3205 = vmatpush2.msra.mxu0 %v12147_v30  ;;  %3276 = vmatpush2.msra.mxu1 %v12153_v16 }
 0x805   :  { %3206 = vmatprep.subr.mxu0 %v12159_v40  ;;  %3277 = vmatprep.subr.mxu1 %v12165_v36 }
 0x806   :  { %3207 = vmatpush2.msra.mxu0 %v12171_v38  ;;  %3278 = vmatpush2.msra.mxu1 %v12177_v21 }
 0x807   :  { %3208 = vmatprep.subr.mxu0 %v12183_v23  ;;  %3279 = vmatprep.subr.mxu1 %v12189_v34 }
 0x808   :  { %3209 = vmatpush2.msra.mxu0 %v12195_v27  ;;  %3280 = vmatpush2.msra.mxu1 %v12201_v57 }
 0x809   :  { %3210 = vmatprep.subr.mxu0 %v12207_v5  ;;  %3281 = vmatprep.subr.mxu1 %v12213_v60 }
 0x80a   :  { %3211 = vmatpush2.msra.mxu0 %v12219_v10  ;;  %3282 = vmatpush2.msra.mxu1 %v12225_v35 }
 0x80b   :  { %3212 = vmatprep.subr.mxu0 %v12231_v28  ;;  %3283 = vmatprep.subr.mxu1 %v12237_v47 }
 0x80c   :  { %3213 = vmatpush2.msra.mxu0 %v12243_v9  ;;  %3284 = vmatpush2.msra.mxu1 %v12249_v39 }
 0x80d   :  { %3214 = vmatprep.subr.mxu0 %v12255_v46  ;;  %3285 = vmatprep.subr.mxu1 %v12261_v41 }
 0x80e   :  { %3215 = vmatpush2.msra.mxu0 %v12267_v43  ;;  %3286 = vmatpush2.msra.mxu1 %v12273_v45 }
 0x80f   :  { %3216 = vmatprep.subr.mxu0 %v12279_v26  ;;  %3287 = vmatprep.subr.mxu1 %v12285_v33 }
 0x810   :  { %3217 = vmatpush2.msra.mxu0 %v12291_v51  ;;  %3288 = vmatpush2.msra.mxu1 %v12297_v22 }
 0x811   :  { %3218 = vmatprep.subr.mxu0 %v12303_v31  ;;  %3289 = vmatprep.subr.mxu1 %v12309_v2 }
 0x812   :  { %3219 = vmatpush2.msra.mxu0 %v12315_v3  ;;  %3290 = vmatpush2.msra.mxu1 %v12321_v53 }
 0x813   :  { %3220 = vmatprep.subr.mxu0 %v12327_v18  ;;  %3291 = vmatprep.subr.mxu1 %v12333_v52 }
 0x814   :  { %3221 = vmatpush2.msra.mxu0 %v12339_v54  ;;  %3292 = vmatpush2.msra.mxu1 %v12345_v32  ;;  %v12363_v54 = vld [vmem:[%s13287_s2 + $0x4e0] sm:$0xff]  ;;  %v12369_v32 = vld [vmem:[%s13287_s2 + $0x4f0] sm:$0xff] }
 0x815   :  { %3222 = vmatprep.subr.mxu0 %v12351_v0  ;;  %3293 = vmatprep.subr.mxu1 %v12357_v58  ;;  %15095 = vst [vmem:[#allocation181_spill] sm:$0xff] %v12363_v54  ;;  %15096 = vst [vmem:[#allocation182_spill] sm:$0xff] %v12369_v32  ;;  %v12375_v0 = vld [vmem:[%s13287_s2 + $0x4a8] sm:$0xff]  ;;  %v12381_v58 = vld [vmem:[%s13287_s2 + $0x4b8] sm:$0xff] }
 0x816   :  { %3223 = vmatpush2.msra.mxu0 %v12363_v54  ;;  %3294 = vmatpush2.msra.mxu1 %v12369_v32  ;;  %15097 = vst [vmem:[#allocation114_spill] sm:$0xff] %v12375_v0  ;;  %15098 = vst [vmem:[#allocation120_spill] sm:$0xff] %v12381_v58  ;;  %v12387_v54 = vld [vmem:[%s13287_s2 + $0x4a0] sm:$0xff]  ;;  %v12393_v32 = vld [vmem:[%s13287_s2 + $0x4b0] sm:$0xff] }
 0x817   :  { %3224 = vmatprep.subr.mxu0 %v12375_v0  ;;  %3295 = vmatprep.subr.mxu1 %v12381_v58  ;;  %15099 = vst [vmem:[#allocation121_spill] sm:$0xff] %v12387_v54  ;;  %15100 = vst [vmem:[#allocation171_spill] sm:$0xff] %v12393_v32  ;;  %v12399_v0 = vld [vmem:[%s13287_s2 + $0x468] sm:$0xff]  ;;  %v12405_v58 = vld [vmem:[%s13287_s2 + $0x478] sm:$0xff] }
 0x818   :  { %3225 = vmatpush2.msra.mxu0 %v12387_v54  ;;  %3296 = vmatpush2.msra.mxu1 %v12393_v32  ;;  %15101 = vst [vmem:[#allocation173_spill] sm:$0xff] %v12399_v0  ;;  %15102 = vst [vmem:[#allocation172_spill] sm:$0xff] %v12405_v58  ;;  %v12411_v54 = vld [vmem:[%s13287_s2 + $0x460] sm:$0xff]  ;;  %v12417_v32 = vld [vmem:[%s13287_s2 + $0x470] sm:$0xff] }
 0x819   :  { %3226 = vmatprep.subr.mxu0 %v12399_v0  ;;  %3297 = vmatprep.subr.mxu1 %v12405_v58  ;;  %15103 = vst [vmem:[#allocation174_spill] sm:$0xff] %v12411_v54  ;;  %15104 = vst [vmem:[#allocation115_spill] sm:$0xff] %v12417_v32  ;;  %v12423_v0 = vld [vmem:[%s13287_s2 + $0x428] sm:$0xff]  ;;  %v12429_v58 = vld [vmem:[%s13287_s2 + $0x438] sm:$0xff] }
 0x81a   :  { %3227 = vmatpush2.msra.mxu0 %v12411_v54  ;;  %3298 = vmatpush2.msra.mxu1 %v12417_v32  ;;  %15105 = vst [vmem:[#allocation30_spill] sm:$0xff] %v12423_v0  ;;  %15106 = vst [vmem:[#allocation31_spill] sm:$0xff] %v12429_v58  ;;  %v12435_v54 = vld [vmem:[%s13287_s2 + $0x420] sm:$0xff]  ;;  %v12441_v32 = vld [vmem:[%s13287_s2 + $0x430] sm:$0xff] }
 0x81b   :  { %3228 = vmatprep.subr.mxu0 %v12423_v0  ;;  %3299 = vmatprep.subr.mxu1 %v12429_v58  ;;  %15107 = vst [vmem:[#allocation32_spill] sm:$0xff] %v12435_v54  ;;  %15108 = vst [vmem:[#allocation33_spill] sm:$0xff] %v12441_v32  ;;  %v5215_v58 = vld [vmem:[%s13287_s2 + $0x3c8] sm:$0xff]  ;;  %v5217_v0 = vld [vmem:[%s13287_s2 + $0x3c0] sm:$0xff] }
 0x81c   :  { %3229 = vmatpush2.msra.mxu0 %v12435_v54  ;;  %3300 = vmatpush2.msra.mxu1 %v12441_v32  ;;  %v5216_v54 = vld [vmem:[%s13287_s2 + $0x3d8] sm:$0xff]  ;;  %v5218_v32 = vld [vmem:[%s13287_s2 + $0x3d0] sm:$0xff] }
 0x81d   :  { %3231 = vmatmul.mubr.f32.vlgmr.msra.gmra.mxu0 %v12049_v4  ;;  %3302 = vmatmul.mubr.f32.vlgmr.msra.gmra.mxu1 %v12049_v4  ;;  %v5219_v4 = vld [vmem:[%s13287_s2 + $0x388] sm:$0xff] }
 0x81e   :  { %3374 = vmatprep.subr.mxu0 %v5215_v58  ;;  %3445 = vmatprep.subr.mxu1 %v5216_v54  ;;  %v5220_v58 = vld [vmem:[%s13287_s2 + $0x398] sm:$0xff]  ;;  %v5221_v54 = vld [vmem:[%s13287_s2 + $0x380] sm:$0xff] }
 0x81f   :  { %3375 = vmatpush1.msra.mxu0 %v5217_v0  ;;  %3446 = vmatpush1.msra.mxu1 %v5218_v32  ;;  %v5222_v0 = vld [vmem:[%s13287_s2 + $0x390] sm:$0xff]  ;;  %v5223_v32 = vld [vmem:[%s13287_s2 + $0x348] sm:$0xff] }
 0x820   :  { %3376 = vmatprep.subr.mxu0 %v5219_v4  ;;  %3447 = vmatprep.subr.mxu1 %v5220_v58  ;;  %v5224_v4 = vld [vmem:[%s13287_s2 + $0x358] sm:$0xff]  ;;  %v5225_v58 = vld [vmem:[%s13287_s2 + $0x340] sm:$0xff] }
 0x821   :  { %3377 = vmatpush1.msra.mxu0 %v5221_v54  ;;  %3448 = vmatpush1.msra.mxu1 %v5222_v0  ;;  %v5226_v54 = vld [vmem:[%s13287_s2 + $0x350] sm:$0xff]  ;;  %v5227_v0 = vld [vmem:[%s13287_s2 + $0x308] sm:$0xff] }
 0x822   :  { %3378 = vmatprep.subr.mxu0 %v5223_v32  ;;  %3449 = vmatprep.subr.mxu1 %v5224_v4  ;;  %v5228_v32 = vld [vmem:[%s13287_s2 + $0x318] sm:$0xff]  ;;  %v5229_v4 = vld [vmem:[%s13287_s2 + $0x300] sm:$0xff] }
 0x823   :  { %3379 = vmatpush1.msra.mxu0 %v5225_v58  ;;  %3450 = vmatpush1.msra.mxu1 %v5226_v54  ;;  %v5230_v58 = vld [vmem:[%s13287_s2 + $0x310] sm:$0xff]  ;;  %v5231_v54 = vld [vmem:[%s13287_s2 + $0x2c8] sm:$0xff] }
 0x824   :  { %3380 = vmatprep.subr.mxu0 %v5227_v0  ;;  %3451 = vmatprep.subr.mxu1 %v5228_v32  ;;  %v5232_v0 = vld [vmem:[%s13287_s2 + $0x2d8] sm:$0xff]  ;;  %v5233_v32 = vld [vmem:[%s13287_s2 + $0x2c0] sm:$0xff] }
 0x825   :  { %3381 = vmatpush1.msra.mxu0 %v5229_v4  ;;  %3452 = vmatpush1.msra.mxu1 %v5230_v58  ;;  %v5234_v4 = vld [vmem:[%s13287_s2 + $0x2d0] sm:$0xff]  ;;  %v5235_v58 = vld [vmem:[%s13287_s2 + $0x288] sm:$0xff] }
 0x826   :  { %3382 = vmatprep.subr.mxu0 %v5231_v54  ;;  %3453 = vmatprep.subr.mxu1 %v5232_v0  ;;  %v5236_v54 = vld [vmem:[%s13287_s2 + $0x298] sm:$0xff]  ;;  %v5237_v0 = vld [vmem:[%s13287_s2 + $0x280] sm:$0xff] }
 0x827   :  { %3383 = vmatpush1.msra.mxu0 %v5233_v32  ;;  %3454 = vmatpush1.msra.mxu1 %v5234_v4  ;;  %v5238_v32 = vld [vmem:[%s13287_s2 + $0x290] sm:$0xff]  ;;  %v5239_v4 = vld [vmem:[%s13287_s2 + $0x248] sm:$0xff] }
 0x828   :  { %3384 = vmatprep.subr.mxu0 %v5235_v58  ;;  %3455 = vmatprep.subr.mxu1 %v5236_v54  ;;  %v5240_v58 = vld [vmem:[%s13287_s2 + $0x258] sm:$0xff]  ;;  %v5241_v54 = vld [vmem:[%s13287_s2 + $0x240] sm:$0xff] }
 0x829   :  { %3385 = vmatpush1.msra.mxu0 %v5237_v0  ;;  %3456 = vmatpush1.msra.mxu1 %v5238_v32  ;;  %v5242_v0 = vld [vmem:[%s13287_s2 + $0x250] sm:$0xff]  ;;  %v5243_v32 = vld [vmem:[%s13287_s2 + $0x208] sm:$0xff] }
 0x82a   :  { %3386 = vmatprep.subr.mxu0 %v5239_v4  ;;  %3457 = vmatprep.subr.mxu1 %v5240_v58  ;;  %v5244_v4 = vld [vmem:[%s13287_s2 + $0x218] sm:$0xff]  ;;  %v5245_v58 = vld [vmem:[%s13287_s2 + $0x200] sm:$0xff] }
 0x82b   :  { %3387 = vmatpush1.msra.mxu0 %v5241_v54  ;;  %3458 = vmatpush1.msra.mxu1 %v5242_v0  ;;  %v5246_v54 = vld [vmem:[%s13287_s2 + $0x210] sm:$0xff]  ;;  %v5247_v0 = vld [vmem:[%s13287_s2 + $0x1c8] sm:$0xff] }
 0x82c   :  { %3388 = vmatprep.subr.mxu0 %v5243_v32  ;;  %3459 = vmatprep.subr.mxu1 %v5244_v4  ;;  %v5248_v32 = vld [vmem:[%s13287_s2 + $0x1d8] sm:$0xff]  ;;  %v5249_v4 = vld [vmem:[%s13287_s2 + $0x1c0] sm:$0xff] }
 0x82d   :  { %3389 = vmatpush1.msra.mxu0 %v5245_v58  ;;  %3460 = vmatpush1.msra.mxu1 %v5246_v54  ;;  %v5250_v58 = vld [vmem:[%s13287_s2 + $0x1d0] sm:$0xff]  ;;  %v5251_v54 = vld [vmem:[%s13287_s2 + $0x188] sm:$0xff] }
 0x82e   :  { %3390 = vmatprep.subr.mxu0 %v5247_v0  ;;  %3461 = vmatprep.subr.mxu1 %v5248_v32  ;;  %v5252_v0 = vld [vmem:[%s13287_s2 + $0x198] sm:$0xff]  ;;  %v5253_v32 = vld [vmem:[%s13287_s2 + $0x180] sm:$0xff] }
 0x82f   :  { %3391 = vmatpush1.msra.mxu0 %v5249_v4  ;;  %3462 = vmatpush1.msra.mxu1 %v5250_v58  ;;  %v5254_v4 = vld [vmem:[%s13287_s2 + $0x190] sm:$0xff]  ;;  %v5255_v58 = vld [vmem:[%s13287_s2 + $0x148] sm:$0xff] }
 0x830   :  { %3392 = vmatprep.subr.mxu0 %v5251_v54  ;;  %3463 = vmatprep.subr.mxu1 %v5252_v0  ;;  %v5256_v54 = vld [vmem:[%s13287_s2 + $0x158] sm:$0xff]  ;;  %v5257_v0 = vld [vmem:[%s13287_s2 + $0x140] sm:$0xff] }
 0x831   :  { %3393 = vmatpush1.msra.mxu0 %v5253_v32  ;;  %3464 = vmatpush1.msra.mxu1 %v5254_v4  ;;  %v5258_v32 = vld [vmem:[%s13287_s2 + $0x150] sm:$0xff]  ;;  %v5259_v4 = vld [vmem:[%s13287_s2 + $0x108] sm:$0xff] }
 0x832   :  { %3394 = vmatprep.subr.mxu0 %v5255_v58  ;;  %3465 = vmatprep.subr.mxu1 %v5256_v54  ;;  %v5260_v58 = vld [vmem:[%s13287_s2 + $0x118] sm:$0xff]  ;;  %v5261_v54 = vld [vmem:[%s13287_s2 + $0x100] sm:$0xff] }
 0x833   :  { %3395 = vmatpush1.msra.mxu0 %v5257_v0  ;;  %3466 = vmatpush1.msra.mxu1 %v5258_v32  ;;  %v5262_v0 = vld [vmem:[%s13287_s2 + $0x110] sm:$0xff]  ;;  %v5263_v32 = vld [vmem:[%s13287_s2 + $0xc8] sm:$0xff] }
 0x834   :  { %3396 = vmatprep.subr.mxu0 %v5259_v4  ;;  %3467 = vmatprep.subr.mxu1 %v5260_v58  ;;  %v5264_v4 = vld [vmem:[%s13287_s2 + $0xd8] sm:$0xff]  ;;  %v5265_v58 = vld [vmem:[%s13287_s2 + $0xc0] sm:$0xff] }
 0x835   :  { %3397 = vmatpush1.msra.mxu0 %v5261_v54  ;;  %3468 = vmatpush1.msra.mxu1 %v5262_v0  ;;  %v5266_v54 = vld [vmem:[%s13287_s2 + $0xd0] sm:$0xff]  ;;  %v5267_v0 = vld [vmem:[%s13287_s2 + $0x88] sm:$0xff] }
 0x836   :  { %3398 = vmatprep.subr.mxu0 %v5263_v32  ;;  %3469 = vmatprep.subr.mxu1 %v5264_v4  ;;  %v5268_v32 = vld [vmem:[%s13287_s2 + $0x98] sm:$0xff]  ;;  %v5269_v4 = vld [vmem:[%s13287_s2 + $0x80] sm:$0xff] }
 0x837   :  { %3399 = vmatpush1.msra.mxu0 %v5265_v58  ;;  %3470 = vmatpush1.msra.mxu1 %v5266_v54  ;;  %v5270_v58 = vld [vmem:[%s13287_s2 + $0x90] sm:$0xff]  ;;  %v5271_v54 = vld [vmem:[%s13287_s2 + $0x48] sm:$0xff] }
 0x838   :  { %3400 = vmatprep.subr.mxu0 %v5267_v0  ;;  %3471 = vmatprep.subr.mxu1 %v5268_v32  ;;  %v5272_v0 = vld [vmem:[%s13287_s2 + $0x58] sm:$0xff]  ;;  %v5273_v32 = vld [vmem:[%s13287_s2 + $0x40] sm:$0xff] }
 0x839   :  { %3401 = vmatpush1.msra.mxu0 %v5269_v4  ;;  %3472 = vmatpush1.msra.mxu1 %v5270_v58  ;;  %v5274_v4 = vld [vmem:[%s13287_s2 + $0x50] sm:$0xff]  ;;  %v5275_v58 = vld [vmem:[%s13287_s2 + $0x8] sm:$0xff] }
 0x83a   :  { %3402 = vmatprep.subr.mxu0 %v5271_v54  ;;  %3473 = vmatprep.subr.mxu1 %v5272_v0  ;;  %v5276_v54 = vld [vmem:[%s13287_s2 + $0x18] sm:$0xff]  ;;  %v5277_v0 = vld [vmem:[%s13287_s2] sm:$0xff] }
 0x83b   :  { %3403 = vmatpush1.msra.mxu0 %v5273_v32  ;;  %3474 = vmatpush1.msra.mxu1 %v5274_v4  ;;  %v5278_v32 = vld [vmem:[%s13287_s2 + $0x10] sm:$0xff]  ;;  %v5279_v4 = vld [vmem:[%s13287_s2 + $0x7c8] sm:$0xff] }
 0x83c   :  { %3404 = vmatprep.subr.mxu0 %v5275_v58  ;;  %3475 = vmatprep.subr.mxu1 %v5276_v54  ;;  %v5280_v58 = vld [vmem:[%s13287_s2 + $0x7d8] sm:$0xff]  ;;  %v5281_v54 = vld [vmem:[%s13287_s2 + $0x7c0] sm:$0xff] }
 0x83d   :  { %3405 = vmatpush1.msra.mxu0 %v5277_v0  ;;  %3476 = vmatpush1.msra.mxu1 %v5278_v32  ;;  %v5282_v0 = vld [vmem:[%s13287_s2 + $0x7d0] sm:$0xff]  ;;  %v5283_v32 = vld [vmem:[%s13287_s2 + $0x788] sm:$0xff] }
 0x83e   :  { %3406 = vmatprep.subr.mxu0 %v5279_v4  ;;  %3477 = vmatprep.subr.mxu1 %v5280_v58  ;;  %v5284_v4 = vld [vmem:[%s13287_s2 + $0x798] sm:$0xff]  ;;  %v5285_v58 = vld [vmem:[%s13287_s2 + $0x780] sm:$0xff] }
 0x83f   :  { %3407 = vmatpush2.msra.mxu0 %v5281_v54  ;;  %3478 = vmatpush2.msra.mxu1 %v5282_v0  ;;  %v5286_v54 = vld [vmem:[%s13287_s2 + $0x790] sm:$0xff]  ;;  %v5287_v0 = vld [vmem:[%s13287_s2 + $0x748] sm:$0xff] }
 0x840   :  { %3408 = vmatprep.subr.mxu0 %v5283_v32  ;;  %3479 = vmatprep.subr.mxu1 %v5284_v4  ;;  %v5288_v32 = vld [vmem:[%s13287_s2 + $0x758] sm:$0xff]  ;;  %v5289_v4 = vld [vmem:[%s13287_s2 + $0x740] sm:$0xff] }
 0x841   :  { %3409 = vmatpush2.msra.mxu0 %v5285_v58  ;;  %3480 = vmatpush2.msra.mxu1 %v5286_v54  ;;  %v5290_v58 = vld [vmem:[%s13287_s2 + $0x750] sm:$0xff]  ;;  %v5291_v54 = vld [vmem:[%s13287_s2 + $0x708] sm:$0xff] }
 0x842   :  { %3410 = vmatprep.subr.mxu0 %v5287_v0  ;;  %3481 = vmatprep.subr.mxu1 %v5288_v32  ;;  %v5292_v0 = vld [vmem:[%s13287_s2 + $0x718] sm:$0xff]  ;;  %v5293_v32 = vld [vmem:[%s13287_s2 + $0x700] sm:$0xff] }
 0x843   :  { %3411 = vmatpush2.msra.mxu0 %v5289_v4  ;;  %3482 = vmatpush2.msra.mxu1 %v5290_v58  ;;  %v5294_v4 = vld [vmem:[%s13287_s2 + $0x710] sm:$0xff]  ;;  %v5295_v58 = vld [vmem:[%s13287_s2 + $0x6c8] sm:$0xff] }
 0x844   :  { %3412 = vmatprep.subr.mxu0 %v5291_v54  ;;  %3483 = vmatprep.subr.mxu1 %v5292_v0  ;;  %v5296_v54 = vld [vmem:[%s13287_s2 + $0x6d8] sm:$0xff]  ;;  %v5297_v0 = vld [vmem:[%s13287_s2 + $0x6c0] sm:$0xff] }
 0x845   :  { %3413 = vmatpush2.msra.mxu0 %v5293_v32  ;;  %3484 = vmatpush2.msra.mxu1 %v5294_v4  ;;  %v5298_v32 = vld [vmem:[%s13287_s2 + $0x6d0] sm:$0xff]  ;;  %v5299_v4 = vld [vmem:[%s13287_s2 + $0x688] sm:$0xff] }
 0x846   :  { %3414 = vmatprep.subr.mxu0 %v5295_v58  ;;  %3485 = vmatprep.subr.mxu1 %v5296_v54  ;;  %v5300_v58 = vld [vmem:[%s13287_s2 + $0x698] sm:$0xff]  ;;  %v5301_v54 = vld [vmem:[%s13287_s2 + $0x680] sm:$0xff] }
 0x847   :  { %3415 = vmatpush2.msra.mxu0 %v5297_v0  ;;  %3486 = vmatpush2.msra.mxu1 %v5298_v32  ;;  %v5302_v0 = vld [vmem:[%s13287_s2 + $0x690] sm:$0xff]  ;;  %v5303_v32 = vld [vmem:[%s13287_s2 + $0x648] sm:$0xff] }
 0x848   :  { %3416 = vmatprep.subr.mxu0 %v5299_v4  ;;  %3487 = vmatprep.subr.mxu1 %v5300_v58  ;;  %v5304_v4 = vld [vmem:[%s13287_s2 + $0x658] sm:$0xff]  ;;  %v5305_v58 = vld [vmem:[%s13287_s2 + $0x640] sm:$0xff] }
 0x849   :  { %3417 = vmatpush2.msra.mxu0 %v5301_v54  ;;  %3488 = vmatpush2.msra.mxu1 %v5302_v0  ;;  %v5306_v54 = vld [vmem:[%s13287_s2 + $0x650] sm:$0xff]  ;;  %v5307_v0 = vld [vmem:[%s13287_s2 + $0x608] sm:$0xff] }
 0x84a   :  { %3418 = vmatprep.subr.mxu0 %v5303_v32  ;;  %3489 = vmatprep.subr.mxu1 %v5304_v4  ;;  %v5308_v32 = vld [vmem:[%s13287_s2 + $0x618] sm:$0xff]  ;;  %v5309_v4 = vld [vmem:[%s13287_s2 + $0x600] sm:$0xff] }
 0x84b   :  { %3419 = vmatpush2.msra.mxu0 %v5305_v58  ;;  %3490 = vmatpush2.msra.mxu1 %v5306_v54  ;;  %v5310_v58 = vld [vmem:[%s13287_s2 + $0x610] sm:$0xff]  ;;  %v5311_v54 = vld [vmem:[%s13287_s2 + $0x5c8] sm:$0xff] }
 0x84c   :  { %3420 = vmatprep.subr.mxu0 %v5307_v0  ;;  %3491 = vmatprep.subr.mxu1 %v5308_v32  ;;  %v5312_v0 = vld [vmem:[%s13287_s2 + $0x5d8] sm:$0xff] }
 0x84d   :  { %3421 = vmatpush2.msra.mxu0 %v5309_v4  ;;  %3492 = vmatpush2.msra.mxu1 %v5310_v58 }
 0x84e   :  { %3422 = vmatprep.subr.mxu0 %v5311_v54  ;;  %3493 = vmatprep.subr.mxu1 %v5312_v0  ;;  %v15124_v0 = vld [vmem:[#allocation145_spill] sm:$0xff] }
 0x84f   :  { %3423 = vmatpush2.msra.mxu0 %v11840_v13  ;;  %3494 = vmatpush2.msra.mxu1 %v11846_v17  ;;  %v15109_v13 = vld [vmem:[#allocation16_spill] sm:$0xff]  ;;  %v15110_v17 = vld [vmem:[#allocation17_spill] sm:$0xff] }
 0x850   :  { %3424 = vmatprep.subr.mxu0 %v11852_v56  ;;  %3495 = vmatprep.subr.mxu1 %v11858_v29  ;;  %v15111_v56 = vld [vmem:[#allocation18_spill] sm:$0xff]  ;;  %v15112_v29 = vld [vmem:[#allocation19_spill] sm:$0xff] }
 0x851   :  { %3425 = vmatpush2.msra.mxu0 %v11864_v49  ;;  %3496 = vmatpush2.msra.mxu1 %v11870_v59  ;;  %v15113_v49 = vld [vmem:[#allocation20_spill] sm:$0xff]  ;;  %v15114_v59 = vld [vmem:[#allocation21_spill] sm:$0xff] }
 0x852   :  { %3426 = vmatprep.subr.mxu0 %v11876_v63  ;;  %3497 = vmatprep.subr.mxu1 %v11882_v37  ;;  %v15115_v63 = vld [vmem:[#allocation22_spill] sm:$0xff]  ;;  %v15116_v37 = vld [vmem:[#allocation23_spill] sm:$0xff] }
 0x853   :  { %3427 = vmatpush2.msra.mxu0 %v11888_v25  ;;  %3498 = vmatpush2.msra.mxu1 %v11894_v20  ;;  %v15117_v25 = vld [vmem:[#allocation24_spill] sm:$0xff]  ;;  %v15118_v20 = vld [vmem:[#allocation25_spill] sm:$0xff] }
 0x854   :  { %3428 = vmatprep.subr.mxu0 %v11900_v62  ;;  %3499 = vmatprep.subr.mxu1 %v11906_v8  ;;  %v15119_v62 = vld [vmem:[#allocation26_spill] sm:$0xff]  ;;  %v15120_v8 = vld [vmem:[#allocation27_spill] sm:$0xff] }
 0x855   :  { %3429 = vmatpush2.msra.mxu0 %v11912_v48  ;;  %3500 = vmatpush2.msra.mxu1 %v11918_v42  ;;  %v15121_v48 = vld [vmem:[#allocation28_spill] sm:$0xff] }
 0x856   :  { %3430 = vmatprep.subr.mxu0 %v11924_v55  ;;  %3501 = vmatprep.subr.mxu1 %v11930_v15  ;;  %v15122_v55 = vld [vmem:[#allocation138_spill] sm:$0xff] }
 0x857   :  { %3431 = vmatpush2.msra.mxu0 %v11936_v11  ;;  %3502 = vmatpush2.msra.mxu1 %v11942_v6 }
 0x858   :  { %3432 = vmatprep.subr.mxu0 %v11948_v1  ;;  %3503 = vmatprep.subr.mxu1 %v15109_v13  ;;  %v15123_v1 = vld [vmem:[#allocation144_spill] sm:$0xff] }
 0x859   :  { %3433 = vmatpush2.msra.mxu0 %v15110_v17  ;;  %3504 = vmatpush2.msra.mxu1 %v15111_v56 }
 0x85a   :  { %3434 = vmatprep.subr.mxu0 %v15112_v29  ;;  %3505 = vmatprep.subr.mxu1 %v15113_v49 }
 0x85b   :  { %3435 = vmatpush2.msra.mxu0 %v15114_v59  ;;  %3506 = vmatpush2.msra.mxu1 %v15115_v63 }
 0x85c   :  { %3436 = vmatprep.subr.mxu0 %v15116_v37  ;;  %3507 = vmatprep.subr.mxu1 %v15117_v25 }
 0x85d   :  { %3437 = vmatpush2.msra.mxu0 %v15118_v20  ;;  %3508 = vmatpush2.msra.mxu1 %v15119_v62 }
 0x85e   :  { %3516 = vmatprep.subr.mxu0 %v15120_v8  ;;  %3587 = vmatprep.subr.mxu1 %v15121_v48  ;;  %v15125_v8 = vld [vmem:[#allocation183_spill] sm:$0xff] }
 0x85f   :  { %v15126_v48 = vld [vmem:[#allocation163_spill] sm:$0xff] }
 0x89c   :  { %v3090_v42 = vpop.f32.mrf.mxu0  ;;  %v3161_v58 = vpop.f32.mrf.mxu1 }
 0x89d   :  { %v3312_v15 = vadd.f32 %v3090_v42, %v15122_v55  ;;  %v435_v42 = vadd.f32 %v15126_v48, %v15125_v8 }
 0x89e   :  { %v3092_v11 = vpop.f32.mrf.mxu0  ;;  %v3163_v54 = vpop.f32.mrf.mxu1 }
 0x89f   :  { %v4055_v6 = vmul.f32 -1.442695, %v3312_v15  ;;  %v3313_v32 = vadd.f32 %v3092_v11, %v15123_v1  ;;  %v3315_v13 = vadd.f32 %v3163_v54, %v15124_v0  ;;  %v15127_v15 = vld [vmem:[#allocation165_spill] sm:$0xff] }
 0x8a0   :  { %v437_v11 = vadd.f32 %v15127_v15, %v7499_v61 }
 0x8a1   :  { %4383 = vpow2.f32 %v4055_v6  ;;  %v4056_v4 = vmul.f32 -1.442695, %v3313_v32 }
 0x8a3   :  { %4385 = vpow2.f32 %v4056_v4 }
 0x8a4   :  { %4387 = vtanh.f32 %v3315_v13  ;;  %v15128_v13 = vld [vmem:[#allocation164_spill] sm:$0xff] }
 0x8ae   :  { %v4384_v17 = vpop.eup %4383 }
 0x8af   :  { %v3333_v56 = vadd.f32 1.0, %v4384_v17 }
 0x8b0   :  { %v4386_v29 = vpop.eup %4385 }
 0x8b1   :  { %4389 = vrcp.f32 %v3333_v56  ;;  %v3334_v49 = vadd.f32 1.0, %v4386_v29  ;;  %v4388_v59 = vpop.eup %4387  ;;  %v15129_v29 = vld [vmem:[#allocation166_spill] sm:$0xff] }
 0x8b3   :  { %4391 = vrcp.f32 %v3334_v49  ;;  %v550_v49 = vadd.f32 %v15129_v29, %v7512_v50 }
 0x8be   :  { %v4390_v63 = vpop.eup %4389 }
 0x8bf   :  { %v3363_v37 = vmul.f32 %v4390_v63, %v4388_v59  ;;  %v15130_v59 = vld [vmem:[#allocation139_spill] sm:$0xff] }
 0x8c0   :  { %v4392_v25 = vpop.eup %4391  ;;  %v3314_v63 = vadd.f32 %v3161_v58, %v15130_v59 }
 0x8c1   :  { %v3362_v20 = vmul.f32 %v4392_v25, %v12033_v14  ;;  %v548_v14 = vadd.f32 %v15128_v13, %v7505_v19 }
 0x8c2   :  { %v4057_v48 = vmul.f32 -1.442695, %v3314_v63 }
 0x8c3   :  { %v12776_v62 = vadd.f32 %v3363_v37, %v3362_v20 }
 0x8dd   :  { %v3232_v55 = vpop.f32.mrf.mxu0  ;;  %v3303_v0 = vpop.f32.mrf.mxu1 }
 0x8de   :  { %v3320_v6 = vadd.f32 %v3232_v55, %v435_v42  ;;  %v3322_v17 = vadd.f32 %v3303_v0, %v548_v14 }
 0x8df   :  { %v3234_v1 = vpop.f32.mrf.mxu0  ;;  %v3305_v56 = vpop.f32.mrf.mxu1 }
 0x8e0   :  { %v4058_v32 = vmul.f32 -1.442695, %v3320_v6  ;;  %v3321_v4 = vadd.f32 %v3234_v1, %v437_v11  ;;  %v4060_v37 = vmul.f32 -1.442695, %v3322_v17  ;;  %v3323_v25 = vadd.f32 %v3305_v56, %v550_v49 }
 0x8e2   :  { %4393 = vpow2.f32 %v4058_v32  ;;  %v4059_v54 = vmul.f32 -1.442695, %v3321_v4 }
 0x8e4   :  { %4395 = vpow2.f32 %v4059_v54 }
 0x8e5   :  { %4397 = vpow2.f32 %v4060_v37  ;;  %v5313_v37 = vld [vmem:[%s13287_s2 + $0x3e0] sm:$0xff] }
 0x8e6   :  { %4399 = vtanh.f32 %v3323_v25  ;;  %v5314_v25 = vld [vmem:[%s13287_s2 + $0x3f0] sm:$0xff] }
 0x8ef   :  { %v4394_v20 = vpop.eup %4393 }
 0x8f0   :  { %v3351_v42 = vadd.f32 1.0, %v4394_v20  ;;  %v5315_v20 = vld [vmem:[%s13287_s2 + $0x3a8] sm:$0xff] }
 0x8f1   :  { %v4396_v55 = vpop.eup %4395 }
 0x8f2   :  { %4401 = vrcp.f32 %v3351_v42  ;;  %v3352_v15 = vadd.f32 1.0, %v4396_v55  ;;  %v4398_v11 = vpop.eup %4397  ;;  %v5317_v42 = vld [vmem:[%s13287_s2 + $0x3a0] sm:$0xff]  ;;  %v5318_v55 = vld [vmem:[%s13287_s2 + $0x3b0] sm:$0xff] }
 0x8f3   :  { %4403 = vpow2.f32 %v4057_v48  ;;  %v4400_v6 = vpop.eup %4399  ;;  %v3353_v0 = vadd.f32 1.0, %v4398_v11  ;;  %v5316_v48 = vld [vmem:[%s13287_s2 + $0x3b8] sm:$0xff] }
 0x8f4   :  { %4405 = vrcp.f32 %v3352_v15  ;;  %v5319_v15 = vld [vmem:[%s13287_s2 + $0x368] sm:$0xff]  ;;  %v5320_v11 = vld [vmem:[%s13287_s2 + $0x378] sm:$0xff] }
 0x8f5   :  { %4407 = vtanh.f32 %v12776_v62 }
 0x8f6   :  { %4409 = vrcp.f32 %v3353_v0  ;;  %v5326_v0 = vld [vmem:[%s13287_s2 + $0x330] sm:$0xff] }
 0x8ff   :  { %v4402_v1 = vpop.eup %4401 }
 0x900   :  { %v4404_v32 = vpop.eup %4403  ;;  %v3366_v4 = vmul.f32 %v4402_v1, %v4400_v6  ;;  %v5321_v6 = vld [vmem:[%s13287_s2 + $0x360] sm:$0xff]  ;;  %v5322_v1 = vld [vmem:[%s13287_s2 + $0x370] sm:$0xff] }
 0x901   :  { %v4406_v54 = vpop.eup %4405  ;;  %v3335_v13 = vadd.f32 1.0, %v4404_v32  ;;  %v5323_v32 = vld [vmem:[%s13287_s2 + $0x328] sm:$0xff] }
 0x902   :  { %v3365_v58 = vmul.f32 %v4406_v54, %v12046_v44  ;;  %v4408_v17 = vpop.eup %4407  ;;  %v5325_v54 = vld [vmem:[%s13287_s2 + $0x320] sm:$0xff] }
 0x903   :  { %v4410_v56 = vpop.eup %4409 }
 0x904   :  { %v12789_v14 = vadd.f32 %v3366_v4, %v3365_v58  ;;  %v5324_v4 = vld [vmem:[%s13287_s2 + $0x338] sm:$0xff]  ;;  %v5327_v58 = vld [vmem:[%s13287_s2 + $0x2e8] sm:$0xff] }
 0x906   :  { %4411 = vtanh.f32 %v12789_v14 }
 0x907   :  { %4413 = vrcp.f32 %v3335_v13  ;;  %v5328_v13 = vld [vmem:[%s13287_s2 + $0x2f8] sm:$0xff] }
 0x913   :  { %v4412_v29 = vpop.eup %4411 }
 0x914   :  { %v4414_v49 = vpop.eup %4413  ;;  %v12792_v59 = vmul.f32 %v4412_v29, %v4410_v56  ;;  %v5330_v56 = vld [vmem:[%s13287_s2 + $0x2f0] sm:$0xff]  ;;  %v5331_v29 = vld [vmem:[%s13287_s2 + $0x2a8] sm:$0xff] }
 0x915   :  { %v12794_v63 = vmul.f32 %v4414_v49, %v4408_v17  ;;  %v5329_v17 = vld [vmem:[%s13287_s2 + $0x2e0] sm:$0xff]  ;;  %v5332_v49 = vld [vmem:[%s13287_s2 + $0x2b8] sm:$0xff] }
 0x916   :  { %3438 = vmatprep.mubr.f32.mxu0 %v12792_v59  ;;  %3509 = vmatprep.mubr.f32.mxu1 %v12792_v59  ;;  %v3373_v44 = vmax.f32 %v12054_v12, %v12792_v59 }
 0x917   :  { %3439 = vmatmul.mubr.f32.vlgmr.msra.gmra.mxu0 %v12794_v63  ;;  %3510 = vmatmul.mubr.f32.vlgmr.msra.gmra.mxu1 %v12794_v63 }
 0x918   :  { %3517 = vmatpush1.msra.mxu0 %v5313_v37  ;;  %3588 = vmatpush1.msra.mxu1 %v5314_v25  ;;  %v5333_v37 = vld [vmem:[%s13287_s2 + $0x2a0] sm:$0xff]  ;;  %v5334_v25 = vld [vmem:[%s13287_s2 + $0x2b0] sm:$0xff] }
 0x919   :  { %3518 = vmatprep.subr.mxu0 %v5315_v20  ;;  %3580 = vmatprep.mubr.f32.mxu0 %v12792_v59  ;;  %v5335_v20 = vld [vmem:[%s13287_s2 + $0x268] sm:$0xff] }
 0x91a   :  { %3589 = vmatprep.subr.mxu1 %v5316_v48  ;;  %3651 = vmatprep.mubr.f32.mxu1 %v12792_v59  ;;  %v5336_v48 = vld [vmem:[%s13287_s2 + $0x278] sm:$0xff] }
 0x91b   :  { %3519 = vmatpush1.msra.mxu0 %v5317_v42  ;;  %3590 = vmatpush1.msra.mxu1 %v5318_v55  ;;  %v5337_v42 = vld [vmem:[%s13287_s2 + $0x260] sm:$0xff]  ;;  %v5338_v55 = vld [vmem:[%s13287_s2 + $0x270] sm:$0xff] }
 0x91c   :  { %3520 = vmatprep.subr.mxu0 %v5319_v15  ;;  %3591 = vmatprep.subr.mxu1 %v5320_v11  ;;  %v5339_v15 = vld [vmem:[%s13287_s2 + $0x228] sm:$0xff]  ;;  %v5340_v11 = vld [vmem:[%s13287_s2 + $0x238] sm:$0xff] }
 0x91d   :  { %3521 = vmatpush1.msra.mxu0 %v5321_v6  ;;  %3592 = vmatpush1.msra.mxu1 %v5322_v1  ;;  %v5341_v6 = vld [vmem:[%s13287_s2 + $0x220] sm:$0xff]  ;;  %v5342_v1 = vld [vmem:[%s13287_s2 + $0x230] sm:$0xff] }
 0x91e   :  { %3522 = vmatprep.subr.mxu0 %v5323_v32  ;;  %3593 = vmatprep.subr.mxu1 %v5324_v4  ;;  %v5343_v32 = vld [vmem:[%s13287_s2 + $0x1e8] sm:$0xff]  ;;  %v5344_v4 = vld [vmem:[%s13287_s2 + $0x1f8] sm:$0xff] }
 0x91f   :  { %3523 = vmatpush1.msra.mxu0 %v5325_v54  ;;  %3594 = vmatpush1.msra.mxu1 %v5326_v0  ;;  %v5345_v54 = vld [vmem:[%s13287_s2 + $0x1e0] sm:$0xff]  ;;  %v5346_v0 = vld [vmem:[%s13287_s2 + $0x1f0] sm:$0xff] }
 0x920   :  { %3524 = vmatprep.subr.mxu0 %v5327_v58  ;;  %3595 = vmatprep.subr.mxu1 %v5328_v13  ;;  %v5347_v58 = vld [vmem:[%s13287_s2 + $0x1a8] sm:$0xff]  ;;  %v5348_v13 = vld [vmem:[%s13287_s2 + $0x1b8] sm:$0xff] }
 0x921   :  { %3525 = vmatpush1.msra.mxu0 %v5329_v17  ;;  %3596 = vmatpush1.msra.mxu1 %v5330_v56  ;;  %v5349_v17 = vld [vmem:[%s13287_s2 + $0x1a0] sm:$0xff]  ;;  %v5350_v56 = vld [vmem:[%s13287_s2 + $0x1b0] sm:$0xff] }
 0x922   :  { %3526 = vmatprep.subr.mxu0 %v5331_v29  ;;  %3597 = vmatprep.subr.mxu1 %v5332_v49  ;;  %v5351_v29 = vld [vmem:[%s13287_s2 + $0x168] sm:$0xff]  ;;  %v5352_v49 = vld [vmem:[%s13287_s2 + $0x178] sm:$0xff] }
 0x923   :  { %3527 = vmatpush1.msra.mxu0 %v5333_v37  ;;  %3598 = vmatpush1.msra.mxu1 %v5334_v25  ;;  %v5353_v37 = vld [vmem:[%s13287_s2 + $0x160] sm:$0xff]  ;;  %v5354_v25 = vld [vmem:[%s13287_s2 + $0x170] sm:$0xff] }
 0x924   :  { %3528 = vmatprep.subr.mxu0 %v5335_v20  ;;  %3599 = vmatprep.subr.mxu1 %v5336_v48  ;;  %v5355_v20 = vld [vmem:[%s13287_s2 + $0x128] sm:$0xff]  ;;  %v5356_v48 = vld [vmem:[%s13287_s2 + $0x138] sm:$0xff] }
 0x925   :  { %3529 = vmatpush1.msra.mxu0 %v5337_v42  ;;  %3600 = vmatpush1.msra.mxu1 %v5338_v55  ;;  %v5357_v42 = vld [vmem:[%s13287_s2 + $0x120] sm:$0xff]  ;;  %v5358_v55 = vld [vmem:[%s13287_s2 + $0x130] sm:$0xff] }
 0x926   :  { %3530 = vmatprep.subr.mxu0 %v5339_v15  ;;  %3601 = vmatprep.subr.mxu1 %v5340_v11  ;;  %v5359_v15 = vld [vmem:[%s13287_s2 + $0xe8] sm:$0xff]  ;;  %v5360_v11 = vld [vmem:[%s13287_s2 + $0xf8] sm:$0xff] }
 0x927   :  { %3531 = vmatpush1.msra.mxu0 %v5341_v6  ;;  %3602 = vmatpush1.msra.mxu1 %v5342_v1  ;;  %v5361_v6 = vld [vmem:[%s13287_s2 + $0xe0] sm:$0xff]  ;;  %v5362_v1 = vld [vmem:[%s13287_s2 + $0xf0] sm:$0xff] }
 0x928   :  { %3532 = vmatprep.subr.mxu0 %v5343_v32  ;;  %3603 = vmatprep.subr.mxu1 %v5344_v4  ;;  %v5363_v32 = vld [vmem:[%s13287_s2 + $0xa8] sm:$0xff]  ;;  %v5364_v4 = vld [vmem:[%s13287_s2 + $0xb8] sm:$0xff] }
 0x929   :  { %3533 = vmatpush1.msra.mxu0 %v5345_v54  ;;  %3604 = vmatpush1.msra.mxu1 %v5346_v0  ;;  %v5365_v54 = vld [vmem:[%s13287_s2 + $0xa0] sm:$0xff]  ;;  %v5366_v0 = vld [vmem:[%s13287_s2 + $0xb0] sm:$0xff] }
 0x92a   :  { %3534 = vmatprep.subr.mxu0 %v5347_v58  ;;  %3605 = vmatprep.subr.mxu1 %v5348_v13  ;;  %v5367_v58 = vld [vmem:[%s13287_s2 + $0x68] sm:$0xff]  ;;  %v5368_v13 = vld [vmem:[%s13287_s2 + $0x78] sm:$0xff] }
 0x92b   :  { %3535 = vmatpush1.msra.mxu0 %v5349_v17  ;;  %3606 = vmatpush1.msra.mxu1 %v5350_v56  ;;  %v5369_v17 = vld [vmem:[%s13287_s2 + $0x60] sm:$0xff]  ;;  %v5370_v56 = vld [vmem:[%s13287_s2 + $0x70] sm:$0xff] }
 0x92c   :  { %3536 = vmatprep.subr.mxu0 %v5351_v29  ;;  %3607 = vmatprep.subr.mxu1 %v5352_v49  ;;  %v5371_v29 = vld [vmem:[%s13287_s2 + $0x28] sm:$0xff]  ;;  %v5372_v49 = vld [vmem:[%s13287_s2 + $0x38] sm:$0xff] }
 0x92d   :  { %3537 = vmatpush1.msra.mxu0 %v5353_v37  ;;  %3608 = vmatpush1.msra.mxu1 %v5354_v25  ;;  %v5373_v37 = vld [vmem:[%s13287_s2 + $0x20] sm:$0xff]  ;;  %v5374_v25 = vld [vmem:[%s13287_s2 + $0x30] sm:$0xff] }
 0x92e   :  { %3538 = vmatprep.subr.mxu0 %v5355_v20  ;;  %3609 = vmatprep.subr.mxu1 %v5356_v48  ;;  %v5375_v20 = vld [vmem:[%s13287_s2 + $0x7e8] sm:$0xff]  ;;  %v5376_v48 = vld [vmem:[%s13287_s2 + $0x7f8] sm:$0xff] }
 0x92f   :  { %3539 = vmatpush1.msra.mxu0 %v5357_v42  ;;  %3610 = vmatpush1.msra.mxu1 %v5358_v55  ;;  %v5377_v42 = vld [vmem:[%s13287_s2 + $0x7e0] sm:$0xff]  ;;  %v5378_v55 = vld [vmem:[%s13287_s2 + $0x7f0] sm:$0xff] }
 0x930   :  { %3540 = vmatprep.subr.mxu0 %v5359_v15  ;;  %3611 = vmatprep.subr.mxu1 %v5360_v11  ;;  %v5379_v15 = vld [vmem:[%s13287_s2 + $0x7a8] sm:$0xff]  ;;  %v5380_v11 = vld [vmem:[%s13287_s2 + $0x7b8] sm:$0xff] }
 0x931   :  { %3541 = vmatpush1.msra.mxu0 %v5361_v6  ;;  %3612 = vmatpush1.msra.mxu1 %v5362_v1  ;;  %v5381_v6 = vld [vmem:[%s13287_s2 + $0x7a0] sm:$0xff]  ;;  %v5382_v1 = vld [vmem:[%s13287_s2 + $0x7b0] sm:$0xff] }
 0x932   :  { %3542 = vmatprep.subr.mxu0 %v5363_v32  ;;  %3613 = vmatprep.subr.mxu1 %v5364_v4  ;;  %v5383_v32 = vld [vmem:[%s13287_s2 + $0x768] sm:$0xff]  ;;  %v5384_v4 = vld [vmem:[%s13287_s2 + $0x778] sm:$0xff] }
 0x933   :  { %3543 = vmatpush1.msra.mxu0 %v5365_v54  ;;  %3614 = vmatpush1.msra.mxu1 %v5366_v0  ;;  %v5385_v54 = vld [vmem:[%s13287_s2 + $0x760] sm:$0xff]  ;;  %v5386_v0 = vld [vmem:[%s13287_s2 + $0x770] sm:$0xff] }
 0x934   :  { %3544 = vmatprep.subr.mxu0 %v5367_v58  ;;  %3615 = vmatprep.subr.mxu1 %v5368_v13  ;;  %v3724_v58 = vld [vmem:[%s13290_s4] sm:$0xff] }
 0x935   :  { %3545 = vmatpush1.msra.mxu0 %v5369_v17  ;;  %3616 = vmatpush1.msra.mxu1 %v5370_v56  ;;  %v911_v17 = vld [vmem:[%s13286_s0 + $0x10] sm:$0xff]  ;;  %v3733_v56 = vld [vmem:[%s13289_s5 + $0x28] sm:$0xff] }
 0x936   :  { %3546 = vmatprep.subr.mxu0 %v5371_v29  ;;  %3617 = vmatprep.subr.mxu1 %v5372_v49  ;;  %v913_v49 = vld [vmem:[%s13286_s0 + $0x18] sm:$0xff] }
 0x937   :  { %3547 = vmatpush1.msra.mxu0 %v5373_v37  ;;  %3618 = vmatpush1.msra.mxu1 %v5374_v25  ;;  %v3732_v37 = vld [vmem:[%s13289_s5 + $0x20] sm:$0xff] }
 0x938   :  { %3548 = vmatprep.subr.mxu0 %v5375_v20  ;;  %3619 = vmatprep.subr.mxu1 %v5376_v48  ;;  %v915_v20 = vld [vmem:[%s13286_s0 + $0x20] sm:$0xff]  ;;  %v3731_v48 = vld [vmem:[%s13289_s5 + $0x18] sm:$0xff] }
 0x939   :  { %3549 = vmatpush2.msra.mxu0 %v5377_v42  ;;  %3620 = vmatpush2.msra.mxu1 %v5378_v55  ;;  %v917_v55 = vld [vmem:[%s13286_s0 + $0x28] sm:$0xff] }
 0x93a   :  { %3550 = vmatprep.subr.mxu0 %v5379_v15  ;;  %3621 = vmatprep.subr.mxu1 %v5380_v11  ;;  %v3730_v15 = vld [vmem:[%s13289_s5 + $0x10] sm:$0xff] }
 0x93b   :  { %3551 = vmatpush2.msra.mxu0 %v5381_v6  ;;  %3622 = vmatpush2.msra.mxu1 %v5382_v1  ;;  %v919_v6 = vld [vmem:[%s13286_s0 + $0x30] sm:$0xff]  ;;  %v3729_v1 = vld [vmem:[%s13289_s5 + $0x8] sm:$0xff] }
 0x93c   :  { %3552 = vmatprep.subr.mxu0 %v5383_v32  ;;  %3623 = vmatprep.subr.mxu1 %v5384_v4  ;;  %v921_v4 = vld [vmem:[%s13286_s0 + $0x38] sm:$0xff] }
 0x93d   :  { %3553 = vmatpush2.msra.mxu0 %v5385_v54  ;;  %3624 = vmatpush2.msra.mxu1 %v5386_v0  ;;  %v3728_v54 = vld [vmem:[%s13289_s5] sm:$0xff] }
 0x93e   :  { %3554 = vmatprep.subr.mxu0 %v12135_v7  ;;  %3625 = vmatprep.subr.mxu1 %v12141_v24  ;;  %v15131_v7 = vld [vmem:[#allocation96_spill] sm:$0xff]  ;;  %v15132_v24 = vld [vmem:[#allocation97_spill] sm:$0xff] }
 0x93f   :  { %3555 = vmatpush2.msra.mxu0 %v12147_v30  ;;  %3626 = vmatpush2.msra.mxu1 %v12153_v16  ;;  %v15133_v30 = vld [vmem:[#allocation179_spill] sm:$0xff]  ;;  %v15134_v16 = vld [vmem:[#allocation180_spill] sm:$0xff] }
 0x940   :  { %3556 = vmatprep.subr.mxu0 %v12159_v40  ;;  %3627 = vmatprep.subr.mxu1 %v12165_v36  ;;  %v15135_v40 = vld [vmem:[#allocation181_spill] sm:$0xff]  ;;  %v15136_v36 = vld [vmem:[#allocation182_spill] sm:$0xff] }
 0x941   :  { %3557 = vmatpush2.msra.mxu0 %v12171_v38  ;;  %3628 = vmatpush2.msra.mxu1 %v12177_v21  ;;  %v15137_v38 = vld [vmem:[#allocation114_spill] sm:$0xff]  ;;  %v15138_v21 = vld [vmem:[#allocation120_spill] sm:$0xff] }
 0x942   :  { %3558 = vmatprep.subr.mxu0 %v12183_v23  ;;  %3629 = vmatprep.subr.mxu1 %v12189_v34  ;;  %v15139_v23 = vld [vmem:[#allocation121_spill] sm:$0xff]  ;;  %v15140_v34 = vld [vmem:[#allocation171_spill] sm:$0xff] }
 0x943   :  { %3559 = vmatpush2.msra.mxu0 %v12195_v27  ;;  %3630 = vmatpush2.msra.mxu1 %v12201_v57  ;;  %v15141_v27 = vld [vmem:[#allocation173_spill] sm:$0xff]  ;;  %v15142_v57 = vld [vmem:[#allocation172_spill] sm:$0xff] }
 0x944   :  { %3560 = vmatprep.subr.mxu0 %v12207_v5  ;;  %3631 = vmatprep.subr.mxu1 %v12213_v60  ;;  %v15143_v5 = vld [vmem:[#allocation174_spill] sm:$0xff]  ;;  %v15144_v60 = vld [vmem:[#allocation115_spill] sm:$0xff] }
 0x945   :  { %3561 = vmatpush2.msra.mxu0 %v12219_v10  ;;  %3632 = vmatpush2.msra.mxu1 %v12225_v35  ;;  %v15145_v10 = vld [vmem:[#allocation30_spill] sm:$0xff]  ;;  %v15146_v35 = vld [vmem:[#allocation31_spill] sm:$0xff] }
 0x946   :  { %3562 = vmatprep.subr.mxu0 %v12231_v28  ;;  %3633 = vmatprep.subr.mxu1 %v12237_v47  ;;  %v15147_v28 = vld [vmem:[#allocation32_spill] sm:$0xff]  ;;  %v15148_v47 = vld [vmem:[#allocation33_spill] sm:$0xff] }
 0x947   :  { %3563 = vmatpush2.msra.mxu0 %v12243_v9  ;;  %3634 = vmatpush2.msra.mxu1 %v12249_v39  ;;  %v15149_v9 = vmov 0.0   ;;  %v3743_v39 = vld [vmem:[%s13289_s5 + $0x78] sm:$0xff] }
 0x948   :  { %3564 = vmatprep.subr.mxu0 %v12255_v46  ;;  %3635 = vmatprep.subr.mxu1 %v12261_v41  ;;  %v3742_v46 = vld [vmem:[%s13289_s5 + $0x70] sm:$0xff]  ;;  %v3741_v41 = vld [vmem:[%s13289_s5 + $0x68] sm:$0xff] }
 0x949   :  { %3565 = vmatpush2.msra.mxu0 %v12267_v43  ;;  %3636 = vmatpush2.msra.mxu1 %v12273_v45  ;;  %v3740_v43 = vld [vmem:[%s13289_s5 + $0x60] sm:$0xff]  ;;  %v3739_v45 = vld [vmem:[%s13289_s5 + $0x58] sm:$0xff] }
 0x94a   :  { %3566 = vmatprep.subr.mxu0 %v12279_v26  ;;  %3637 = vmatprep.subr.mxu1 %v12285_v33  ;;  %v3738_v26 = vld [vmem:[%s13289_s5 + $0x50] sm:$0xff]  ;;  %v3737_v33 = vld [vmem:[%s13289_s5 + $0x48] sm:$0xff] }
 0x94b   :  { %3567 = vmatpush2.msra.mxu0 %v12291_v51  ;;  %3638 = vmatpush2.msra.mxu1 %v12297_v22  ;;  %v3736_v51 = vld [vmem:[%s13289_s5 + $0x40] sm:$0xff]  ;;  %v3727_v22 = vld [vmem:[%s13290_s4 + $0x18] sm:$0xff] }
 0x94c   :  { %3568 = vmatprep.subr.mxu0 %v12303_v31  ;;  %3639 = vmatprep.subr.mxu1 %v12309_v2  ;;  %v3735_v31 = vld [vmem:[%s13289_s5 + $0x38] sm:$0xff]  ;;  %v3726_v2 = vld [vmem:[%s13290_s4 + $0x10] sm:$0xff] }
 0x94d   :  { %3569 = vmatpush2.msra.mxu0 %v12315_v3  ;;  %3640 = vmatpush2.msra.mxu1 %v12321_v53  ;;  %v3725_v3 = vld [vmem:[%s13290_s4 + $0x8] sm:$0xff]  ;;  %v908_v53 = vld [vmem:[%s13286_s0] sm:$0xff] }
 0x94e   :  { %3570 = vmatprep.subr.mxu0 %v12327_v18  ;;  %3641 = vmatprep.subr.mxu1 %v12333_v52  ;;  %v3734_v18 = vld [vmem:[%s13289_s5 + $0x30] sm:$0xff]  ;;  %v909_v52 = vld [vmem:[%s13286_s0 + $0x8] sm:$0xff] }
 0x94f   :  { %3571 = vmatpush2.msra.mxu0 %v15131_v7  ;;  %3642 = vmatpush2.msra.mxu1 %v15132_v24  ;;  %v910_v13 = vmax.f32 %v908_v53, %v909_v52  ;;  %v3902_v24 = vld [vmem:[%s13291_s6 + $0x78] sm:$0xff]  ;;  %v15153_v53 = vld [vmem:[#allocation156_spill] sm:$0xff] }
 0x950   :  { %3572 = vmatprep.subr.mxu0 %v15133_v30  ;;  %3643 = vmatprep.subr.mxu1 %v15134_v16  ;;  %v3901_v30 = vld [vmem:[%s13291_s6 + $0x70] sm:$0xff]  ;;  %v3900_v16 = vld [vmem:[%s13291_s6 + $0x68] sm:$0xff] }
 0x951   :  { %3573 = vmatpush2.msra.mxu0 %v15135_v40  ;;  %3644 = vmatpush2.msra.mxu1 %v15136_v36  ;;  %v912_v29 = vmax.f32 %v910_v13, %v911_v17  ;;  %v3899_v40 = vld [vmem:[%s13291_s6 + $0x60] sm:$0xff]  ;;  %v3898_v36 = vld [vmem:[%s13291_s6 + $0x58] sm:$0xff] }
 0x952   :  { %3574 = vmatprep.subr.mxu0 %v15137_v38  ;;  %3645 = vmatprep.subr.mxu1 %v15138_v21  ;;  %v3897_v38 = vld [vmem:[%s13291_s6 + $0x50] sm:$0xff]  ;;  %v3896_v21 = vld [vmem:[%s13291_s6 + $0x48] sm:$0xff] }
 0x953   :  { %3575 = vmatpush2.msra.mxu0 %v15139_v23  ;;  %3646 = vmatpush2.msra.mxu1 %v15140_v34  ;;  %v914_v25 = vmax.f32 %v912_v29, %v913_v49  ;;  %v3895_v23 = vld [vmem:[%s13291_s6 + $0x40] sm:$0xff]  ;;  %v3894_v34 = vld [vmem:[%s13291_s6 + $0x38] sm:$0xff] }
 0x954   :  { %3576 = vmatprep.subr.mxu0 %v15141_v27  ;;  %3647 = vmatprep.subr.mxu1 %v15142_v57  ;;  %v3893_v27 = vld [vmem:[%s13291_s6 + $0x30] sm:$0xff]  ;;  %v3892_v57 = vld [vmem:[%s13291_s6 + $0x28] sm:$0xff] }
 0x955   :  { %3577 = vmatpush2.msra.mxu0 %v15143_v5  ;;  %3648 = vmatpush2.msra.mxu1 %v15144_v60  ;;  %v916_v42 = vmax.f32 %v914_v25, %v915_v20  ;;  %v3891_v5 = vld [vmem:[%s13291_s6 + $0x20] sm:$0xff]  ;;  %v3890_v60 = vld [vmem:[%s13291_s6 + $0x18] sm:$0xff] }
 0x956   :  { %3578 = vmatprep.subr.mxu0 %v15145_v10  ;;  %3649 = vmatprep.subr.mxu1 %v15146_v35  ;;  %v3889_v10 = vld [vmem:[%s13291_s6 + $0x10] sm:$0xff]  ;;  %v3888_v35 = vld [vmem:[%s13291_s6 + $0x8] sm:$0xff] }
 0x957   :  { %3579 = vmatpush2.msra.mxu0 %v15147_v28  ;;  %3650 = vmatpush2.msra.mxu1 %v15148_v47  ;;  %v918_v11 = vmax.f32 %v916_v42, %v917_v55  ;;  %v3887_v28 = vld [vmem:[%s13291_s6] sm:$0xff]  ;;  %v15154_v42 = vld [vmem:[#allocation184_spill] sm:$0xff] }
 0x958   :  { %3581 = vmatmul.mubr.f32.vlgmr.msra.gmra.mxu0 %v12794_v63  ;;  %3652 = vmatmul.mubr.f32.vlgmr.msra.gmra.mxu1 %v12794_v63  ;;  %v1272_v55 = vmax.f32 %v15154_v42, 0.0 }
 0x959   :  { %4108 = vmatprep.subr.mxu0 %v15149_v9  ;;  %4143 = vmatprep.subr.mxu1 %v15149_v9  ;;  %v920_v32 = vmax.f32 %v918_v11, %v919_v6  ;;  %v15156_v6 = vld [vmem:[#allocation192_spill] sm:$0xff] }
 0x95a   :  { %4109 = vmatpush3.msra.mxu0 %v3743_v39  ;;  %4140 = vmatprep.mubr.msk.f32.mxu0 %vm5388_vm1, %v15149_v9  ;;  %v15150_v39 = vld [vmem:[#allocation150_spill] sm:$0xff] }
 0x95b   :  { %4110 = vmatprep.subr.mxu0 %v15149_v9  ;;  %4151 = vmatprep.mubr.msk.f32.mxu1 %vm5388_vm1, %v15149_v9  ;;  %v922_v0 = vmax.f32 %v920_v32, %v921_v4  ;;  %v15157_v32 = vld [vmem:[#allocation91_spill] sm:$0xff] }
 0x95c   :  { %4111 = vmatpush3.msra.mxu0 %v3742_v46  ;;  %4144 = vmatpush3.msra.mxu1 %v3727_v22  ;;  %v15152_v22 = vld [vmem:[#allocation151_spill] sm:$0xff] }
 0x95d   :  { %4112 = vmatprep.subr.mxu0 %v15149_v9  ;;  %4145 = vmatprep.subr.mxu1 %v15149_v9  ;;  %v923_v7 = vmax.f32 %v922_v0, 0.0 }
 0x95e   :  { %4113 = vmatpush3.msra.mxu0 %v3741_v41  ;;  %4146 = vmatpush3.msra.mxu1 %v3726_v2 }
 0x95f   :  { %4114 = vmatprep.subr.mxu0 %v15149_v9  ;;  %4147 = vmatprep.subr.mxu1 %v15149_v9 }
 0x960   :  { %4115 = vmatpush3.msra.mxu0 %v3740_v43  ;;  %4148 = vmatpush3.msra.mxu1 %v3725_v3 }
 0x961   :  { %4116 = vmatprep.subr.mxu0 %v15149_v9  ;;  %4149 = vmatprep.subr.mxu1 %v15149_v9 }
 0x962   :  { %4117 = vmatpush3.msra.mxu0 %v3739_v45  ;;  %4150 = vmatpush3.msra.mxu1 %v3724_v58  ;;  %v15151_v45 = vld [vmem:[#allocation155_spill] sm:$0xff] }
 0x963   :  { %4118 = vmatprep.subr.mxu0 %v15149_v9  ;;  %4154 = vmatprep.subr.mxu1 %v15149_v9 }
 0x964   :  { %4119 = vmatpush3.msra.mxu0 %v3738_v26  ;;  %4152 = vmatmul.mubr.msk.f32.vlgmr.msra.gmra.mxu1 %vm111_vm0, %v923_v7 }
 0x965   :  { %4120 = vmatprep.subr.mxu0 %v15149_v9  ;;  %4186 = vmatprep.mubr.msk.f32.mxu1 %vm5388_vm1, %v15149_v9 }
 0x966   :  { %4121 = vmatpush3.msra.mxu0 %v3737_v33  ;;  %4155 = vmatpush3.msra.mxu1 %v3902_v24  ;;  %v15159_v24 = vld [vmem:[#allocation90_spill] sm:$0xff] }
 0x967   :  { %4122 = vmatprep.subr.mxu0 %v15149_v9  ;;  %4156 = vmatprep.subr.mxu1 %v15149_v9 }
 0x968   :  { %4123 = vmatpush3.msra.mxu0 %v3736_v51  ;;  %4157 = vmatpush3.msra.mxu1 %v3901_v30 }
 0x969   :  { %4124 = vmatprep.subr.mxu0 %v15149_v9  ;;  %4158 = vmatprep.subr.mxu1 %v15149_v9 }
 0x96a   :  { %4125 = vmatpush3.msra.mxu0 %v3735_v31  ;;  %4159 = vmatpush3.msra.mxu1 %v3900_v16 }
 0x96b   :  { %4126 = vmatprep.subr.mxu0 %v15149_v9  ;;  %4160 = vmatprep.subr.mxu1 %v15149_v9 }
 0x96c   :  { %4127 = vmatpush3.msra.mxu0 %v3734_v18  ;;  %4161 = vmatpush3.msra.mxu1 %v3899_v40 }
 0x96d   :  { %4128 = vmatprep.subr.mxu0 %v15149_v9  ;;  %4162 = vmatprep.subr.mxu1 %v15149_v9 }
 0x96e   :  { %4129 = vmatpush3.msra.mxu0 %v3733_v56  ;;  %4163 = vmatpush3.msra.mxu1 %v3898_v36 }
 0x96f   :  { %4130 = vmatprep.subr.mxu0 %v15149_v9  ;;  %4164 = vmatprep.subr.mxu1 %v15149_v9 }
 0x970   :  { %4131 = vmatpush3.msra.mxu0 %v3732_v37  ;;  %4165 = vmatpush3.msra.mxu1 %v3897_v38  ;;  %v15160_v38 = vld [vmem:[#allocation159_spill] sm:$0xff] }
 0x971   :  { %4132 = vmatprep.subr.mxu0 %v15149_v9  ;;  %4166 = vmatprep.subr.mxu1 %v15149_v9 }
 0x972   :  { %4133 = vmatpush3.msra.mxu0 %v3731_v48  ;;  %4167 = vmatpush3.msra.mxu1 %v3896_v21  ;;  %v429_v21 = vadd.f32 %v15160_v38, %v15125_v8 }
 0x973   :  { %4134 = vmatprep.subr.mxu0 %v15149_v9  ;;  %4168 = vmatprep.subr.mxu1 %v15149_v9 }
 0x974   :  { %4135 = vmatpush3.msra.mxu0 %v3730_v15  ;;  %4169 = vmatpush3.msra.mxu1 %v3895_v23  ;;  %v15155_v15 = vld [vmem:[#allocation29_spill] sm:$0xff] }
 0x975   :  { %4136 = vmatprep.subr.mxu0 %v15149_v9  ;;  %4170 = vmatprep.subr.mxu1 %v15149_v9  ;;  %v1622_v11 = vmax.f32 %v1272_v55, %v15155_v15 }
 0x976   :  { %4137 = vmatpush3.msra.mxu0 %v3729_v1  ;;  %4171 = vmatpush3.msra.mxu1 %v3894_v34  ;;  %v15161_v34 = vld [vmem:[#allocation161_spill] sm:$0xff] }
 0x977   :  { %4138 = vmatprep.subr.mxu0 %v15149_v9  ;;  %4172 = vmatprep.subr.mxu1 %v15149_v9  ;;  %v1972_v1 = vmax.f32 %v1622_v11, %v15156_v6 }
 0x978   :  { %4139 = vmatpush3.msra.mxu0 %v3728_v54  ;;  %4173 = vmatpush3.msra.mxu1 %v3893_v27  ;;  %v15158_v54 = vld [vmem:[#allocation102_spill] sm:$0xff]  ;;  %v431_v27 = vadd.f32 %v15161_v34, %v7499_v61 }
 0x979   :  { %4174 = vmatprep.subr.mxu1 %v15149_v9  ;;  %v2322_v4 = vmax.f32 %v1972_v1, %v15157_v32 }
 0x97a   :  { %4175 = vmatpush3.msra.mxu1 %v3892_v57 }
 0x97b   :  { %4176 = vmatprep.subr.mxu1 %v15149_v9  ;;  %v2672_v0 = vmax.f32 %v2322_v4, %v15158_v54 }
 0x97c   :  { %4177 = vmatpush3.msra.mxu1 %v3891_v5 }
 0x97d   :  { %4178 = vmatprep.subr.mxu1 %v15149_v9  ;;  %v3022_v30 = vmax.f32 %v2672_v0, %v15159_v24 }
 0x97e   :  { %4179 = vmatpush3.msra.mxu1 %v3890_v60 }
 0x97f   :  { %4180 = vmatprep.subr.mxu1 %v15149_v9  ;;  %v3372_v40 = vmax.f32 %v3022_v30, %v12794_v63  ;;  %v15162_v63 = vld [vmem:[#allocation160_spill] sm:$0xff] }
 0x980   :  { %4181 = vmatpush3.msra.mxu1 %v3889_v10 }
 0x981   :  { %4182 = vmatprep.subr.mxu1 %v15149_v9 }
 0x982   :  { %4183 = vmatpush3.msra.mxu1 %v3888_v35 }
 0x983   :  { %4184 = vmatprep.subr.mxu1 %v15149_v9 }
 0x984   :  { %4185 = vmatpush3.msra.mxu1 %v3887_v28 }
 0x9d7   :  { %v3440_v47 = vpop.f32.mrf.mxu0  ;;  %v3511_v51 = vpop.f32.mrf.mxu1 }
 0x9d8   :  { %v3662_v46 = vadd.f32 %v3440_v47, %v15150_v39  ;;  %v3664_v31 = vadd.f32 %v3511_v51, %v15152_v22  ;;  %v542_v47 = vadd.f32 %v15162_v63, %v7505_v19 }
 0x9d9   :  { %v3442_v41 = vpop.f32.mrf.mxu0  ;;  %v3513_v2 = vpop.f32.mrf.mxu1 }
 0x9da   :  { %v4061_v43 = vmul.f32 -1.442695, %v3662_v46  ;;  %v3663_v26 = vadd.f32 %v3442_v41, %v15151_v45  ;;  %v4063_v3 = vmul.f32 -1.442695, %v3664_v31  ;;  %v3665_v18 = vadd.f32 %v3513_v2, %v15153_v53  ;;  %v15163_v41 = vld [vmem:[#allocation162_spill] sm:$0xff] }
 0x9db   :  { %v544_v8 = vadd.f32 %v15163_v41, %v7512_v50 }
 0x9dc   :  { %4415 = vpow2.f32 %v4061_v43  ;;  %v4062_v33 = vmul.f32 -1.442695, %v3663_v26 }
 0x9de   :  { %4417 = vpow2.f32 %v4062_v33 }
 0x9df   :  { %4419 = vpow2.f32 %v4063_v3 }
 0x9e0   :  { %4421 = vtanh.f32 %v3665_v18 }
 0x9e9   :  { %v4416_v52 = vpop.eup %4415 }
 0x9ea   :  { %v3683_v9 = vadd.f32 1.0, %v4416_v52 }
 0x9eb   :  { %v4418_v58 = vpop.eup %4417 }
 0x9ec   :  { %4423 = vrcp.f32 %v3683_v9  ;;  %v3684_v13 = vadd.f32 1.0, %v4418_v58  ;;  %v4420_v17 = vpop.eup %4419 }
 0x9ed   :  { %v4422_v56 = vpop.eup %4421  ;;  %v3685_v25 = vadd.f32 1.0, %v4420_v17 }
 0x9ee   :  { %4425 = vrcp.f32 %v3684_v13 }
 0x9ef   :  { %4427 = vrcp.f32 %v3685_v25 }
 0x9f9   :  { %v4424_v29 = vpop.eup %4423 }
 0x9fa   :  { %v3713_v49 = vmul.f32 %v4424_v29, %v4422_v56 }
 0x9fb   :  { %v4426_v37 = vpop.eup %4425 }
 0x9fc   :  { %v3712_v20 = vmul.f32 %v4426_v37, %v12776_v62  ;;  %v4428_v7 = vpop.eup %4427 }
 0x9fe   :  { %v3714_v48 = vadd.f32 %v3713_v49, %v3712_v20 }
 0xa00   :  { %4429 = vtanh.f32 %v3714_v48 }
 0xa0d   :  { %v4430_v16 = vpop.eup %4429 }
 0xa0e   :  { %v3719_v62 = vmul.f32 %v4430_v16, %v4428_v7 }
 0xa10   :  { %v3722_v36 = vmax.f32 %v3372_v40, %v3719_v62 }
 0xa12   :  { %4141 = vmatmul.mubr.f32.vlgmr.msra.gmra.mxu0 %v3722_v36 }
 0xa18   :  { %v3582_v23 = vpop.f32.mrf.mxu0  ;;  %v3653_v28 = vpop.f32.mrf.mxu1 }
 0xa19   :  { %v3670_v57 = vadd.f32 %v3582_v23, %v429_v21  ;;  %v3672_v39 = vadd.f32 %v3653_v28, %v542_v47 }
 0xa1a   :  { %v3584_v5 = vpop.f32.mrf.mxu0  ;;  %v3655_v46 = vpop.f32.mrf.mxu1 }
 0xa1b   :  { %v4064_v60 = vmul.f32 -1.442695, %v3670_v57  ;;  %v3671_v10 = vadd.f32 %v3584_v5, %v431_v27  ;;  %v4066_v43 = vmul.f32 -1.442695, %v3672_v39  ;;  %v3673_v45 = vadd.f32 %v3655_v46, %v544_v8 }
 0xa1d   :  { %4431 = vpow2.f32 %v4064_v60  ;;  %v4065_v35 = vmul.f32 -1.442695, %v3671_v10 }
 0xa1f   :  { %4433 = vpow2.f32 %v4065_v35 }
 0xa20   :  { %4435 = vpow2.f32 %v4066_v43 }
 0xa21   :  { %4437 = vtanh.f32 %v3673_v45 }
 0xa24   :  { %v3883_v17 = vpop.f32.mrf.mxu1 }
 0xa26   :  { %v4153_v56 = vpop.f32.mrf.mxu1 }
 0xa2a   :  { %v4432_v26 = vpop.eup %4431 }
 0xa2b   :  { %v3701_v61 = vadd.f32 1.0, %v4432_v26 }
 0xa2c   :  { %v4434_v33 = vpop.eup %4433 }
 0xa2d   :  { %4439 = vrcp.f32 %v3701_v61  ;;  %v3702_v51 = vadd.f32 1.0, %v4434_v33  ;;  %v4436_v22 = vpop.eup %4435 }
 0xa2e   :  { %v4438_v31 = vpop.eup %4437  ;;  %v3703_v53 = vadd.f32 1.0, %v4436_v22 }
 0xa2f   :  { %4441 = vrcp.f32 %v3702_v51 }
 0xa30   :  { %4443 = vrcp.f32 %v3703_v53 }
 0xa3a   :  { %v4440_v2 = vpop.eup %4439 }
 0xa3b   :  { %v3716_v3 = vmul.f32 %v4440_v2, %v4438_v31 }
 0xa3c   :  { %v4442_v19 = vpop.eup %4441 }
 0xa3d   :  { %v3715_v18 = vmul.f32 %v4442_v19, %v12789_v14  ;;  %v4444_v50 = vpop.eup %4443  ;;  %v4068_v14 = vld [vmem:[%s13292_s7] ss:$0 sm:$0xff] }
 0xa3f   :  { %v3717_v52 = vadd.f32 %v3716_v3, %v3715_v18 }
 0xa41   :  { %4445 = vtanh.f32 %v3717_v52 }
 0xa4e   :  { %v4446_v9 = vpop.eup %4445 }
 0xa4f   :  { %v3721_v58 = vmul.f32 %v4446_v9, %v4444_v50 }
 0xa51   :  { %v3723_v13 = vmax.f32 %v3373_v44, %v3721_v58 }
 0xa53   :  { %4187 = vmatmul.mubr.f32.vlgmr.msra.gmra.mxu1 %v3723_v13 }
 0xad2   :  { %v3810_v29 = vpop.f32.mrf.mxu0 }
 0xad3   :  { %v3884_v37 = vadd.f32 %v3883_v17, %v3810_v29 }
 0xad4   :  { %v4142_v49 = vpop.f32.mrf.mxu0 }
 0xb13   :  { %v3969_v25 = vpop.f32.mrf.mxu1 }
 0xb14   :  { %v3973_v20 = vadd.f32 %v3969_v25, %v3884_v37 }
 0xb15   :  { %v4188_v48 = vpop.f32.mrf.mxu1 }
 0xb16   :  { %v3981_v42 = vadd.f32 %v4068_v14, %v3973_v20 }
 0xb18   :  { %3982 = vst [vmem:[%s13293_s8] sm:$0xff] %v3981_v42 }

</bundles_post_ra>
